<compile_context>
chip_gen: v7x
topology: tpu7x:2x2x1
jax: 0.10.0
libtpu: 0.0.40
codegen_flags: <defaults>
</compile_context>

<pallas_src>
import functools

import jax
import jax.numpy as jnp
from jax.experimental import pallas as pl
from jax.experimental.pallas import tpu as pltpu

_VMEM_LIMIT = 32 * 1024 * 1024       # scoped-VMEM limit safe on v5e/v6e/v7x


# ----------------------------------------------------------------------------
# Static conv geometry: output size + the set of (kh, kw) taps that touch any
# non-padding input (all other taps multiply pure zeros and are skipped).
# ----------------------------------------------------------------------------

def _conv_geom(h, w, ksize, stride, pad):
    oh = (h + 2 * pad - ksize) // stride + 1
    ow = (w + 2 * pad - ksize) // stride + 1
    taps = []
    for kh in range(ksize):
        if not any(pad <= kh + stride * i < pad + h for i in range(oh)):
            continue                                    # row range is pure padding
        for kw in range(ksize):
            if not any(pad <= kw + stride * j < pad + w for j in range(ow)):
                continue                                # col range is pure padding
            taps.append((kh, kw))
    return oh, ow, tuple(taps)


# ----------------------------------------------------------------------------
# Fused conv-as-matmul kernel (single fused-K step; bias/residual/downsample/ReLU
# epilogue in f32; bf16 output)
# ----------------------------------------------------------------------------

def _conv_kernel(*refs, relu, mode):
    if mode == 'plain':
        a_ref, w_ref, b_ref, o_ref = refs
    elif mode == 'res':
        a_ref, w_ref, b_ref, r_ref, o_ref = refs
    else:  # 'ds' : residual = downsample-conv computed in-kernel
        a_ref, w_ref, b_ref, xd_ref, wd_ref, bd_ref, o_ref = refs

    out = jnp.dot(a_ref[...], w_ref[...],
                  preferred_element_type=jnp.float32) + b_ref[...]
    if mode == 'res':
        out = out + r_ref[...].astype(jnp.float32)
    elif mode == 'ds':
        out = out + (jnp.dot(xd_ref[...], wd_ref[...],
                             preferred_element_type=jnp.float32) + bd_ref[...])
    if relu:
        out = jnp.maximum(out, 0.0)
    o_ref[...] = out.astype(o_ref.dtype)


def _matmul_conv(a, wp, relu, residual=None, downsample=None):
    """a: (M, K) bf16, wp = {'w': (K, Cout) bf16, 'b': (1, Cout) f32}.
    Optional residual (M, Cout) bf16, or downsample = (xd, wd, bd).
    Returns bf16 (M, Cout)."""
    M, K = a.shape
    Cout = wp['w'].shape[1]
    TM = 256 if (M >= 512 and M % 256 == 0) else M       # parallel M tiling (v7x)
    num_m = M // TM

    mode = 'plain'
    args = [a, wp['w'], wp['b']]
    in_specs = [pl.BlockSpec((TM, K), lambda m: (m, 0)),
                pl.BlockSpec((K, Cout), lambda m: (0, 0)),
                pl.BlockSpec((1, Cout), lambda m: (0, 0))]
    if residual is not None:
        mode = 'res'
        args.append(residual)
        in_specs.append(pl.BlockSpec((TM, Cout), lambda m: (m, 0)))
    elif downsample is not None:
        mode = 'ds'
        xd, wd, bd = downsample
        cin_d = xd.shape[1]
        args += [xd, wd, bd]
        in_specs += [pl.BlockSpec((TM, cin_d), lambda m: (m, 0)),
                     pl.BlockSpec((cin_d, Cout), lambda m: (0, 0)),
                     pl.BlockSpec((1, Cout), lambda m: (0, 0))]

    return pl.pallas_call(
        functools.partial(_conv_kernel, relu=relu, mode=mode),
        grid=(num_m,),
        in_specs=in_specs,
        out_specs=pl.BlockSpec((TM, Cout), lambda m: (m, 0)),
        out_shape=jax.ShapeDtypeStruct((M, Cout), jnp.bfloat16),
        compiler_params=pltpu.CompilerParams(
            dimension_semantics=("parallel",),
            vmem_limit_bytes=_VMEM_LIMIT),
    )(*args)


def conv_call(x, wp, ksize, stride, pad, relu, residual=None, downsample=None):
    """x: (N,H,W,Cin) bf16. Weights pre-packed (valid taps only, BN folded)."""
    N, H, W, Cin = x.shape
    oh, ow, taps = _conv_geom(H, W, ksize, stride, pad)
    M = N * oh * ow
    K, Cout = wp['w'].shape
    assert K == len(taps) * Cin, "weight packing / geometry mismatch"

    xp = jnp.pad(x, ((0, 0), (pad, pad), (pad, pad), (0, 0))) if pad else x
    # TODO(synk): at large resolutions, build patches in-kernel (pl.ds windows on
    # the padded NHWC block) instead of materializing the (M, K) im2col in HBM.
    a = jnp.concatenate(
        [xp[:, kh:kh + stride * oh:stride, kw:kw + stride * ow:stride, :]
         .reshape(M, Cin) for kh, kw in taps], axis=-1)

    out = _matmul_conv(a, wp, relu, residual=residual, downsample=downsample)
    return out.reshape(N, oh, ow, Cout)


def basic_block(x, bp, stride):
    """ResNet basic block; the 1x1 downsample matmul (if any) runs inside conv2's
    kernel (residual computed in-kernel), fusing 3 convs into 2 launches."""
    out1 = conv_call(x, bp['c1'], 3, stride, 1, relu=True)
    if 'cd' in bp:
        N, H, W, Cin = x.shape
        oh = (H - 1) // stride + 1
        ow = (W - 1) // stride + 1
        xd = x[:, ::stride, ::stride, :][:, :oh, :ow, :].reshape(N * oh * ow, Cin)
        return conv_call(out1, bp['c2'], 3, 1, 1, relu=True,
                         downsample=(xd, bp['cd']['w'], bp['cd']['b']))
    res = x.reshape(-1, x.shape[-1])
    return conv_call(out1, bp['c2'], 3, 1, 1, relu=True, residual=res)


# ----------------------------------------------------------------------------
# Deep tail: layer3 + layer4 + avg-pool + fc + pairwise softmax in ONE kernel.
# Valid only when layer2's output spatial is <= 2x2 (true at 16x16 input): every
# conv reduces to a plain matmul, and avg-pool over 1x1 spatial is the identity.
# ----------------------------------------------------------------------------

def _deep_tail_kernel(a31, xds3,
                      w31, b31, wd3, bd3, w32, b32,
                      w33, b33, w34, b34,
                      w41, b41, wd4, bd4, w42, b42,
                      w43, b43, w44, b44,
                      fw0, fw1, fb0, fb1,
                      l0_ref, l1_ref, p_ref):
    def mm(x, wr, br):
        return jnp.dot(x, wr[...], preferred_element_type=jnp.float32) + br[...]

    def mmb(x, wr, br):                      # bf16-cast the f32 activation first
        return mm(x.astype(jnp.bfloat16), wr, br)

    relu = lambda t: jnp.maximum(t, 0.0)

    # layer3 block0 (stride 2, with downsample)
    h = relu(mm(a31[...], w31, b31))
    idn = mm(xds3[...], wd3, bd3)
    x3 = relu(mmb(h, w32, b32) + idn)
    # layer3 block1
    h = relu(mmb(x3, w33, b33))
    x3 = relu(mmb(h, w34, b34) + x3)
    # layer4 block0 (stride 2, with downsample)
    h = relu(mmb(x3, w41, b41))
    idn = mmb(x3, wd4, bd4)
    x4 = relu(mmb(h, w42, b42) + idn)
    # layer4 block1
    h = relu(mmb(x4, w43, b43))
    x4 = relu(mmb(h, w44, b44) + x4)

    # global avg-pool over 1x1 spatial == identity; fc (split columns) + softmax
    feat = x4.astype(jnp.bfloat16)
    l0 = mm(feat, fw0, fb0)
    l1 = mm(feat, fw1, fb1)
    m = jnp.maximum(l0, l1)
    e0 = jnp.exp(l0 - m)
    e1 = jnp.exp(l1 - m)
    l0_ref[...] = l0
    l1_ref[...] = l1
    p_ref[...] = e1 / (e0 + e1)


def deep_tail_fused(x2, params):
    N, H2, W2, C2 = x2.shape
    nc1 = params['fc_b0'].shape[1]
    l3, l4 = params['layer3'], params['layer4']

    # layer3-block0 conv1's valid taps are exactly the H2*W2 input positions in
    # row-major order, so its im2col is a plain flatten; its 1x1/s2 downsample
    # reads position (0, 0).
    a31 = x2.reshape(N, H2 * W2 * C2)
    xds3 = x2[:, 0, 0, :]
    assert a31.shape[1] == l3[0]['c1']['w'].shape[0]
    assert l3[0]['c2']['w'].shape[0] == 256 and l4[0]['c2']['w'].shape[0] == 512

    args = [a31, xds3,
            l3[0]['c1']['w'], l3[0]['c1']['b'], l3[0]['cd']['w'], l3[0]['cd']['b'],
            l3[0]['c2']['w'], l3[0]['c2']['b'],
            l3[1]['c1']['w'], l3[1]['c1']['b'], l3[1]['c2']['w'], l3[1]['c2']['b'],
            l4[0]['c1']['w'], l4[0]['c1']['b'], l4[0]['cd']['w'], l4[0]['cd']['b'],
            l4[0]['c2']['w'], l4[0]['c2']['b'],
            l4[1]['c1']['w'], l4[1]['c1']['b'], l4[1]['c2']['w'], l4[1]['c2']['b'],
            params['fc_w0'], params['fc_w1'], params['fc_b0'], params['fc_b1']]
    in_specs = [pl.BlockSpec(a.shape, lambda i: (0, 0)) for a in args]  # all 2-D

    l0, l1, p = pl.pallas_call(
        _deep_tail_kernel,
        grid=(1,),
        in_specs=in_specs,
        out_specs=[pl.BlockSpec((N, nc1), lambda i: (0, 0))] * 3,
        out_shape=[jax.ShapeDtypeStruct((N, nc1), jnp.float32)] * 3,
        compiler_params=pltpu.CompilerParams(
            dimension_semantics=("arbitrary",),
            vmem_limit_bytes=_VMEM_LIMIT),
    )(*args)
    logits = jnp.stack([l0, l1], axis=-1)            # == view(-1, nc-1, 2)
    return logits, p


# ----------------------------------------------------------------------------
# Generic tail (avg-pool + fc + softmax) -- fallback for larger spatial sizes.
# ----------------------------------------------------------------------------

def _pool_fc_softmax_kernel(x_ref, w0_ref, w1_ref, b0_ref, b1_ref,
                            l0_ref, l1_ref, p_ref, *, inv_hw):
    feat = (jnp.sum(x_ref[...].astype(jnp.float32), axis=1) * inv_hw
            ).astype(jnp.bfloat16)
    l0 = jnp.dot(feat, w0_ref[...], preferred_element_type=jnp.float32) + b0_ref[...]
    l1 = jnp.dot(feat, w1_ref[...], preferred_element_type=jnp.float32) + b1_ref[...]
    m = jnp.maximum(l0, l1)
    e0 = jnp.exp(l0 - m)
    e1 = jnp.exp(l1 - m)
    l0_ref[...] = l0
    l1_ref[...] = l1
    p_ref[...] = e1 / (e0 + e1)


def pool_fc_softmax(x, params):
    N, H, W, C = x.shape
    nc1 = params['fc_b0'].shape[1]
    xr = x.reshape(N, H * W, C)
    l0, l1, p = pl.pallas_call(
        functools.partial(_pool_fc_softmax_kernel, inv_hw=1.0 / float(H * W)),
        grid=(1,),
        in_specs=[pl.BlockSpec((N, H * W, C), lambda i: (0, 0, 0)),
                  pl.BlockSpec((C, nc1), lambda i: (0, 0)),
                  pl.BlockSpec((C, nc1), lambda i: (0, 0)),
                  pl.BlockSpec((1, nc1), lambda i: (0, 0)),
                  pl.BlockSpec((1, nc1), lambda i: (0, 0))],
        out_specs=[pl.BlockSpec((N, nc1), lambda i: (0, 0))] * 3,
        out_shape=[jax.ShapeDtypeStruct((N, nc1), jnp.float32)] * 3,
        compiler_params=pltpu.CompilerParams(
            dimension_semantics=("arbitrary",),
            vmem_limit_bytes=_VMEM_LIMIT),
    )(xr, params['fc_w0'], params['fc_w1'], params['fc_b0'], params['fc_b1'])
    return jnp.stack([l0, l1], axis=-1), p


# ----------------------------------------------------------------------------
# Parameter construction: synthetic, deterministic; BN folded; weights packed at
# init into the exact fused-K (valid-tap) bf16 layout the kernels consume.
# ----------------------------------------------------------------------------

def init_params(key, num_classes=5, input_hw=(16, 16)):
    EPS = 1e-5
    kbox = [key]

    def nk():
        kbox[0], sub = jax.random.split(kbox[0])
        return sub

    def bn_fold(c):
        gamma = 1.0 + 0.1 * jax.random.normal(nk(), (c,), jnp.float32)
        beta = 0.1 * jax.random.normal(nk(), (c,), jnp.float32)
        mean = 0.05 * jax.random.normal(nk(), (c,), jnp.float32)
        var = jnp.abs(1.0 + 0.1 * jax.random.normal(nk(), (c,), jnp.float32))
        scale = gamma / jnp.sqrt(var + EPS)
        return scale, beta - mean * scale

    def packed_conv_bn(k, cin, cout, taps):
        std = (2.0 / (k * k * cin)) ** 0.5
        w = std * jax.random.normal(nk(), (k, k, cin, cout), jnp.float32)
        scale, bias = bn_fold(cout)
        w = (w * scale[None, None, None, :]).reshape(k * k, cin, cout)
        w = jnp.concatenate([w[kh * k + kw] for kh, kw in taps], axis=0)
        return {'w': w.astype(jnp.bfloat16),
                'b': bias.reshape(1, cout).astype(jnp.float32)}

    p = {}
    h, w_ = input_hw
    oh, ow, taps = _conv_geom(h, w_, 7, 2, 3)
    p['stem'] = packed_conv_bn(7, 3, 64, taps)
    h, w_ = oh, ow
    h, w_, _ = _conv_geom(h, w_, 3, 2, 1)[0], _conv_geom(h, w_, 3, 2, 1)[1], None

    specs = {'layer1': (64, 64, 1), 'layer2': (64, 128, 2),
             'layer3': (128, 256, 2), 'layer4': (256, 512, 2)}
    for name, (cin, cout, stride) in specs.items():
        blocks = []
        for b in range(2):
            s = stride if b == 0 else 1
            ci = cin if b == 0 else cout
            blk = {}
            o1h, o1w, taps1 = _conv_geom(h, w_, 3, s, 1)
            blk['c1'] = packed_conv_bn(3, ci, cout, taps1)
            o2h, o2w, taps2 = _conv_geom(o1h, o1w, 3, 1, 1)
            blk['c2'] = packed_conv_bn(3, cout, cout, taps2)
            if s != 1 or ci != cout:
                blk['cd'] = packed_conv_bn(1, ci, cout, ((0, 0),))
            blocks.append(blk)
            h, w_ = o2h, o2w
        p[name] = blocks

    nc1 = num_classes - 1
    fc_w = (1.0 / 512 ** 0.5) * jax.random.normal(nk(), (512, 2 * nc1), jnp.float32)
    fc_b = 0.01 * jax.random.normal(nk(), (2 * nc1,), jnp.float32)
    # Split into the two softmax branches (columns 2j / 2j+1) -> reproduces
    # view(-1, nc-1, 2) semantics without in-kernel lane-strided slicing.
    p['fc_w0'] = fc_w[:, 0::2].astype(jnp.bfloat16)
    p['fc_w1'] = fc_w[:, 1::2].astype(jnp.bfloat16)
    p['fc_b0'] = fc_b[0::2].reshape(1, nc1)
    p['fc_b1'] = fc_b[1::2].reshape(1, nc1)
    return p


# ----------------------------------------------------------------------------
# Full forward (matches model_classifier.forward semantics)
# ----------------------------------------------------------------------------

def model_classifier_forward(params, x_nchw, num_classes=5):
    x = jnp.transpose(x_nchw, (0, 2, 3, 1)).astype(jnp.bfloat16)   # NCHW -> NHWC

    # Stem: conv7x7/s2 + folded BN + ReLU (one fused Pallas matmul).
    x = conv_call(x, params['stem'], 7, 2, 3, relu=True)

    # 3x3/s2 max-pool on XLA reduce_window (single fused op), per perf review.
    x = jax.lax.reduce_window(x, jnp.array(-jnp.inf, x.dtype), jax.lax.max,
                              window_dimensions=(1, 3, 3, 1),
                              window_strides=(1, 2, 2, 1),
                              padding=((0, 0), (1, 1), (1, 1), (0, 0)))

    for name, first_stride in (('layer1', 1), ('layer2', 2)):
        x = basic_block(x, params[name][0], first_stride)
        x = basic_block(x, params[name][1], 1)

    N, H2, W2, _ = x.shape
    if H2 <= 2 and W2 <= 2:
        # layer3 + layer4 + avg-pool + fc + softmax fused into ONE kernel.
        return deep_tail_fused(x, params)

    # Fallback for larger inputs: per-conv kernels + generic pooled head.
    for name in ('layer3', 'layer4'):
        x = basic_block(x, params[name][0], 2)
        x = basic_block(x, params[name][1], 1)
    return pool_fc_softmax(x, params)


if __name__ == "__main__":
    NUM_CLASSES = 5
    key = jax.random.PRNGKey(0)
    pkey, xkey = jax.random.split(key)

    x = jax.random.normal(xkey, (2, 3, 16, 16), jnp.float32)       # NCHW like PyTorch
    params = init_params(pkey, num_classes=NUM_CLASSES, input_hw=(16, 16))

    fwd = jax.jit(lambda inp: model_classifier_forward(params, inp,
                                                       num_classes=NUM_CLASSES))
    logits, probas = fwd(x)
    jax.block_until_ready((logits, probas))

    assert logits.shape == (2, NUM_CLASSES - 1, 2)
    assert probas.shape == (2, NUM_CLASSES - 1)
    assert bool(jnp.all(jnp.isfinite(logits))) and bool(jnp.all(jnp.isfinite(probas)))
    print("KERNEL_OK")
</pallas_src>

<mosaic_0001>
module attributes {stable_mosaic.version = 11 : i64} {
  func.func @_conv_kernel(%arg0: i32, %arg1: memref<128x147xbf16, #tpu.memory_space<vmem>>, %arg2: memref<147x64xbf16, #tpu.memory_space<vmem>>, %arg3: memref<1x64xf32, #tpu.memory_space<vmem>>, %arg4: memref<128x64xbf16, #tpu.memory_space<vmem>>) attributes {dimension_semantics = [#tpu.dimension_semantics<parallel>], iteration_bounds = array<i64: 1>, scalar_prefetch = 0 : i64, scratch_operands = 0 : i64, tpu.core_type = #tpu.core_type<tc>, window_params = [{transform_indices = @transform_0, window_bounds = array<i64: 128, 147>}, {pipeline_mode = #tpu.pipeline_mode<synchronous>, transform_indices = @transform_1, window_bounds = array<i64: 147, 64>}, {pipeline_mode = #tpu.pipeline_mode<synchronous>, transform_indices = @transform_2, window_bounds = array<i64: 1, 64>}, {transform_indices = @transform_3, window_bounds = array<i64: 128, 64>}]} {
    %c0 = arith.constant 0 : index
    %c0_0 = arith.constant 0 : index
    %0 = vector.load %arg1[%c0, %c0_0] : memref<128x147xbf16, #tpu.memory_space<vmem>>, vector<128x147xbf16>
    %c0_1 = arith.constant 0 : index
    %c0_2 = arith.constant 0 : index
    %1 = vector.load %arg2[%c0_1, %c0_2] : memref<147x64xbf16, #tpu.memory_space<vmem>>, vector<147x64xbf16>
    %cst = arith.constant dense<0.000000e+00> : vector<128x64xf32>
    %2 = tpu.matmul %0, %1, %cst {dimension_numbers = #tpu.dot_dimension_numbers<[1], [0], [0], [1], [0, 0, 1, 1], [], []>} : vector<128x147xbf16>, vector<147x64xbf16>, vector<128x64xf32> -> vector<128x64xf32>
    %c0_3 = arith.constant 0 : index
    %c0_4 = arith.constant 0 : index
    %3 = vector.load %arg3[%c0_3, %c0_4] : memref<1x64xf32, #tpu.memory_space<vmem>>, vector<1x64xf32>
    %4 = vector.broadcast %3 : vector<1x64xf32> to vector<128x64xf32>
    %5 = arith.addf %2, %4 : vector<128x64xf32>
    %cst_5 = arith.constant 0.000000e+00 : f32
    %6 = vector.broadcast %cst_5 : f32 to vector<128x64xf32>
    %7 = arith.maximumf %5, %6 : vector<128x64xf32>
    %8 = arith.truncf %7 : vector<128x64xf32> to vector<128x64xbf16>
    %c0_6 = arith.constant 0 : index
    %c0_7 = arith.constant 0 : index
    %9 = vector.load %arg4[%c0_6, %c0_7] : memref<128x64xbf16, #tpu.memory_space<vmem>>, vector<128x64xbf16>
    tpu.vector_store %arg4[%c0_6, %c0_7], %8 {strides = array<i32>} : memref<128x64xbf16, #tpu.memory_space<vmem>>, vector<128x64xbf16>,
    return
  }
  func.func @transform_0(%arg0: i32) -> (i32, i32) {
    %c0_i32 = arith.constant 0 : i32
    %c0_i32_0 = arith.constant 0 : i32
    return %arg0, %c0_i32 : i32, i32
  }
  func.func @transform_1(%arg0: i32) -> (i32, i32) {
    %c0_i32 = arith.constant 0 : i32
    %c0_i32_0 = arith.constant 0 : i32
    %c0_i32_1 = arith.constant 0 : i32
    return %c0_i32, %c0_i32_0 : i32, i32
  }
  func.func @transform_2(%arg0: i32) -> (i32, i32) {
    %c0_i32 = arith.constant 0 : i32
    %c0_i32_0 = arith.constant 0 : i32
    %c0_i32_1 = arith.constant 0 : i32
    return %c0_i32, %c0_i32_0 : i32, i32
  }
  func.func @transform_3(%arg0: i32) -> (i32, i32) {
    %c0_i32 = arith.constant 0 : i32
    %c0_i32_0 = arith.constant 0 : i32
    return %arg0, %c0_i32 : i32, i32
  }
}

module attributes {stable_mosaic.version = 11 : i64} {
  func.func @_conv_kernel(%arg0: i32, %arg1: memref<32x576xbf16, #tpu.memory_space<vmem>>, %arg2: memref<576x64xbf16, #tpu.memory_space<vmem>>, %arg3: memref<1x64xf32, #tpu.memory_space<vmem>>, %arg4: memref<32x64xbf16, #tpu.memory_space<vmem>>) attributes {dimension_semantics = [#tpu.dimension_semantics<parallel>], iteration_bounds = array<i64: 1>, scalar_prefetch = 0 : i64, scratch_operands = 0 : i64, tpu.core_type = #tpu.core_type<tc>, window_params = [{transform_indices = @transform_0, window_bounds = array<i64: 32, 576>}, {pipeline_mode = #tpu.pipeline_mode<synchronous>, transform_indices = @transform_1, window_bounds = array<i64: 576, 64>}, {pipeline_mode = #tpu.pipeline_mode<synchronous>, transform_indices = @transform_2, window_bounds = array<i64: 1, 64>}, {transform_indices = @transform_3, window_bounds = array<i64: 32, 64>}]} {
    %c0 = arith.constant 0 : index
    %c0_0 = arith.constant 0 : index
    %0 = vector.load %arg1[%c0, %c0_0] : memref<32x576xbf16, #tpu.memory_space<vmem>>, vector<32x576xbf16>
    %c0_1 = arith.constant 0 : index
    %c0_2 = arith.constant 0 : index
    %1 = vector.load %arg2[%c0_1, %c0_2] : memref<576x64xbf16, #tpu.memory_space<vmem>>, vector<576x64xbf16>
    %cst = arith.constant dense<0.000000e+00> : vector<32x64xf32>
    %2 = tpu.matmul %0, %1, %cst {dimension_numbers = #tpu.dot_dimension_numbers<[1], [0], [0], [1], [0, 0, 1, 1], [], []>} : vector<32x576xbf16>, vector<576x64xbf16>, vector<32x64xf32> -> vector<32x64xf32>
    %c0_3 = arith.constant 0 : index
    %c0_4 = arith.constant 0 : index
    %3 = vector.load %arg3[%c0_3, %c0_4] : memref<1x64xf32, #tpu.memory_space<vmem>>, vector<1x64xf32>
    %4 = vector.broadcast %3 : vector<1x64xf32> to vector<32x64xf32>
    %5 = arith.addf %2, %4 : vector<32x64xf32>
    %cst_5 = arith.constant 0.000000e+00 : f32
    %6 = vector.broadcast %cst_5 : f32 to vector<32x64xf32>
    %7 = arith.maximumf %5, %6 : vector<32x64xf32>
    %8 = arith.truncf %7 : vector<32x64xf32> to vector<32x64xbf16>
    %c0_6 = arith.constant 0 : index
    %c0_7 = arith.constant 0 : index
    %9 = vector.load %arg4[%c0_6, %c0_7] : memref<32x64xbf16, #tpu.memory_space<vmem>>, vector<32x64xbf16>
    tpu.vector_store %arg4[%c0_6, %c0_7], %8 {strides = array<i32>} : memref<32x64xbf16, #tpu.memory_space<vmem>>, vector<32x64xbf16>,
    return
  }
  func.func @transform_0(%arg0: i32) -> (i32, i32) {
    %c0_i32 = arith.constant 0 : i32
    %c0_i32_0 = arith.constant 0 : i32
    return %arg0, %c0_i32 : i32, i32
  }
  func.func @transform_1(%arg0: i32) -> (i32, i32) {
    %c0_i32 = arith.constant 0 : i32
    %c0_i32_0 = arith.constant 0 : i32
    %c0_i32_1 = arith.constant 0 : i32
    return %c0_i32, %c0_i32_0 : i32, i32
  }
  func.func @transform_2(%arg0: i32) -> (i32, i32) {
    %c0_i32 = arith.constant 0 : i32
    %c0_i32_0 = arith.constant 0 : i32
    %c0_i32_1 = arith.constant 0 : i32
    return %c0_i32, %c0_i32_0 : i32, i32
  }
  func.func @transform_3(%arg0: i32) -> (i32, i32) {
    %c0_i32 = arith.constant 0 : i32
    %c0_i32_0 = arith.constant 0 : i32
    return %arg0, %c0_i32 : i32, i32
  }
}

module attributes {stable_mosaic.version = 11 : i64} {
  func.func @_conv_kernel(%arg0: i32, %arg1: memref<32x576xbf16, #tpu.memory_space<vmem>>, %arg2: memref<576x64xbf16, #tpu.memory_space<vmem>>, %arg3: memref<1x64xf32, #tpu.memory_space<vmem>>, %arg4: memref<32x64xbf16, #tpu.memory_space<vmem>>, %arg5: memref<32x64xbf16, #tpu.memory_space<vmem>>) attributes {dimension_semantics = [#tpu.dimension_semantics<parallel>], iteration_bounds = array<i64: 1>, scalar_prefetch = 0 : i64, scratch_operands = 0 : i64, tpu.core_type = #tpu.core_type<tc>, window_params = [{transform_indices = @transform_0, window_bounds = array<i64: 32, 576>}, {pipeline_mode = #tpu.pipeline_mode<synchronous>, transform_indices = @transform_1, window_bounds = array<i64: 576, 64>}, {pipeline_mode = #tpu.pipeline_mode<synchronous>, transform_indices = @transform_2, window_bounds = array<i64: 1, 64>}, {transform_indices = @transform_3, window_bounds = array<i64: 32, 64>}, {transform_indices = @transform_4, window_bounds = array<i64: 32, 64>}]} {
    %c0 = arith.constant 0 : index
    %c0_0 = arith.constant 0 : index
    %0 = vector.load %arg1[%c0, %c0_0] : memref<32x576xbf16, #tpu.memory_space<vmem>>, vector<32x576xbf16>
    %c0_1 = arith.constant 0 : index
    %c0_2 = arith.constant 0 : index
    %1 = vector.load %arg2[%c0_1, %c0_2] : memref<576x64xbf16, #tpu.memory_space<vmem>>, vector<576x64xbf16>
    %cst = arith.constant dense<0.000000e+00> : vector<32x64xf32>
    %2 = tpu.matmul %0, %1, %cst {dimension_numbers = #tpu.dot_dimension_numbers<[1], [0], [0], [1], [0, 0, 1, 1], [], []>} : vector<32x576xbf16>, vector<576x64xbf16>, vector<32x64xf32> -> vector<32x64xf32>
    %c0_3 = arith.constant 0 : index
    %c0_4 = arith.constant 0 : index
    %3 = vector.load %arg3[%c0_3, %c0_4] : memref<1x64xf32, #tpu.memory_space<vmem>>, vector<1x64xf32>
    %4 = vector.broadcast %3 : vector<1x64xf32> to vector<32x64xf32>
    %5 = arith.addf %2, %4 : vector<32x64xf32>
    %c0_5 = arith.constant 0 : index
    %c0_6 = arith.constant 0 : index
    %6 = vector.load %arg4[%c0_5, %c0_6] : memref<32x64xbf16, #tpu.memory_space<vmem>>, vector<32x64xbf16>
    %7 = arith.extf %6 : vector<32x64xbf16> to vector<32x64xf32>
    %8 = arith.addf %5, %7 : vector<32x64xf32>
    %cst_7 = arith.constant 0.000000e+00 : f32
    %9 = vector.broadcast %cst_7 : f32 to vector<32x64xf32>
    %10 = arith.maximumf %8, %9 : vector<32x64xf32>
    %11 = arith.truncf %10 : vector<32x64xf32> to vector<32x64xbf16>
    %c0_8 = arith.constant 0 : index
    %c0_9 = arith.constant 0 : index
    %12 = vector.load %arg5[%c0_8, %c0_9] : memref<32x64xbf16, #tpu.memory_space<vmem>>, vector<32x64xbf16>
    tpu.vector_store %arg5[%c0_8, %c0_9], %11 {strides = array<i32>} : memref<32x64xbf16, #tpu.memory_space<vmem>>, vector<32x64xbf16>,
    return
  }
  func.func @transform_0(%arg0: i32) -> (i32, i32) {
    %c0_i32 = arith.constant 0 : i32
    %c0_i32_0 = arith.constant 0 : i32
    return %arg0, %c0_i32 : i32, i32
  }
  func.func @transform_1(%arg0: i32) -> (i32, i32) {
    %c0_i32 = arith.constant 0 : i32
    %c0_i32_0 = arith.constant 0 : i32
    %c0_i32_1 = arith.constant 0 : i32
    return %c0_i32, %c0_i32_0 : i32, i32
  }
  func.func @transform_2(%arg0: i32) -> (i32, i32) {
    %c0_i32 = arith.constant 0 : i32
    %c0_i32_0 = arith.constant 0 : i32
    %c0_i32_1 = arith.constant 0 : i32
    return %c0_i32, %c0_i32_0 : i32, i32
  }
  func.func @transform_3(%arg0: i32) -> (i32, i32) {
    %c0_i32 = arith.constant 0 : i32
    %c0_i32_0 = arith.constant 0 : i32
    return %arg0, %c0_i32 : i32, i32
  }
  func.func @transform_4(%arg0: i32) -> (i32, i32) {
    %c0_i32 = arith.constant 0 : i32
    %c0_i32_0 = arith.constant 0 : i32
    return %arg0, %c0_i32 : i32, i32
  }
}

module attributes {stable_mosaic.version = 11 : i64} {
  func.func @_conv_kernel(%arg0: i32, %arg1: memref<8x576xbf16, #tpu.memory_space<vmem>>, %arg2: memref<576x128xbf16, #tpu.memory_space<vmem>>, %arg3: memref<1x128xf32, #tpu.memory_space<vmem>>, %arg4: memref<8x128xbf16, #tpu.memory_space<vmem>>) attributes {dimension_semantics = [#tpu.dimension_semantics<parallel>], iteration_bounds = array<i64: 1>, scalar_prefetch = 0 : i64, scratch_operands = 0 : i64, tpu.core_type = #tpu.core_type<tc>, window_params = [{transform_indices = @transform_0, window_bounds = array<i64: 8, 576>}, {pipeline_mode = #tpu.pipeline_mode<synchronous>, transform_indices = @transform_1, window_bounds = array<i64: 576, 128>}, {pipeline_mode = #tpu.pipeline_mode<synchronous>, transform_indices = @transform_2, window_bounds = array<i64: 1, 128>}, {transform_indices = @transform_3, window_bounds = array<i64: 8, 128>}]} {
    %c0 = arith.constant 0 : index
    %c0_0 = arith.constant 0 : index
    %0 = vector.load %arg1[%c0, %c0_0] : memref<8x576xbf16, #tpu.memory_space<vmem>>, vector<8x576xbf16>
    %c0_1 = arith.constant 0 : index
    %c0_2 = arith.constant 0 : index
    %1 = vector.load %arg2[%c0_1, %c0_2] : memref<576x128xbf16, #tpu.memory_space<vmem>>, vector<576x128xbf16>
    %cst = arith.constant dense<0.000000e+00> : vector<8x128xf32>
    %2 = tpu.matmul %0, %1, %cst {dimension_numbers = #tpu.dot_dimension_numbers<[1], [0], [0], [1], [0, 0, 1, 1], [], []>} : vector<8x576xbf16>, vector<576x128xbf16>, vector<8x128xf32> -> vector<8x128xf32>
    %c0_3 = arith.constant 0 : index
    %c0_4 = arith.constant 0 : index
    %3 = vector.load %arg3[%c0_3, %c0_4] : memref<1x128xf32, #tpu.memory_space<vmem>>, vector<1x128xf32>
    %4 = vector.broadcast %3 : vector<1x128xf32> to vector<8x128xf32>
    %5 = arith.addf %2, %4 : vector<8x128xf32>
    %cst_5 = arith.constant 0.000000e+00 : f32
    %6 = vector.broadcast %cst_5 : f32 to vector<8x128xf32>
    %7 = arith.maximumf %5, %6 : vector<8x128xf32>
    %8 = arith.truncf %7 : vector<8x128xf32> to vector<8x128xbf16>
    %c0_6 = arith.constant 0 : index
    %c0_7 = arith.constant 0 : index
    %9 = vector.load %arg4[%c0_6, %c0_7] : memref<8x128xbf16, #tpu.memory_space<vmem>>, vector<8x128xbf16>
    tpu.vector_store %arg4[%c0_6, %c0_7], %8 {strides = array<i32>} : memref<8x128xbf16, #tpu.memory_space<vmem>>, vector<8x128xbf16>,
    return
  }
  func.func @transform_0(%arg0: i32) -> (i32, i32) {
    %c0_i32 = arith.constant 0 : i32
    %c0_i32_0 = arith.constant 0 : i32
    return %arg0, %c0_i32 : i32, i32
  }
  func.func @transform_1(%arg0: i32) -> (i32, i32) {
    %c0_i32 = arith.constant 0 : i32
    %c0_i32_0 = arith.constant 0 : i32
    %c0_i32_1 = arith.constant 0 : i32
    return %c0_i32, %c0_i32_0 : i32, i32
  }
  func.func @transform_2(%arg0: i32) -> (i32, i32) {
    %c0_i32 = arith.constant 0 : i32
    %c0_i32_0 = arith.constant 0 : i32
    %c0_i32_1 = arith.constant 0 : i32
    return %c0_i32, %c0_i32_0 : i32, i32
  }
  func.func @transform_3(%arg0: i32) -> (i32, i32) {
    %c0_i32 = arith.constant 0 : i32
    %c0_i32_0 = arith.constant 0 : i32
    return %arg0, %c0_i32 : i32, i32
  }
}

module attributes {stable_mosaic.version = 11 : i64} {
  func.func @_conv_kernel(%arg0: i32, %arg1: memref<8x1152xbf16, #tpu.memory_space<vmem>>, %arg2: memref<1152x128xbf16, #tpu.memory_space<vmem>>, %arg3: memref<1x128xf32, #tpu.memory_space<vmem>>, %arg4: memref<8x64xbf16, #tpu.memory_space<vmem>>, %arg5: memref<64x128xbf16, #tpu.memory_space<vmem>>, %arg6: memref<1x128xf32, #tpu.memory_space<vmem>>, %arg7: memref<8x128xbf16, #tpu.memory_space<vmem>>) attributes {dimension_semantics = [#tpu.dimension_semantics<parallel>], iteration_bounds = array<i64: 1>, scalar_prefetch = 0 : i64, scratch_operands = 0 : i64, tpu.core_type = #tpu.core_type<tc>, window_params = [{transform_indices = @transform_0, window_bounds = array<i64: 8, 1152>}, {pipeline_mode = #tpu.pipeline_mode<synchronous>, transform_indices = @transform_1, window_bounds = array<i64: 1152, 128>}, {pipeline_mode = #tpu.pipeline_mode<synchronous>, transform_indices = @transform_2, window_bounds = array<i64: 1, 128>}, {transform_indices = @transform_3, window_bounds = array<i64: 8, 64>}, {pipeline_mode = #tpu.pipeline_mode<synchronous>, transform_indices = @transform_4, window_bounds = array<i64: 64, 128>}, {pipeline_mode = #tpu.pipeline_mode<synchronous>, transform_indices = @transform_5, window_bounds = array<i64: 1, 128>}, {transform_indices = @transform_6, window_bounds = array<i64: 8, 128>}]} {
    %c0 = arith.constant 0 : index
    %c0_0 = arith.constant 0 : index
    %0 = vector.load %arg1[%c0, %c0_0] : memref<8x1152xbf16, #tpu.memory_space<vmem>>, vector<8x1152xbf16>
    %c0_1 = arith.constant 0 : index
    %c0_2 = arith.constant 0 : index
    %1 = vector.load %arg2[%c0_1, %c0_2] : memref<1152x128xbf16, #tpu.memory_space<vmem>>, vector<1152x128xbf16>
    %cst = arith.constant dense<0.000000e+00> : vector<8x128xf32>
    %2 = tpu.matmul %0, %1, %cst {dimension_numbers = #tpu.dot_dimension_numbers<[1], [0], [0], [1], [0, 0, 1, 1], [], []>} : vector<8x1152xbf16>, vector<1152x128xbf16>, vector<8x128xf32> -> vector<8x128xf32>
    %c0_3 = arith.constant 0 : index
    %c0_4 = arith.constant 0 : index
    %3 = vector.load %arg3[%c0_3, %c0_4] : memref<1x128xf32, #tpu.memory_space<vmem>>, vector<1x128xf32>
    %4 = vector.broadcast %3 : vector<1x128xf32> to vector<8x128xf32>
    %5 = arith.addf %2, %4 : vector<8x128xf32>
    %c0_5 = arith.constant 0 : index
    %c0_6 = arith.constant 0 : index
    %6 = vector.load %arg4[%c0_5, %c0_6] : memref<8x64xbf16, #tpu.memory_space<vmem>>, vector<8x64xbf16>
    %c0_7 = arith.constant 0 : index
    %c0_8 = arith.constant 0 : index
    %7 = vector.load %arg5[%c0_7, %c0_8] : memref<64x128xbf16, #tpu.memory_space<vmem>>, vector<64x128xbf16>
    %cst_9 = arith.constant dense<0.000000e+00> : vector<8x128xf32>
    %8 = tpu.matmul %6, %7, %cst_9 {dimension_numbers = #tpu.dot_dimension_numbers<[1], [0], [0], [1], [0, 0, 1, 1], [], []>} : vector<8x64xbf16>, vector<64x128xbf16>, vector<8x128xf32> -> vector<8x128xf32>
    %c0_10 = arith.constant 0 : index
    %c0_11 = arith.constant 0 : index
    %9 = vector.load %arg6[%c0_10, %c0_11] : memref<1x128xf32, #tpu.memory_space<vmem>>, vector<1x128xf32>
    %10 = vector.broadcast %9 : vector<1x128xf32> to vector<8x128xf32>
    %11 = arith.addf %8, %10 : vector<8x128xf32>
    %12 = arith.addf %5, %11 : vector<8x128xf32>
    %cst_12 = arith.constant 0.000000e+00 : f32
    %13 = vector.broadcast %cst_12 : f32 to vector<8x128xf32>
    %14 = arith.maximumf %12, %13 : vector<8x128xf32>
    %15 = arith.truncf %14 : vector<8x128xf32> to vector<8x128xbf16>
    %c0_13 = arith.constant 0 : index
    %c0_14 = arith.constant 0 : index
    %16 = vector.load %arg7[%c0_13, %c0_14] : memref<8x128xbf16, #tpu.memory_space<vmem>>, vector<8x128xbf16>
    tpu.vector_store %arg7[%c0_13, %c0_14], %15 {strides = array<i32>} : memref<8x128xbf16, #tpu.memory_space<vmem>>, vector<8x128xbf16>,
    return
  }
  func.func @transform_0(%arg0: i32) -> (i32, i32) {
    %c0_i32 = arith.constant 0 : i32
    %c0_i32_0 = arith.constant 0 : i32
    return %arg0, %c0_i32 : i32, i32
  }
  func.func @transform_1(%arg0: i32) -> (i32, i32) {
    %c0_i32 = arith.constant 0 : i32
    %c0_i32_0 = arith.constant 0 : i32
    %c0_i32_1 = arith.constant 0 : i32
    return %c0_i32, %c0_i32_0 : i32, i32
  }
  func.func @transform_2(%arg0: i32) -> (i32, i32) {
    %c0_i32 = arith.constant 0 : i32
    %c0_i32_0 = arith.constant 0 : i32
    %c0_i32_1 = arith.constant 0 : i32
    return %c0_i32, %c0_i32_0 : i32, i32
  }
  func.func @transform_3(%arg0: i32) -> (i32, i32) {
    %c0_i32 = arith.constant 0 : i32
    %c0_i32_0 = arith.constant 0 : i32
    return %arg0, %c0_i32 : i32, i32
  }
  func.func @transform_4(%arg0: i32) -> (i32, i32) {
    %c0_i32 = arith.constant 0 : i32
    %c0_i32_0 = arith.constant 0 : i32
    %c0_i32_1 = arith.constant 0 : i32
    return %c0_i32, %c0_i32_0 : i32, i32
  }
  func.func @transform_5(%arg0: i32) -> (i32, i32) {
    %c0_i32 = arith.constant 0 : i32
    %c0_i32_0 = arith.constant 0 : i32
    %c0_i32_1 = arith.constant 0 : i32
    return %c0_i32, %c0_i32_0 : i32, i32
  }
  func.func @transform_6(%arg0: i32) -> (i32, i32) {
    %c0_i32 = arith.constant 0 : i32
    %c0_i32_0 = arith.constant 0 : i32
    return %arg0, %c0_i32 : i32, i32
  }
}

module attributes {stable_mosaic.version = 11 : i64} {
  func.func @_conv_kernel(%arg0: i32, %arg1: memref<8x1152xbf16, #tpu.memory_space<vmem>>, %arg2: memref<1152x128xbf16, #tpu.memory_space<vmem>>, %arg3: memref<1x128xf32, #tpu.memory_space<vmem>>, %arg4: memref<8x128xbf16, #tpu.memory_space<vmem>>) attributes {dimension_semantics = [#tpu.dimension_semantics<parallel>], iteration_bounds = array<i64: 1>, scalar_prefetch = 0 : i64, scratch_operands = 0 : i64, tpu.core_type = #tpu.core_type<tc>, window_params = [{transform_indices = @transform_0, window_bounds = array<i64: 8, 1152>}, {pipeline_mode = #tpu.pipeline_mode<synchronous>, transform_indices = @transform_1, window_bounds = array<i64: 1152, 128>}, {pipeline_mode = #tpu.pipeline_mode<synchronous>, transform_indices = @transform_2, window_bounds = array<i64: 1, 128>}, {transform_indices = @transform_3, window_bounds = array<i64: 8, 128>}]} {
    %c0 = arith.constant 0 : index
    %c0_0 = arith.constant 0 : index
    %0 = vector.load %arg1[%c0, %c0_0] : memref<8x1152xbf16, #tpu.memory_space<vmem>>, vector<8x1152xbf16>
    %c0_1 = arith.constant 0 : index
    %c0_2 = arith.constant 0 : index
    %1 = vector.load %arg2[%c0_1, %c0_2] : memref<1152x128xbf16, #tpu.memory_space<vmem>>, vector<1152x128xbf16>
    %cst = arith.constant dense<0.000000e+00> : vector<8x128xf32>
    %2 = tpu.matmul %0, %1, %cst {dimension_numbers = #tpu.dot_dimension_numbers<[1], [0], [0], [1], [0, 0, 1, 1], [], []>} : vector<8x1152xbf16>, vector<1152x128xbf16>, vector<8x128xf32> -> vector<8x128xf32>
    %c0_3 = arith.constant 0 : index
    %c0_4 = arith.constant 0 : index
    %3 = vector.load %arg3[%c0_3, %c0_4] : memref<1x128xf32, #tpu.memory_space<vmem>>, vector<1x128xf32>
    %4 = vector.broadcast %3 : vector<1x128xf32> to vector<8x128xf32>
    %5 = arith.addf %2, %4 : vector<8x128xf32>
    %cst_5 = arith.constant 0.000000e+00 : f32
    %6 = vector.broadcast %cst_5 : f32 to vector<8x128xf32>
    %7 = arith.maximumf %5, %6 : vector<8x128xf32>
    %8 = arith.truncf %7 : vector<8x128xf32> to vector<8x128xbf16>
    %c0_6 = arith.constant 0 : index
    %c0_7 = arith.constant 0 : index
    %9 = vector.load %arg4[%c0_6, %c0_7] : memref<8x128xbf16, #tpu.memory_space<vmem>>, vector<8x128xbf16>
    tpu.vector_store %arg4[%c0_6, %c0_7], %8 {strides = array<i32>} : memref<8x128xbf16, #tpu.memory_space<vmem>>, vector<8x128xbf16>,
    return
  }
  func.func @transform_0(%arg0: i32) -> (i32, i32) {
    %c0_i32 = arith.constant 0 : i32
    %c0_i32_0 = arith.constant 0 : i32
    return %arg0, %c0_i32 : i32, i32
  }
  func.func @transform_1(%arg0: i32) -> (i32, i32) {
    %c0_i32 = arith.constant 0 : i32
    %c0_i32_0 = arith.constant 0 : i32
    %c0_i32_1 = arith.constant 0 : i32
    return %c0_i32, %c0_i32_0 : i32, i32
  }
  func.func @transform_2(%arg0: i32) -> (i32, i32) {
    %c0_i32 = arith.constant 0 : i32
    %c0_i32_0 = arith.constant 0 : i32
    %c0_i32_1 = arith.constant 0 : i32
    return %c0_i32, %c0_i32_0 : i32, i32
  }
  func.func @transform_3(%arg0: i32) -> (i32, i32) {
    %c0_i32 = arith.constant 0 : i32
    %c0_i32_0 = arith.constant 0 : i32
    return %arg0, %c0_i32 : i32, i32
  }
}

module attributes {stable_mosaic.version = 11 : i64} {
  func.func @_conv_kernel(%arg0: i32, %arg1: memref<8x1152xbf16, #tpu.memory_space<vmem>>, %arg2: memref<1152x128xbf16, #tpu.memory_space<vmem>>, %arg3: memref<1x128xf32, #tpu.memory_space<vmem>>, %arg4: memref<8x128xbf16, #tpu.memory_space<vmem>>, %arg5: memref<8x128xbf16, #tpu.memory_space<vmem>>) attributes {dimension_semantics = [#tpu.dimension_semantics<parallel>], iteration_bounds = array<i64: 1>, scalar_prefetch = 0 : i64, scratch_operands = 0 : i64, tpu.core_type = #tpu.core_type<tc>, window_params = [{transform_indices = @transform_0, window_bounds = array<i64: 8, 1152>}, {pipeline_mode = #tpu.pipeline_mode<synchronous>, transform_indices = @transform_1, window_bounds = array<i64: 1152, 128>}, {pipeline_mode = #tpu.pipeline_mode<synchronous>, transform_indices = @transform_2, window_bounds = array<i64: 1, 128>}, {transform_indices = @transform_3, window_bounds = array<i64: 8, 128>}, {transform_indices = @transform_4, window_bounds = array<i64: 8, 128>}]} {
    %c0 = arith.constant 0 : index
    %c0_0 = arith.constant 0 : index
    %0 = vector.load %arg1[%c0, %c0_0] : memref<8x1152xbf16, #tpu.memory_space<vmem>>, vector<8x1152xbf16>
    %c0_1 = arith.constant 0 : index
    %c0_2 = arith.constant 0 : index
    %1 = vector.load %arg2[%c0_1, %c0_2] : memref<1152x128xbf16, #tpu.memory_space<vmem>>, vector<1152x128xbf16>
    %cst = arith.constant dense<0.000000e+00> : vector<8x128xf32>
    %2 = tpu.matmul %0, %1, %cst {dimension_numbers = #tpu.dot_dimension_numbers<[1], [0], [0], [1], [0, 0, 1, 1], [], []>} : vector<8x1152xbf16>, vector<1152x128xbf16>, vector<8x128xf32> -> vector<8x128xf32>
    %c0_3 = arith.constant 0 : index
    %c0_4 = arith.constant 0 : index
    %3 = vector.load %arg3[%c0_3, %c0_4] : memref<1x128xf32, #tpu.memory_space<vmem>>, vector<1x128xf32>
    %4 = vector.broadcast %3 : vector<1x128xf32> to vector<8x128xf32>
    %5 = arith.addf %2, %4 : vector<8x128xf32>
    %c0_5 = arith.constant 0 : index
    %c0_6 = arith.constant 0 : index
    %6 = vector.load %arg4[%c0_5, %c0_6] : memref<8x128xbf16, #tpu.memory_space<vmem>>, vector<8x128xbf16>
    %7 = arith.extf %6 : vector<8x128xbf16> to vector<8x128xf32>
    %8 = arith.addf %5, %7 : vector<8x128xf32>
    %cst_7 = arith.constant 0.000000e+00 : f32
    %9 = vector.broadcast %cst_7 : f32 to vector<8x128xf32>
    %10 = arith.maximumf %8, %9 : vector<8x128xf32>
    %11 = arith.truncf %10 : vector<8x128xf32> to vector<8x128xbf16>
    %c0_8 = arith.constant 0 : index
    %c0_9 = arith.constant 0 : index
    %12 = vector.load %arg5[%c0_8, %c0_9] : memref<8x128xbf16, #tpu.memory_space<vmem>>, vector<8x128xbf16>
    tpu.vector_store %arg5[%c0_8, %c0_9], %11 {strides = array<i32>} : memref<8x128xbf16, #tpu.memory_space<vmem>>, vector<8x128xbf16>,
    return
  }
  func.func @transform_0(%arg0: i32) -> (i32, i32) {
    %c0_i32 = arith.constant 0 : i32
    %c0_i32_0 = arith.constant 0 : i32
    return %arg0, %c0_i32 : i32, i32
  }
  func.func @transform_1(%arg0: i32) -> (i32, i32) {
    %c0_i32 = arith.constant 0 : i32
    %c0_i32_0 = arith.constant 0 : i32
    %c0_i32_1 = arith.constant 0 : i32
    return %c0_i32, %c0_i32_0 : i32, i32
  }
  func.func @transform_2(%arg0: i32) -> (i32, i32) {
    %c0_i32 = arith.constant 0 : i32
    %c0_i32_0 = arith.constant 0 : i32
    %c0_i32_1 = arith.constant 0 : i32
    return %c0_i32, %c0_i32_0 : i32, i32
  }
  func.func @transform_3(%arg0: i32) -> (i32, i32) {
    %c0_i32 = arith.constant 0 : i32
    %c0_i32_0 = arith.constant 0 : i32
    return %arg0, %c0_i32 : i32, i32
  }
  func.func @transform_4(%arg0: i32) -> (i32, i32) {
    %c0_i32 = arith.constant 0 : i32
    %c0_i32_0 = arith.constant 0 : i32
    return %arg0, %c0_i32 : i32, i32
  }
}

module attributes {stable_mosaic.version = 11 : i64} {
  func.func @_deep_tail_kernel(%arg0: i32, %arg1: memref<2x512xbf16, #tpu.memory_space<vmem>>, %arg2: memref<2x128xbf16, #tpu.memory_space<vmem>>, %arg3: memref<512x256xbf16, #tpu.memory_space<vmem>>, %arg4: memref<1x256xf32, #tpu.memory_space<vmem>>, %arg5: memref<128x256xbf16, #tpu.memory_space<vmem>>, %arg6: memref<1x256xf32, #tpu.memory_space<vmem>>, %arg7: memref<256x256xbf16, #tpu.memory_space<vmem>>, %arg8: memref<1x256xf32, #tpu.memory_space<vmem>>, %arg9: memref<256x256xbf16, #tpu.memory_space<vmem>>, %arg10: memref<1x256xf32, #tpu.memory_space<vmem>>, %arg11: memref<256x256xbf16, #tpu.memory_space<vmem>>, %arg12: memref<1x256xf32, #tpu.memory_space<vmem>>, %arg13: memref<256x512xbf16, #tpu.memory_space<vmem>>, %arg14: memref<1x512xf32, #tpu.memory_space<vmem>>, %arg15: memref<256x512xbf16, #tpu.memory_space<vmem>>, %arg16: memref<1x512xf32, #tpu.memory_space<vmem>>, %arg17: memref<512x512xbf16, #tpu.memory_space<vmem>>, %arg18: memref<1x512xf32, #tpu.memory_space<vmem>>, %arg19: memref<512x512xbf16, #tpu.memory_space<vmem>>, %arg20: memref<1x512xf32, #tpu.memory_space<vmem>>, %arg21: memref<512x512xbf16, #tpu.memory_space<vmem>>, %arg22: memref<1x512xf32, #tpu.memory_space<vmem>>, %arg23: memref<512x4xbf16, #tpu.memory_space<vmem>>, %arg24: memref<512x4xbf16, #tpu.memory_space<vmem>>, %arg25: memref<1x4xf32, #tpu.memory_space<vmem>>, %arg26: memref<1x4xf32, #tpu.memory_space<vmem>>, %arg27: memref<2x4xf32, #tpu.memory_space<vmem>>, %arg28: memref<2x4xf32, #tpu.memory_space<vmem>>, %arg29: memref<2x4xf32, #tpu.memory_space<vmem>>) attributes {dimension_semantics = [#tpu.dimension_semantics<arbitrary>], iteration_bounds = array<i64: 1>, scalar_prefetch = 0 : i64, scratch_operands = 0 : i64, tpu.core_type = #tpu.core_type<tc>, window_params = [{pipeline_mode = #tpu.pipeline_mode<synchronous>, transform_indices = @transform_0, window_bounds = array<i64: 2, 512>}, {pipeline_mode = #tpu.pipeline_mode<synchronous>, transform_indices = @transform_1, window_bounds = array<i64: 2, 128>}, {pipeline_mode = #tpu.pipeline_mode<synchronous>, transform_indices = @transform_2, window_bounds = array<i64: 512, 256>}, {pipeline_mode = #tpu.pipeline_mode<synchronous>, transform_indices = @transform_3, window_bounds = array<i64: 1, 256>}, {pipeline_mode = #tpu.pipeline_mode<synchronous>, transform_indices = @transform_4, window_bounds = array<i64: 128, 256>}, {pipeline_mode = #tpu.pipeline_mode<synchronous>, transform_indices = @transform_5, window_bounds = array<i64: 1, 256>}, {pipeline_mode = #tpu.pipeline_mode<synchronous>, transform_indices = @transform_6, window_bounds = array<i64: 256, 256>}, {pipeline_mode = #tpu.pipeline_mode<synchronous>, transform_indices = @transform_7, window_bounds = array<i64: 1, 256>}, {pipeline_mode = #tpu.pipeline_mode<synchronous>, transform_indices = @transform_8, window_bounds = array<i64: 256, 256>}, {pipeline_mode = #tpu.pipeline_mode<synchronous>, transform_indices = @transform_9, window_bounds = array<i64: 1, 256>}, {pipeline_mode = #tpu.pipeline_mode<synchronous>, transform_indices = @transform_10, window_bounds = array<i64: 256, 256>}, {pipeline_mode = #tpu.pipeline_mode<synchronous>, transform_indices = @transform_11, window_bounds = array<i64: 1, 256>}, {pipeline_mode = #tpu.pipeline_mode<synchronous>, transform_indices = @transform_12, window_bounds = array<i64: 256, 512>}, {pipeline_mode = #tpu.pipeline_mode<synchronous>, transform_indices = @transform_13, window_bounds = array<i64: 1, 512>}, {pipeline_mode = #tpu.pipeline_mode<synchronous>, transform_indices = @transform_14, window_bounds = array<i64: 256, 512>}, {pipeline_mode = #tpu.pipeline_mode<synchronous>, transform_indices = @transform_15, window_bounds = array<i64: 1, 512>}, {pipeline_mode = #tpu.pipeline_mode<synchronous>, transform_indices = @transform_16, window_bounds = array<i64: 512, 512>}, {pipeline_mode = #tpu.pipeline_mode<synchronous>, transform_indices = @transform_17, window_bounds = array<i64: 1, 512>}, {pipeline_mode = #tpu.pipeline_mode<synchronous>, transform_indices = @transform_18, window_bounds = array<i64: 512, 512>}, {pipeline_mode = #tpu.pipeline_mode<synchronous>, transform_indices = @transform_19, window_bounds = array<i64: 1, 512>}, {pipeline_mode = #tpu.pipeline_mode<synchronous>, transform_indices = @transform_20, window_bounds = array<i64: 512, 512>}, {pipeline_mode = #tpu.pipeline_mode<synchronous>, transform_indices = @transform_21, window_bounds = array<i64: 1, 512>}, {pipeline_mode = #tpu.pipeline_mode<synchronous>, transform_indices = @transform_22, window_bounds = array<i64: 512, 4>}, {pipeline_mode = #tpu.pipeline_mode<synchronous>, transform_indices = @transform_23, window_bounds = array<i64: 512, 4>}, {pipeline_mode = #tpu.pipeline_mode<synchronous>, transform_indices = @transform_24, window_bounds = array<i64: 1, 4>}, {pipeline_mode = #tpu.pipeline_mode<synchronous>, transform_indices = @transform_25, window_bounds = array<i64: 1, 4>}, {pipeline_mode = #tpu.pipeline_mode<synchronous>, transform_indices = @transform_26, window_bounds = array<i64: 2, 4>}, {pipeline_mode = #tpu.pipeline_mode<synchronous>, transform_indices = @transform_27, window_bounds = array<i64: 2, 4>}, {pipeline_mode = #tpu.pipeline_mode<synchronous>, transform_indices = @transform_28, window_bounds = array<i64: 2, 4>}]} {
    %c0 = arith.constant 0 : index
    %c0_0 = arith.constant 0 : index
    %0 = vector.load %arg1[%c0, %c0_0] : memref<2x512xbf16, #tpu.memory_space<vmem>>, vector<2x512xbf16>
    %c0_1 = arith.constant 0 : index
    %c0_2 = arith.constant 0 : index
    %1 = vector.load %arg3[%c0_1, %c0_2] : memref<512x256xbf16, #tpu.memory_space<vmem>>, vector<512x256xbf16>
    %cst = arith.constant dense<0.000000e+00> : vector<2x256xf32>
    %2 = tpu.matmul %0, %1, %cst {dimension_numbers = #tpu.dot_dimension_numbers<[1], [0], [0], [1], [0, 0, 1, 1], [], []>} : vector<2x512xbf16>, vector<512x256xbf16>, vector<2x256xf32> -> vector<2x256xf32>
    %c0_3 = arith.constant 0 : index
    %c0_4 = arith.constant 0 : index
    %3 = vector.load %arg4[%c0_3, %c0_4] : memref<1x256xf32, #tpu.memory_space<vmem>>, vector<1x256xf32>
    %4 = vector.broadcast %3 : vector<1x256xf32> to vector<2x256xf32>
    %5 = arith.addf %2, %4 : vector<2x256xf32>
    %cst_5 = arith.constant 0.000000e+00 : f32
    %6 = vector.broadcast %cst_5 : f32 to vector<2x256xf32>
    %7 = arith.maximumf %5, %6 : vector<2x256xf32>
    %c0_6 = arith.constant 0 : index
    %c0_7 = arith.constant 0 : index
    %8 = vector.load %arg2[%c0_6, %c0_7] : memref<2x128xbf16, #tpu.memory_space<vmem>>, vector<2x128xbf16>
    %c0_8 = arith.constant 0 : index
    %c0_9 = arith.constant 0 : index
    %9 = vector.load %arg5[%c0_8, %c0_9] : memref<128x256xbf16, #tpu.memory_space<vmem>>, vector<128x256xbf16>
    %cst_10 = arith.constant dense<0.000000e+00> : vector<2x256xf32>
    %10 = tpu.matmul %8, %9, %cst_10 {dimension_numbers = #tpu.dot_dimension_numbers<[1], [0], [0], [1], [0, 0, 1, 1], [], []>} : vector<2x128xbf16>, vector<128x256xbf16>, vector<2x256xf32> -> vector<2x256xf32>
    %c0_11 = arith.constant 0 : index
    %c0_12 = arith.constant 0 : index
    %11 = vector.load %arg6[%c0_11, %c0_12] : memref<1x256xf32, #tpu.memory_space<vmem>>, vector<1x256xf32>
    %12 = vector.broadcast %11 : vector<1x256xf32> to vector<2x256xf32>
    %13 = arith.addf %10, %12 : vector<2x256xf32>
    %14 = arith.truncf %7 : vector<2x256xf32> to vector<2x256xbf16>
    %c0_13 = arith.constant 0 : index
    %c0_14 = arith.constant 0 : index
    %15 = vector.load %arg7[%c0_13, %c0_14] : memref<256x256xbf16, #tpu.memory_space<vmem>>, vector<256x256xbf16>
    %cst_15 = arith.constant dense<0.000000e+00> : vector<2x256xf32>
    %16 = tpu.matmul %14, %15, %cst_15 {dimension_numbers = #tpu.dot_dimension_numbers<[1], [0], [0], [1], [0, 0, 1, 1], [], []>} : vector<2x256xbf16>, vector<256x256xbf16>, vector<2x256xf32> -> vector<2x256xf32>
    %c0_16 = arith.constant 0 : index
    %c0_17 = arith.constant 0 : index
    %17 = vector.load %arg8[%c0_16, %c0_17] : memref<1x256xf32, #tpu.memory_space<vmem>>, vector<1x256xf32>
    %18 = vector.broadcast %17 : vector<1x256xf32> to vector<2x256xf32>
    %19 = arith.addf %16, %18 : vector<2x256xf32>
    %20 = arith.addf %19, %13 : vector<2x256xf32>
    %cst_18 = arith.constant 0.000000e+00 : f32
    %21 = vector.broadcast %cst_18 : f32 to vector<2x256xf32>
    %22 = arith.maximumf %20, %21 : vector<2x256xf32>
    %23 = arith.truncf %22 : vector<2x256xf32> to vector<2x256xbf16>
    %c0_19 = arith.constant 0 : index
    %c0_20 = arith.constant 0 : index
    %24 = vector.load %arg9[%c0_19, %c0_20] : memref<256x256xbf16, #tpu.memory_space<vmem>>, vector<256x256xbf16>
    %cst_21 = arith.constant dense<0.000000e+00> : vector<2x256xf32>
    %25 = tpu.matmul %23, %24, %cst_21 {dimension_numbers = #tpu.dot_dimension_numbers<[1], [0], [0], [1], [0, 0, 1, 1], [], []>} : vector<2x256xbf16>, vector<256x256xbf16>, vector<2x256xf32> -> vector<2x256xf32>
    %c0_22 = arith.constant 0 : index
    %c0_23 = arith.constant 0 : index
    %26 = vector.load %arg10[%c0_22, %c0_23] : memref<1x256xf32, #tpu.memory_space<vmem>>, vector<1x256xf32>
    %27 = vector.broadcast %26 : vector<1x256xf32> to vector<2x256xf32>
    %28 = arith.addf %25, %27 : vector<2x256xf32>
    %cst_24 = arith.constant 0.000000e+00 : f32
    %29 = vector.broadcast %cst_24 : f32 to vector<2x256xf32>
    %30 = arith.maximumf %28, %29 : vector<2x256xf32>
    %31 = arith.truncf %30 : vector<2x256xf32> to vector<2x256xbf16>
    %c0_25 = arith.constant 0 : index
    %c0_26 = arith.constant 0 : index
    %32 = vector.load %arg11[%c0_25, %c0_26] : memref<256x256xbf16, #tpu.memory_space<vmem>>, vector<256x256xbf16>
    %cst_27 = arith.constant dense<0.000000e+00> : vector<2x256xf32>
    %33 = tpu.matmul %31, %32, %cst_27 {dimension_numbers = #tpu.dot_dimension_numbers<[1], [0], [0], [1], [0, 0, 1, 1], [], []>} : vector<2x256xbf16>, vector<256x256xbf16>, vector<2x256xf32> -> vector<2x256xf32>
    %c0_28 = arith.constant 0 : index
    %c0_29 = arith.constant 0 : index
    %34 = vector.load %arg12[%c0_28, %c0_29] : memref<1x256xf32, #tpu.memory_space<vmem>>, vector<1x256xf32>
    %35 = vector.broadcast %34 : vector<1x256xf32> to vector<2x256xf32>
    %36 = arith.addf %33, %35 : vector<2x256xf32>
    %37 = arith.addf %36, %22 : vector<2x256xf32>
    %cst_30 = arith.constant 0.000000e+00 : f32
    %38 = vector.broadcast %cst_30 : f32 to vector<2x256xf32>
    %39 = arith.maximumf %37, %38 : vector<2x256xf32>
    %40 = arith.truncf %39 : vector<2x256xf32> to vector<2x256xbf16>
    %c0_31 = arith.constant 0 : index
    %c0_32 = arith.constant 0 : index
    %41 = vector.load %arg13[%c0_31, %c0_32] : memref<256x512xbf16, #tpu.memory_space<vmem>>, vector<256x512xbf16>
    %cst_33 = arith.constant dense<0.000000e+00> : vector<2x512xf32>
    %42 = tpu.matmul %40, %41, %cst_33 {dimension_numbers = #tpu.dot_dimension_numbers<[1], [0], [0], [1], [0, 0, 1, 1], [], []>} : vector<2x256xbf16>, vector<256x512xbf16>, vector<2x512xf32> -> vector<2x512xf32>
    %c0_34 = arith.constant 0 : index
    %c0_35 = arith.constant 0 : index
    %43 = vector.load %arg14[%c0_34, %c0_35] : memref<1x512xf32, #tpu.memory_space<vmem>>, vector<1x512xf32>
    %44 = vector.broadcast %43 : vector<1x512xf32> to vector<2x512xf32>
    %45 = arith.addf %42, %44 : vector<2x512xf32>
    %cst_36 = arith.constant 0.000000e+00 : f32
    %46 = vector.broadcast %cst_36 : f32 to vector<2x512xf32>
    %47 = arith.maximumf %45, %46 : vector<2x512xf32>
    %48 = arith.truncf %39 : vector<2x256xf32> to vector<2x256xbf16>
    %c0_37 = arith.constant 0 : index
    %c0_38 = arith.constant 0 : index
    %49 = vector.load %arg15[%c0_37, %c0_38] : memref<256x512xbf16, #tpu.memory_space<vmem>>, vector<256x512xbf16>
    %cst_39 = arith.constant dense<0.000000e+00> : vector<2x512xf32>
    %50 = tpu.matmul %48, %49, %cst_39 {dimension_numbers = #tpu.dot_dimension_numbers<[1], [0], [0], [1], [0, 0, 1, 1], [], []>} : vector<2x256xbf16>, vector<256x512xbf16>, vector<2x512xf32> -> vector<2x512xf32>
    %c0_40 = arith.constant 0 : index
    %c0_41 = arith.constant 0 : index
    %51 = vector.load %arg16[%c0_40, %c0_41] : memref<1x512xf32, #tpu.memory_space<vmem>>, vector<1x512xf32>
    %52 = vector.broadcast %51 : vector<1x512xf32> to vector<2x512xf32>
    %53 = arith.addf %50, %52 : vector<2x512xf32>
    %54 = arith.truncf %47 : vector<2x512xf32> to vector<2x512xbf16>
    %c0_42 = arith.constant 0 : index
    %c0_43 = arith.constant 0 : index
    %55 = vector.load %arg17[%c0_42, %c0_43] : memref<512x512xbf16, #tpu.memory_space<vmem>>, vector<512x512xbf16>
    %cst_44 = arith.constant dense<0.000000e+00> : vector<2x512xf32>
    %56 = tpu.matmul %54, %55, %cst_44 {dimension_numbers = #tpu.dot_dimension_numbers<[1], [0], [0], [1], [0, 0, 1, 1], [], []>} : vector<2x512xbf16>, vector<512x512xbf16>, vector<2x512xf32> -> vector<2x512xf32>
    %c0_45 = arith.constant 0 : index
    %c0_46 = arith.constant 0 : index
    %57 = vector.load %arg18[%c0_45, %c0_46] : memref<1x512xf32, #tpu.memory_space<vmem>>, vector<1x512xf32>
    %58 = vector.broadcast %57 : vector<1x512xf32> to vector<2x512xf32>
    %59 = arith.addf %56, %58 : vector<2x512xf32>
    %60 = arith.addf %59, %53 : vector<2x512xf32>
    %cst_47 = arith.constant 0.000000e+00 : f32
    %61 = vector.broadcast %cst_47 : f32 to vector<2x512xf32>
    %62 = arith.maximumf %60, %61 : vector<2x512xf32>
    %63 = arith.truncf %62 : vector<2x512xf32> to vector<2x512xbf16>
    %c0_48 = arith.constant 0 : index
    %c0_49 = arith.constant 0 : index
    %64 = vector.load %arg19[%c0_48, %c0_49] : memref<512x512xbf16, #tpu.memory_space<vmem>>, vector<512x512xbf16>
    %cst_50 = arith.constant dense<0.000000e+00> : vector<2x512xf32>
    %65 = tpu.matmul %63, %64, %cst_50 {dimension_numbers = #tpu.dot_dimension_numbers<[1], [0], [0], [1], [0, 0, 1, 1], [], []>} : vector<2x512xbf16>, vector<512x512xbf16>, vector<2x512xf32> -> vector<2x512xf32>
    %c0_51 = arith.constant 0 : index
    %c0_52 = arith.constant 0 : index
    %66 = vector.load %arg20[%c0_51, %c0_52] : memref<1x512xf32, #tpu.memory_space<vmem>>, vector<1x512xf32>
    %67 = vector.broadcast %66 : vector<1x512xf32> to vector<2x512xf32>
    %68 = arith.addf %65, %67 : vector<2x512xf32>
    %cst_53 = arith.constant 0.000000e+00 : f32
    %69 = vector.broadcast %cst_53 : f32 to vector<2x512xf32>
    %70 = arith.maximumf %68, %69 : vector<2x512xf32>
    %71 = arith.truncf %70 : vector<2x512xf32> to vector<2x512xbf16>
    %c0_54 = arith.constant 0 : index
    %c0_55 = arith.constant 0 : index
    %72 = vector.load %arg21[%c0_54, %c0_55] : memref<512x512xbf16, #tpu.memory_space<vmem>>, vector<512x512xbf16>
    %cst_56 = arith.constant dense<0.000000e+00> : vector<2x512xf32>
    %73 = tpu.matmul %71, %72, %cst_56 {dimension_numbers = #tpu.dot_dimension_numbers<[1], [0], [0], [1], [0, 0, 1, 1], [], []>} : vector<2x512xbf16>, vector<512x512xbf16>, vector<2x512xf32> -> vector<2x512xf32>
    %c0_57 = arith.constant 0 : index
    %c0_58 = arith.constant 0 : index
    %74 = vector.load %arg22[%c0_57, %c0_58] : memref<1x512xf32, #tpu.memory_space<vmem>>, vector<1x512xf32>
    %75 = vector.broadcast %74 : vector<1x512xf32> to vector<2x512xf32>
    %76 = arith.addf %73, %75 : vector<2x512xf32>
    %77 = arith.addf %76, %62 : vector<2x512xf32>
    %cst_59 = arith.constant 0.000000e+00 : f32
    %78 = vector.broadcast %cst_59 : f32 to vector<2x512xf32>
    %79 = arith.maximumf %77, %78 : vector<2x512xf32>
    %80 = arith.truncf %79 : vector<2x512xf32> to vector<2x512xbf16>
    %c0_60 = arith.constant 0 : index
    %c0_61 = arith.constant 0 : index
    %81 = vector.load %arg23[%c0_60, %c0_61] : memref<512x4xbf16, #tpu.memory_space<vmem>>, vector<512x4xbf16>
    %cst_62 = arith.constant dense<0.000000e+00> : vector<2x4xf32>
    %82 = tpu.matmul %80, %81, %cst_62 {dimension_numbers = #tpu.dot_dimension_numbers<[1], [0], [0], [1], [0, 0, 1, 1], [], []>} : vector<2x512xbf16>, vector<512x4xbf16>, vector<2x4xf32> -> vector<2x4xf32>
    %c0_63 = arith.constant 0 : index
    %c0_64 = arith.constant 0 : index
    %83 = vector.load %arg25[%c0_63, %c0_64] : memref<1x4xf32, #tpu.memory_space<vmem>>, vector<1x4xf32>
    %84 = vector.broadcast %83 : vector<1x4xf32> to vector<2x4xf32>
    %85 = arith.addf %82, %84 : vector<2x4xf32>
    %c0_65 = arith.constant 0 : index
    %c0_66 = arith.constant 0 : index
    %86 = vector.load %arg24[%c0_65, %c0_66] : memref<512x4xbf16, #tpu.memory_space<vmem>>, vector<512x4xbf16>
    %cst_67 = arith.constant dense<0.000000e+00> : vector<2x4xf32>
    %87 = tpu.matmul %80, %86, %cst_67 {dimension_numbers = #tpu.dot_dimension_numbers<[1], [0], [0], [1], [0, 0, 1, 1], [], []>} : vector<2x512xbf16>, vector<512x4xbf16>, vector<2x4xf32> -> vector<2x4xf32>
    %c0_68 = arith.constant 0 : index
    %c0_69 = arith.constant 0 : index
    %88 = vector.load %arg26[%c0_68, %c0_69] : memref<1x4xf32, #tpu.memory_space<vmem>>, vector<1x4xf32>
    %89 = vector.broadcast %88 : vector<1x4xf32> to vector<2x4xf32>
    %90 = arith.addf %87, %89 : vector<2x4xf32>
    %91 = arith.maximumf %85, %90 : vector<2x4xf32>
    %92 = arith.subf %85, %91 : vector<2x4xf32>
    %93 = math.exp %92 : vector<2x4xf32>
    %94 = arith.subf %90, %91 : vector<2x4xf32>
    %95 = math.exp %94 : vector<2x4xf32>
    %c0_70 = arith.constant 0 : index
    %c0_71 = arith.constant 0 : index
    %96 = vector.load %arg27[%c0_70, %c0_71] : memref<2x4xf32, #tpu.memory_space<vmem>>, vector<2x4xf32>
    tpu.vector_store %arg27[%c0_70, %c0_71], %85 {strides = array<i32>} : memref<2x4xf32, #tpu.memory_space<vmem>>, vector<2x4xf32>,
    %c0_72 = arith.constant 0 : index
    %c0_73 = arith.constant 0 : index
    %97 = vector.load %arg28[%c0_72, %c0_73] : memref<2x4xf32, #tpu.memory_space<vmem>>, vector<2x4xf32>
    tpu.vector_store %arg28[%c0_72, %c0_73], %90 {strides = array<i32>} : memref<2x4xf32, #tpu.memory_space<vmem>>, vector<2x4xf32>,
    %98 = arith.addf %93, %95 : vector<2x4xf32>
    %99 = arith.divf %95, %98 : vector<2x4xf32>
    %c0_74 = arith.constant 0 : index
    %c0_75 = arith.constant 0 : index
    %100 = vector.load %arg29[%c0_74, %c0_75] : memref<2x4xf32, #tpu.memory_space<vmem>>, vector<2x4xf32>
    tpu.vector_store %arg29[%c0_74, %c0_75], %99 {strides = array<i32>} : memref<2x4xf32, #tpu.memory_space<vmem>>, vector<2x4xf32>,
    return
  }
  func.func @transform_0(%arg0: i32) -> (i32, i32) {
    %c0_i32 = arith.constant 0 : i32
    %c0_i32_0 = arith.constant 0 : i32
    %c0_i32_1 = arith.constant 0 : i32
    return %c0_i32, %c0_i32_0 : i32, i32
  }
  func.func @transform_1(%arg0: i32) -> (i32, i32) {
    %c0_i32 = arith.constant 0 : i32
    %c0_i32_0 = arith.constant 0 : i32
    %c0_i32_1 = arith.constant 0 : i32
    return %c0_i32, %c0_i32_0 : i32, i32
  }
  func.func @transform_2(%arg0: i32) -> (i32, i32) {
    %c0_i32 = arith.constant 0 : i32
    %c0_i32_0 = arith.constant 0 : i32
    %c0_i32_1 = arith.constant 0 : i32
    return %c0_i32, %c0_i32_0 : i32, i32
  }
  func.func @transform_3(%arg0: i32) -> (i32, i32) {
    %c0_i32 = arith.constant 0 : i32
    %c0_i32_0 = arith.constant 0 : i32
    %c0_i32_1 = arith.constant 0 : i32
    return %c0_i32, %c0_i32_0 : i32, i32
  }
  func.func @transform_4(%arg0: i32) -> (i32, i32) {
    %c0_i32 = arith.constant 0 : i32
    %c0_i32_0 = arith.constant 0 : i32
    %c0_i32_1 = arith.constant 0 : i32
    return %c0_i32, %c0_i32_0 : i32, i32
  }
  func.func @transform_5(%arg0: i32) -> (i32, i32) {
    %c0_i32 = arith.constant 0 : i32
    %c0_i32_0 = arith.constant 0 : i32
    %c0_i32_1 = arith.constant 0 : i32
    return %c0_i32, %c0_i32_0 : i32, i32
  }
  func.func @transform_6(%arg0: i32) -> (i32, i32) {
    %c0_i32 = arith.constant 0 : i32
    %c0_i32_0 = arith.constant 0 : i32
    %c0_i32_1 = arith.constant 0 : i32
    return %c0_i32, %c0_i32_0 : i32, i32
  }
  func.func @transform_7(%arg0: i32) -> (i32, i32) {
    %c0_i32 = arith.constant 0 : i32
    %c0_i32_0 = arith.constant 0 : i32
    %c0_i32_1 = arith.constant 0 : i32
    return %c0_i32, %c0_i32_0 : i32, i32
  }
  func.func @transform_8(%arg0: i32) -> (i32, i32) {
    %c0_i32 = arith.constant 0 : i32
    %c0_i32_0 = arith.constant 0 : i32
    %c0_i32_1 = arith.constant 0 : i32
    return %c0_i32, %c0_i32_0 : i32, i32
  }
  func.func @transform_9(%arg0: i32) -> (i32, i32) {
    %c0_i32 = arith.constant 0 : i32
    %c0_i32_0 = arith.constant 0 : i32
    %c0_i32_1 = arith.constant 0 : i32
    return %c0_i32, %c0_i32_0 : i32, i32
  }
  func.func @transform_10(%arg0: i32) -> (i32, i32) {
    %c0_i32 = arith.constant 0 : i32
    %c0_i32_0 = arith.constant 0 : i32
    %c0_i32_1 = arith.constant 0 : i32
    return %c0_i32, %c0_i32_0 : i32, i32
  }
  func.func @transform_11(%arg0: i32) -> (i32, i32) {
    %c0_i32 = arith.constant 0 : i32
    %c0_i32_0 = arith.constant 0 : i32
    %c0_i32_1 = arith.constant 0 : i32
    return %c0_i32, %c0_i32_0 : i32, i32
  }
  func.func @transform_12(%arg0: i32) -> (i32, i32) {
    %c0_i32 = arith.constant 0 : i32
    %c0_i32_0 = arith.constant 0 : i32
    %c0_i32_1 = arith.constant 0 : i32
    return %c0_i32, %c0_i32_0 : i32, i32
  }
  func.func @transform_13(%arg0: i32) -> (i32, i32) {
    %c0_i32 = arith.constant 0 : i32
    %c0_i32_0 = arith.constant 0 : i32
    %c0_i32_1 = arith.constant 0 : i32
    return %c0_i32, %c0_i32_0 : i32, i32
  }
  func.func @transform_14(%arg0: i32) -> (i32, i32) {
    %c0_i32 = arith.constant 0 : i32
    %c0_i32_0 = arith.constant 0 : i32
    %c0_i32_1 = arith.constant 0 : i32
    return %c0_i32, %c0_i32_0 : i32, i32
  }
  func.func @transform_15(%arg0: i32) -> (i32, i32) {
    %c0_i32 = arith.constant 0 : i32
    %c0_i32_0 = arith.constant 0 : i32
    %c0_i32_1 = arith.constant 0 : i32
    return %c0_i32, %c0_i32_0 : i32, i32
  }
  func.func @transform_16(%arg0: i32) -> (i32, i32) {
    %c0_i32 = arith.constant 0 : i32
    %c0_i32_0 = arith.constant 0 : i32
    %c0_i32_1 = arith.constant 0 : i32
    return %c0_i32, %c0_i32_0 : i32, i32
  }
  func.func @transform_17(%arg0: i32) -> (i32, i32) {
    %c0_i32 = arith.constant 0 : i32
    %c0_i32_0 = arith.constant 0 : i32
    %c0_i32_1 = arith.constant 0 : i32
    return %c0_i32, %c0_i32_0 : i32, i32
  }
  func.func @transform_18(%arg0: i32) -> (i32, i32) {
    %c0_i32 = arith.constant 0 : i32
    %c0_i32_0 = arith.constant 0 : i32
    %c0_i32_1 = arith.constant 0 : i32
    return %c0_i32, %c0_i32_0 : i32, i32
  }
  func.func @transform_19(%arg0: i32) -> (i32, i32) {
    %c0_i32 = arith.constant 0 : i32
    %c0_i32_0 = arith.constant 0 : i32
    %c0_i32_1 = arith.constant 0 : i32
    return %c0_i32, %c0_i32_0 : i32, i32
  }
  func.func @transform_20(%arg0: i32) -> (i32, i32) {
    %c0_i32 = arith.constant 0 : i32
    %c0_i32_0 = arith.constant 0 : i32
    %c0_i32_1 = arith.constant 0 : i32
    return %c0_i32, %c0_i32_0 : i32, i32
  }
  func.func @transform_21(%arg0: i32) -> (i32, i32) {
    %c0_i32 = arith.constant 0 : i32
    %c0_i32_0 = arith.constant 0 : i32
    %c0_i32_1 = arith.constant 0 : i32
    return %c0_i32, %c0_i32_0 : i32, i32
  }
  func.func @transform_22(%arg0: i32) -> (i32, i32) {
    %c0_i32 = arith.constant 0 : i32
    %c0_i32_0 = arith.constant 0 : i32
    %c0_i32_1 = arith.constant 0 : i32
    return %c0_i32, %c0_i32_0 : i32, i32
  }
  func.func @transform_23(%arg0: i32) -> (i32, i32) {
    %c0_i32 = arith.constant 0 : i32
    %c0_i32_0 = arith.constant 0 : i32
    %c0_i32_1 = arith.constant 0 : i32
    return %c0_i32, %c0_i32_0 : i32, i32
  }
  func.func @transform_24(%arg0: i32) -> (i32, i32) {
    %c0_i32 = arith.constant 0 : i32
    %c0_i32_0 = arith.constant 0 : i32
    %c0_i32_1 = arith.constant 0 : i32
    return %c0_i32, %c0_i32_0 : i32, i32
  }
  func.func @transform_25(%arg0: i32) -> (i32, i32) {
    %c0_i32 = arith.constant 0 : i32
    %c0_i32_0 = arith.constant 0 : i32
    %c0_i32_1 = arith.constant 0 : i32
    return %c0_i32, %c0_i32_0 : i32, i32
  }
  func.func @transform_26(%arg0: i32) -> (i32, i32) {
    %c0_i32 = arith.constant 0 : i32
    %c0_i32_0 = arith.constant 0 : i32
    %c0_i32_1 = arith.constant 0 : i32
    return %c0_i32, %c0_i32_0 : i32, i32
  }
  func.func @transform_27(%arg0: i32) -> (i32, i32) {
    %c0_i32 = arith.constant 0 : i32
    %c0_i32_0 = arith.constant 0 : i32
    %c0_i32_1 = arith.constant 0 : i32
    return %c0_i32, %c0_i32_0 : i32, i32
  }
  func.func @transform_28(%arg0: i32) -> (i32, i32) {
    %c0_i32 = arith.constant 0 : i32
    %c0_i32_0 = arith.constant 0 : i32
    %c0_i32_1 = arith.constant 0 : i32
    return %c0_i32, %c0_i32_0 : i32, i32
  }
}

</mosaic_0001>

<bundles_post_ra>
// kernel: _lambda_.10
= control target key start
LH: loop header
LB: loop body
LE: loop exit
PB: predicated region body
PF: predicated region fallthrough
CT: control target
= control target key end

     0   :  { %v539_v0 = vmov 0   ;;  %vm186_vm0 = vcmask 154624   ;;  %vm211_vm1 = vcmask 1040384   ;;  %vm212_vm2 = vcmask 1041408   ;;  %s732_s1 = inlined_call_operand.vmem [shape: bf16[147,64], index: 1, kind: input, shape index: {}]   ;;  %s733_s0 = inlined_call_operand.vmem [shape: bf16[128,147], index: 0, kind: input, shape index: {}]   ;;  %s734_s2 = inlined_call_operand.vmem [shape: f32[1,64], index: 2, kind: input, shape index: {}]   ;;  %s735_s3 = inlined_call_operand.vmem [shape: bf16[128,64], index: 3, kind: output, shape index: {}]  }
   0x1   :  { %218 = vmatprep.subr.bf16.mxu0 %v539_v0  ;;  %483 = vmatprep.subr.bf16.mxu1 %v539_v0  ;;  %v505_v1 = vld [vmem:[%s732_s1] sm:$0xff]   ;;  %v506_v2 = vld [vmem:[%s732_s1 + $0x8] sm:$0xff]   ;;  %v507_v3 = vld [vmem:[%s732_s1 + $0x10] sm:$0xff]   ;;  %v540_v11 = vmov 65535   ;;  %vm395_vm3 = vcmask 519168  }
   0x2   :  { %219 = vmatpush1.bf16.msra.mxu0 %v505_v1  ;;  %493 = vmatpush1.bf16.msra.mxu1 %v505_v1  ;;  %v508_v4 = vld [vmem:[%s732_s1 + $0x18] sm:$0xff]   ;;  %v517_v5 = vld [vmem:[%s733_s0 + $0x4] ss:$8 sps:$4 sm:$0xff]   ;;  %v511_v9 = vld [vmem:[%s732_s1 + $0x30] sm:$0xff]   ;;  %v213_v12 = vsel %vm211_vm1, 4294967295, %v540_v11 }
   0x3   :  { %220 = vmatprep.subr.bf16.mxu0 %v539_v0  ;;  %484 = vmatprep.subr.bf16.mxu1 %v539_v0  ;;  %v520_v6 = vld [vmem:[%s733_s0 + $0x44] ss:$8 sps:$4 sm:$0xff]   ;;  %v512_v10 = vld [vmem:[%s732_s1 + $0x38] sm:$0xff]   ;;  %v514_v14 = vld [vmem:[%s732_s1 + $0x48] ss:$0 sps:$4 sm:$0x33]  }
   0x4   :  { %443 = vmatprep.mubr.msk.bf16.mxu0 %vm186_vm0, %v517_v5  ;;  %v509_v7 = vld [vmem:[%s732_s1 + $0x20] sm:$0xff]   ;;  %447 = vmatprep.mubr.msk.bf16.mxu1 %vm186_vm0, %v520_v6  ;;  %v510_v8 = vld [vmem:[%s732_s1 + $0x28] sm:$0xff]   ;;  %v214_v15 = vsel %vm212_vm2, %v213_v12, 0  ;;  %v521_v19 = vld [vmem:[%s733_s0 + $0x14] ss:$8 sps:$4 sm:$0xff]  }
   0x5   :  { %v513_v13 = vld [vmem:[%s732_s1 + $0x40] sm:$0xff]   ;;  %v216_v16 = vand.u32 %v514_v14, %v214_v15  ;;  %v523_v20 = vld [vmem:[%s733_s0 + $0x54] ss:$8 sps:$4 sm:$0xff]   ;;  %v525_v21 = vld [vmem:[%s733_s0 + $0x10] ss:$8 sps:$4 sm:$0xff]  }
   0x6   :  { %221 = vmatpush1.bf16.msra.mxu0 %v506_v2  ;;  %494 = vmatpush1.bf16.msra.mxu1 %v506_v2  ;;  %v515_v17 = vld [vmem:[%s733_s0] ss:$8 sps:$4 sm:$0xff]   ;;  %v526_v22 = vld [vmem:[%s733_s0 + $0x50] ss:$8 sps:$4 sm:$0xff]   ;;  %v527_v23 = vld [vmem:[%s733_s0 + $0x24] ss:$8 sps:$4 sm:$0xff]  }
   0x7   :  { %222 = vmatprep.subr.bf16.mxu0 %v539_v0  ;;  %485 = vmatprep.subr.bf16.mxu1 %v539_v0  ;;  %v518_v18 = vld [vmem:[%s733_s0 + $0x40] ss:$8 sps:$4 sm:$0xff]   ;;  %v529_v24 = vld [vmem:[%s733_s0 + $0x64] ss:$8 sps:$4 sm:$0xff]   ;;  %v533_v27 = vld [vmem:[%s733_s0 + $0x34] ss:$8 sps:$4 sm:$0xff]  }
   0x8   :  { %v531_v25 = vld [vmem:[%s733_s0 + $0x20] ss:$8 sps:$4 sm:$0xff]   ;;  %v535_v28 = vld [vmem:[%s733_s0 + $0x74] ss:$8 sps:$4 sm:$0xff]   ;;  %v537_v29 = vld [vmem:[%s733_s0 + $0x30] ss:$8 sps:$4 sm:$0xff]  }
   0x9   :  { %v532_v26 = vld [vmem:[%s733_s0 + $0x60] ss:$8 sps:$4 sm:$0xff]   ;;  %v538_v30 = vld [vmem:[%s733_s0 + $0x70] ss:$8 sps:$4 sm:$0xff]  }
   0xa   :  { %223 = vmatpush1.bf16.msra.mxu0 %v507_v3  ;;  %495 = vmatpush1.bf16.msra.mxu1 %v507_v3  ;;  %v650_v31 = vld [vmem:[%s734_s2] ss:$0 sm:$0xff] }
   0xb   :  { %224 = vmatprep.subr.bf16.mxu0 %v539_v0  ;;  %486 = vmatprep.subr.bf16.mxu1 %v539_v0 }
   0xe   :  { %225 = vmatpush1.bf16.msra.mxu0 %v508_v4  ;;  %496 = vmatpush1.bf16.msra.mxu1 %v508_v4 }
   0xf   :  { %226 = vmatprep.subr.bf16.mxu0 %v539_v0  ;;  %487 = vmatprep.subr.bf16.mxu1 %v539_v0 }
  0x12   :  { %227 = vmatpush1.bf16.msra.mxu0 %v509_v7  ;;  %497 = vmatpush1.bf16.msra.mxu1 %v509_v7 }
  0x13   :  { %228 = vmatprep.subr.bf16.mxu0 %v539_v0  ;;  %488 = vmatprep.subr.bf16.mxu1 %v539_v0 }
  0x16   :  { %229 = vmatpush1.bf16.msra.mxu0 %v510_v8  ;;  %498 = vmatpush1.bf16.msra.mxu1 %v510_v8 }
  0x17   :  { %230 = vmatprep.subr.bf16.mxu0 %v539_v0  ;;  %489 = vmatprep.subr.bf16.mxu1 %v539_v0 }
  0x1a   :  { %231 = vmatpush1.bf16.msra.mxu0 %v511_v9  ;;  %499 = vmatpush1.bf16.msra.mxu1 %v511_v9 }
  0x1b   :  { %232 = vmatprep.subr.bf16.mxu0 %v539_v0  ;;  %490 = vmatprep.subr.bf16.mxu1 %v539_v0 }
  0x1e   :  { %233 = vmatpush1.bf16.msra.mxu0 %v512_v10  ;;  %500 = vmatpush1.bf16.msra.mxu1 %v512_v10 }
  0x1f   :  { %234 = vmatprep.subr.bf16.mxu0 %v539_v0  ;;  %491 = vmatprep.subr.bf16.mxu1 %v539_v0 }
  0x22   :  { %235 = vmatpush1.bf16.msra.mxu0 %v513_v13  ;;  %501 = vmatpush1.bf16.msra.mxu1 %v513_v13 }
  0x23   :  { %236 = vmatprep.subr.bf16.mxu0 %v539_v0  ;;  %492 = vmatprep.subr.bf16.mxu1 %v539_v0 }
  0x26   :  { %237 = vmatpush1.bf16.msra.mxu0 %v216_v16  ;;  %502 = vmatpush1.bf16.msra.mxu1 %v216_v16 }
  0x29   :  { %251 = vmatmul.mubr.bf16.vlgmr.msra.gmra.mrb[0].mxu0 %v515_v17  ;;  %283 = vmatmul.mubr.bf16.vlgmr.msra.gmra.mrb[0].mxu1 %v518_v18 }
  0x2a   :  { %444 = vmatprep.mubr.msk.bf16.mxu0 %vm186_vm0, %v521_v19  ;;  %448 = vmatprep.mubr.msk.bf16.mxu1 %vm186_vm0, %v523_v20 }
  0x31   :  { %259 = vmatmul.mubr.bf16.gmra.mrb[4].mxu0 %v525_v21  ;;  %291 = vmatmul.mubr.bf16.gmra.mrb[4].mxu1 %v526_v22 }
  0x32   :  { %445 = vmatprep.mubr.msk.bf16.mxu0 %vm186_vm0, %v527_v23  ;;  %449 = vmatprep.mubr.msk.bf16.mxu1 %vm186_vm0, %v529_v24 }
  0x39   :  { %267 = vmatmul.mubr.bf16.gmra.mrb[8].mxu0 %v531_v25  ;;  %299 = vmatmul.mubr.bf16.gmra.mrb[8].mxu1 %v532_v26 }
  0x3a   :  { %446 = vmatprep.mubr.msk.bf16.mxu0 %vm186_vm0, %v533_v27  ;;  %450 = vmatprep.mubr.msk.bf16.mxu1 %vm186_vm0, %v535_v28 }
  0x41   :  { %275 = vmatmul.mubr.bf16.gmra.mrb[12].mxu0 %v537_v29  ;;  %307 = vmatmul.mubr.bf16.gmra.mrb[12].mxu1 %v538_v30 }
  0xfc   :  { %v252_v32 = vpop.f32.mrb[0].mxu0  ;;  %v284_v33 = vpop.f32.mrb[0].mxu1 }
  0xfd   :  { %v253_v34 = vadd.f32 %v650_v31, %v252_v32  ;;  %v285_v35 = vadd.f32 %v650_v31, %v284_v33  ;;  %v254_v36 = vpop.f32.mrb[1].mxu0  ;;  %v286_v37 = vpop.f32.mrb[1].mxu1 }
  0xfe   :  { %v255_v38 = vpop.f32.mrb[2].mxu0  ;;  %v287_v39 = vpop.f32.mrb[2].mxu1 }
  0xff   :  { %v315_v40 = vmax.f32 %v253_v34, 0.0  ;;  %v323_v41 = vmax.f32 %v285_v35, 0.0  ;;  %v256_v42 = vadd.f32 %v650_v31, %v255_v38  ;;  %v288_v43 = vadd.f32 %v650_v31, %v287_v39  ;;  %v257_v44 = vpop.f32.mrb[3].mxu0  ;;  %v289_v45 = vpop.f32.mrb[3].mxu1 }
 0x101   :  { %v467_v46 = vpack.c.bf16 %v315_v40, %v315_v40  ;;  %v475_v47 = vpack.c.bf16 %v323_v41, %v323_v41  ;;  %v316_v48 = vmax.f32 %v256_v42, 0.0  ;;  %v324_v49 = vmax.f32 %v288_v43, 0.0 }
 0x103   :  { %396 = vst.msk [vmem:[%s735_s3] sm:$0xf] %vm395_vm3, %v467_v46  ;;  %404 = vst.msk [vmem:[%s735_s3 + $0x20] sm:$0xf] %vm395_vm3, %v475_v47  ;;  %v468_v50 = vpack.c.bf16 %v316_v48, %v316_v48  ;;  %v476_v51 = vpack.c.bf16 %v324_v49, %v324_v49 }
 0x104   :  { %v260_v52 = vpop.f32.mrb[4].mxu0  ;;  %v292_v53 = vpop.f32.mrb[4].mxu1 }
 0x105   :  { %397 = vst.msk [vmem:[%s735_s3 + $0x4] sm:$0xf] %vm395_vm3, %v468_v50  ;;  %405 = vst.msk [vmem:[%s735_s3 + $0x24] sm:$0xf] %vm395_vm3, %v476_v51  ;;  %v261_v54 = vadd.f32 %v650_v31, %v260_v52  ;;  %v293_v55 = vadd.f32 %v650_v31, %v292_v53  ;;  %v262_v56 = vpop.f32.mrb[5].mxu0  ;;  %v294_v57 = vpop.f32.mrb[5].mxu1 }
 0x106   :  { %v263_v58 = vpop.f32.mrb[6].mxu0  ;;  %v295_v59 = vpop.f32.mrb[6].mxu1 }
 0x107   :  { %v317_v60 = vmax.f32 %v261_v54, 0.0  ;;  %v325_v61 = vmax.f32 %v293_v55, 0.0  ;;  %v264_v62 = vadd.f32 %v650_v31, %v263_v58  ;;  %v296_v63 = vadd.f32 %v650_v31, %v295_v59  ;;  %v265_v0 = vpop.f32.mrb[7].mxu0  ;;  %v297_v1 = vpop.f32.mrb[7].mxu1 }
 0x109   :  { %v469_v2 = vpack.c.bf16 %v317_v60, %v317_v60  ;;  %v477_v3 = vpack.c.bf16 %v325_v61, %v325_v61  ;;  %v318_v4 = vmax.f32 %v264_v62, 0.0  ;;  %v326_v5 = vmax.f32 %v296_v63, 0.0 }
 0x10b   :  { %398 = vst.msk [vmem:[%s735_s3 + $0x8] sm:$0xf] %vm395_vm3, %v469_v2  ;;  %406 = vst.msk [vmem:[%s735_s3 + $0x28] sm:$0xf] %vm395_vm3, %v477_v3  ;;  %v470_v6 = vpack.c.bf16 %v318_v4, %v318_v4  ;;  %v478_v7 = vpack.c.bf16 %v326_v5, %v326_v5 }
 0x10c   :  { %v268_v8 = vpop.f32.mrb[8].mxu0  ;;  %v300_v9 = vpop.f32.mrb[8].mxu1 }
 0x10d   :  { %399 = vst.msk [vmem:[%s735_s3 + $0xc] sm:$0xf] %vm395_vm3, %v470_v6  ;;  %407 = vst.msk [vmem:[%s735_s3 + $0x2c] sm:$0xf] %vm395_vm3, %v478_v7  ;;  %v269_v10 = vadd.f32 %v650_v31, %v268_v8  ;;  %v301_v11 = vadd.f32 %v650_v31, %v300_v9  ;;  %v270_v12 = vpop.f32.mrb[9].mxu0  ;;  %v302_v13 = vpop.f32.mrb[9].mxu1 }
 0x10e   :  { %v271_v14 = vpop.f32.mrb[10].mxu0  ;;  %v303_v15 = vpop.f32.mrb[10].mxu1 }
 0x10f   :  { %v319_v16 = vmax.f32 %v269_v10, 0.0  ;;  %v327_v17 = vmax.f32 %v301_v11, 0.0  ;;  %v272_v18 = vadd.f32 %v650_v31, %v271_v14  ;;  %v304_v19 = vadd.f32 %v650_v31, %v303_v15  ;;  %v273_v20 = vpop.f32.mrb[11].mxu0  ;;  %v305_v21 = vpop.f32.mrb[11].mxu1 }
 0x111   :  { %v471_v22 = vpack.c.bf16 %v319_v16, %v319_v16  ;;  %v479_v23 = vpack.c.bf16 %v327_v17, %v327_v17  ;;  %v320_v24 = vmax.f32 %v272_v18, 0.0  ;;  %v328_v25 = vmax.f32 %v304_v19, 0.0 }
 0x113   :  { %400 = vst.msk [vmem:[%s735_s3 + $0x10] sm:$0xf] %vm395_vm3, %v471_v22  ;;  %408 = vst.msk [vmem:[%s735_s3 + $0x30] sm:$0xf] %vm395_vm3, %v479_v23  ;;  %v472_v26 = vpack.c.bf16 %v320_v24, %v320_v24  ;;  %v480_v27 = vpack.c.bf16 %v328_v25, %v328_v25 }
 0x114   :  { %v276_v28 = vpop.f32.mrb[12].mxu0  ;;  %v308_v29 = vpop.f32.mrb[12].mxu1 }
 0x115   :  { %401 = vst.msk [vmem:[%s735_s3 + $0x14] sm:$0xf] %vm395_vm3, %v472_v26  ;;  %409 = vst.msk [vmem:[%s735_s3 + $0x34] sm:$0xf] %vm395_vm3, %v480_v27  ;;  %v277_v30 = vadd.f32 %v650_v31, %v276_v28  ;;  %v309_v32 = vadd.f32 %v650_v31, %v308_v29  ;;  %v278_v33 = vpop.f32.mrb[13].mxu0  ;;  %v310_v34 = vpop.f32.mrb[13].mxu1 }
 0x116   :  { %v279_v35 = vpop.f32.mrb[14].mxu0  ;;  %v311_v36 = vpop.f32.mrb[14].mxu1 }
 0x117   :  { %v321_v37 = vmax.f32 %v277_v30, 0.0  ;;  %v329_v38 = vmax.f32 %v309_v32, 0.0  ;;  %v280_v39 = vadd.f32 %v650_v31, %v279_v35  ;;  %v312_v40 = vadd.f32 %v650_v31, %v311_v36  ;;  %v281_v41 = vpop.f32.mrb[15].mxu0  ;;  %v313_v42 = vpop.f32.mrb[15].mxu1 }
 0x119   :  { %v473_v43 = vpack.c.bf16 %v321_v37, %v321_v37  ;;  %v481_v44 = vpack.c.bf16 %v329_v38, %v329_v38  ;;  %v322_v45 = vmax.f32 %v280_v39, 0.0  ;;  %v330_v46 = vmax.f32 %v312_v40, 0.0 }
 0x11b   :  { %402 = vst.msk [vmem:[%s735_s3 + $0x18] sm:$0xf] %vm395_vm3, %v473_v43  ;;  %410 = vst.msk [vmem:[%s735_s3 + $0x38] sm:$0xf] %vm395_vm3, %v481_v44  ;;  %v474_v47 = vpack.c.bf16 %v322_v45, %v322_v45  ;;  %v482_v48 = vpack.c.bf16 %v330_v46, %v330_v46 }
 0x11d   :  { %403 = vst.msk [vmem:[%s735_s3 + $0x1c] sm:$0xf] %vm395_vm3, %v474_v47  ;;  %411 = vst.msk [vmem:[%s735_s3 + $0x3c] sm:$0xf] %vm395_vm3, %v482_v48 }

// kernel: _lambda_.11
= control target key start
LH: loop header
LB: loop body
LE: loop exit
PB: predicated region body
PF: predicated region fallthrough
CT: control target
= control target key end

     0   :  { %vm372_vm0 = vcmask 523264   ;;  %vm546_vm1 = vcmask 519168   ;;  %s909_s1 = inlined_call_operand.vmem [shape: bf16[576,64], index: 1, kind: input, shape index: {}]   ;;  %s910_s0 = inlined_call_operand.vmem [shape: bf16[32,576], index: 0, kind: input, shape index: {}]   ;;  %s911_s2 = inlined_call_operand.vmem [shape: f32[1,64], index: 2, kind: input, shape index: {}]   ;;  %s912_s3 = inlined_call_operand.vmem [shape: bf16[32,64], index: 3, kind: output, shape index: {}]  }
   0x1   :  { %v686_v0 = vld [vmem:[%s909_s1 + $0x40] sm:$0xff]   ;;  %v690_v4 = vld [vmem:[%s909_s1 + $0x48] sm:$0xff]   ;;  %v694_v8 = vld [vmem:[%s909_s1 + $0x50] sm:$0xff]  }
   0x2   :  { %v687_v1 = vld [vmem:[%s909_s1] sm:$0xff]   ;;  %612 = vmatprep.subr.bf16.mxu0 %v686_v0  ;;  %v691_v5 = vld [vmem:[%s909_s1 + $0x8] sm:$0xff]   ;;  %v695_v9 = vld [vmem:[%s909_s1 + $0x10] sm:$0xff]  }
   0x3   :  { %v688_v2 = vld [vmem:[%s909_s1 + $0xc0] sm:$0xff]   ;;  %613 = vmatpush3.bf16.msra.mxu0 %v687_v1  ;;  %v692_v6 = vld [vmem:[%s909_s1 + $0xc8] sm:$0xff]   ;;  %v696_v10 = vld [vmem:[%s909_s1 + $0xd0] sm:$0xff]  }
   0x4   :  { %v689_v3 = vld [vmem:[%s909_s1 + $0x80] sm:$0xff]   ;;  %640 = vmatprep.subr.bf16.mxu1 %v688_v2  ;;  %614 = vmatprep.subr.bf16.mxu0 %v690_v4  ;;  %v693_v7 = vld [vmem:[%s909_s1 + $0x88] sm:$0xff]   ;;  %v697_v11 = vld [vmem:[%s909_s1 + $0x90] sm:$0xff]  }
   0x5   :  { %641 = vmatpush3.bf16.msra.mxu1 %v689_v3  ;;  %v698_v12 = vld [vmem:[%s909_s1 + $0x58] sm:$0xff]   ;;  %v702_v16 = vld [vmem:[%s909_s1 + $0x60] sm:$0xff]   ;;  %v706_v20 = vld [vmem:[%s909_s1 + $0x68] sm:$0xff]  }
   0x6   :  { %642 = vmatprep.subr.bf16.mxu1 %v692_v6  ;;  %v699_v13 = vld [vmem:[%s909_s1 + $0x18] sm:$0xff]   ;;  %v703_v17 = vld [vmem:[%s909_s1 + $0x20] sm:$0xff]   ;;  %v707_v21 = vld [vmem:[%s909_s1 + $0x28] sm:$0xff]  }
   0x7   :  { %615 = vmatpush3.bf16.msra.mxu0 %v691_v5  ;;  %v700_v14 = vld [vmem:[%s909_s1 + $0xd8] sm:$0xff]   ;;  %v704_v18 = vld [vmem:[%s909_s1 + $0xe0] sm:$0xff]   ;;  %v708_v22 = vld [vmem:[%s909_s1 + $0xe8] sm:$0xff]  }
   0x8   :  { %616 = vmatprep.subr.bf16.mxu0 %v694_v8  ;;  %v701_v15 = vld [vmem:[%s909_s1 + $0x98] sm:$0xff]   ;;  %v705_v19 = vld [vmem:[%s909_s1 + $0xa0] sm:$0xff]   ;;  %v709_v23 = vld [vmem:[%s909_s1 + $0xa8] sm:$0xff]  }
   0x9   :  { %643 = vmatpush3.bf16.msra.mxu1 %v693_v7  ;;  %v710_v24 = vld [vmem:[%s909_s1 + $0x70] sm:$0xff]   ;;  %v714_v28 = vld [vmem:[%s909_s1 + $0x78] sm:$0xff]   ;;  %v721_v34 = vld [vmem:[%s909_s1 + $0x100] sm:$0xff]  }
   0xa   :  { %644 = vmatprep.subr.bf16.mxu1 %v696_v10  ;;  %v711_v25 = vld [vmem:[%s909_s1 + $0x30] sm:$0xff]   ;;  %v715_v29 = vld [vmem:[%s909_s1 + $0x38] sm:$0xff]   ;;  %v724_v36 = vld [vmem:[%s910_s0 + $0xc] ss:$20 sps:$4 sm:$0xff]  }
   0xb   :  { %617 = vmatpush3.bf16.msra.mxu0 %v695_v9  ;;  %v712_v26 = vld [vmem:[%s909_s1 + $0xf0] sm:$0xff]   ;;  %v716_v30 = vld [vmem:[%s909_s1 + $0xf8] sm:$0xff]   ;;  %v725_v37 = vld [vmem:[%s909_s1 + $0x108] sm:$0xff]   ;;  %460 = vmatprep.mubr.bf16.mxu1 %v724_v36 }
   0xc   :  { %618 = vmatprep.subr.bf16.mxu0 %v698_v12  ;;  %v713_v27 = vld [vmem:[%s909_s1 + $0xb0] sm:$0xff]   ;;  %v719_v32 = vld [vmem:[%s910_s0 + $0x4] ss:$20 sps:$4 sm:$0xff]   ;;  %v722_v35 = vld [vmem:[%s910_s0 + $0x8] ss:$20 sps:$4 sm:$0xff]  }
   0xd   :  { %645 = vmatpush3.bf16.msra.mxu1 %v697_v11  ;;  %v717_v31 = vld [vmem:[%s910_s0] ss:$20 sps:$4 sm:$0xff]   ;;  %v720_v33 = vld [vmem:[%s909_s1 + $0xb8] sm:$0xff]   ;;  %411 = vmatprep.mubr.bf16.mxu0 %v719_v32  ;;  %v732_v42 = vld [vmem:[%s910_s0 + $0x30] ss:$20 sps:$4 sm:$0xff]  }
   0xe   :  { %646 = vmatprep.subr.bf16.mxu1 %v700_v14  ;;  %v726_v38 = vld [vmem:[%s910_s0 + $0x2c] ss:$20 sps:$4 sm:$0xff]   ;;  %v728_v39 = vld [vmem:[%s910_s0 + $0x28] ss:$20 sps:$4 sm:$0xff]   ;;  %v729_v40 = vld [vmem:[%s909_s1 + $0x110] sm:$0xff]  }
   0xf   :  { %619 = vmatpush3.bf16.msra.mxu0 %v699_v13  ;;  %v730_v41 = vld [vmem:[%s910_s0 + $0x34] ss:$20 sps:$4 sm:$0xff]   ;;  %v733_v43 = vld [vmem:[%s909_s1 + $0x118] sm:$0xff]   ;;  %v734_v44 = vld [vmem:[%s910_s0 + $0x10] ss:$20 sps:$4 sm:$0xff]  }
  0x10   :  { %620 = vmatprep.subr.bf16.mxu0 %v702_v16  ;;  %v735_v45 = vld [vmem:[%s910_s0 + $0x38] ss:$20 sps:$4 sm:$0xff]   ;;  %v555_v47 = vld [vmem:[%s911_s2] ss:$0 sm:$0xff] }
  0x11   :  { %647 = vmatpush3.bf16.msra.mxu1 %v701_v15 }
  0x12   :  { %648 = vmatprep.subr.bf16.mxu1 %v704_v18 }
  0x13   :  { %621 = vmatpush3.bf16.msra.mxu0 %v703_v17 }
  0x14   :  { %622 = vmatprep.subr.bf16.mxu0 %v706_v20 }
  0x15   :  { %649 = vmatpush3.bf16.msra.mxu1 %v705_v19 }
  0x16   :  { %650 = vmatprep.subr.bf16.mxu1 %v708_v22 }
  0x17   :  { %623 = vmatpush3.bf16.msra.mxu0 %v707_v21 }
  0x18   :  { %624 = vmatprep.subr.bf16.mxu0 %v710_v24 }
  0x19   :  { %651 = vmatpush3.bf16.msra.mxu1 %v709_v23 }
  0x1a   :  { %652 = vmatprep.subr.bf16.mxu1 %v712_v26 }
  0x1b   :  { %625 = vmatpush3.bf16.msra.mxu0 %v711_v25 }
  0x1c   :  { %626 = vmatprep.subr.bf16.mxu0 %v714_v28 }
  0x1d   :  { %653 = vmatpush3.bf16.msra.mxu1 %v713_v27 }
  0x1e   :  { %654 = vmatprep.subr.bf16.mxu1 %v716_v30 }
  0x1f   :  { %627 = vmatpush3.bf16.msra.mxu0 %v715_v29 }
  0x20   :  { %674 = vmatprep.subr.bf16.mxu0 %v721_v34 }
  0x21   :  { %655 = vmatpush3.bf16.msra.mxu1 %v720_v33 }
  0x22   :  { %412 = vmatmul.mubr.bf16.vlgmr.msra.gmra.mrb[0].mxu0 %v717_v31 }
  0x23   :  { %675 = vmatpush3.bf16.msra.mxu0 %v721_v34  ;;  %419 = vmatprep.mubr.bf16.mxu0 %v726_v38 }
  0x24   :  { %461 = vmatmul.mubr.bf16.vlgmr.msra.gmra.mrb[0].mxu1 %v722_v35  ;;  %676 = vmatprep.subr.bf16.mxu0 %v725_v37 }
  0x25   :  { %468 = vmatprep.mubr.bf16.mxu1 %v730_v41 }
  0x27   :  { %677 = vmatpush3.bf16.msra.mxu0 %v725_v37 }
  0x28   :  { %678 = vmatprep.subr.bf16.mxu0 %v729_v40 }
  0x2a   :  { %420 = vmatmul.mubr.bf16.gmra.mrb[4].mxu0 %v728_v39 }
  0x2b   :  { %682 = vmatprep.mubr.msk.bf16.mxu0 %vm372_vm0, %v734_v44  ;;  %679 = vmatpush3.bf16.msra.mxu0 %v729_v40 }
  0x2c   :  { %469 = vmatmul.mubr.bf16.gmra.mrb[4].mxu1 %v732_v42  ;;  %680 = vmatprep.subr.bf16.mxu0 %v733_v43 }
  0x2f   :  { %681 = vmatpush3.bf16.msra.mxu0 %v733_v43 }
  0x32   :  { %683 = vmatmul.mubr.msk.bf16.vlgmr.msra.gmra.mrb[8].mxu0 %vm372_vm0, %v735_v45 }
  0xf5   :  { %v628_v46 = vpop.f32.mrb[0].mxu0 }
  0xf6   :  { %v629_v48 = vpop.f32.mrb[1].mxu0 }
  0xf7   :  { %v630_v49 = vadd.f32 %v629_v48, %v628_v46  ;;  %v631_v50 = vpop.f32.mrb[2].mxu0  ;;  %v656_v51 = vpop.f32.mrb[0].mxu1 }
  0xf8   :  { %v632_v52 = vpop.f32.mrb[3].mxu0  ;;  %v657_v55 = vpop.f32.mrb[1].mxu1 }
  0xf9   :  { %v414_v53 = vadd.f32 %v630_v49, %v555_v47  ;;  %v633_v54 = vadd.f32 %v632_v52, %v631_v50  ;;  %v658_v56 = vadd.f32 %v657_v55, %v656_v51  ;;  %v659_v57 = vpop.f32.mrb[2].mxu1 }
  0xfa   :  { %v660_v59 = vpop.f32.mrb[3].mxu1 }
  0xfb   :  { %v417_v58 = vadd.f32 %v633_v54, %v555_v47  ;;  %v661_v60 = vadd.f32 %v660_v59, %v659_v57  ;;  %v463_v61 = vadd.f32 %v658_v56, %v414_v53 }
  0xfd   :  { %v634_v62 = vpop.f32.mrb[4].mxu0  ;;  %v466_v0 = vadd.f32 %v661_v60, %v417_v58 }
  0xfe   :  { %v635_v63 = vpop.f32.mrb[5].mxu0 }
  0xff   :  { %v636_v1 = vadd.f32 %v635_v63, %v634_v62  ;;  %v637_v2 = vpop.f32.mrb[6].mxu0  ;;  %v662_v3 = vpop.f32.mrb[4].mxu1 }
 0x100   :  { %v638_v4 = vpop.f32.mrb[7].mxu0  ;;  %v663_v7 = vpop.f32.mrb[5].mxu1 }
 0x101   :  { %v422_v5 = vadd.f32 %v636_v1, %v555_v47  ;;  %v639_v6 = vadd.f32 %v638_v4, %v637_v2  ;;  %v664_v8 = vadd.f32 %v663_v7, %v662_v3  ;;  %v665_v9 = vpop.f32.mrb[6].mxu1 }
 0x102   :  { %v666_v11 = vpop.f32.mrb[7].mxu1 }
 0x103   :  { %v425_v10 = vadd.f32 %v639_v6, %v555_v47  ;;  %v667_v12 = vadd.f32 %v666_v11, %v665_v9  ;;  %v471_v13 = vadd.f32 %v664_v8, %v422_v5 }
 0x105   :  { %v684_v14 = vpop.f32.mrb[8].mxu0  ;;  %v474_v15 = vadd.f32 %v667_v12, %v425_v10 }
 0x106   :  { %v520_v16 = vadd.f32 %v684_v14, %v471_v13  ;;  %v511_v17 = vpop.f32.mrb[9].mxu0 }
 0x107   :  { %v512_v18 = vadd.f32 %v511_v17, %v463_v61  ;;  %v685_v19 = vpop.f32.mrb[10].mxu0 }
 0x108   :  { %v528_v20 = vmax.f32 %v520_v16, 0.0  ;;  %v523_v21 = vadd.f32 %v685_v19, %v474_v15  ;;  %v514_v22 = vpop.f32.mrb[11].mxu0 }
 0x109   :  { %v526_v23 = vmax.f32 %v512_v18, 0.0  ;;  %v515_v24 = vadd.f32 %v514_v22, %v466_v0 }
 0x10a   :  { %v610_v25 = vpack.c.bf16 %v528_v20, %v528_v20  ;;  %v529_v26 = vmax.f32 %v523_v21, 0.0 }
 0x10b   :  { %v608_v27 = vpack.c.bf16 %v526_v23, %v526_v23  ;;  %v527_v28 = vmax.f32 %v515_v24, 0.0 }
 0x10c   :  { %549 = vst.msk [vmem:[%s912_s3 + $0x8] sm:$0xf] %vm546_vm1, %v610_v25  ;;  %v611_v29 = vpack.c.bf16 %v529_v26, %v529_v26 }
 0x10d   :  { %547 = vst.msk [vmem:[%s912_s3] sm:$0xf] %vm546_vm1, %v608_v27  ;;  %v609_v30 = vpack.c.bf16 %v527_v28, %v527_v28 }
 0x10e   :  { %550 = vst.msk [vmem:[%s912_s3 + $0xc] sm:$0xf] %vm546_vm1, %v611_v29 }
 0x10f   :  { %548 = vst.msk [vmem:[%s912_s3 + $0x4] sm:$0xf] %vm546_vm1, %v609_v30 }

// kernel: _lambda_.12
= control target key start
LH: loop header
LB: loop body
LE: loop exit
PB: predicated region body
PF: predicated region fallthrough
CT: control target
= control target key end

     0   :  { %vm375_vm0 = vcmask 523264   ;;  %vm561_vm1 = vcmask 519168   ;;  %s944_s1 = inlined_call_operand.vmem [shape: bf16[576,64], index: 1, kind: input, shape index: {}]   ;;  %s945_s0 = inlined_call_operand.vmem [shape: bf16[32,576], index: 0, kind: input, shape index: {}]   ;;  %s946_s2 = inlined_call_operand.vmem [shape: f32[1,64], index: 2, kind: input, shape index: {}]   ;;  %s947_s3 = inlined_call_operand.vmem [shape: bf16[32,64], index: 3, kind: input, shape index: {}]   ;;  %s948_s4 = inlined_call_operand.vmem [shape: bf16[32,64], index: 4, kind: output, shape index: {}]  }
   0x1   :  { %v710_v0 = vld [vmem:[%s944_s1 + $0x40] sm:$0xff]   ;;  %v714_v4 = vld [vmem:[%s944_s1 + $0x48] sm:$0xff]   ;;  %v718_v8 = vld [vmem:[%s944_s1 + $0x50] sm:$0xff]  }
   0x2   :  { %v711_v1 = vld [vmem:[%s944_s1] sm:$0xff]   ;;  %636 = vmatprep.subr.bf16.mxu0 %v710_v0  ;;  %v715_v5 = vld [vmem:[%s944_s1 + $0x8] sm:$0xff]   ;;  %v719_v9 = vld [vmem:[%s944_s1 + $0x10] sm:$0xff]  }
   0x3   :  { %v712_v2 = vld [vmem:[%s944_s1 + $0xc0] sm:$0xff]   ;;  %637 = vmatpush3.bf16.msra.mxu0 %v711_v1  ;;  %v716_v6 = vld [vmem:[%s944_s1 + $0xc8] sm:$0xff]   ;;  %v720_v10 = vld [vmem:[%s944_s1 + $0xd0] sm:$0xff]  }
   0x4   :  { %v713_v3 = vld [vmem:[%s944_s1 + $0x80] sm:$0xff]   ;;  %664 = vmatprep.subr.bf16.mxu1 %v712_v2  ;;  %638 = vmatprep.subr.bf16.mxu0 %v714_v4  ;;  %v717_v7 = vld [vmem:[%s944_s1 + $0x88] sm:$0xff]   ;;  %v721_v11 = vld [vmem:[%s944_s1 + $0x90] sm:$0xff]  }
   0x5   :  { %665 = vmatpush3.bf16.msra.mxu1 %v713_v3  ;;  %v722_v12 = vld [vmem:[%s944_s1 + $0x58] sm:$0xff]   ;;  %v726_v16 = vld [vmem:[%s944_s1 + $0x60] sm:$0xff]   ;;  %v730_v20 = vld [vmem:[%s944_s1 + $0x68] sm:$0xff]  }
   0x6   :  { %666 = vmatprep.subr.bf16.mxu1 %v716_v6  ;;  %v723_v13 = vld [vmem:[%s944_s1 + $0x18] sm:$0xff]   ;;  %v727_v17 = vld [vmem:[%s944_s1 + $0x20] sm:$0xff]   ;;  %v731_v21 = vld [vmem:[%s944_s1 + $0x28] sm:$0xff]  }
   0x7   :  { %639 = vmatpush3.bf16.msra.mxu0 %v715_v5  ;;  %v724_v14 = vld [vmem:[%s944_s1 + $0xd8] sm:$0xff]   ;;  %v728_v18 = vld [vmem:[%s944_s1 + $0xe0] sm:$0xff]   ;;  %v732_v22 = vld [vmem:[%s944_s1 + $0xe8] sm:$0xff]  }
   0x8   :  { %640 = vmatprep.subr.bf16.mxu0 %v718_v8  ;;  %v725_v15 = vld [vmem:[%s944_s1 + $0x98] sm:$0xff]   ;;  %v729_v19 = vld [vmem:[%s944_s1 + $0xa0] sm:$0xff]   ;;  %v733_v23 = vld [vmem:[%s944_s1 + $0xa8] sm:$0xff]  }
   0x9   :  { %667 = vmatpush3.bf16.msra.mxu1 %v717_v7  ;;  %v734_v24 = vld [vmem:[%s944_s1 + $0x70] sm:$0xff]   ;;  %v738_v28 = vld [vmem:[%s944_s1 + $0x78] sm:$0xff]   ;;  %v745_v34 = vld [vmem:[%s944_s1 + $0x100] sm:$0xff]  }
   0xa   :  { %668 = vmatprep.subr.bf16.mxu1 %v720_v10  ;;  %v735_v25 = vld [vmem:[%s944_s1 + $0x30] sm:$0xff]   ;;  %v739_v29 = vld [vmem:[%s944_s1 + $0x38] sm:$0xff]   ;;  %v748_v36 = vld [vmem:[%s945_s0 + $0xc] ss:$20 sps:$4 sm:$0xff]  }
   0xb   :  { %641 = vmatpush3.bf16.msra.mxu0 %v719_v9  ;;  %v736_v26 = vld [vmem:[%s944_s1 + $0xf0] sm:$0xff]   ;;  %v740_v30 = vld [vmem:[%s944_s1 + $0xf8] sm:$0xff]   ;;  %v749_v37 = vld [vmem:[%s944_s1 + $0x108] sm:$0xff]   ;;  %463 = vmatprep.mubr.bf16.mxu1 %v748_v36 }
   0xc   :  { %642 = vmatprep.subr.bf16.mxu0 %v722_v12  ;;  %v737_v27 = vld [vmem:[%s944_s1 + $0xb0] sm:$0xff]   ;;  %v743_v32 = vld [vmem:[%s945_s0 + $0x4] ss:$20 sps:$4 sm:$0xff]   ;;  %v746_v35 = vld [vmem:[%s945_s0 + $0x8] ss:$20 sps:$4 sm:$0xff]  }
   0xd   :  { %669 = vmatpush3.bf16.msra.mxu1 %v721_v11  ;;  %v741_v31 = vld [vmem:[%s945_s0] ss:$20 sps:$4 sm:$0xff]   ;;  %v744_v33 = vld [vmem:[%s944_s1 + $0xb8] sm:$0xff]   ;;  %414 = vmatprep.mubr.bf16.mxu0 %v743_v32  ;;  %v756_v42 = vld [vmem:[%s945_s0 + $0x30] ss:$20 sps:$4 sm:$0xff]  }
   0xe   :  { %670 = vmatprep.subr.bf16.mxu1 %v724_v14  ;;  %v750_v38 = vld [vmem:[%s945_s0 + $0x2c] ss:$20 sps:$4 sm:$0xff]   ;;  %v752_v39 = vld [vmem:[%s945_s0 + $0x28] ss:$20 sps:$4 sm:$0xff]   ;;  %v753_v40 = vld [vmem:[%s944_s1 + $0x110] sm:$0xff]  }
   0xf   :  { %643 = vmatpush3.bf16.msra.mxu0 %v723_v13  ;;  %v754_v41 = vld [vmem:[%s945_s0 + $0x34] ss:$20 sps:$4 sm:$0xff]   ;;  %v757_v43 = vld [vmem:[%s944_s1 + $0x118] sm:$0xff]   ;;  %v758_v44 = vld [vmem:[%s945_s0 + $0x10] ss:$20 sps:$4 sm:$0xff]  }
  0x10   :  { %644 = vmatprep.subr.bf16.mxu0 %v726_v16  ;;  %v759_v45 = vld [vmem:[%s945_s0 + $0x38] ss:$20 sps:$4 sm:$0xff]   ;;  %v570_v47 = vld [vmem:[%s946_s2] ss:$0 sm:$0xff] }
  0x11   :  { %671 = vmatpush3.bf16.msra.mxu1 %v725_v15  ;;  %v635_v10 = vld [vmem:[%s947_s3 + $0x8] sm:$0xff]   ;;  %v628_v13 = vld [vmem:[%s947_s3] sm:$0xff]  }
  0x12   :  { %672 = vmatprep.subr.bf16.mxu1 %v728_v18  ;;  %v633_v16 = vunpack.c.l.bf16 %v635_v10  ;;  %v629_v18 = vunpack.c.l.bf16 %v628_v13 }
  0x13   :  { %645 = vmatpush3.bf16.msra.mxu0 %v727_v17 }
  0x14   :  { %646 = vmatprep.subr.bf16.mxu0 %v730_v20 }
  0x15   :  { %673 = vmatpush3.bf16.msra.mxu1 %v729_v19 }
  0x16   :  { %674 = vmatprep.subr.bf16.mxu1 %v732_v22  ;;  %v634_v22 = vunpack.c.h.bf16 %v635_v10 }
  0x17   :  { %647 = vmatpush3.bf16.msra.mxu0 %v731_v21 }
  0x18   :  { %648 = vmatprep.subr.bf16.mxu0 %v734_v24 }
  0x19   :  { %675 = vmatpush3.bf16.msra.mxu1 %v733_v23 }
  0x1a   :  { %676 = vmatprep.subr.bf16.mxu1 %v736_v26 }
  0x1b   :  { %649 = vmatpush3.bf16.msra.mxu0 %v735_v25  ;;  %v630_v25 = vunpack.c.h.bf16 %v628_v13 }
  0x1c   :  { %650 = vmatprep.subr.bf16.mxu0 %v738_v28 }
  0x1d   :  { %677 = vmatpush3.bf16.msra.mxu1 %v737_v27 }
  0x1e   :  { %678 = vmatprep.subr.bf16.mxu1 %v740_v30 }
  0x1f   :  { %651 = vmatpush3.bf16.msra.mxu0 %v739_v29 }
  0x20   :  { %698 = vmatprep.subr.bf16.mxu0 %v745_v34 }
  0x21   :  { %679 = vmatpush3.bf16.msra.mxu1 %v744_v33 }
  0x22   :  { %415 = vmatmul.mubr.bf16.vlgmr.msra.gmra.mrb[0].mxu0 %v741_v31 }
  0x23   :  { %699 = vmatpush3.bf16.msra.mxu0 %v745_v34  ;;  %422 = vmatprep.mubr.bf16.mxu0 %v750_v38 }
  0x24   :  { %464 = vmatmul.mubr.bf16.vlgmr.msra.gmra.mrb[0].mxu1 %v746_v35  ;;  %700 = vmatprep.subr.bf16.mxu0 %v749_v37 }
  0x25   :  { %471 = vmatprep.mubr.bf16.mxu1 %v754_v41 }
  0x27   :  { %701 = vmatpush3.bf16.msra.mxu0 %v749_v37 }
  0x28   :  { %702 = vmatprep.subr.bf16.mxu0 %v753_v40 }
  0x2a   :  { %423 = vmatmul.mubr.bf16.gmra.mrb[4].mxu0 %v752_v39 }
  0x2b   :  { %706 = vmatprep.mubr.msk.bf16.mxu0 %vm375_vm0, %v758_v44  ;;  %703 = vmatpush3.bf16.msra.mxu0 %v753_v40 }
  0x2c   :  { %472 = vmatmul.mubr.bf16.gmra.mrb[4].mxu1 %v756_v42  ;;  %704 = vmatprep.subr.bf16.mxu0 %v757_v43 }
  0x2f   :  { %705 = vmatpush3.bf16.msra.mxu0 %v757_v43 }
  0x32   :  { %707 = vmatmul.mubr.msk.bf16.vlgmr.msra.gmra.mrb[8].mxu0 %vm375_vm0, %v759_v45 }
  0xf5   :  { %v652_v46 = vpop.f32.mrb[0].mxu0 }
  0xf6   :  { %v653_v48 = vpop.f32.mrb[1].mxu0 }
  0xf7   :  { %v654_v49 = vadd.f32 %v653_v48, %v652_v46  ;;  %v655_v50 = vpop.f32.mrb[2].mxu0  ;;  %v680_v51 = vpop.f32.mrb[0].mxu1 }
  0xf8   :  { %v656_v52 = vpop.f32.mrb[3].mxu0  ;;  %v681_v55 = vpop.f32.mrb[1].mxu1 }
  0xf9   :  { %v417_v53 = vadd.f32 %v654_v49, %v570_v47  ;;  %v657_v54 = vadd.f32 %v656_v52, %v655_v50  ;;  %v682_v56 = vadd.f32 %v681_v55, %v680_v51  ;;  %v683_v57 = vpop.f32.mrb[2].mxu1 }
  0xfa   :  { %v684_v59 = vpop.f32.mrb[3].mxu1 }
  0xfb   :  { %v420_v58 = vadd.f32 %v657_v54, %v570_v47  ;;  %v685_v60 = vadd.f32 %v684_v59, %v683_v57  ;;  %v466_v61 = vadd.f32 %v682_v56, %v417_v53 }
  0xfd   :  { %v658_v62 = vpop.f32.mrb[4].mxu0  ;;  %v469_v0 = vadd.f32 %v685_v60, %v420_v58 }
  0xfe   :  { %v659_v63 = vpop.f32.mrb[5].mxu0 }
  0xff   :  { %v660_v1 = vadd.f32 %v659_v63, %v658_v62  ;;  %v661_v2 = vpop.f32.mrb[6].mxu0  ;;  %v686_v3 = vpop.f32.mrb[4].mxu1 }
 0x100   :  { %v662_v4 = vpop.f32.mrb[7].mxu0  ;;  %v687_v7 = vpop.f32.mrb[5].mxu1 }
 0x101   :  { %v425_v5 = vadd.f32 %v660_v1, %v570_v47  ;;  %v663_v6 = vadd.f32 %v662_v4, %v661_v2  ;;  %v688_v8 = vadd.f32 %v687_v7, %v686_v3  ;;  %v689_v9 = vpop.f32.mrb[6].mxu1 }
 0x102   :  { %v690_v12 = vpop.f32.mrb[7].mxu1 }
 0x103   :  { %v428_v11 = vadd.f32 %v663_v6, %v570_v47  ;;  %v691_v14 = vadd.f32 %v690_v12, %v689_v9  ;;  %v474_v15 = vadd.f32 %v688_v8, %v425_v5 }
 0x105   :  { %v708_v17 = vpop.f32.mrb[8].mxu0  ;;  %v477_v19 = vadd.f32 %v691_v14, %v428_v11 }
 0x106   :  { %v523_v20 = vadd.f32 %v708_v17, %v474_v15  ;;  %v514_v21 = vpop.f32.mrb[9].mxu0 }
 0x107   :  { %v515_v23 = vadd.f32 %v514_v21, %v466_v61  ;;  %v709_v24 = vpop.f32.mrb[10].mxu0 }
 0x108   :  { %v539_v26 = vadd.f32 %v633_v16, %v523_v20  ;;  %v526_v27 = vadd.f32 %v709_v24, %v477_v19  ;;  %v517_v28 = vpop.f32.mrb[11].mxu0 }
 0x109   :  { %v537_v29 = vadd.f32 %v629_v18, %v515_v23  ;;  %v518_v30 = vadd.f32 %v517_v28, %v469_v0 }
 0x10a   :  { %v543_v31 = vmax.f32 %v539_v26, 0.0  ;;  %v540_v32 = vadd.f32 %v634_v22, %v526_v27 }
 0x10b   :  { %v541_v33 = vmax.f32 %v537_v29, 0.0  ;;  %v538_v34 = vadd.f32 %v630_v25, %v518_v30 }
 0x10c   :  { %v625_v35 = vpack.c.bf16 %v543_v31, %v543_v31  ;;  %v544_v36 = vmax.f32 %v540_v32, 0.0 }
 0x10d   :  { %v623_v37 = vpack.c.bf16 %v541_v33, %v541_v33  ;;  %v542_v38 = vmax.f32 %v538_v34, 0.0 }
 0x10e   :  { %564 = vst.msk [vmem:[%s948_s4 + $0x8] sm:$0xf] %vm561_vm1, %v625_v35  ;;  %v626_v39 = vpack.c.bf16 %v544_v36, %v544_v36 }
 0x10f   :  { %562 = vst.msk [vmem:[%s948_s4] sm:$0xf] %vm561_vm1, %v623_v37  ;;  %v624_v40 = vpack.c.bf16 %v542_v38, %v542_v38 }
 0x110   :  { %565 = vst.msk [vmem:[%s948_s4 + $0xc] sm:$0xf] %vm561_vm1, %v626_v39 }
 0x111   :  { %563 = vst.msk [vmem:[%s948_s4 + $0x4] sm:$0xf] %vm561_vm1, %v624_v40 }

// kernel: _lambda_.15
= control target key start
LH: loop header
LB: loop body
LE: loop exit
PB: predicated region body
PF: predicated region fallthrough
CT: control target
= control target key end

     0   :  { %v608_v35 = vmov 0.0   ;;  %vm609_vm0 = vmmov 0   ;;  %vm330_vm1 = vcmask 523264   ;;  %s753_s1 = inlined_call_operand.vmem [shape: bf16[576,128], index: 1, kind: input, shape index: {}]   ;;  %s754_s0 = inlined_call_operand.vmem [shape: bf16[8,576], index: 0, kind: input, shape index: {}]   ;;  %s755_s2 = inlined_call_operand.vmem [shape: f32[1,128], index: 2, kind: input, shape index: {}]   ;;  %s756_s3 = inlined_call_operand.vmem [shape: bf16[8,128], index: 3, kind: output, shape index: {}]  }
   0x1   :  { %v567_v0 = vld [vmem:[%s753_s1 + $0x40] sm:$0xff]   ;;  %v571_v4 = vld [vmem:[%s753_s1 + $0x48] sm:$0xff]   ;;  %v575_v8 = vld [vmem:[%s753_s1 + $0x50] sm:$0xff]  }
   0x2   :  { %v568_v1 = vld [vmem:[%s753_s1] sm:$0xff]   ;;  %504 = vmatprep.subr.bf16.mxu0 %v567_v0  ;;  %v572_v5 = vld [vmem:[%s753_s1 + $0x8] sm:$0xff]   ;;  %v576_v9 = vld [vmem:[%s753_s1 + $0x10] sm:$0xff]  }
   0x3   :  { %v569_v2 = vld [vmem:[%s753_s1 + $0xc0] sm:$0xff]   ;;  %505 = vmatpush3.bf16.msra.mxu0 %v568_v1  ;;  %v573_v6 = vld [vmem:[%s753_s1 + $0xc8] sm:$0xff]   ;;  %v577_v10 = vld [vmem:[%s753_s1 + $0xd0] sm:$0xff]  }
   0x4   :  { %v570_v3 = vld [vmem:[%s753_s1 + $0x80] sm:$0xff]   ;;  %526 = vmatprep.subr.bf16.mxu1 %v569_v2  ;;  %506 = vmatprep.subr.bf16.mxu0 %v571_v4  ;;  %v574_v7 = vld [vmem:[%s753_s1 + $0x88] sm:$0xff]   ;;  %v578_v11 = vld [vmem:[%s753_s1 + $0x90] sm:$0xff]  }
   0x5   :  { %527 = vmatpush3.bf16.msra.mxu1 %v570_v3  ;;  %v579_v12 = vld [vmem:[%s753_s1 + $0x58] sm:$0xff]   ;;  %v583_v16 = vld [vmem:[%s753_s1 + $0x60] sm:$0xff]   ;;  %v587_v20 = vld [vmem:[%s753_s1 + $0x68] sm:$0xff]  }
   0x6   :  { %528 = vmatprep.subr.bf16.mxu1 %v573_v6  ;;  %v580_v13 = vld [vmem:[%s753_s1 + $0x18] sm:$0xff]   ;;  %v584_v17 = vld [vmem:[%s753_s1 + $0x20] sm:$0xff]   ;;  %v588_v21 = vld [vmem:[%s753_s1 + $0x28] sm:$0xff]  }
   0x7   :  { %507 = vmatpush3.bf16.msra.mxu0 %v572_v5  ;;  %v581_v14 = vld [vmem:[%s753_s1 + $0xd8] sm:$0xff]   ;;  %v585_v18 = vld [vmem:[%s753_s1 + $0xe0] sm:$0xff]   ;;  %v589_v22 = vld [vmem:[%s753_s1 + $0xe8] sm:$0xff]  }
   0x8   :  { %508 = vmatprep.subr.bf16.mxu0 %v575_v8  ;;  %v582_v15 = vld [vmem:[%s753_s1 + $0x98] sm:$0xff]   ;;  %v586_v19 = vld [vmem:[%s753_s1 + $0xa0] sm:$0xff]   ;;  %v590_v23 = vld [vmem:[%s753_s1 + $0xa8] sm:$0xff]  }
   0x9   :  { %529 = vmatpush3.bf16.msra.mxu1 %v574_v7  ;;  %v591_v24 = vld [vmem:[%s753_s1 + $0x70] sm:$0xff]   ;;  %v595_v28 = vld [vmem:[%s753_s1 + $0x78] sm:$0xff]   ;;  %v15_v31 = vld [vmem:[%s754_s0] sm:$0xff] }
   0xa   :  { %530 = vmatprep.subr.bf16.mxu1 %v577_v10  ;;  %v592_v25 = vld [vmem:[%s753_s1 + $0x30] sm:$0xff]   ;;  %v596_v29 = vld [vmem:[%s753_s1 + $0x38] sm:$0xff]   ;;  %v462_v32 = vcombine.low %v15_v31, %v15_v31  ;;  %v463_v33 = vcombine.high %v15_v31, %v15_v31  ;;  %v16_v36 = vld [vmem:[%s754_s0 + $0x8] sm:$0xff] }
   0xb   :  { %509 = vmatpush3.bf16.msra.mxu0 %v576_v9  ;;  %v593_v26 = vld [vmem:[%s753_s1 + $0xf0] sm:$0xff]   ;;  %v597_v30 = vld [vmem:[%s753_s1 + $0xf8] sm:$0xff]   ;;  %v464_v37 = vcombine.low %v16_v36, %v16_v36  ;;  %v465_v38 = vcombine.high %v16_v36, %v16_v36  ;;  %v604_v39 = vld [vmem:[%s753_s1 + $0x100] sm:$0xff]  }
   0xc   :  { %510 = vmatprep.subr.bf16.mxu0 %v579_v12  ;;  %v594_v27 = vld [vmem:[%s753_s1 + $0xb0] sm:$0xff]   ;;  %v601_v34 = vld [vmem:[%s753_s1 + $0xb8] sm:$0xff]   ;;  %366 = vmatprep.mubr.bf16.mxu0 %v463_v33  ;;  %v605_v40 = vld [vmem:[%s753_s1 + $0x108] sm:$0xff]  }
   0xd   :  { %531 = vmatpush3.bf16.msra.mxu1 %v578_v11  ;;  %406 = vmatprep.mubr.bf16.mxu1 %v465_v38  ;;  %v606_v41 = vld [vmem:[%s753_s1 + $0x110] sm:$0xff]   ;;  %v607_v42 = vld [vmem:[%s753_s1 + $0x118] sm:$0xff]   ;;  %v461_v45 = vld [vmem:[%s755_s2] ss:$0 sm:$0xff] }
   0xe   :  { %532 = vmatprep.subr.bf16.mxu1 %v581_v14  ;;  %v600_v43 = vld [vmem:[%s754_s0 + $0x10] ss:$0 sps:$4 sm:$0xff]  }
   0xf   :  { %511 = vmatpush3.bf16.msra.mxu0 %v580_v13 }
  0x10   :  { %512 = vmatprep.subr.bf16.mxu0 %v583_v16 }
  0x11   :  { %533 = vmatpush3.bf16.msra.mxu1 %v582_v15 }
  0x12   :  { %534 = vmatprep.subr.bf16.mxu1 %v585_v18 }
  0x13   :  { %513 = vmatpush3.bf16.msra.mxu0 %v584_v17 }
  0x14   :  { %514 = vmatprep.subr.bf16.mxu0 %v587_v20 }
  0x15   :  { %535 = vmatpush3.bf16.msra.mxu1 %v586_v19 }
  0x16   :  { %536 = vmatprep.subr.bf16.mxu1 %v589_v22 }
  0x17   :  { %515 = vmatpush3.bf16.msra.mxu0 %v588_v21 }
  0x18   :  { %516 = vmatprep.subr.bf16.mxu0 %v591_v24 }
  0x19   :  { %537 = vmatpush3.bf16.msra.mxu1 %v590_v23 }
  0x1a   :  { %538 = vmatprep.subr.bf16.mxu1 %v593_v26 }
  0x1b   :  { %517 = vmatpush3.bf16.msra.mxu0 %v592_v25 }
  0x1c   :  { %518 = vmatprep.subr.bf16.mxu0 %v595_v28 }
  0x1d   :  { %539 = vmatpush3.bf16.msra.mxu1 %v594_v27 }
  0x1e   :  { %540 = vmatprep.subr.bf16.mxu1 %v597_v30 }
  0x1f   :  { %519 = vmatpush3.bf16.msra.mxu0 %v596_v29 }
  0x20   :  { %553 = vmatprep.subr.bf16.mxu0 %v608_v35 }
  0x21   :  { %541 = vmatpush3.bf16.msra.mxu1 %v601_v34 }
  0x22   :  { %367 = vmatmul.mubr.bf16.vlgmr.msra.gmra.mrb[0].mxu0 %v462_v32 }
  0x23   :  { %554 = vmatpush3.bf16.msra.mxu0 %v604_v39  ;;  %561 = vmatprep.mubr.msk.bf16.mxu0 %vm609_vm0, %v608_v35 }
  0x24   :  { %407 = vmatmul.mubr.bf16.vlgmr.msra.gmra.mrb[0].mxu1 %v464_v37  ;;  %555 = vmatprep.subr.bf16.mxu0 %v608_v35 }
  0x27   :  { %556 = vmatpush3.bf16.msra.mxu0 %v605_v40 }
  0x28   :  { %557 = vmatprep.subr.bf16.mxu0 %v608_v35 }
  0x2b   :  { %558 = vmatpush3.bf16.msra.mxu0 %v606_v41 }
  0x2c   :  { %559 = vmatprep.subr.bf16.mxu0 %v608_v35 }
  0x2f   :  { %560 = vmatpush3.bf16.msra.mxu0 %v607_v42 }
  0x32   :  { %562 = vmatmul.mubr.msk.bf16.vlgmr.msra.gmra.mrb[4].mxu0 %vm330_vm1, %v600_v43 }
  0xf5   :  { %v520_v44 = vpop.f32.mrb[0].mxu0 }
  0xf6   :  { %v521_v46 = vpop.f32.mrb[1].mxu0 }
  0xf7   :  { %v522_v47 = vadd.f32 %v521_v46, %v520_v44  ;;  %v523_v48 = vpop.f32.mrb[2].mxu0  ;;  %v542_v49 = vpop.f32.mrb[0].mxu1 }
  0xf8   :  { %v524_v50 = vpop.f32.mrb[3].mxu0  ;;  %v543_v51 = vpop.f32.mrb[1].mxu1 }
  0xf9   :  { %v369_v52 = vadd.f32 %v522_v47, %v461_v45  ;;  %v544_v53 = vadd.f32 %v543_v51, %v542_v49  ;;  %v545_v54 = vpop.f32.mrb[2].mxu1 }
  0xfa   :  { %v546_v55 = vpop.f32.mrb[3].mxu1 }
  0xfb   :  { %v409_v56 = vadd.f32 %v544_v53, %v369_v52 }
 0x105   :  { %v448_v57 = vpop.f32.mrb[4].mxu0 }
 0x106   :  { %v449_v58 = vadd.f32 %v448_v57, %v409_v56  ;;  %v563_v59 = vpop.f32.mrb[5].mxu0 }
 0x107   :  { %v451_v60 = vpop.f32.mrb[6].mxu0 }
 0x108   :  { %v454_v61 = vmax.f32 %v449_v58, 0.0  ;;  %v564_v62 = vpop.f32.mrb[7].mxu0 }
 0x10a   :  { %v455_v63 = vpack.c.bf16 %v454_v61, %v454_v61 }
 0x10c   :  { %456 = vst [vmem:[%s756_s3] sm:$0xf] %v455_v63 }

// kernel: _lambda_.16
= control target key start
LH: loop header
LB: loop body
LE: loop exit
PB: predicated region body
PF: predicated region fallthrough
CT: control target
= control target key end

     0   :  { %v1251_v42 = vmov 0.0   ;;  %vm1252_vm0 = vmmov 0   ;;  %vm884_vm1 = vcmask 523264   ;;  %s1559_s1 = inlined_call_operand.vmem [shape: bf16[1152,128], index: 1, kind: input, shape index: {}]   ;;  %s1560_s0 = inlined_call_operand.vmem [shape: bf16[8,1152], index: 0, kind: input, shape index: {}]   ;;  %s1561_s4 = inlined_call_operand.vmem [shape: bf16[64,128], index: 4, kind: input, shape index: {}]   ;;  %s1562_s3 = inlined_call_operand.vmem [shape: bf16[8,64], index: 3, kind: input, shape index: {}]   ;;  %s1563_s2 = inlined_call_operand.vmem [shape: f32[1,128], index: 2, kind: input, shape index: {}]   ;;  %s1564_s5 = inlined_call_operand.vmem [shape: f32[1,128], index: 5, kind: input, shape index: {}]   ;;  %s1565_s6 = inlined_call_operand.vmem [shape: bf16[8,128], index: 6, kind: output, shape index: {}]  }
   0x1   :  { %v1166_v0 = vld [vmem:[%s1559_s1 + $0x40] sm:$0xff]   ;;  %v1168_v2 = vld [vmem:[%s1559_s1 + $0x48] sm:$0xff]   ;;  %v1172_v6 = vld [vmem:[%s1559_s1 + $0x50] sm:$0xff]  }
   0x2   :  { %v1167_v1 = vld [vmem:[%s1559_s1] sm:$0xff]   ;;  %1024 = vmatprep.subr.bf16.mxu1 %v1166_v0  ;;  %v1169_v3 = vld [vmem:[%s1559_s1 + $0x8] sm:$0xff]   ;;  %v1173_v7 = vld [vmem:[%s1559_s1 + $0x10] sm:$0xff]  }
   0x3   :  { %1025 = vmatpush3.bf16.msra.mxu1 %v1167_v1  ;;  %v1170_v4 = vld [vmem:[%s1559_s1 + $0x140] sm:$0xff]   ;;  %v1174_v8 = vld [vmem:[%s1559_s1 + $0x148] sm:$0xff]   ;;  %v1176_v10 = vld [vmem:[%s1559_s1 + $0x58] sm:$0xff]  }
   0x4   :  { %1026 = vmatprep.subr.bf16.mxu1 %v1168_v2  ;;  %v1171_v5 = vld [vmem:[%s1559_s1 + $0x100] sm:$0xff]   ;;  %1068 = vmatprep.subr.bf16.mxu0 %v1170_v4  ;;  %v1175_v9 = vld [vmem:[%s1559_s1 + $0x108] sm:$0xff]   ;;  %v1177_v11 = vld [vmem:[%s1559_s1 + $0x18] sm:$0xff]  }
   0x5   :  { %1069 = vmatpush3.bf16.msra.mxu0 %v1171_v5  ;;  %v1178_v12 = vld [vmem:[%s1559_s1 + $0x150] sm:$0xff]   ;;  %v1180_v14 = vld [vmem:[%s1559_s1 + $0x60] sm:$0xff]   ;;  %v1182_v16 = vld [vmem:[%s1559_s1 + $0x158] sm:$0xff]  }
   0x6   :  { %1070 = vmatprep.subr.bf16.mxu0 %v1174_v8  ;;  %v1179_v13 = vld [vmem:[%s1559_s1 + $0x110] sm:$0xff]   ;;  %v1181_v15 = vld [vmem:[%s1559_s1 + $0x20] sm:$0xff]   ;;  %v1183_v17 = vld [vmem:[%s1559_s1 + $0x118] sm:$0xff]  }
   0x7   :  { %1027 = vmatpush3.bf16.msra.mxu1 %v1169_v3  ;;  %v1184_v18 = vld [vmem:[%s1559_s1 + $0x68] sm:$0xff]   ;;  %v1186_v20 = vld [vmem:[%s1559_s1 + $0x160] sm:$0xff]   ;;  %v1188_v22 = vld [vmem:[%s1559_s1 + $0x70] sm:$0xff]  }
   0x8   :  { %1028 = vmatprep.subr.bf16.mxu1 %v1172_v6  ;;  %v1185_v19 = vld [vmem:[%s1559_s1 + $0x28] sm:$0xff]   ;;  %v1187_v21 = vld [vmem:[%s1559_s1 + $0x120] sm:$0xff]   ;;  %v1189_v23 = vld [vmem:[%s1559_s1 + $0x30] sm:$0xff]  }
   0x9   :  { %1071 = vmatpush3.bf16.msra.mxu0 %v1175_v9  ;;  %v1190_v24 = vld [vmem:[%s1559_s1 + $0x168] sm:$0xff]   ;;  %v1192_v26 = vld [vmem:[%s1559_s1 + $0x78] sm:$0xff]   ;;  %v1194_v28 = vld [vmem:[%s1559_s1 + $0x170] sm:$0xff]  }
   0xa   :  { %1072 = vmatprep.subr.bf16.mxu0 %v1178_v12  ;;  %v1191_v25 = vld [vmem:[%s1559_s1 + $0x128] sm:$0xff]   ;;  %v1193_v27 = vld [vmem:[%s1559_s1 + $0x38] sm:$0xff]   ;;  %v1195_v29 = vld [vmem:[%s1559_s1 + $0x130] sm:$0xff]  }
   0xb   :  { %1029 = vmatpush3.bf16.msra.mxu1 %v1173_v7  ;;  %v24_v30 = vld [vmem:[%s1560_s0] sm:$0xff]  ;;  %v1200_v35 = vld [vmem:[%s1559_s1 + $0x178] sm:$0xff]   ;;  %v1202_v37 = vld [vmem:[%s1559_s1 + $0xc8] sm:$0xff]  }
   0xc   :  { %1030 = vmatprep.subr.bf16.mxu1 %v1176_v10  ;;  %v937_v31 = vcombine.low %v24_v30, %v24_v30  ;;  %v938_v32 = vcombine.high %v24_v30, %v24_v30  ;;  %v1198_v33 = vld [vmem:[%s1559_s1 + $0xc0] sm:$0xff]   ;;  %v1201_v36 = vld [vmem:[%s1559_s1 + $0x138] sm:$0xff]   ;;  %v1203_v38 = vld [vmem:[%s1559_s1 + $0x88] sm:$0xff]  }
   0xd   :  { %1073 = vmatpush3.bf16.msra.mxu0 %v1179_v13  ;;  %v1199_v34 = vld [vmem:[%s1559_s1 + $0x80] sm:$0xff]   ;;  %v26_v39 = vld [vmem:[%s1560_s0 + $0x10] sm:$0xff]  ;;  %v1209_v46 = vld [vmem:[%s1559_s1 + $0x208] sm:$0xff]  }
   0xe   :  { %1074 = vmatprep.subr.bf16.mxu0 %v1182_v16  ;;  %676 = vmatprep.mubr.bf16.mxu1 %v938_v32  ;;  %v941_v40 = vcombine.low %v26_v39, %v26_v39  ;;  %v942_v41 = vcombine.high %v26_v39, %v26_v39  ;;  %v1206_v43 = vld [vmem:[%s1559_s1 + $0x200] sm:$0xff]   ;;  %v1207_v44 = vld [vmem:[%s1559_s1 + $0xd0] sm:$0xff]   ;;  %v1210_v47 = vld [vmem:[%s1559_s1 + $0xd8] sm:$0xff]  }
   0xf   :  { %1031 = vmatpush3.bf16.msra.mxu1 %v1177_v11  ;;  %v1208_v45 = vld [vmem:[%s1559_s1 + $0x90] sm:$0xff]   ;;  %v1211_v48 = vld [vmem:[%s1559_s1 + $0x98] sm:$0xff]   ;;  %v1213_v49 = vld [vmem:[%s1559_s1 + $0xe0] sm:$0xff]  }
  0x10   :  { %1032 = vmatprep.subr.bf16.mxu1 %v1180_v14  ;;  %756 = vmatprep.mubr.bf16.mxu0 %v942_v41  ;;  %v1212_v50 = vld [vmem:[%s1559_s1 + $0x210] sm:$0xff]   ;;  %v1214_v51 = vld [vmem:[%s1559_s1 + $0xa0] sm:$0xff]   ;;  %v1216_v52 = vld [vmem:[%s1559_s1 + $0xe8] sm:$0xff]  }
  0x11   :  { %1075 = vmatpush3.bf16.msra.mxu0 %v1183_v17  ;;  %v1215_v53 = vld [vmem:[%s1559_s1 + $0x218] sm:$0xff]   ;;  %v1217_v54 = vld [vmem:[%s1559_s1 + $0xa8] sm:$0xff]   ;;  %v1219_v55 = vld [vmem:[%s1559_s1 + $0xf0] sm:$0xff]  }
  0x12   :  { %1076 = vmatprep.subr.bf16.mxu0 %v1186_v20  ;;  %v1218_v56 = vld [vmem:[%s1559_s1 + $0x220] sm:$0xff]   ;;  %v1220_v57 = vld [vmem:[%s1559_s1 + $0xb0] sm:$0xff]   ;;  %v25_v58 = vld [vmem:[%s1560_s0 + $0x8] sm:$0xff] }
  0x13   :  { %1033 = vmatpush3.bf16.msra.mxu1 %v1181_v15  ;;  %v1222_v59 = vld [vmem:[%s1559_s1 + $0xf8] sm:$0xff]   ;;  %v940_v60 = vcombine.high %v25_v58, %v25_v58  ;;  %v1221_v61 = vld [vmem:[%s1559_s1 + $0x228] sm:$0xff]   ;;  %v1227_v63 = vld [vmem:[%s1559_s1 + $0x1c0] sm:$0xff]   ;;  %v939_v1 = vcombine.low %v25_v58, %v25_v58 }
  0x14   :  { %1034 = vmatprep.subr.bf16.mxu1 %v1184_v18  ;;  %v1223_v62 = vld [vmem:[%s1559_s1 + $0xb8] sm:$0xff]   ;;  %v1224_v0 = vld [vmem:[%s1559_s1 + $0x230] sm:$0xff]   ;;  %v1228_v2 = vld [vmem:[%s1559_s1 + $0x180] sm:$0xff]  }
  0x15   :  { %1077 = vmatpush3.bf16.msra.mxu0 %v1187_v21  ;;  %v1230_v3 = vld [vmem:[%s1559_s1 + $0x1c8] sm:$0xff]   ;;  %v1229_v4 = vld [vmem:[%s1559_s1 + $0x238] sm:$0xff]   ;;  %v1232_v6 = vld [vmem:[%s1560_s0 + $0x20] ss:$0 sps:$4 sm:$0xff]  }
  0x16   :  { %1078 = vmatprep.subr.bf16.mxu0 %v1190_v24  ;;  %v1231_v5 = vld [vmem:[%s1559_s1 + $0x188] sm:$0xff]   ;;  %v1234_v7 = vld [vmem:[%s1559_s1 + $0x1d0] sm:$0xff]   ;;  %v1233_v8 = vld [vmem:[%s1561_s4] sm:$0xff]  }
  0x17   :  { %1035 = vmatpush3.bf16.msra.mxu1 %v1185_v19  ;;  %v1235_v9 = vld [vmem:[%s1559_s1 + $0x190] sm:$0xff]   ;;  %v1237_v10 = vld [vmem:[%s1559_s1 + $0x1d8] sm:$0xff]   ;;  %v1236_v11 = vld [vmem:[%s1561_s4 + $0x8] sm:$0xff]  }
  0x18   :  { %1036 = vmatprep.subr.bf16.mxu1 %v1188_v22  ;;  %v1238_v12 = vld [vmem:[%s1559_s1 + $0x198] sm:$0xff]   ;;  %v1240_v13 = vld [vmem:[%s1559_s1 + $0x1e0] sm:$0xff]   ;;  %v1239_v14 = vld [vmem:[%s1561_s4 + $0x10] sm:$0xff]  }
  0x19   :  { %1079 = vmatpush3.bf16.msra.mxu0 %v1191_v25  ;;  %v27_v15 = vld [vmem:[%s1560_s0 + $0x18] sm:$0xff]  ;;  %v1241_v16 = vld [vmem:[%s1559_s1 + $0x1a0] sm:$0xff]   ;;  %v1243_v18 = vld [vmem:[%s1559_s1 + $0x1e8] sm:$0xff]  }
  0x1a   :  { %1080 = vmatprep.subr.bf16.mxu0 %v1194_v28  ;;  %v944_v17 = vcombine.high %v27_v15, %v27_v15  ;;  %v1242_v19 = vld [vmem:[%s1561_s4 + $0x18] sm:$0xff]   ;;  %v1244_v20 = vld [vmem:[%s1559_s1 + $0x1a8] sm:$0xff]   ;;  %v1245_v21 = vld [vmem:[%s1559_s1 + $0x1f0] sm:$0xff]  }
  0x1b   :  { %1037 = vmatpush3.bf16.msra.mxu1 %v1189_v23  ;;  %v844_v22 = vld [vmem:[%s1562_s3] sm:$0xf]  ;;  %v1246_v23 = vld [vmem:[%s1559_s1 + $0x1b0] sm:$0xff]   ;;  %v1247_v24 = vld [vmem:[%s1559_s1 + $0x1f8] sm:$0xff]  }
  0x1c   :  { %1038 = vmatprep.subr.bf16.mxu1 %v1192_v26  ;;  %v1248_v25 = vld [vmem:[%s1559_s1 + $0x1b8] sm:$0xff]   ;;  %v943_v26 = vcombine.low %v27_v15, %v27_v15 }
  0x1d   :  { %1081 = vmatpush3.bf16.msra.mxu0 %v1195_v29 }
  0x1e   :  { %1082 = vmatprep.subr.bf16.mxu0 %v1200_v35 }
  0x1f   :  { %1039 = vmatpush3.bf16.msra.mxu1 %v1193_v27 }
  0x20   :  { %1046 = vmatprep.subr.bf16.mxu1 %v1198_v33 }
  0x21   :  { %1083 = vmatpush3.bf16.msra.mxu0 %v1201_v36 }
  0x22   :  { %677 = vmatmul.mubr.bf16.vlgmr.msra.gmra.mrb[0].mxu1 %v937_v31  ;;  %1126 = vmatprep.subr.bf16.mxu0 %v1251_v42 }
  0x23   :  { %1047 = vmatpush3.bf16.msra.mxu1 %v1199_v34  ;;  %716 = vmatprep.mubr.bf16.mxu1 %v940_v60 }
  0x24   :  { %1048 = vmatprep.subr.bf16.mxu1 %v1202_v37  ;;  %757 = vmatmul.mubr.bf16.vlgmr.msra.gmra.mrb[0].mxu0 %v941_v40  ;;  %v936_v37 = vld [vmem:[%s1563_s2] ss:$0 sm:$0xff] }
  0x25   :  { %1127 = vmatpush3.bf16.msra.mxu0 %v1206_v43  ;;  %1142 = vmatprep.mubr.msk.bf16.mxu0 %vm1252_vm0, %v1251_v42 }
  0x26   :  { %1128 = vmatprep.subr.bf16.mxu0 %v1251_v42 }
  0x27   :  { %1049 = vmatpush3.bf16.msra.mxu1 %v1203_v38 }
  0x28   :  { %1050 = vmatprep.subr.bf16.mxu1 %v1207_v44 }
  0x29   :  { %1129 = vmatpush3.bf16.msra.mxu0 %v1209_v46 }
  0x2a   :  { %1130 = vmatprep.subr.bf16.mxu0 %v1251_v42 }
  0x2b   :  { %1051 = vmatpush3.bf16.msra.mxu1 %v1208_v45 }
  0x2c   :  { %1052 = vmatprep.subr.bf16.mxu1 %v1210_v47 }
  0x2d   :  { %1131 = vmatpush3.bf16.msra.mxu0 %v1212_v50 }
  0x2e   :  { %1132 = vmatprep.subr.bf16.mxu0 %v1251_v42 }
  0x2f   :  { %1053 = vmatpush3.bf16.msra.mxu1 %v1211_v48 }
  0x30   :  { %1054 = vmatprep.subr.bf16.mxu1 %v1213_v49 }
  0x31   :  { %1133 = vmatpush3.bf16.msra.mxu0 %v1215_v53 }
  0x32   :  { %1134 = vmatprep.subr.bf16.mxu0 %v1251_v42 }
  0x33   :  { %1055 = vmatpush3.bf16.msra.mxu1 %v1214_v51 }
  0x34   :  { %1056 = vmatprep.subr.bf16.mxu1 %v1216_v52 }
  0x35   :  { %1135 = vmatpush3.bf16.msra.mxu0 %v1218_v56 }
  0x36   :  { %1136 = vmatprep.subr.bf16.mxu0 %v1251_v42 }
  0x37   :  { %1057 = vmatpush3.bf16.msra.mxu1 %v1217_v54  ;;  %v1018_v54 = vld [vmem:[%s1564_s5] ss:$0 sm:$0xff] }
  0x38   :  { %1058 = vmatprep.subr.bf16.mxu1 %v1219_v55 }
  0x39   :  { %1137 = vmatpush3.bf16.msra.mxu0 %v1221_v61 }
  0x3a   :  { %1138 = vmatprep.subr.bf16.mxu0 %v1251_v42 }
  0x3b   :  { %1059 = vmatpush3.bf16.msra.mxu1 %v1220_v57 }
  0x3c   :  { %1060 = vmatprep.subr.bf16.mxu1 %v1222_v59 }
  0x3d   :  { %1139 = vmatpush3.bf16.msra.mxu0 %v1224_v0 }
  0x3e   :  { %1140 = vmatprep.subr.bf16.mxu0 %v1251_v42 }
  0x3f   :  { %1061 = vmatpush3.bf16.msra.mxu1 %v1223_v62 }
  0x40   :  { %1090 = vmatprep.subr.bf16.mxu1 %v1227_v63 }
  0x41   :  { %1141 = vmatpush3.bf16.msra.mxu0 %v1229_v4 }
  0x42   :  { %717 = vmatmul.mubr.bf16.vlgmr.msra.gmra.mrb[4].mxu1 %v939_v1  ;;  %1146 = vmatprep.subr.bf16.mxu0 %v1251_v42 }
  0x43   :  { %1091 = vmatpush3.bf16.msra.mxu1 %v1228_v2  ;;  %796 = vmatprep.mubr.bf16.mxu1 %v944_v17 }
  0x44   :  { %1092 = vmatprep.subr.bf16.mxu1 %v1230_v3  ;;  %1143 = vmatmul.mubr.bf16.vlgmr.msra.gmra.mrb[4].mxu0 %v1232_v6 }
  0x45   :  { %1147 = vmatpush3.bf16.msra.mxu0 %v1233_v8  ;;  %1154 = vmatprep.mubr.msk.bf16.mxu0 %vm1252_vm0, %v1251_v42 }
  0x46   :  { %1148 = vmatprep.subr.bf16.mxu0 %v1251_v42 }
  0x47   :  { %1093 = vmatpush3.bf16.msra.mxu1 %v1231_v5 }
  0x48   :  { %1094 = vmatprep.subr.bf16.mxu1 %v1234_v7 }
  0x49   :  { %1149 = vmatpush3.bf16.msra.mxu0 %v1236_v11 }
  0x4a   :  { %1150 = vmatprep.subr.bf16.mxu0 %v1251_v42 }
  0x4b   :  { %1095 = vmatpush3.bf16.msra.mxu1 %v1235_v9 }
  0x4c   :  { %1096 = vmatprep.subr.bf16.mxu1 %v1237_v10 }
  0x4d   :  { %1151 = vmatpush3.bf16.msra.mxu0 %v1239_v14 }
  0x4e   :  { %1152 = vmatprep.subr.bf16.mxu0 %v1251_v42 }
  0x4f   :  { %1097 = vmatpush3.bf16.msra.mxu1 %v1238_v12 }
  0x50   :  { %1098 = vmatprep.subr.bf16.mxu1 %v1240_v13 }
  0x51   :  { %1153 = vmatpush3.bf16.msra.mxu0 %v1242_v19 }
  0x53   :  { %1099 = vmatpush3.bf16.msra.mxu1 %v1241_v16 }
  0x54   :  { %1100 = vmatprep.subr.bf16.mxu1 %v1243_v18  ;;  %1155 = vmatmul.mubr.msk.bf16.vlgmr.msra.gmra.mrb[4].mxu0 %vm884_vm1, %v844_v22 }
  0x57   :  { %1101 = vmatpush3.bf16.msra.mxu1 %v1244_v20 }
  0x58   :  { %1102 = vmatprep.subr.bf16.mxu1 %v1245_v21 }
  0x5b   :  { %1103 = vmatpush3.bf16.msra.mxu1 %v1246_v23 }
  0x5c   :  { %1104 = vmatprep.subr.bf16.mxu1 %v1247_v24 }
  0x5f   :  { %1105 = vmatpush3.bf16.msra.mxu1 %v1248_v25 }
  0x62   :  { %797 = vmatmul.mubr.bf16.vlgmr.msra.gmra.mrb[8].mxu1 %v943_v26 }
  0xf5   :  { %v1040_v27 = vpop.f32.mrb[0].mxu1 }
  0xf6   :  { %v1041_v28 = vpop.f32.mrb[1].mxu1 }
  0xf7   :  { %v1042_v29 = vadd.f32 %v1041_v28, %v1040_v27  ;;  %v1043_v30 = vpop.f32.mrb[2].mxu1  ;;  %v1084_v32 = vpop.f32.mrb[0].mxu0 }
  0xf8   :  { %v1044_v31 = vpop.f32.mrb[3].mxu1  ;;  %v1085_v33 = vpop.f32.mrb[1].mxu0 }
  0xf9   :  { %v1086_v34 = vadd.f32 %v1085_v33, %v1084_v32  ;;  %v1087_v35 = vpop.f32.mrb[2].mxu0  ;;  %v679_v40 = vadd.f32 %v1042_v29, %v936_v37 }
  0xfa   :  { %v1088_v36 = vpop.f32.mrb[3].mxu0 }
 0x115   :  { %v1062_v38 = vpop.f32.mrb[4].mxu1 }
 0x116   :  { %v1063_v39 = vpop.f32.mrb[5].mxu1 }
 0x117   :  { %v1064_v41 = vadd.f32 %v1063_v39, %v1062_v38  ;;  %v1065_v42 = vpop.f32.mrb[6].mxu1 }
 0x118   :  { %v1066_v43 = vpop.f32.mrb[7].mxu1 }
 0x119   :  { %v719_v44 = vadd.f32 %v1064_v41, %v679_v40 }
 0x11b   :  { %v759_v45 = vadd.f32 %v1086_v34, %v719_v44 }
 0x127   :  { %v922_v46 = vpop.f32.mrb[4].mxu0 }
 0x128   :  { %v1156_v47 = vpop.f32.mrb[5].mxu0 }
 0x129   :  { %v925_v48 = vpop.f32.mrb[6].mxu0 }
 0x12a   :  { %v1157_v49 = vpop.f32.mrb[7].mxu0 }
 0x135   :  { %v1106_v50 = vpop.f32.mrb[8].mxu1 }
 0x136   :  { %v1107_v51 = vpop.f32.mrb[9].mxu1 }
 0x137   :  { %v1108_v52 = vadd.f32 %v1107_v51, %v1106_v50  ;;  %v1109_v53 = vpop.f32.mrb[10].mxu1 }
 0x138   :  { %v1110_v55 = vpop.f32.mrb[11].mxu1 }
 0x139   :  { %v799_v56 = vadd.f32 %v1108_v52, %v759_v45 }
 0x13b   :  { %v1158_v57 = vadd.f32 %v1018_v54, %v799_v56 }
 0x13d   :  { %v1159_v58 = vadd.f32 %v1158_v57, %v922_v46 }
 0x13f   :  { %v929_v59 = vmax.f32 %v1159_v58, 0.0 }
 0x141   :  { %v930_v60 = vpack.c.bf16 %v929_v59, %v929_v59 }
 0x143   :  { %931 = vst [vmem:[%s1565_s6] sm:$0xf] %v930_v60 }

// kernel: _lambda_.17
= control target key start
LH: loop header
LB: loop body
LE: loop exit
PB: predicated region body
PF: predicated region fallthrough
CT: control target
= control target key end

     0   :  { %vm1125_vm0 = vmmov 0   ;;  %s1383_s1 = inlined_call_operand.vmem [shape: bf16[1152,128], index: 1, kind: input, shape index: {}]   ;;  %s1384_s0 = inlined_call_operand.vmem [shape: bf16[8,1152], index: 0, kind: input, shape index: {}]   ;;  %s1385_s2 = inlined_call_operand.vmem [shape: f32[1,128], index: 2, kind: input, shape index: {}]   ;;  %s1386_s3 = inlined_call_operand.vmem [shape: bf16[8,128], index: 3, kind: output, shape index: {}]  }
   0x1   :  { %v1043_v0 = vld [vmem:[%s1383_s1 + $0x40] sm:$0xff]   ;;  %v1047_v4 = vld [vmem:[%s1383_s1 + $0x48] sm:$0xff]   ;;  %v1051_v8 = vld [vmem:[%s1383_s1 + $0x50] sm:$0xff]  }
   0x2   :  { %v1044_v1 = vld [vmem:[%s1383_s1] sm:$0xff]   ;;  %924 = vmatprep.subr.bf16.mxu0 %v1043_v0  ;;  %v1048_v5 = vld [vmem:[%s1383_s1 + $0x8] sm:$0xff]   ;;  %v1052_v9 = vld [vmem:[%s1383_s1 + $0x10] sm:$0xff]  }
   0x3   :  { %v1045_v2 = vld [vmem:[%s1383_s1 + $0xc0] sm:$0xff]   ;;  %925 = vmatpush3.bf16.msra.mxu0 %v1044_v1  ;;  %v1049_v6 = vld [vmem:[%s1383_s1 + $0xc8] sm:$0xff]   ;;  %v1053_v10 = vld [vmem:[%s1383_s1 + $0xd0] sm:$0xff]  }
   0x4   :  { %v1046_v3 = vld [vmem:[%s1383_s1 + $0x80] sm:$0xff]   ;;  %946 = vmatprep.subr.bf16.mxu1 %v1045_v2  ;;  %926 = vmatprep.subr.bf16.mxu0 %v1047_v4  ;;  %v1050_v7 = vld [vmem:[%s1383_s1 + $0x88] sm:$0xff]   ;;  %v1054_v11 = vld [vmem:[%s1383_s1 + $0x90] sm:$0xff]  }
   0x5   :  { %947 = vmatpush3.bf16.msra.mxu1 %v1046_v3  ;;  %v1055_v12 = vld [vmem:[%s1383_s1 + $0x58] sm:$0xff]   ;;  %v1059_v16 = vld [vmem:[%s1383_s1 + $0x60] sm:$0xff]   ;;  %v1063_v20 = vld [vmem:[%s1383_s1 + $0x68] sm:$0xff]  }
   0x6   :  { %948 = vmatprep.subr.bf16.mxu1 %v1049_v6  ;;  %v1056_v13 = vld [vmem:[%s1383_s1 + $0x18] sm:$0xff]   ;;  %v1060_v17 = vld [vmem:[%s1383_s1 + $0x20] sm:$0xff]   ;;  %v1064_v21 = vld [vmem:[%s1383_s1 + $0x28] sm:$0xff]  }
   0x7   :  { %927 = vmatpush3.bf16.msra.mxu0 %v1048_v5  ;;  %v1057_v14 = vld [vmem:[%s1383_s1 + $0xd8] sm:$0xff]   ;;  %v1061_v18 = vld [vmem:[%s1383_s1 + $0xe0] sm:$0xff]   ;;  %v1065_v22 = vld [vmem:[%s1383_s1 + $0xe8] sm:$0xff]  }
   0x8   :  { %928 = vmatprep.subr.bf16.mxu0 %v1051_v8  ;;  %v1058_v15 = vld [vmem:[%s1383_s1 + $0x98] sm:$0xff]   ;;  %v1062_v19 = vld [vmem:[%s1383_s1 + $0xa0] sm:$0xff]   ;;  %v1066_v23 = vld [vmem:[%s1383_s1 + $0xa8] sm:$0xff]  }
   0x9   :  { %949 = vmatpush3.bf16.msra.mxu1 %v1050_v7  ;;  %v1067_v24 = vld [vmem:[%s1383_s1 + $0x70] sm:$0xff]   ;;  %v1071_v28 = vld [vmem:[%s1383_s1 + $0x78] sm:$0xff]   ;;  %v15_v31 = vld [vmem:[%s1384_s0] sm:$0xff] }
   0xa   :  { %950 = vmatprep.subr.bf16.mxu1 %v1053_v10  ;;  %v1068_v25 = vld [vmem:[%s1383_s1 + $0x30] sm:$0xff]   ;;  %v1072_v29 = vld [vmem:[%s1383_s1 + $0x38] sm:$0xff]   ;;  %v843_v32 = vcombine.low %v15_v31, %v15_v31  ;;  %v844_v33 = vcombine.high %v15_v31, %v15_v31  ;;  %v1077_v35 = vld [vmem:[%s1383_s1 + $0x140] sm:$0xff]  }
   0xb   :  { %929 = vmatpush3.bf16.msra.mxu0 %v1052_v9  ;;  %v1069_v26 = vld [vmem:[%s1383_s1 + $0xf0] sm:$0xff]   ;;  %v1073_v30 = vld [vmem:[%s1383_s1 + $0xf8] sm:$0xff]   ;;  %v16_v36 = vld [vmem:[%s1384_s0 + $0x8] sm:$0xff]  ;;  %v1124_v9 = vmov 0.0  }
   0xc   :  { %930 = vmatprep.subr.bf16.mxu0 %v1055_v12  ;;  %v1070_v27 = vld [vmem:[%s1383_s1 + $0xb0] sm:$0xff]   ;;  %v1076_v34 = vld [vmem:[%s1383_s1 + $0xb8] sm:$0xff]   ;;  %667 = vmatprep.mubr.bf16.mxu0 %v844_v33  ;;  %v845_v37 = vcombine.low %v16_v36, %v16_v36  ;;  %v846_v38 = vcombine.high %v16_v36, %v16_v36  ;;  %v1080_v39 = vld [vmem:[%s1383_s1 + $0x100] sm:$0xff]  }
   0xd   :  { %951 = vmatpush3.bf16.msra.mxu1 %v1054_v11  ;;  %v1081_v40 = vld [vmem:[%s1383_s1 + $0x1c0] sm:$0xff]   ;;  %v1083_v42 = vld [vmem:[%s1383_s1 + $0x148] sm:$0xff]   ;;  %v1087_v46 = vld [vmem:[%s1383_s1 + $0x150] sm:$0xff]  }
   0xe   :  { %952 = vmatprep.subr.bf16.mxu1 %v1057_v14  ;;  %707 = vmatprep.mubr.bf16.mxu1 %v846_v38  ;;  %v1082_v41 = vld [vmem:[%s1383_s1 + $0x180] sm:$0xff]   ;;  %v1084_v43 = vld [vmem:[%s1383_s1 + $0x108] sm:$0xff]   ;;  %v1088_v47 = vld [vmem:[%s1383_s1 + $0x110] sm:$0xff]  }
   0xf   :  { %931 = vmatpush3.bf16.msra.mxu0 %v1056_v13  ;;  %v1085_v44 = vld [vmem:[%s1383_s1 + $0x1c8] sm:$0xff]   ;;  %v1089_v48 = vld [vmem:[%s1383_s1 + $0x1d0] sm:$0xff]   ;;  %v1091_v50 = vld [vmem:[%s1383_s1 + $0x158] sm:$0xff]  }
  0x10   :  { %932 = vmatprep.subr.bf16.mxu0 %v1059_v16  ;;  %v1086_v45 = vld [vmem:[%s1383_s1 + $0x188] sm:$0xff]   ;;  %v1090_v49 = vld [vmem:[%s1383_s1 + $0x190] sm:$0xff]   ;;  %v1092_v51 = vld [vmem:[%s1383_s1 + $0x118] sm:$0xff]  }
  0x11   :  { %953 = vmatpush3.bf16.msra.mxu1 %v1058_v15  ;;  %v1093_v52 = vld [vmem:[%s1383_s1 + $0x1d8] sm:$0xff]   ;;  %v1095_v54 = vld [vmem:[%s1383_s1 + $0x160] sm:$0xff]   ;;  %v1099_v58 = vld [vmem:[%s1383_s1 + $0x168] sm:$0xff]  }
  0x12   :  { %954 = vmatprep.subr.bf16.mxu1 %v1061_v18  ;;  %v1094_v53 = vld [vmem:[%s1383_s1 + $0x198] sm:$0xff]   ;;  %v1096_v55 = vld [vmem:[%s1383_s1 + $0x120] sm:$0xff]   ;;  %v1100_v59 = vld [vmem:[%s1383_s1 + $0x128] sm:$0xff]  }
  0x13   :  { %933 = vmatpush3.bf16.msra.mxu0 %v1060_v17  ;;  %v1097_v56 = vld [vmem:[%s1383_s1 + $0x1e0] sm:$0xff]   ;;  %v1101_v60 = vld [vmem:[%s1383_s1 + $0x1e8] sm:$0xff]   ;;  %v1103_v62 = vld [vmem:[%s1383_s1 + $0x170] sm:$0xff]  }
  0x14   :  { %934 = vmatprep.subr.bf16.mxu0 %v1063_v20  ;;  %v1098_v57 = vld [vmem:[%s1383_s1 + $0x1a0] sm:$0xff]   ;;  %v1102_v61 = vld [vmem:[%s1383_s1 + $0x1a8] sm:$0xff]   ;;  %v1104_v63 = vld [vmem:[%s1383_s1 + $0x130] sm:$0xff]  }
  0x15   :  { %955 = vmatpush3.bf16.msra.mxu1 %v1062_v19  ;;  %v1105_v0 = vld [vmem:[%s1383_s1 + $0x1f0] sm:$0xff]   ;;  %v1107_v2 = vld [vmem:[%s1383_s1 + $0x178] sm:$0xff]   ;;  %v1115_v13 = vld [vmem:[%s1383_s1 + $0x200] sm:$0xff]  }
  0x16   :  { %956 = vmatprep.subr.bf16.mxu1 %v1065_v22  ;;  %v1106_v1 = vld [vmem:[%s1383_s1 + $0x1b0] sm:$0xff]   ;;  %v1108_v3 = vld [vmem:[%s1383_s1 + $0x138] sm:$0xff]   ;;  %v1116_v14 = vld [vmem:[%s1383_s1 + $0x208] sm:$0xff]  }
  0x17   :  { %935 = vmatpush3.bf16.msra.mxu0 %v1064_v21  ;;  %v1109_v4 = vld [vmem:[%s1383_s1 + $0x1f8] sm:$0xff]   ;;  %v17_v5 = vld [vmem:[%s1384_s0 + $0x10] sm:$0xff]  ;;  %v1119_v17 = vld [vmem:[%s1383_s1 + $0x220] sm:$0xff]  }
  0x18   :  { %936 = vmatprep.subr.bf16.mxu0 %v1067_v24  ;;  %v847_v6 = vcombine.low %v17_v5, %v17_v5  ;;  %v848_v7 = vcombine.high %v17_v5, %v17_v5  ;;  %v1112_v8 = vld [vmem:[%s1383_s1 + $0x1b8] sm:$0xff]   ;;  %v1117_v15 = vld [vmem:[%s1383_s1 + $0x210] sm:$0xff]   ;;  %v1120_v18 = vld [vmem:[%s1383_s1 + $0x228] sm:$0xff]  }
  0x19   :  { %957 = vmatpush3.bf16.msra.mxu1 %v1066_v23  ;;  %v18_v10 = vld [vmem:[%s1384_s0 + $0x18] sm:$0xff]  ;;  %v1121_v19 = vld [vmem:[%s1383_s1 + $0x230] sm:$0xff]   ;;  %v1123_v21 = vld [vmem:[%s1384_s0 + $0x20] ss:$0 sps:$4 sm:$0xff]  }
  0x1a   :  { %958 = vmatprep.subr.bf16.mxu1 %v1069_v26  ;;  %v849_v11 = vcombine.low %v18_v10, %v18_v10  ;;  %v850_v12 = vcombine.high %v18_v10, %v18_v10  ;;  %v1118_v16 = vld [vmem:[%s1383_s1 + $0x218] sm:$0xff]   ;;  %v842_v23 = vld [vmem:[%s1385_s2] ss:$0 sm:$0xff] }
  0x1b   :  { %937 = vmatpush3.bf16.msra.mxu0 %v1068_v25  ;;  %v1122_v20 = vld [vmem:[%s1383_s1 + $0x238] sm:$0xff]  }
  0x1c   :  { %938 = vmatprep.subr.bf16.mxu0 %v1071_v28 }
  0x1d   :  { %959 = vmatpush3.bf16.msra.mxu1 %v1070_v27 }
  0x1e   :  { %960 = vmatprep.subr.bf16.mxu1 %v1073_v30 }
  0x1f   :  { %939 = vmatpush3.bf16.msra.mxu0 %v1072_v29 }
  0x20   :  { %968 = vmatprep.subr.bf16.mxu0 %v1077_v35 }
  0x21   :  { %961 = vmatpush3.bf16.msra.mxu1 %v1076_v34 }
  0x22   :  { %668 = vmatmul.mubr.bf16.vlgmr.msra.gmra.mrb[0].mxu0 %v843_v32  ;;  %990 = vmatprep.subr.bf16.mxu1 %v1081_v40 }
  0x23   :  { %969 = vmatpush3.bf16.msra.mxu0 %v1080_v39  ;;  %747 = vmatprep.mubr.bf16.mxu0 %v848_v7 }
  0x24   :  { %708 = vmatmul.mubr.bf16.vlgmr.msra.gmra.mrb[0].mxu1 %v845_v37  ;;  %970 = vmatprep.subr.bf16.mxu0 %v1083_v42 }
  0x25   :  { %991 = vmatpush3.bf16.msra.mxu1 %v1082_v41  ;;  %787 = vmatprep.mubr.bf16.mxu1 %v850_v12 }
  0x26   :  { %992 = vmatprep.subr.bf16.mxu1 %v1085_v44 }
  0x27   :  { %971 = vmatpush3.bf16.msra.mxu0 %v1084_v43 }
  0x28   :  { %972 = vmatprep.subr.bf16.mxu0 %v1087_v46 }
  0x29   :  { %993 = vmatpush3.bf16.msra.mxu1 %v1086_v45 }
  0x2a   :  { %994 = vmatprep.subr.bf16.mxu1 %v1089_v48 }
  0x2b   :  { %973 = vmatpush3.bf16.msra.mxu0 %v1088_v47 }
  0x2c   :  { %974 = vmatprep.subr.bf16.mxu0 %v1091_v50 }
  0x2d   :  { %995 = vmatpush3.bf16.msra.mxu1 %v1090_v49 }
  0x2e   :  { %996 = vmatprep.subr.bf16.mxu1 %v1093_v52 }
  0x2f   :  { %975 = vmatpush3.bf16.msra.mxu0 %v1092_v51 }
  0x30   :  { %976 = vmatprep.subr.bf16.mxu0 %v1095_v54 }
  0x31   :  { %997 = vmatpush3.bf16.msra.mxu1 %v1094_v53 }
  0x32   :  { %998 = vmatprep.subr.bf16.mxu1 %v1097_v56 }
  0x33   :  { %977 = vmatpush3.bf16.msra.mxu0 %v1096_v55 }
  0x34   :  { %978 = vmatprep.subr.bf16.mxu0 %v1099_v58 }
  0x35   :  { %999 = vmatpush3.bf16.msra.mxu1 %v1098_v57 }
  0x36   :  { %1000 = vmatprep.subr.bf16.mxu1 %v1101_v60 }
  0x37   :  { %979 = vmatpush3.bf16.msra.mxu0 %v1100_v59 }
  0x38   :  { %980 = vmatprep.subr.bf16.mxu0 %v1103_v62 }
  0x39   :  { %1001 = vmatpush3.bf16.msra.mxu1 %v1102_v61 }
  0x3a   :  { %1002 = vmatprep.subr.bf16.mxu1 %v1105_v0 }
  0x3b   :  { %981 = vmatpush3.bf16.msra.mxu0 %v1104_v63 }
  0x3c   :  { %982 = vmatprep.subr.bf16.mxu0 %v1107_v2 }
  0x3d   :  { %1003 = vmatpush3.bf16.msra.mxu1 %v1106_v1 }
  0x3e   :  { %1004 = vmatprep.subr.bf16.mxu1 %v1109_v4 }
  0x3f   :  { %983 = vmatpush3.bf16.msra.mxu0 %v1108_v3 }
  0x40   :  { %1021 = vmatprep.subr.bf16.mxu0 %v1124_v9 }
  0x41   :  { %1005 = vmatpush3.bf16.msra.mxu1 %v1112_v8 }
  0x42   :  { %748 = vmatmul.mubr.bf16.vlgmr.msra.gmra.mrb[4].mxu0 %v847_v6 }
  0x43   :  { %1022 = vmatpush3.bf16.msra.mxu0 %v1115_v13  ;;  %1037 = vmatprep.mubr.msk.bf16.mxu0 %vm1125_vm0, %v1124_v9 }
  0x44   :  { %788 = vmatmul.mubr.bf16.vlgmr.msra.gmra.mrb[4].mxu1 %v849_v11  ;;  %1023 = vmatprep.subr.bf16.mxu0 %v1124_v9 }
  0x47   :  { %1024 = vmatpush3.bf16.msra.mxu0 %v1116_v14 }
  0x48   :  { %1025 = vmatprep.subr.bf16.mxu0 %v1124_v9 }
  0x4b   :  { %1026 = vmatpush3.bf16.msra.mxu0 %v1117_v15 }
  0x4c   :  { %1027 = vmatprep.subr.bf16.mxu0 %v1124_v9 }
  0x4f   :  { %1028 = vmatpush3.bf16.msra.mxu0 %v1118_v16 }
  0x50   :  { %1029 = vmatprep.subr.bf16.mxu0 %v1124_v9 }
  0x53   :  { %1030 = vmatpush3.bf16.msra.mxu0 %v1119_v17 }
  0x54   :  { %1031 = vmatprep.subr.bf16.mxu0 %v1124_v9 }
  0x57   :  { %1032 = vmatpush3.bf16.msra.mxu0 %v1120_v18 }
  0x58   :  { %1033 = vmatprep.subr.bf16.mxu0 %v1124_v9 }
  0x5b   :  { %1034 = vmatpush3.bf16.msra.mxu0 %v1121_v19 }
  0x5c   :  { %1035 = vmatprep.subr.bf16.mxu0 %v1124_v9 }
  0x5f   :  { %1036 = vmatpush3.bf16.msra.mxu0 %v1122_v20 }
  0x62   :  { %1038 = vmatmul.mubr.bf16.vlgmr.msra.gmra.mrb[8].mxu0 %v1123_v21 }
  0xf5   :  { %v940_v22 = vpop.f32.mrb[0].mxu0 }
  0xf6   :  { %v941_v24 = vpop.f32.mrb[1].mxu0 }
  0xf7   :  { %v942_v25 = vadd.f32 %v941_v24, %v940_v22  ;;  %v943_v26 = vpop.f32.mrb[2].mxu0  ;;  %v962_v27 = vpop.f32.mrb[0].mxu1 }
  0xf8   :  { %v944_v28 = vpop.f32.mrb[3].mxu0  ;;  %v963_v29 = vpop.f32.mrb[1].mxu1 }
  0xf9   :  { %v670_v30 = vadd.f32 %v942_v25, %v842_v23  ;;  %v964_v31 = vadd.f32 %v963_v29, %v962_v27  ;;  %v965_v32 = vpop.f32.mrb[2].mxu1 }
  0xfa   :  { %v966_v33 = vpop.f32.mrb[3].mxu1 }
  0xfb   :  { %v710_v34 = vadd.f32 %v964_v31, %v670_v30 }
 0x115   :  { %v984_v35 = vpop.f32.mrb[4].mxu0 }
 0x116   :  { %v985_v36 = vpop.f32.mrb[5].mxu0 }
 0x117   :  { %v986_v37 = vadd.f32 %v985_v36, %v984_v35  ;;  %v987_v38 = vpop.f32.mrb[6].mxu0  ;;  %v1006_v39 = vpop.f32.mrb[4].mxu1 }
 0x118   :  { %v988_v40 = vpop.f32.mrb[7].mxu0  ;;  %v1007_v41 = vpop.f32.mrb[5].mxu1 }
 0x119   :  { %v750_v42 = vadd.f32 %v986_v37, %v710_v34  ;;  %v1008_v43 = vadd.f32 %v1007_v41, %v1006_v39  ;;  %v1009_v44 = vpop.f32.mrb[6].mxu1 }
 0x11a   :  { %v1010_v45 = vpop.f32.mrb[7].mxu1 }
 0x11b   :  { %v790_v46 = vadd.f32 %v1008_v43, %v750_v42 }
 0x135   :  { %v829_v47 = vpop.f32.mrb[8].mxu0 }
 0x136   :  { %v830_v48 = vadd.f32 %v829_v47, %v790_v46  ;;  %v1039_v49 = vpop.f32.mrb[9].mxu0 }
 0x137   :  { %v832_v50 = vpop.f32.mrb[10].mxu0 }
 0x138   :  { %v835_v51 = vmax.f32 %v830_v48, 0.0  ;;  %v1040_v52 = vpop.f32.mrb[11].mxu0 }
 0x13a   :  { %v836_v53 = vpack.c.bf16 %v835_v51, %v835_v51 }
 0x13c   :  { %837 = vst [vmem:[%s1386_s3] sm:$0xf] %v836_v53 }

// kernel: _lambda_.18
= control target key start
LH: loop header
LB: loop body
LE: loop exit
PB: predicated region body
PF: predicated region fallthrough
CT: control target
= control target key end

     0   :  { %vm1131_vm0 = vmmov 0   ;;  %s1397_s1 = inlined_call_operand.vmem [shape: bf16[1152,128], index: 1, kind: input, shape index: {}]   ;;  %s1398_s0 = inlined_call_operand.vmem [shape: bf16[8,1152], index: 0, kind: input, shape index: {}]   ;;  %s1399_s2 = inlined_call_operand.vmem [shape: f32[1,128], index: 2, kind: input, shape index: {}]   ;;  %s1400_s3 = inlined_call_operand.vmem [shape: bf16[8,128], index: 3, kind: input, shape index: {}]   ;;  %s1401_s4 = inlined_call_operand.vmem [shape: bf16[8,128], index: 4, kind: output, shape index: {}]  }
   0x1   :  { %v1049_v0 = vld [vmem:[%s1397_s1 + $0x40] sm:$0xff]   ;;  %v1053_v4 = vld [vmem:[%s1397_s1 + $0x48] sm:$0xff]   ;;  %v1057_v8 = vld [vmem:[%s1397_s1 + $0x50] sm:$0xff]  }
   0x2   :  { %v1050_v1 = vld [vmem:[%s1397_s1] sm:$0xff]   ;;  %930 = vmatprep.subr.bf16.mxu0 %v1049_v0  ;;  %v1054_v5 = vld [vmem:[%s1397_s1 + $0x8] sm:$0xff]   ;;  %v1058_v9 = vld [vmem:[%s1397_s1 + $0x10] sm:$0xff]  }
   0x3   :  { %v1051_v2 = vld [vmem:[%s1397_s1 + $0xc0] sm:$0xff]   ;;  %931 = vmatpush3.bf16.msra.mxu0 %v1050_v1  ;;  %v1055_v6 = vld [vmem:[%s1397_s1 + $0xc8] sm:$0xff]   ;;  %v1059_v10 = vld [vmem:[%s1397_s1 + $0xd0] sm:$0xff]  }
   0x4   :  { %v1052_v3 = vld [vmem:[%s1397_s1 + $0x80] sm:$0xff]   ;;  %952 = vmatprep.subr.bf16.mxu1 %v1051_v2  ;;  %932 = vmatprep.subr.bf16.mxu0 %v1053_v4  ;;  %v1056_v7 = vld [vmem:[%s1397_s1 + $0x88] sm:$0xff]   ;;  %v1060_v11 = vld [vmem:[%s1397_s1 + $0x90] sm:$0xff]  }
   0x5   :  { %953 = vmatpush3.bf16.msra.mxu1 %v1052_v3  ;;  %v1061_v12 = vld [vmem:[%s1397_s1 + $0x58] sm:$0xff]   ;;  %v1065_v16 = vld [vmem:[%s1397_s1 + $0x60] sm:$0xff]   ;;  %v1069_v20 = vld [vmem:[%s1397_s1 + $0x68] sm:$0xff]  }
   0x6   :  { %954 = vmatprep.subr.bf16.mxu1 %v1055_v6  ;;  %v1062_v13 = vld [vmem:[%s1397_s1 + $0x18] sm:$0xff]   ;;  %v1066_v17 = vld [vmem:[%s1397_s1 + $0x20] sm:$0xff]   ;;  %v1070_v21 = vld [vmem:[%s1397_s1 + $0x28] sm:$0xff]  }
   0x7   :  { %933 = vmatpush3.bf16.msra.mxu0 %v1054_v5  ;;  %v1063_v14 = vld [vmem:[%s1397_s1 + $0xd8] sm:$0xff]   ;;  %v1067_v18 = vld [vmem:[%s1397_s1 + $0xe0] sm:$0xff]   ;;  %v1071_v22 = vld [vmem:[%s1397_s1 + $0xe8] sm:$0xff]  }
   0x8   :  { %934 = vmatprep.subr.bf16.mxu0 %v1057_v8  ;;  %v1064_v15 = vld [vmem:[%s1397_s1 + $0x98] sm:$0xff]   ;;  %v1068_v19 = vld [vmem:[%s1397_s1 + $0xa0] sm:$0xff]   ;;  %v1072_v23 = vld [vmem:[%s1397_s1 + $0xa8] sm:$0xff]  }
   0x9   :  { %955 = vmatpush3.bf16.msra.mxu1 %v1056_v7  ;;  %v1073_v24 = vld [vmem:[%s1397_s1 + $0x70] sm:$0xff]   ;;  %v1077_v28 = vld [vmem:[%s1397_s1 + $0x78] sm:$0xff]   ;;  %v18_v31 = vld [vmem:[%s1398_s0] sm:$0xff] }
   0xa   :  { %956 = vmatprep.subr.bf16.mxu1 %v1059_v10  ;;  %v1074_v25 = vld [vmem:[%s1397_s1 + $0x30] sm:$0xff]   ;;  %v1078_v29 = vld [vmem:[%s1397_s1 + $0x38] sm:$0xff]   ;;  %v849_v32 = vcombine.low %v18_v31, %v18_v31  ;;  %v850_v33 = vcombine.high %v18_v31, %v18_v31  ;;  %v1083_v35 = vld [vmem:[%s1397_s1 + $0x140] sm:$0xff]  }
   0xb   :  { %935 = vmatpush3.bf16.msra.mxu0 %v1058_v9  ;;  %v1075_v26 = vld [vmem:[%s1397_s1 + $0xf0] sm:$0xff]   ;;  %v1079_v30 = vld [vmem:[%s1397_s1 + $0xf8] sm:$0xff]   ;;  %v19_v36 = vld [vmem:[%s1398_s0 + $0x8] sm:$0xff]  ;;  %v1130_v9 = vmov 0.0  }
   0xc   :  { %936 = vmatprep.subr.bf16.mxu0 %v1061_v12  ;;  %v1076_v27 = vld [vmem:[%s1397_s1 + $0xb0] sm:$0xff]   ;;  %v1082_v34 = vld [vmem:[%s1397_s1 + $0xb8] sm:$0xff]   ;;  %670 = vmatprep.mubr.bf16.mxu0 %v850_v33  ;;  %v851_v37 = vcombine.low %v19_v36, %v19_v36  ;;  %v852_v38 = vcombine.high %v19_v36, %v19_v36  ;;  %v1086_v39 = vld [vmem:[%s1397_s1 + $0x100] sm:$0xff]  }
   0xd   :  { %957 = vmatpush3.bf16.msra.mxu1 %v1060_v11  ;;  %v1087_v40 = vld [vmem:[%s1397_s1 + $0x1c0] sm:$0xff]   ;;  %v1089_v42 = vld [vmem:[%s1397_s1 + $0x148] sm:$0xff]   ;;  %v1093_v46 = vld [vmem:[%s1397_s1 + $0x150] sm:$0xff]  }
   0xe   :  { %958 = vmatprep.subr.bf16.mxu1 %v1063_v14  ;;  %710 = vmatprep.mubr.bf16.mxu1 %v852_v38  ;;  %v1088_v41 = vld [vmem:[%s1397_s1 + $0x180] sm:$0xff]   ;;  %v1090_v43 = vld [vmem:[%s1397_s1 + $0x108] sm:$0xff]   ;;  %v1094_v47 = vld [vmem:[%s1397_s1 + $0x110] sm:$0xff]  }
   0xf   :  { %937 = vmatpush3.bf16.msra.mxu0 %v1062_v13  ;;  %v1091_v44 = vld [vmem:[%s1397_s1 + $0x1c8] sm:$0xff]   ;;  %v1095_v48 = vld [vmem:[%s1397_s1 + $0x1d0] sm:$0xff]   ;;  %v1097_v50 = vld [vmem:[%s1397_s1 + $0x158] sm:$0xff]  }
  0x10   :  { %938 = vmatprep.subr.bf16.mxu0 %v1065_v16  ;;  %v1092_v45 = vld [vmem:[%s1397_s1 + $0x188] sm:$0xff]   ;;  %v1096_v49 = vld [vmem:[%s1397_s1 + $0x190] sm:$0xff]   ;;  %v1098_v51 = vld [vmem:[%s1397_s1 + $0x118] sm:$0xff]  }
  0x11   :  { %959 = vmatpush3.bf16.msra.mxu1 %v1064_v15  ;;  %v1099_v52 = vld [vmem:[%s1397_s1 + $0x1d8] sm:$0xff]   ;;  %v1101_v54 = vld [vmem:[%s1397_s1 + $0x160] sm:$0xff]   ;;  %v1105_v58 = vld [vmem:[%s1397_s1 + $0x168] sm:$0xff]  }
  0x12   :  { %960 = vmatprep.subr.bf16.mxu1 %v1067_v18  ;;  %v1100_v53 = vld [vmem:[%s1397_s1 + $0x198] sm:$0xff]   ;;  %v1102_v55 = vld [vmem:[%s1397_s1 + $0x120] sm:$0xff]   ;;  %v1106_v59 = vld [vmem:[%s1397_s1 + $0x128] sm:$0xff]  }
  0x13   :  { %939 = vmatpush3.bf16.msra.mxu0 %v1066_v17  ;;  %v1103_v56 = vld [vmem:[%s1397_s1 + $0x1e0] sm:$0xff]   ;;  %v1107_v60 = vld [vmem:[%s1397_s1 + $0x1e8] sm:$0xff]   ;;  %v1109_v62 = vld [vmem:[%s1397_s1 + $0x170] sm:$0xff]  }
  0x14   :  { %940 = vmatprep.subr.bf16.mxu0 %v1069_v20  ;;  %v1104_v57 = vld [vmem:[%s1397_s1 + $0x1a0] sm:$0xff]   ;;  %v1108_v61 = vld [vmem:[%s1397_s1 + $0x1a8] sm:$0xff]   ;;  %v1110_v63 = vld [vmem:[%s1397_s1 + $0x130] sm:$0xff]  }
  0x15   :  { %961 = vmatpush3.bf16.msra.mxu1 %v1068_v19  ;;  %v1111_v0 = vld [vmem:[%s1397_s1 + $0x1f0] sm:$0xff]   ;;  %v1113_v2 = vld [vmem:[%s1397_s1 + $0x178] sm:$0xff]   ;;  %v1121_v13 = vld [vmem:[%s1397_s1 + $0x200] sm:$0xff]  }
  0x16   :  { %962 = vmatprep.subr.bf16.mxu1 %v1071_v22  ;;  %v1112_v1 = vld [vmem:[%s1397_s1 + $0x1b0] sm:$0xff]   ;;  %v1114_v3 = vld [vmem:[%s1397_s1 + $0x138] sm:$0xff]   ;;  %v1122_v14 = vld [vmem:[%s1397_s1 + $0x208] sm:$0xff]  }
  0x17   :  { %941 = vmatpush3.bf16.msra.mxu0 %v1070_v21  ;;  %v1115_v4 = vld [vmem:[%s1397_s1 + $0x1f8] sm:$0xff]   ;;  %v20_v5 = vld [vmem:[%s1398_s0 + $0x10] sm:$0xff]  ;;  %v1125_v17 = vld [vmem:[%s1397_s1 + $0x220] sm:$0xff]  }
  0x18   :  { %942 = vmatprep.subr.bf16.mxu0 %v1073_v24  ;;  %v853_v6 = vcombine.low %v20_v5, %v20_v5  ;;  %v854_v7 = vcombine.high %v20_v5, %v20_v5  ;;  %v1118_v8 = vld [vmem:[%s1397_s1 + $0x1b8] sm:$0xff]   ;;  %v1123_v15 = vld [vmem:[%s1397_s1 + $0x210] sm:$0xff]   ;;  %v1126_v18 = vld [vmem:[%s1397_s1 + $0x228] sm:$0xff]  }
  0x19   :  { %963 = vmatpush3.bf16.msra.mxu1 %v1072_v23  ;;  %v21_v10 = vld [vmem:[%s1398_s0 + $0x18] sm:$0xff]  ;;  %v1127_v19 = vld [vmem:[%s1397_s1 + $0x230] sm:$0xff]   ;;  %v1129_v21 = vld [vmem:[%s1398_s0 + $0x20] ss:$0 sps:$4 sm:$0xff]  }
  0x1a   :  { %964 = vmatprep.subr.bf16.mxu1 %v1075_v26  ;;  %v855_v11 = vcombine.low %v21_v10, %v21_v10  ;;  %v856_v12 = vcombine.high %v21_v10, %v21_v10  ;;  %v1124_v16 = vld [vmem:[%s1397_s1 + $0x218] sm:$0xff]   ;;  %v848_v23 = vld [vmem:[%s1399_s2] ss:$0 sm:$0xff] }
  0x1b   :  { %943 = vmatpush3.bf16.msra.mxu0 %v1074_v25  ;;  %v1128_v20 = vld [vmem:[%s1397_s1 + $0x238] sm:$0xff]  }
  0x1c   :  { %944 = vmatprep.subr.bf16.mxu0 %v1077_v28 }
  0x1d   :  { %965 = vmatpush3.bf16.msra.mxu1 %v1076_v27 }
  0x1e   :  { %966 = vmatprep.subr.bf16.mxu1 %v1079_v30 }
  0x1f   :  { %945 = vmatpush3.bf16.msra.mxu0 %v1078_v29 }
  0x20   :  { %974 = vmatprep.subr.bf16.mxu0 %v1083_v35 }
  0x21   :  { %967 = vmatpush3.bf16.msra.mxu1 %v1082_v34 }
  0x22   :  { %671 = vmatmul.mubr.bf16.vlgmr.msra.gmra.mrb[0].mxu0 %v849_v32  ;;  %996 = vmatprep.subr.bf16.mxu1 %v1087_v40 }
  0x23   :  { %975 = vmatpush3.bf16.msra.mxu0 %v1086_v39  ;;  %750 = vmatprep.mubr.bf16.mxu0 %v854_v7 }
  0x24   :  { %711 = vmatmul.mubr.bf16.vlgmr.msra.gmra.mrb[0].mxu1 %v851_v37  ;;  %976 = vmatprep.subr.bf16.mxu0 %v1089_v42 }
  0x25   :  { %997 = vmatpush3.bf16.msra.mxu1 %v1088_v41  ;;  %790 = vmatprep.mubr.bf16.mxu1 %v856_v12 }
  0x26   :  { %998 = vmatprep.subr.bf16.mxu1 %v1091_v44 }
  0x27   :  { %977 = vmatpush3.bf16.msra.mxu0 %v1090_v43 }
  0x28   :  { %978 = vmatprep.subr.bf16.mxu0 %v1093_v46 }
  0x29   :  { %999 = vmatpush3.bf16.msra.mxu1 %v1092_v45 }
  0x2a   :  { %1000 = vmatprep.subr.bf16.mxu1 %v1095_v48 }
  0x2b   :  { %979 = vmatpush3.bf16.msra.mxu0 %v1094_v47  ;;  %v838_v47 = vld [vmem:[%s1400_s3] sm:$0xf] }
  0x2c   :  { %980 = vmatprep.subr.bf16.mxu0 %v1097_v50  ;;  %v839_v48 = vunpack.c.l.bf16 %v838_v47 }
  0x2d   :  { %1001 = vmatpush3.bf16.msra.mxu1 %v1096_v49 }
  0x2e   :  { %1002 = vmatprep.subr.bf16.mxu1 %v1099_v52 }
  0x2f   :  { %981 = vmatpush3.bf16.msra.mxu0 %v1098_v51 }
  0x30   :  { %982 = vmatprep.subr.bf16.mxu0 %v1101_v54 }
  0x31   :  { %1003 = vmatpush3.bf16.msra.mxu1 %v1100_v53 }
  0x32   :  { %1004 = vmatprep.subr.bf16.mxu1 %v1103_v56 }
  0x33   :  { %983 = vmatpush3.bf16.msra.mxu0 %v1102_v55 }
  0x34   :  { %984 = vmatprep.subr.bf16.mxu0 %v1105_v58 }
  0x35   :  { %1005 = vmatpush3.bf16.msra.mxu1 %v1104_v57 }
  0x36   :  { %1006 = vmatprep.subr.bf16.mxu1 %v1107_v60 }
  0x37   :  { %985 = vmatpush3.bf16.msra.mxu0 %v1106_v59 }
  0x38   :  { %986 = vmatprep.subr.bf16.mxu0 %v1109_v62 }
  0x39   :  { %1007 = vmatpush3.bf16.msra.mxu1 %v1108_v61 }
  0x3a   :  { %1008 = vmatprep.subr.bf16.mxu1 %v1111_v0 }
  0x3b   :  { %987 = vmatpush3.bf16.msra.mxu0 %v1110_v63 }
  0x3c   :  { %988 = vmatprep.subr.bf16.mxu0 %v1113_v2 }
  0x3d   :  { %1009 = vmatpush3.bf16.msra.mxu1 %v1112_v1 }
  0x3e   :  { %1010 = vmatprep.subr.bf16.mxu1 %v1115_v4 }
  0x3f   :  { %989 = vmatpush3.bf16.msra.mxu0 %v1114_v3 }
  0x40   :  { %1027 = vmatprep.subr.bf16.mxu0 %v1130_v9 }
  0x41   :  { %1011 = vmatpush3.bf16.msra.mxu1 %v1118_v8 }
  0x42   :  { %751 = vmatmul.mubr.bf16.vlgmr.msra.gmra.mrb[4].mxu0 %v853_v6 }
  0x43   :  { %1028 = vmatpush3.bf16.msra.mxu0 %v1121_v13  ;;  %1043 = vmatprep.mubr.msk.bf16.mxu0 %vm1131_vm0, %v1130_v9 }
  0x44   :  { %791 = vmatmul.mubr.bf16.vlgmr.msra.gmra.mrb[4].mxu1 %v855_v11  ;;  %1029 = vmatprep.subr.bf16.mxu0 %v1130_v9 }
  0x47   :  { %1030 = vmatpush3.bf16.msra.mxu0 %v1122_v14 }
  0x48   :  { %1031 = vmatprep.subr.bf16.mxu0 %v1130_v9 }
  0x4b   :  { %1032 = vmatpush3.bf16.msra.mxu0 %v1123_v15 }
  0x4c   :  { %1033 = vmatprep.subr.bf16.mxu0 %v1130_v9 }
  0x4f   :  { %1034 = vmatpush3.bf16.msra.mxu0 %v1124_v16 }
  0x50   :  { %1035 = vmatprep.subr.bf16.mxu0 %v1130_v9 }
  0x53   :  { %1036 = vmatpush3.bf16.msra.mxu0 %v1125_v17 }
  0x54   :  { %1037 = vmatprep.subr.bf16.mxu0 %v1130_v9 }
  0x57   :  { %1038 = vmatpush3.bf16.msra.mxu0 %v1126_v18 }
  0x58   :  { %1039 = vmatprep.subr.bf16.mxu0 %v1130_v9 }
  0x5b   :  { %1040 = vmatpush3.bf16.msra.mxu0 %v1127_v19 }
  0x5c   :  { %1041 = vmatprep.subr.bf16.mxu0 %v1130_v9 }
  0x5f   :  { %1042 = vmatpush3.bf16.msra.mxu0 %v1128_v20 }
  0x62   :  { %1044 = vmatmul.mubr.bf16.vlgmr.msra.gmra.mrb[8].mxu0 %v1129_v21 }
  0xf5   :  { %v946_v22 = vpop.f32.mrb[0].mxu0 }
  0xf6   :  { %v947_v24 = vpop.f32.mrb[1].mxu0 }
  0xf7   :  { %v948_v25 = vadd.f32 %v947_v24, %v946_v22  ;;  %v949_v26 = vpop.f32.mrb[2].mxu0  ;;  %v968_v27 = vpop.f32.mrb[0].mxu1 }
  0xf8   :  { %v950_v28 = vpop.f32.mrb[3].mxu0  ;;  %v969_v29 = vpop.f32.mrb[1].mxu1 }
  0xf9   :  { %v673_v30 = vadd.f32 %v948_v25, %v848_v23  ;;  %v970_v31 = vadd.f32 %v969_v29, %v968_v27  ;;  %v971_v32 = vpop.f32.mrb[2].mxu1 }
  0xfa   :  { %v972_v33 = vpop.f32.mrb[3].mxu1 }
  0xfb   :  { %v713_v34 = vadd.f32 %v970_v31, %v673_v30 }
 0x115   :  { %v990_v35 = vpop.f32.mrb[4].mxu0 }
 0x116   :  { %v991_v36 = vpop.f32.mrb[5].mxu0 }
 0x117   :  { %v992_v37 = vadd.f32 %v991_v36, %v990_v35  ;;  %v993_v38 = vpop.f32.mrb[6].mxu0  ;;  %v1012_v39 = vpop.f32.mrb[4].mxu1 }
 0x118   :  { %v994_v40 = vpop.f32.mrb[7].mxu0  ;;  %v1013_v41 = vpop.f32.mrb[5].mxu1 }
 0x119   :  { %v753_v42 = vadd.f32 %v992_v37, %v713_v34  ;;  %v1014_v43 = vadd.f32 %v1013_v41, %v1012_v39  ;;  %v1015_v44 = vpop.f32.mrb[6].mxu1 }
 0x11a   :  { %v1016_v45 = vpop.f32.mrb[7].mxu1 }
 0x11b   :  { %v793_v46 = vadd.f32 %v1014_v43, %v753_v42 }
 0x135   :  { %v832_v49 = vpop.f32.mrb[8].mxu0 }
 0x136   :  { %v833_v50 = vadd.f32 %v832_v49, %v793_v46  ;;  %v1045_v51 = vpop.f32.mrb[9].mxu0 }
 0x137   :  { %v835_v52 = vpop.f32.mrb[10].mxu0 }
 0x138   :  { %v840_v53 = vadd.f32 %v839_v48, %v833_v50  ;;  %v1046_v54 = vpop.f32.mrb[11].mxu0 }
 0x13a   :  { %v841_v55 = vmax.f32 %v840_v53, 0.0 }
 0x13c   :  { %v842_v56 = vpack.c.bf16 %v841_v55, %v841_v55 }
 0x13e   :  { %843 = vst [vmem:[%s1401_s4] sm:$0xf] %v842_v56 }

// kernel: _lambda_.19
= control target key start
LH: loop header
LB: loop body
LE: loop exit
PB: predicated region body
PF: predicated region fallthrough
CT: control target
= control target key end

     0   :  { %s10728_s0 = inlined_call_operand.vmem [shape: bf16[2,512], index: 0, kind: input, shape index: {}]   ;;  %s10729_s1 = inlined_call_operand.vmem [shape: bf16[2,128], index: 1, kind: input, shape index: {}]   ;;  %s10730_s2 = inlined_call_operand.vmem [shape: bf16[512,256], index: 2, kind: input, shape index: {}]   ;;  %s10731_s3 = inlined_call_operand.vmem [shape: f32[1,256], index: 3, kind: input, shape index: {}]   ;;  %s10732_s4 = inlined_call_operand.vmem [shape: bf16[128,256], index: 4, kind: input, shape index: {}]   ;;  %s10733_s5 = inlined_call_operand.vmem [shape: f32[1,256], index: 5, kind: input, shape index: {}]   ;;  %s10734_s6 = inlined_call_operand.vmem [shape: bf16[256,256], index: 6, kind: input, shape index: {}]   ;;  %s10735_s7 = inlined_call_operand.vmem [shape: f32[1,256], index: 7, kind: input, shape index: {}]   ;;  %s10736_s8 = inlined_call_operand.vmem [shape: bf16[256,256], index: 8, kind: input, shape index: {}]   ;;  %s10737_s9 = inlined_call_operand.vmem [shape: f32[1,256], index: 9, kind: input, shape index: {}]   ;;  %s10738_s10 = inlined_call_operand.vmem [shape: bf16[256,256], index: 10, kind: input, shape index: {}]   ;;  %s10739_s11 = inlined_call_operand.vmem [shape: f32[1,256], index: 11, kind: input, shape index: {}]   ;;  %s10740_s12 = inlined_call_operand.vmem [shape: bf16[256,512], index: 12, kind: input, shape index: {}]   ;;  %s10741_s13 = inlined_call_operand.vmem [shape: f32[1,512], index: 13, kind: input, shape index: {}]   ;;  %s10742_s14 = inlined_call_operand.vmem [shape: bf16[256,512], index: 14, kind: input, shape index: {}]   ;;  %s10743_s15 = inlined_call_operand.vmem [shape: f32[1,512], index: 15, kind: input, shape index: {}]   ;;  %s10744_s16 = inlined_call_operand.vmem [shape: bf16[512,512], index: 16, kind: input, shape index: {}]   ;;  %s10745_s17 = inlined_call_operand.vmem [shape: f32[1,512], index: 17, kind: input, shape index: {}]   ;;  %s10746_s18 = inlined_call_operand.vmem [shape: bf16[512,512], index: 18, kind: input, shape index: {}]   ;;  %s10747_s19 = inlined_call_operand.vmem [shape: f32[1,512], index: 19, kind: input, shape index: {}]   ;;  %s10748_s20 = inlined_call_operand.vmem [shape: bf16[512,512], index: 20, kind: input, shape index: {}]   ;;  %s10749_s21 = inlined_call_operand.vmem [shape: f32[1,512], index: 21, kind: input, shape index: {}]   ;;  %s10750_s22 = inlined_call_operand.vmem [shape: bf16[512,4], index: 22, kind: input, shape index: {}]   ;;  %s10751_s23 = inlined_call_operand.vmem [shape: bf16[512,4], index: 23, kind: input, shape index: {}]   ;;  %s10752_s24 = inlined_call_operand.vmem [shape: f32[1,4], index: 24, kind: input, shape index: {}]   ;;  %s10753_s25 = inlined_call_operand.vmem [shape: f32[1,4], index: 25, kind: input, shape index: {}]   ;;  %s10754_s26 = inlined_call_operand.vmem [shape: f32[2,4], index: 26, kind: output, shape index: {0}]   ;;  %s10755_s27 = inlined_call_operand.vmem [shape: f32[2,4], index: 27, kind: output, shape index: {1}]   ;;  %s10756_s28 = inlined_call_operand.hbm [shape: f32[2,4], index: 28, kind: output, shape index: {2}]  }
   0x1   :  { %10763 = sst [smem:[#allocation5_spill]] %s10728_s0 }
   0x2   :  { %10764 = sst [smem:[#allocation6_spill]] %s10729_s1 }
   0x3   :  { %10765 = sst [smem:[#allocation7_spill]] %s10730_s2 }
   0x4   :  { %10766 = sst [smem:[#allocation8_spill]] %s10731_s3 }
   0x5   :  { %10767 = sst [smem:[#allocation9_spill]] %s10732_s4 }
   0x6   :  { %10768 = sst [smem:[#allocation10_spill]] %s10733_s5 }
   0x7   :  { %10769 = sst [smem:[#allocation11_spill]] %s10734_s6 }
   0x8   :  { %10770 = sst [smem:[#allocation12_spill]] %s10735_s7 }
   0x9   :  { %10771 = sst [smem:[#allocation13_spill]] %s10736_s8 }
   0xa   :  { %10772 = sst [smem:[#allocation14_spill]] %s10737_s9 }
   0xb   :  { %10773 = sst [smem:[#allocation15_spill]] %s10738_s10 }
   0xc   :  { %10774 = sst [smem:[#allocation16_spill]] %s10739_s11 }
   0xd   :  { %10775 = sst [smem:[#allocation17_spill]] %s10740_s12 }
   0xe   :  { %s10776_s9 = sld [smem:[#allocation7_spill]]  ;;  %v8123_v5 = vmov 0   ;;  %v155_v10 = vlaneseq  ;;  %v8124_v11 = vmov 1966171168   ;;  %s10777_s8 = sld [smem:[#allocation5_spill]] }
   0xf   :  { %739 = vmatprep.mubr.bf16.mxu1 %v8123_v5  ;;  %v175_v12 = vunpack.c.l.s4 %v8124_v11  ;;  %s10778_s4 = sld [smem:[#allocation9_spill]]  ;;  %s10779_s7 = sld [smem:[#allocation11_spill]] }
  0x10   :  { %v8304_v15 = vshrl.u32 %v155_v10, 7  ;;  %s10781_s11 = sld [smem:[#allocation13_spill]] }
  0x11   :  { %v176_v16 = vunpack.c.0.s8 %v175_v12 }
  0x13   :  { %v8313_v19 = vsub.s32 %v176_v16, %v8304_v15 }
  0x14   :  { %v6997_v0 = vld [vmem:[%s10776_s9 + $0x4] ss:$8 sps:$4 sm:$0xff]   ;;  %v6999_v1 = vld [vmem:[%s10776_s9] ss:$8 sps:$4 sm:$0xff]   ;;  %v7000_v2 = vld [vmem:[%s10776_s9 + $0x14] ss:$8 sps:$4 sm:$0xff]  }
  0x15   :  { %514 = vmatprep.subr.bf16.mxu0 %v6997_v0  ;;  %v7002_v3 = vld [vmem:[%s10776_s9 + $0x10] ss:$8 sps:$4 sm:$0xff]   ;;  %v7003_v4 = vld [vmem:[%s10776_s9 + $0x24] ss:$8 sps:$4 sm:$0xff]   ;;  %v7005_v6 = vld [vmem:[%s10776_s9 + $0x20] ss:$8 sps:$4 sm:$0xff]  }
  0x16   :  { %515 = vmatpush1.bf16.msra.mxu0 %v6999_v1  ;;  %v7006_v7 = vld [vmem:[%s10776_s9 + $0x34] ss:$8 sps:$4 sm:$0xff]   ;;  %v7008_v8 = vld [vmem:[%s10776_s9 + $0x30] ss:$8 sps:$4 sm:$0xff]   ;;  %v7009_v9 = vld [vmem:[%s10776_s9 + $0x44] ss:$8 sps:$4 sm:$0xff]  }
  0x17   :  { %516 = vmatprep.subr.bf16.mxu0 %v7000_v2  ;;  %v7011_v13 = vld [vmem:[%s10776_s9 + $0x40] ss:$8 sps:$4 sm:$0xff]   ;;  %v7012_v14 = vld [vmem:[%s10776_s9 + $0x54] ss:$8 sps:$4 sm:$0xff]   ;;  %v7014_v17 = vld [vmem:[%s10776_s9 + $0x50] ss:$8 sps:$4 sm:$0xff]  }
  0x18   :  { %v7015_v18 = vld [vmem:[%s10776_s9 + $0x64] ss:$8 sps:$4 sm:$0xff]   ;;  %v8318_v20 = vld.sshfl [vmem:[%s10777_s8] sm:$0x33 pattern:$0x75316420] }
  0x19   :  { %v173_v21 = vcombine.high %v8318_v20, %v8318_v20  ;;  %v7017_v22 = vld [vmem:[%s10776_s9 + $0x60] ss:$8 sps:$4 sm:$0xff]   ;;  %v7018_v23 = vld [vmem:[%s10776_s9 + $0x74] ss:$8 sps:$4 sm:$0xff]   ;;  %v7020_v25 = vld [vmem:[%s10776_s9 + $0x70] ss:$8 sps:$4 sm:$0xff]   ;;  %v8421_v54 = vrot.slane %v8318_v20, %v8313_v19 }
  0x1a   :  { %517 = vmatpush1.bf16.msra.mxu0 %v7002_v3  ;;  %v7021_v26 = vld [vmem:[%s10776_s9 + $0x84] ss:$8 sps:$4 sm:$0xff]   ;;  %v7023_v27 = vld [vmem:[%s10776_s9 + $0x80] ss:$8 sps:$4 sm:$0xff]   ;;  %v7024_v28 = vld [vmem:[%s10776_s9 + $0x94] ss:$8 sps:$4 sm:$0xff]  }
  0x1b   :  { %518 = vmatprep.subr.bf16.mxu0 %v7003_v4  ;;  %v8329_v24 = vrot.slane %v173_v21, %v8313_v19  ;;  %v7026_v29 = vld [vmem:[%s10776_s9 + $0x90] ss:$8 sps:$4 sm:$0xff]   ;;  %v7027_v30 = vld [vmem:[%s10776_s9 + $0xa4] ss:$8 sps:$4 sm:$0xff]   ;;  %v7029_v31 = vld [vmem:[%s10776_s9 + $0xa0] ss:$8 sps:$4 sm:$0xff]  }
  0x1c   :  { %v7030_v32 = vld [vmem:[%s10776_s9 + $0xb4] ss:$8 sps:$4 sm:$0xff]   ;;  %v7032_v33 = vld [vmem:[%s10776_s9 + $0xb0] ss:$8 sps:$4 sm:$0xff]   ;;  %v7033_v34 = vld [vmem:[%s10776_s9 + $0xc4] ss:$8 sps:$4 sm:$0xff]  }
  0x1d   :  { %546 = vmatprep.mubr.bf16.mxu0 %v8329_v24  ;;  %v7093_v35 = vld [vmem:[%s10778_s4 + $0x4] ss:$8 sps:$4 sm:$0xff]   ;;  %v7095_v36 = vld [vmem:[%s10778_s4] ss:$8 sps:$4 sm:$0xff]   ;;  %v7096_v37 = vld [vmem:[%s10778_s4 + $0x14] ss:$8 sps:$4 sm:$0xff]   ;;  %v189_v55 = vcombine.high %v8329_v24, %v8329_v24 }
  0x1e   :  { %519 = vmatpush1.bf16.msra.mxu0 %v7005_v6  ;;  %v7035_v38 = vld [vmem:[%s10776_s9 + $0xc0] ss:$8 sps:$4 sm:$0xff]   ;;  %707 = vmatprep.subr.bf16.mxu1 %v7093_v35  ;;  %v7098_v39 = vld [vmem:[%s10778_s4 + $0x10] ss:$8 sps:$4 sm:$0xff]   ;;  %v7036_v40 = vld [vmem:[%s10776_s9 + $0xd4] ss:$8 sps:$4 sm:$0xff]  }
  0x1f   :  { %520 = vmatprep.subr.bf16.mxu0 %v7006_v7  ;;  %708 = vmatpush1.bf16.msra.mxu1 %v7095_v36  ;;  %v7099_v41 = vld [vmem:[%s10778_s4 + $0x24] ss:$8 sps:$4 sm:$0xff]   ;;  %v7038_v42 = vld [vmem:[%s10776_s9 + $0xd0] ss:$8 sps:$4 sm:$0xff]   ;;  %v7101_v43 = vld [vmem:[%s10778_s4 + $0x20] ss:$8 sps:$4 sm:$0xff]  }
  0x20   :  { %709 = vmatprep.subr.bf16.mxu1 %v7096_v37  ;;  %v7039_v44 = vld [vmem:[%s10776_s9 + $0xe4] ss:$8 sps:$4 sm:$0xff]   ;;  %v7102_v45 = vld [vmem:[%s10778_s4 + $0x34] ss:$8 sps:$4 sm:$0xff]   ;;  %v7041_v46 = vld [vmem:[%s10776_s9 + $0xe0] ss:$8 sps:$4 sm:$0xff]  }
  0x21   :  { %v7104_v47 = vld [vmem:[%s10778_s4 + $0x30] ss:$8 sps:$4 sm:$0xff]   ;;  %v7042_v48 = vld [vmem:[%s10776_s9 + $0xf4] ss:$8 sps:$4 sm:$0xff]   ;;  %v7105_v49 = vld [vmem:[%s10778_s4 + $0x44] ss:$8 sps:$4 sm:$0xff]  }
  0x22   :  { %521 = vmatpush1.bf16.msra.mxu0 %v7008_v8  ;;  %v7044_v50 = vld [vmem:[%s10776_s9 + $0xf0] ss:$8 sps:$4 sm:$0xff]   ;;  %v7107_v51 = vld [vmem:[%s10778_s4 + $0x40] ss:$8 sps:$4 sm:$0xff]   ;;  %v7047_v52 = vld [vmem:[%s10776_s9 + $0x104] ss:$8 sps:$4 sm:$0xff]  }
  0x23   :  { %522 = vmatprep.subr.bf16.mxu0 %v7009_v9  ;;  %710 = vmatpush1.bf16.msra.mxu1 %v7098_v39  ;;  %v7108_v53 = vld [vmem:[%s10778_s4 + $0x54] ss:$8 sps:$4 sm:$0xff]   ;;  %v7045_v56 = vld [vmem:[%s10776_s9 + $0x100] ss:$8 sps:$4 sm:$0xff]   ;;  %v7110_v58 = vld [vmem:[%s10778_s4 + $0x50] ss:$8 sps:$4 sm:$0xff]  }
  0x24   :  { %711 = vmatprep.subr.bf16.mxu1 %v7099_v41  ;;  %v7050_v57 = vld [vmem:[%s10776_s9 + $0x114] ss:$8 sps:$4 sm:$0xff]   ;;  %v7111_v59 = vld [vmem:[%s10778_s4 + $0x64] ss:$8 sps:$4 sm:$0xff]   ;;  %v7048_v60 = vld [vmem:[%s10776_s9 + $0x110] ss:$8 sps:$4 sm:$0xff]  }
  0x25   :  { %v7053_v61 = vld [vmem:[%s10776_s9 + $0x124] ss:$8 sps:$4 sm:$0xff]   ;;  %v7113_v62 = vld [vmem:[%s10778_s4 + $0x60] ss:$8 sps:$4 sm:$0xff]   ;;  %v7114_v63 = vld [vmem:[%s10778_s4 + $0x74] ss:$8 sps:$4 sm:$0xff]  }
  0x26   :  { %523 = vmatpush1.bf16.msra.mxu0 %v7011_v13  ;;  %v7051_v0 = vld [vmem:[%s10776_s9 + $0x120] ss:$8 sps:$4 sm:$0xff]   ;;  %v7056_v1 = vld [vmem:[%s10776_s9 + $0x134] ss:$8 sps:$4 sm:$0xff]   ;;  %v7116_v2 = vld [vmem:[%s10778_s4 + $0x70] ss:$8 sps:$4 sm:$0xff]  }
  0x27   :  { %524 = vmatprep.subr.bf16.mxu0 %v7012_v14  ;;  %712 = vmatpush1.bf16.msra.mxu1 %v7101_v43  ;;  %v7054_v3 = vld [vmem:[%s10776_s9 + $0x130] ss:$8 sps:$4 sm:$0xff]   ;;  %v7119_v4 = vld [vmem:[%s10779_s7 + $0x4] ss:$8 sps:$4 sm:$0xff]   ;;  %v7117_v6 = vld [vmem:[%s10779_s7] ss:$8 sps:$4 sm:$0xff]  }
  0x28   :  { %713 = vmatprep.subr.bf16.mxu1 %v7102_v45  ;;  %v7059_v5 = vld [vmem:[%s10776_s9 + $0x144] ss:$8 sps:$4 sm:$0xff]   ;;  %s10780_s4 = sld [smem:[#allocation6_spill]]  ;;  %v7122_v8 = vld [vmem:[%s10779_s7 + $0x14] ss:$8 sps:$4 sm:$0xff]  }
  0x29   :  { %v7057_v9 = vld [vmem:[%s10776_s9 + $0x140] ss:$8 sps:$4 sm:$0xff]   ;;  %v7062_v10 = vld [vmem:[%s10776_s9 + $0x154] ss:$8 sps:$4 sm:$0xff]   ;;  %v7120_v11 = vld [vmem:[%s10779_s7 + $0x10] ss:$8 sps:$4 sm:$0xff]  }
  0x2a   :  { %525 = vmatpush1.bf16.msra.mxu0 %v7014_v17  ;;  %v7125_v12 = vld [vmem:[%s10779_s7 + $0x24] ss:$8 sps:$4 sm:$0xff]   ;;  %v7060_v13 = vld [vmem:[%s10776_s9 + $0x150] ss:$8 sps:$4 sm:$0xff]   ;;  %v7123_v16 = vld [vmem:[%s10779_s7 + $0x20] ss:$8 sps:$4 sm:$0xff]  }
  0x2b   :  { %526 = vmatprep.subr.bf16.mxu0 %v7015_v18  ;;  %714 = vmatpush1.bf16.msra.mxu1 %v7104_v47  ;;  %v7065_v14 = vld [vmem:[%s10776_s9 + $0x164] ss:$8 sps:$4 sm:$0xff]   ;;  %v7128_v17 = vld [vmem:[%s10779_s7 + $0x34] ss:$8 sps:$4 sm:$0xff]   ;;  %v7063_v18 = vld [vmem:[%s10776_s9 + $0x160] ss:$8 sps:$4 sm:$0xff]  }
  0x2c   :  { %715 = vmatprep.subr.bf16.mxu1 %v7105_v49  ;;  %v7068_v19 = vld [vmem:[%s10776_s9 + $0x174] ss:$8 sps:$4 sm:$0xff]   ;;  %v7126_v20 = vld [vmem:[%s10779_s7 + $0x30] ss:$8 sps:$4 sm:$0xff]   ;;  %v7131_v21 = vld [vmem:[%s10779_s7 + $0x44] ss:$8 sps:$4 sm:$0xff]  }
  0x2d   :  { %v7129_v24 = vld [vmem:[%s10779_s7 + $0x40] ss:$8 sps:$4 sm:$0xff]   ;;  %v7080_v35 = vld [vmem:[%s10776_s9 + $0x1b4] ss:$8 sps:$4 sm:$0xff]   ;;  %v7138_v36 = vld [vmem:[%s10779_s7 + $0x70] ss:$8 sps:$4 sm:$0xff]  }
  0x2e   :  { %527 = vmatpush1.bf16.msra.mxu0 %v7017_v22  ;;  %v598_v7 = vld [vmem:[%s10780_s4] sm:$0x1]  ;;  %v7066_v22 = vld [vmem:[%s10776_s9 + $0x170] ss:$8 sps:$4 sm:$0xff]   ;;  %v7143_v37 = vld [vmem:[%s10779_s7 + $0x84] ss:$8 sps:$4 sm:$0xff]  }
  0x2f   :  { %528 = vmatprep.subr.bf16.mxu0 %v7018_v23  ;;  %716 = vmatpush1.bf16.msra.mxu1 %v7107_v51  ;;  %v7071_v23 = vld [vmem:[%s10776_s9 + $0x184] ss:$8 sps:$4 sm:$0xff]   ;;  %v7146_v41 = vld [vmem:[%s10779_s7 + $0x94] ss:$8 sps:$4 sm:$0xff]  }
  0x30   :  { %717 = vmatprep.subr.bf16.mxu1 %v7108_v53  ;;  %v7083_v39 = vld [vmem:[%s10776_s9 + $0x1c4] ss:$8 sps:$4 sm:$0xff]   ;;  %v7086_v43 = vld [vmem:[%s10776_s9 + $0x1d4] ss:$8 sps:$4 sm:$0xff]  }
  0x31   :  { %v7149_v45 = vld [vmem:[%s10779_s7 + $0xa4] ss:$8 sps:$4 sm:$0xff]   ;;  %v7152_v49 = vld [vmem:[%s10779_s7 + $0xb4] ss:$8 sps:$4 sm:$0xff]  }
  0x32   :  { %529 = vmatpush1.bf16.msra.mxu0 %v7020_v25  ;;  %v7134_v25 = vld [vmem:[%s10779_s7 + $0x54] ss:$8 sps:$4 sm:$0xff]   ;;  %v7089_v47 = vld [vmem:[%s10776_s9 + $0x1e4] ss:$8 sps:$4 sm:$0xff]  }
  0x33   :  { %530 = vmatprep.subr.bf16.mxu0 %v7021_v26  ;;  %718 = vmatpush1.bf16.msra.mxu1 %v7110_v58  ;;  %v7069_v26 = vld [vmem:[%s10776_s9 + $0x180] ss:$8 sps:$4 sm:$0xff]   ;;  %v7092_v51 = vld [vmem:[%s10776_s9 + $0x1f4] ss:$8 sps:$4 sm:$0xff]   ;;  %v7155_v53 = vld [vmem:[%s10779_s7 + $0xc4] ss:$8 sps:$4 sm:$0xff]   ;;  %v188_v58 = vcombine.high %v8421_v54, %v8421_v54 }
  0x34   :  { %719 = vmatprep.subr.bf16.mxu1 %v7111_v59  ;;  %v7156_v59 = vld [vmem:[%s10779_s7 + $0xd0] ss:$8 sps:$4 sm:$0xff]  }
  0x36   :  { %531 = vmatpush1.bf16.msra.mxu0 %v7023_v27  ;;  %v7074_v27 = vld [vmem:[%s10776_s9 + $0x194] ss:$8 sps:$4 sm:$0xff]  }
  0x37   :  { %532 = vmatprep.subr.bf16.mxu0 %v7024_v28  ;;  %720 = vmatpush1.bf16.msra.mxu1 %v7113_v62  ;;  %v7132_v28 = vld [vmem:[%s10779_s7 + $0x50] ss:$8 sps:$4 sm:$0xff]  }
  0x38   :  { %721 = vmatprep.subr.bf16.mxu1 %v7114_v63  ;;  %v7162_v62 = vld [vmem:[%s10779_s7 + $0xf0] ss:$8 sps:$4 sm:$0xff]   ;;  %v7167_v63 = vld [vmem:[%s10781_s11 + $0x4] ss:$8 sps:$4 sm:$0xff]  }
  0x3a   :  { %533 = vmatpush1.bf16.msra.mxu0 %v7026_v29  ;;  %v7137_v29 = vld [vmem:[%s10779_s7 + $0x64] ss:$8 sps:$4 sm:$0xff]  }
  0x3b   :  { %534 = vmatprep.subr.bf16.mxu0 %v7027_v30  ;;  %722 = vmatpush1.bf16.msra.mxu1 %v7116_v2  ;;  %v7072_v30 = vld [vmem:[%s10776_s9 + $0x190] ss:$8 sps:$4 sm:$0xff]  }
  0x3c   :  { %954 = vmatprep.subr.bf16.mxu1 %v7119_v4 }
  0x3e   :  { %535 = vmatpush1.bf16.msra.mxu0 %v7029_v31  ;;  %740 = vmatmul.mubr.bf16.vlgmr.msra.gmra.mrb[0].mxu1 %v598_v7  ;;  %v7077_v31 = vld [vmem:[%s10776_s9 + $0x1a4] ss:$8 sps:$4 sm:$0xff]  }
  0x3f   :  { %536 = vmatprep.subr.bf16.mxu0 %v7030_v32  ;;  %955 = vmatpush1.bf16.msra.mxu1 %v7117_v6  ;;  %v7135_v32 = vld [vmem:[%s10779_s7 + $0x60] ss:$8 sps:$4 sm:$0xff]  }
  0x40   :  { %956 = vmatprep.subr.bf16.mxu1 %v7122_v8 }
  0x42   :  { %537 = vmatpush1.bf16.msra.mxu0 %v7032_v33  ;;  %v7140_v33 = vld [vmem:[%s10779_s7 + $0x74] ss:$8 sps:$4 sm:$0xff]  }
  0x43   :  { %538 = vmatprep.subr.bf16.mxu0 %v7033_v34  ;;  %957 = vmatpush1.bf16.msra.mxu1 %v7120_v11  ;;  %v7075_v34 = vld [vmem:[%s10776_s9 + $0x1a0] ss:$8 sps:$4 sm:$0xff]  }
  0x44   :  { %958 = vmatprep.subr.bf16.mxu1 %v7125_v12 }
  0x46   :  { %539 = vmatpush1.bf16.msra.mxu0 %v7035_v38  ;;  %v7078_v38 = vld [vmem:[%s10776_s9 + $0x1b0] ss:$8 sps:$4 sm:$0xff]  }
  0x47   :  { %540 = vmatprep.subr.bf16.mxu0 %v7036_v40  ;;  %959 = vmatpush1.bf16.msra.mxu1 %v7123_v16  ;;  %v7141_v40 = vld [vmem:[%s10779_s7 + $0x80] ss:$8 sps:$4 sm:$0xff]  }
  0x48   :  { %960 = vmatprep.subr.bf16.mxu1 %v7128_v17 }
  0x4a   :  { %541 = vmatpush1.bf16.msra.mxu0 %v7038_v42  ;;  %v7081_v42 = vld [vmem:[%s10776_s9 + $0x1c0] ss:$8 sps:$4 sm:$0xff]  }
  0x4b   :  { %542 = vmatprep.subr.bf16.mxu0 %v7039_v44  ;;  %961 = vmatpush1.bf16.msra.mxu1 %v7126_v20  ;;  %v7144_v44 = vld [vmem:[%s10779_s7 + $0x90] ss:$8 sps:$4 sm:$0xff]  }
  0x4c   :  { %962 = vmatprep.subr.bf16.mxu1 %v7131_v21 }
  0x4e   :  { %543 = vmatpush1.bf16.msra.mxu0 %v7041_v46  ;;  %v7084_v46 = vld [vmem:[%s10776_s9 + $0x1d0] ss:$8 sps:$4 sm:$0xff]  }
  0x4f   :  { %544 = vmatprep.subr.bf16.mxu0 %v7042_v48  ;;  %963 = vmatpush1.bf16.msra.mxu1 %v7129_v24  ;;  %v7147_v48 = vld [vmem:[%s10779_s7 + $0xa0] ss:$8 sps:$4 sm:$0xff]  }
  0x50   :  { %964 = vmatprep.subr.bf16.mxu1 %v7134_v25 }
  0x52   :  { %545 = vmatpush1.bf16.msra.mxu0 %v7044_v50  ;;  %v7087_v50 = vld [vmem:[%s10776_s9 + $0x1e0] ss:$8 sps:$4 sm:$0xff]  }
  0x53   :  { %555 = vmatprep.subr.bf16.mxu0 %v7047_v52  ;;  %965 = vmatpush1.bf16.msra.mxu1 %v7132_v28  ;;  %v7150_v52 = vld [vmem:[%s10779_s7 + $0xb0] ss:$8 sps:$4 sm:$0xff]  }
  0x54   :  { %966 = vmatprep.subr.bf16.mxu1 %v7137_v29 }
  0x55   :  { %547 = vmatmul.mubr.bf16.vlgmr.msra.gmra.mrb[0].mxu0 %v8421_v54  ;;  %v7164_v54 = vld [vmem:[%s10779_s7 + $0xf4] ss:$8 sps:$4 sm:$0xff]  }
  0x56   :  { %556 = vmatpush1.bf16.msra.mxu0 %v7045_v56  ;;  %587 = vmatprep.mubr.bf16.mxu0 %v189_v55  ;;  %v7090_v55 = vld [vmem:[%s10776_s9 + $0x1f0] ss:$8 sps:$4 sm:$0xff]   ;;  %v7153_v56 = vld [vmem:[%s10779_s7 + $0xc0] ss:$8 sps:$4 sm:$0xff]  }
  0x57   :  { %557 = vmatprep.subr.bf16.mxu0 %v7050_v57  ;;  %967 = vmatpush1.bf16.msra.mxu1 %v7135_v32  ;;  %v7158_v57 = vld [vmem:[%s10779_s7 + $0xd4] ss:$8 sps:$4 sm:$0xff]  }
  0x58   :  { %968 = vmatprep.subr.bf16.mxu1 %v7140_v33 }
  0x5a   :  { %558 = vmatpush1.bf16.msra.mxu0 %v7048_v60  ;;  %v7161_v60 = vld [vmem:[%s10779_s7 + $0xe4] ss:$8 sps:$4 sm:$0xff]  }
  0x5b   :  { %559 = vmatprep.subr.bf16.mxu0 %v7053_v61  ;;  %969 = vmatpush1.bf16.msra.mxu1 %v7138_v36  ;;  %v7159_v61 = vld [vmem:[%s10779_s7 + $0xe0] ss:$8 sps:$4 sm:$0xff]  }
  0x5c   :  { %970 = vmatprep.subr.bf16.mxu1 %v7143_v37 }
  0x5e   :  { %560 = vmatpush1.bf16.msra.mxu0 %v7051_v0 }
  0x5f   :  { %561 = vmatprep.subr.bf16.mxu0 %v7056_v1  ;;  %971 = vmatpush1.bf16.msra.mxu1 %v7141_v40 }
  0x60   :  { %972 = vmatprep.subr.bf16.mxu1 %v7146_v41 }
  0x62   :  { %562 = vmatpush1.bf16.msra.mxu0 %v7054_v3 }
  0x63   :  { %563 = vmatprep.subr.bf16.mxu0 %v7059_v5  ;;  %973 = vmatpush1.bf16.msra.mxu1 %v7144_v44 }
  0x64   :  { %974 = vmatprep.subr.bf16.mxu1 %v7149_v45 }
  0x66   :  { %564 = vmatpush1.bf16.msra.mxu0 %v7057_v9 }
  0x67   :  { %565 = vmatprep.subr.bf16.mxu0 %v7062_v10  ;;  %975 = vmatpush1.bf16.msra.mxu1 %v7147_v48 }
  0x68   :  { %976 = vmatprep.subr.bf16.mxu1 %v7152_v49 }
  0x6a   :  { %566 = vmatpush1.bf16.msra.mxu0 %v7060_v13 }
  0x6b   :  { %567 = vmatprep.subr.bf16.mxu0 %v7065_v14  ;;  %977 = vmatpush1.bf16.msra.mxu1 %v7150_v52 }
  0x6c   :  { %978 = vmatprep.subr.bf16.mxu1 %v7155_v53 }
  0x6e   :  { %568 = vmatpush1.bf16.msra.mxu0 %v7063_v18 }
  0x6f   :  { %569 = vmatprep.subr.bf16.mxu0 %v7068_v19  ;;  %979 = vmatpush1.bf16.msra.mxu1 %v7153_v56 }
  0x70   :  { %980 = vmatprep.subr.bf16.mxu1 %v7158_v57 }
  0x72   :  { %570 = vmatpush1.bf16.msra.mxu0 %v7066_v22 }
  0x73   :  { %571 = vmatprep.subr.bf16.mxu0 %v7071_v23  ;;  %981 = vmatpush1.bf16.msra.mxu1 %v7156_v59 }
  0x74   :  { %982 = vmatprep.subr.bf16.mxu1 %v7161_v60 }
  0x76   :  { %572 = vmatpush1.bf16.msra.mxu0 %v7069_v26 }
  0x77   :  { %573 = vmatprep.subr.bf16.mxu0 %v7074_v27  ;;  %983 = vmatpush1.bf16.msra.mxu1 %v7159_v61 }
  0x78   :  { %984 = vmatprep.subr.bf16.mxu1 %v7164_v54 }
  0x7a   :  { %574 = vmatpush1.bf16.msra.mxu0 %v7072_v30 }
  0x7b   :  { %575 = vmatprep.subr.bf16.mxu0 %v7077_v31  ;;  %985 = vmatpush1.bf16.msra.mxu1 %v7162_v62 }
  0x7c   :  { %1205 = vmatprep.subr.bf16.mxu1 %v7167_v63 }
  0x7e   :  { %576 = vmatpush1.bf16.msra.mxu0 %v7075_v34 }
  0x7f   :  { %577 = vmatprep.subr.bf16.mxu0 %v7080_v35 }
  0x82   :  { %578 = vmatpush1.bf16.msra.mxu0 %v7078_v38 }
  0x83   :  { %579 = vmatprep.subr.bf16.mxu0 %v7083_v39 }
  0x86   :  { %580 = vmatpush1.bf16.msra.mxu0 %v7081_v42 }
  0x87   :  { %581 = vmatprep.subr.bf16.mxu0 %v7086_v43 }
  0x8a   :  { %582 = vmatpush1.bf16.msra.mxu0 %v7084_v46 }
  0x8b   :  { %583 = vmatprep.subr.bf16.mxu0 %v7089_v47 }
  0x8e   :  { %584 = vmatpush1.bf16.msra.mxu0 %v7087_v50 }
  0x8f   :  { %585 = vmatprep.subr.bf16.mxu0 %v7092_v51 }
  0x92   :  { %586 = vmatpush1.bf16.msra.mxu0 %v7090_v55 }
  0x95   :  { %588 = vmatmul.mubr.bf16.vlgmr.msra.gmra.mrb[0].mxu0 %v188_v58 }
  0x96   :  { %34 = vsyncpa [#allocation3], 0  ;;  %v8639_v0 = vsub.s32 0, %v8304_v15  ;;  %v8642_v1 = vsub.s32 1, %v8304_v15  ;;  %s10782_s12 = sld [smem:[#allocation8_spill]]  ;;  %s10783_s6 = sld [smem:[#allocation15_spill]] }
  0x97   :  { %v7165_v14 = vld [vmem:[%s10781_s11] ss:$8 sps:$4 sm:$0xff]   ;;  %v7170_v17 = vld [vmem:[%s10781_s11 + $0x14] ss:$8 sps:$4 sm:$0xff]   ;;  %v7168_v18 = vld [vmem:[%s10781_s11 + $0x10] ss:$8 sps:$4 sm:$0xff]  }
  0x98   :  { %v7173_v19 = vld [vmem:[%s10781_s11 + $0x24] ss:$8 sps:$4 sm:$0xff]   ;;  %v7171_v20 = vld [vmem:[%s10781_s11 + $0x20] ss:$8 sps:$4 sm:$0xff]   ;;  %v7176_v21 = vld [vmem:[%s10781_s11 + $0x34] ss:$8 sps:$4 sm:$0xff]  }
  0x99   :  { %v7174_v22 = vld [vmem:[%s10781_s11 + $0x30] ss:$8 sps:$4 sm:$0xff]   ;;  %v7179_v23 = vld [vmem:[%s10781_s11 + $0x44] ss:$8 sps:$4 sm:$0xff]   ;;  %v7177_v24 = vld [vmem:[%s10781_s11 + $0x40] ss:$8 sps:$4 sm:$0xff]  }
  0x9a   :  { %v7182_v25 = vld [vmem:[%s10781_s11 + $0x54] ss:$8 sps:$4 sm:$0xff]   ;;  %v7180_v26 = vld [vmem:[%s10781_s11 + $0x50] ss:$8 sps:$4 sm:$0xff]   ;;  %v7185_v27 = vld [vmem:[%s10781_s11 + $0x64] ss:$8 sps:$4 sm:$0xff]  }
  0x9b   :  { %v7183_v28 = vld [vmem:[%s10781_s11 + $0x60] ss:$8 sps:$4 sm:$0xff]   ;;  %v7188_v29 = vld [vmem:[%s10781_s11 + $0x74] ss:$8 sps:$4 sm:$0xff]   ;;  %v7186_v30 = vld [vmem:[%s10781_s11 + $0x70] ss:$8 sps:$4 sm:$0xff]  }
  0x9c   :  { %v153_v2 = vld [vmem:[%s10782_s12] sm:$0x3]  ;;  %v7191_v31 = vld [vmem:[%s10781_s11 + $0x84] ss:$8 sps:$4 sm:$0xff]   ;;  %v7194_v33 = vld [vmem:[%s10781_s11 + $0x94] ss:$8 sps:$4 sm:$0xff]  }
  0x9d   :  { %v158_v3 = vrot.slane %v153_v2, %v8639_v0  ;;  %v162_v4 = vrot.slane %v153_v2, %v8642_v1  ;;  %v7189_v32 = vld [vmem:[%s10781_s11 + $0x80] ss:$8 sps:$4 sm:$0xff]   ;;  %v7192_v34 = vld [vmem:[%s10781_s11 + $0x90] ss:$8 sps:$4 sm:$0xff]   ;;  %v7197_v35 = vld [vmem:[%s10781_s11 + $0xa4] ss:$8 sps:$4 sm:$0xff]  }
  0x9e   :  { %v7195_v36 = vld [vmem:[%s10781_s11 + $0xa0] ss:$8 sps:$4 sm:$0xff]   ;;  %v7200_v37 = vld [vmem:[%s10781_s11 + $0xb4] ss:$8 sps:$4 sm:$0xff]   ;;  %v7198_v38 = vld [vmem:[%s10781_s11 + $0xb0] ss:$8 sps:$4 sm:$0xff]  }
  0x9f   :  { %v7203_v39 = vld [vmem:[%s10781_s11 + $0xc4] ss:$8 sps:$4 sm:$0xff]   ;;  %v7201_v40 = vld [vmem:[%s10781_s11 + $0xc0] ss:$8 sps:$4 sm:$0xff]   ;;  %v7206_v41 = vld [vmem:[%s10781_s11 + $0xd4] ss:$8 sps:$4 sm:$0xff]  }
  0xa0   :  { %v7204_v42 = vld [vmem:[%s10781_s11 + $0xd0] ss:$8 sps:$4 sm:$0xff]   ;;  %v7209_v43 = vld [vmem:[%s10781_s11 + $0xe4] ss:$8 sps:$4 sm:$0xff]   ;;  %v7207_v44 = vld [vmem:[%s10781_s11 + $0xe0] ss:$8 sps:$4 sm:$0xff]  }
  0xa1   :  { %v7212_v45 = vld [vmem:[%s10781_s11 + $0xf4] ss:$8 sps:$4 sm:$0xff]   ;;  %v7210_v46 = vld [vmem:[%s10781_s11 + $0xf0] ss:$8 sps:$4 sm:$0xff]   ;;  %v7213_v47 = vld [vmem:[%s10783_s6] ss:$8 sps:$4 sm:$0xff]  }
  0xa2   :  { %v7215_v48 = vld [vmem:[%s10783_s6 + $0x4] ss:$8 sps:$4 sm:$0xff]   ;;  %v7218_v49 = vld [vmem:[%s10783_s6 + $0x14] ss:$8 sps:$4 sm:$0xff]   ;;  %v7216_v50 = vld [vmem:[%s10783_s6 + $0x10] ss:$8 sps:$4 sm:$0xff]  }
  0xa3   :  { %1454 = vmatprep.subr.bf16.mxu0 %v7215_v48  ;;  %v7221_v51 = vld [vmem:[%s10783_s6 + $0x24] ss:$8 sps:$4 sm:$0xff]   ;;  %v7219_v52 = vld [vmem:[%s10783_s6 + $0x20] ss:$8 sps:$4 sm:$0xff]   ;;  %v7224_v53 = vld [vmem:[%s10783_s6 + $0x34] ss:$8 sps:$4 sm:$0xff]  }
  0xa4   :  { %1455 = vmatpush1.bf16.msra.mxu0 %v7213_v47  ;;  %v7222_v55 = vld [vmem:[%s10783_s6 + $0x30] ss:$8 sps:$4 sm:$0xff]   ;;  %v7227_v56 = vld [vmem:[%s10783_s6 + $0x44] ss:$8 sps:$4 sm:$0xff]   ;;  %v7225_v57 = vld [vmem:[%s10783_s6 + $0x40] ss:$8 sps:$4 sm:$0xff]  }
  0xa5   :  { %1456 = vmatprep.subr.bf16.mxu0 %v7218_v49  ;;  %v7230_v58 = vld [vmem:[%s10783_s6 + $0x54] ss:$8 sps:$4 sm:$0xff]   ;;  %v7228_v59 = vld [vmem:[%s10783_s6 + $0x50] ss:$8 sps:$4 sm:$0xff]   ;;  %v7233_v60 = vld [vmem:[%s10783_s6 + $0x64] ss:$8 sps:$4 sm:$0xff]  }
  0xa6   :  { %v7231_v61 = vld [vmem:[%s10783_s6 + $0x60] ss:$8 sps:$4 sm:$0xff]   ;;  %v7236_v54 = vld [vmem:[%s10783_s6 + $0x74] ss:$8 sps:$4 sm:$0xff]   ;;  %v7234_v62 = vld [vmem:[%s10783_s6 + $0x70] ss:$8 sps:$4 sm:$0xff]  }
  0xa7   :  { %v7239_v63 = vld [vmem:[%s10783_s6 + $0x84] ss:$8 sps:$4 sm:$0xff]   ;;  %v7237_v2 = vld [vmem:[%s10783_s6 + $0x80] ss:$8 sps:$4 sm:$0xff]   ;;  %s10784_s10 = sld [smem:[#allocation10_spill]]  ;;  %s10785_s2 = sld [smem:[#allocation12_spill]] }
  0xa8   :  { %1457 = vmatpush1.bf16.msra.mxu0 %v7216_v50  ;;  %s10788_s8 = sld [smem:[#allocation16_spill]]  ;;  %vm6072_vm0 = vcmask 25600  }
  0xa9   :  { %1458 = vmatprep.subr.bf16.mxu0 %v7221_v51 }
  0xac   :  { %1459 = vmatpush1.bf16.msra.mxu0 %v7219_v52 }
  0xad   :  { %1460 = vmatprep.subr.bf16.mxu0 %v7224_v53 }
  0xb0   :  { %1461 = vmatpush1.bf16.msra.mxu0 %v7222_v55 }
  0xb1   :  { %1462 = vmatprep.subr.bf16.mxu0 %v7227_v56 }
  0xb4   :  { %1463 = vmatpush1.bf16.msra.mxu0 %v7225_v57 }
  0xb5   :  { %1464 = vmatprep.subr.bf16.mxu0 %v7230_v58 }
  0xb8   :  { %1465 = vmatpush1.bf16.msra.mxu0 %v7228_v59 }
  0xb9   :  { %1466 = vmatprep.subr.bf16.mxu0 %v7233_v60 }
  0xbc   :  { %1467 = vmatpush1.bf16.msra.mxu0 %v7231_v61 }
  0xbd   :  { %1468 = vmatprep.subr.bf16.mxu0 %v7236_v54 }
  0xc0   :  { %1469 = vmatpush1.bf16.msra.mxu0 %v7234_v62 }
  0xc1   :  { %1470 = vmatprep.subr.bf16.mxu0 %v7239_v63 }
  0xc4   :  { %1471 = vmatpush1.bf16.msra.mxu0 %v7237_v2 }
 0x168   :  { %v589_v5 = vpop.f32.mrb[0].mxu0 }
 0x169   :  { %v6944_v6 = vadd.f32 %v589_v5, %v158_v3  ;;  %v591_v7 = vpop.f32.mrb[1].mxu0  ;;  %v7242_v3 = vld [vmem:[%s10783_s6 + $0x94] ss:$8 sps:$4 sm:$0xff]   ;;  %v7245_v5 = vld [vmem:[%s10783_s6 + $0xa4] ss:$8 sps:$4 sm:$0xff]  }
 0x16a   :  { %v6945_v8 = vadd.f32 %v591_v7, %v162_v4  ;;  %v593_v9 = vpop.f32.mrb[2].mxu0  ;;  %v7240_v4 = vld [vmem:[%s10783_s6 + $0x90] ss:$8 sps:$4 sm:$0xff]   ;;  %1472 = vmatprep.subr.bf16.mxu0 %v7242_v3  ;;  %v7248_v7 = vld [vmem:[%s10783_s6 + $0xb4] ss:$8 sps:$4 sm:$0xff]  }
 0x16b   :  { %v596_v10 = vmax.f32 %v6944_v6, 0.0  ;;  %v594_v11 = vpop.f32.mrb[3].mxu0  ;;  %1473 = vmatpush1.bf16.msra.mxu0 %v7240_v4  ;;  %v7243_v6 = vld [vmem:[%s10783_s6 + $0xa0] ss:$8 sps:$4 sm:$0xff]   ;;  %v7251_v9 = vld [vmem:[%s10783_s6 + $0xc4] ss:$8 sps:$4 sm:$0xff]  }
 0x16c   :  { %v597_v12 = vmax.f32 %v6945_v8, 0.0  ;;  %1474 = vmatprep.subr.bf16.mxu0 %v7245_v5  ;;  %v7246_v8 = vld [vmem:[%s10783_s6 + $0xb0] ss:$8 sps:$4 sm:$0xff]   ;;  %v7254_v11 = vld [vmem:[%s10783_s6 + $0xd4] ss:$8 sps:$4 sm:$0xff]  }
 0x16d   :  { %v748_v16 = vpack.c.bf16 %v596_v10, %v596_v10  ;;  %v7249_v10 = vld [vmem:[%s10783_s6 + $0xc0] ss:$8 sps:$4 sm:$0xff]  }
 0x16e   :  { %v749_v13 = vpack.c.bf16 %v597_v12, %v597_v12  ;;  %v7252_v12 = vld [vmem:[%s10783_s6 + $0xd0] ss:$8 sps:$4 sm:$0xff]  }
 0x16f   :  { %1475 = vmatpush1.bf16.msra.mxu0 %v7243_v6 }
 0x170   :  { %986 = vmatprep.mubr.bf16.mxu1 %v749_v13  ;;  %1476 = vmatprep.subr.bf16.mxu0 %v7248_v7  ;;  %v615_v13 = vld [vmem:[%s10784_s10] sm:$0x3]  ;;  %s10786_s10 = sld [smem:[#allocation17_spill]] }
 0x171   :  { %987 = vmatmul.mubr.bf16.vlgmr.msra.gmra.mrb[0].mxu1 %v748_v16  ;;  %v620_v16 = vrot.slane %v615_v13, %v8639_v0 }
 0x172   :  { %1206 = vmatpush1.bf16.msra.mxu1 %v7165_v14  ;;  %v782_v14 = vld [vmem:[%s10785_s2] sm:$0x3]  ;;  %s10787_s2 = sld [smem:[#allocation14_spill]] }
 0x173   :  { %1207 = vmatprep.subr.bf16.mxu1 %v7170_v17  ;;  %1477 = vmatpush1.bf16.msra.mxu0 %v7246_v8  ;;  %v787_v17 = vrot.slane %v782_v14, %v8639_v0 }
 0x174   :  { %1478 = vmatprep.subr.bf16.mxu0 %v7251_v9 }
 0x176   :  { %1208 = vmatpush1.bf16.msra.mxu1 %v7168_v18  ;;  %v624_v18 = vrot.slane %v615_v13, %v8642_v1  ;;  %v7293_v47 = vld [vmem:[%s10786_s10 + $0xa4] ss:$16 sps:$4 sm:$0xff]   ;;  %v7291_v48 = vld [vmem:[%s10786_s10 + $0xa0] ss:$16 sps:$4 sm:$0xff]  }
 0x177   :  { %1209 = vmatprep.subr.bf16.mxu1 %v7173_v19  ;;  %1479 = vmatpush1.bf16.msra.mxu0 %v7249_v10  ;;  %v791_v19 = vrot.slane %v782_v14, %v8642_v1  ;;  %v7299_v49 = vld [vmem:[%s10786_s10 + $0xc4] ss:$16 sps:$4 sm:$0xff]   ;;  %v7297_v50 = vld [vmem:[%s10786_s10 + $0xc0] ss:$16 sps:$4 sm:$0xff]  }
 0x178   :  { %1480 = vmatprep.subr.bf16.mxu0 %v7254_v11  ;;  %v7305_v51 = vld [vmem:[%s10786_s10 + $0xe4] ss:$16 sps:$4 sm:$0xff]   ;;  %v7303_v52 = vld [vmem:[%s10786_s10 + $0xe0] ss:$16 sps:$4 sm:$0xff]  }
 0x179   :  { %v7311_v53 = vld [vmem:[%s10786_s10 + $0x104] ss:$16 sps:$4 sm:$0xff]   ;;  %v7309_v55 = vld [vmem:[%s10786_s10 + $0x100] ss:$16 sps:$4 sm:$0xff]  }
 0x17a   :  { %1210 = vmatpush1.bf16.msra.mxu1 %v7171_v20  ;;  %v6946_v20 = vadd.f32 %v787_v17, %v620_v16  ;;  %v7317_v56 = vld [vmem:[%s10786_s10 + $0x124] ss:$16 sps:$4 sm:$0xff]   ;;  %v7315_v57 = vld [vmem:[%s10786_s10 + $0x120] ss:$16 sps:$4 sm:$0xff]   ;;  %v7264_v16 = vld [vmem:[%s10786_s10 + $0x8] ss:$16 sps:$4 sm:$0xff]  }
 0x17b   :  { %1211 = vmatprep.subr.bf16.mxu1 %v7176_v21  ;;  %1481 = vmatpush1.bf16.msra.mxu0 %v7252_v12  ;;  %v6948_v21 = vadd.f32 %v791_v19, %v624_v18  ;;  %v7323_v58 = vld [vmem:[%s10786_s10 + $0x144] ss:$16 sps:$4 sm:$0xff]   ;;  %v7321_v59 = vld [vmem:[%s10786_s10 + $0x140] ss:$16 sps:$4 sm:$0xff]   ;;  %v7272_v18 = vld [vmem:[%s10786_s10 + $0x2c] ss:$16 sps:$4 sm:$0xff]  }
 0x17c   :  { %v7329_v60 = vld [vmem:[%s10786_s10 + $0x164] ss:$16 sps:$4 sm:$0xff]   ;;  %v7327_v61 = vld [vmem:[%s10786_s10 + $0x160] ss:$16 sps:$4 sm:$0xff]   ;;  %v7270_v19 = vld [vmem:[%s10786_s10 + $0x28] ss:$16 sps:$4 sm:$0xff]  }
 0x17d   :  { %v7335_v54 = vld [vmem:[%s10786_s10 + $0x184] ss:$16 sps:$4 sm:$0xff]   ;;  %v7333_v62 = vld [vmem:[%s10786_s10 + $0x180] ss:$16 sps:$4 sm:$0xff]  }
 0x17e   :  { %1212 = vmatpush1.bf16.msra.mxu1 %v7174_v22  ;;  %v7341_v63 = vld [vmem:[%s10786_s10 + $0x1a4] ss:$16 sps:$4 sm:$0xff]   ;;  %v7339_v2 = vld [vmem:[%s10786_s10 + $0x1a0] ss:$16 sps:$4 sm:$0xff]  }
 0x17f   :  { %1213 = vmatprep.subr.bf16.mxu1 %v7179_v23  ;;  %v1033_v3 = vld [vmem:[%s10787_s2] sm:$0x3] }
 0x180   :  { %v1038_v4 = vrot.slane %v1033_v3, %v8639_v0  ;;  %v1042_v5 = vrot.slane %v1033_v3, %v8642_v1 }
 0x182   :  { %1214 = vmatpush1.bf16.msra.mxu1 %v7177_v24 }
 0x183   :  { %1215 = vmatprep.subr.bf16.mxu1 %v7182_v25 }
 0x186   :  { %1216 = vmatpush1.bf16.msra.mxu1 %v7180_v26 }
 0x187   :  { %1217 = vmatprep.subr.bf16.mxu1 %v7185_v27 }
 0x18a   :  { %1218 = vmatpush1.bf16.msra.mxu1 %v7183_v28 }
 0x18b   :  { %1219 = vmatprep.subr.bf16.mxu1 %v7188_v29 }
 0x18e   :  { %1220 = vmatpush1.bf16.msra.mxu1 %v7186_v30 }
 0x18f   :  { %1221 = vmatprep.subr.bf16.mxu1 %v7191_v31 }
 0x192   :  { %1222 = vmatpush1.bf16.msra.mxu1 %v7189_v32  ;;  %v7257_v32 = vld [vmem:[%s10783_s6 + $0xe4] ss:$8 sps:$4 sm:$0xff]  }
 0x193   :  { %1223 = vmatprep.subr.bf16.mxu1 %v7194_v33  ;;  %v7255_v33 = vld [vmem:[%s10783_s6 + $0xe0] ss:$8 sps:$4 sm:$0xff]   ;;  %1482 = vmatprep.subr.bf16.mxu0 %v7257_v32  ;;  %v7308_v32 = vld [vmem:[%s10786_s10 + $0xec] ss:$16 sps:$4 sm:$0xff]  }
 0x194   :  { %1483 = vmatpush1.bf16.msra.mxu0 %v7255_v33  ;;  %v7306_v33 = vld [vmem:[%s10786_s10 + $0xe8] ss:$16 sps:$4 sm:$0xff]  }
 0x196   :  { %1224 = vmatpush1.bf16.msra.mxu1 %v7192_v34  ;;  %v7260_v34 = vld [vmem:[%s10783_s6 + $0xf4] ss:$8 sps:$4 sm:$0xff]  }
 0x197   :  { %1225 = vmatprep.subr.bf16.mxu1 %v7197_v35  ;;  %v7258_v35 = vld [vmem:[%s10783_s6 + $0xf0] ss:$8 sps:$4 sm:$0xff]   ;;  %1484 = vmatprep.subr.bf16.mxu0 %v7260_v34  ;;  %v7314_v34 = vld [vmem:[%s10786_s10 + $0x10c] ss:$16 sps:$4 sm:$0xff]  }
 0x198   :  { %1485 = vmatpush1.bf16.msra.mxu0 %v7258_v35  ;;  %v7312_v35 = vld [vmem:[%s10786_s10 + $0x108] ss:$16 sps:$4 sm:$0xff]  }
 0x19a   :  { %1226 = vmatpush1.bf16.msra.mxu1 %v7195_v36  ;;  %v7261_v36 = vld [vmem:[%s10786_s10] ss:$16 sps:$4 sm:$0xff]  }
 0x19b   :  { %1227 = vmatprep.subr.bf16.mxu1 %v7200_v37  ;;  %v7263_v37 = vld [vmem:[%s10786_s10 + $0x4] ss:$16 sps:$4 sm:$0xff]  }
 0x19e   :  { %1228 = vmatpush1.bf16.msra.mxu1 %v7198_v38  ;;  %v7266_v38 = vld [vmem:[%s10786_s10 + $0xc] ss:$16 sps:$4 sm:$0xff]  }
 0x19f   :  { %1229 = vmatprep.subr.bf16.mxu1 %v7203_v39  ;;  %v7269_v39 = vld [vmem:[%s10786_s10 + $0x24] ss:$16 sps:$4 sm:$0xff]   ;;  %1948 = vmatprep.subr.bf16.mxu0 %v7266_v38  ;;  %v7326_v38 = vld [vmem:[%s10786_s10 + $0x14c] ss:$16 sps:$4 sm:$0xff]  }
 0x1a2   :  { %1230 = vmatpush1.bf16.msra.mxu1 %v7201_v40  ;;  %v7267_v40 = vld [vmem:[%s10786_s10 + $0x20] ss:$16 sps:$4 sm:$0xff]  }
 0x1a3   :  { %1231 = vmatprep.subr.bf16.mxu1 %v7206_v41  ;;  %v7275_v41 = vld [vmem:[%s10786_s10 + $0x44] ss:$16 sps:$4 sm:$0xff]  }
 0x1a6   :  { %1232 = vmatpush1.bf16.msra.mxu1 %v7204_v42  ;;  %v7273_v42 = vld [vmem:[%s10786_s10 + $0x40] ss:$16 sps:$4 sm:$0xff]  }
 0x1a7   :  { %1233 = vmatprep.subr.bf16.mxu1 %v7209_v43  ;;  %v7281_v43 = vld [vmem:[%s10786_s10 + $0x64] ss:$16 sps:$4 sm:$0xff]  }
 0x1aa   :  { %1234 = vmatpush1.bf16.msra.mxu1 %v7207_v44  ;;  %v7279_v44 = vld [vmem:[%s10786_s10 + $0x60] ss:$16 sps:$4 sm:$0xff]  }
 0x1ab   :  { %1235 = vmatprep.subr.bf16.mxu1 %v7212_v45  ;;  %v7287_v45 = vld [vmem:[%s10786_s10 + $0x84] ss:$16 sps:$4 sm:$0xff]  }
 0x1ae   :  { %1236 = vmatpush1.bf16.msra.mxu1 %v7210_v46  ;;  %v7285_v46 = vld [vmem:[%s10786_s10 + $0x80] ss:$16 sps:$4 sm:$0xff]  }
 0x1af   :  { %1907 = vmatprep.subr.bf16.mxu1 %v7263_v37  ;;  %v7318_v37 = vld [vmem:[%s10786_s10 + $0x128] ss:$16 sps:$4 sm:$0xff]  }
 0x244   :  { %v988_v22 = vpop.f32.mrb[0].mxu1 }
 0x245   :  { %v6947_v23 = vadd.f32 %v6946_v20, %v988_v22  ;;  %v990_v24 = vpop.f32.mrb[1].mxu1  ;;  %v7278_v20 = vld [vmem:[%s10786_s10 + $0x4c] ss:$16 sps:$4 sm:$0xff]  }
 0x246   :  { %v6949_v25 = vadd.f32 %v6948_v21, %v990_v24  ;;  %v992_v26 = vpop.f32.mrb[2].mxu1  ;;  %v7276_v21 = vld [vmem:[%s10786_s10 + $0x48] ss:$16 sps:$4 sm:$0xff]   ;;  %v7284_v22 = vld [vmem:[%s10786_s10 + $0x6c] ss:$16 sps:$4 sm:$0xff]  }
 0x247   :  { %v8836_v27 = vmax.f32 %v6947_v23, 0.0  ;;  %v993_v28 = vpop.f32.mrb[3].mxu1  ;;  %v7282_v23 = vld [vmem:[%s10786_s10 + $0x68] ss:$16 sps:$4 sm:$0xff]   ;;  %v7290_v24 = vld [vmem:[%s10786_s10 + $0x8c] ss:$16 sps:$4 sm:$0xff]  }
 0x248   :  { %v8838_v29 = vmax.f32 %v6949_v25, 0.0  ;;  %v7288_v25 = vld [vmem:[%s10786_s10 + $0x88] ss:$16 sps:$4 sm:$0xff]   ;;  %v7296_v26 = vld [vmem:[%s10786_s10 + $0xac] ss:$16 sps:$4 sm:$0xff]  }
 0x249   :  { %v999_v31 = vpack.c.bf16 %v8836_v27, %v8836_v27  ;;  %v7294_v28 = vld [vmem:[%s10786_s10 + $0xa8] ss:$16 sps:$4 sm:$0xff]  }
 0x24a   :  { %v1000_v30 = vpack.c.bf16 %v8838_v29, %v8838_v29 }
 0x24c   :  { %1237 = vmatprep.mubr.bf16.mxu1 %v1000_v30  ;;  %v7302_v30 = vld [vmem:[%s10786_s10 + $0xcc] ss:$16 sps:$4 sm:$0xff]  }
 0x24d   :  { %1238 = vmatmul.mubr.bf16.vlgmr.msra.gmra.mrb[4].mxu1 %v999_v31  ;;  %v7300_v31 = vld [vmem:[%s10786_s10 + $0xc8] ss:$16 sps:$4 sm:$0xff]  }
 0x24e   :  { %1908 = vmatpush1.bf16.msra.mxu1 %v7261_v36  ;;  %v7320_v36 = vld [vmem:[%s10786_s10 + $0x12c] ss:$16 sps:$4 sm:$0xff]  }
 0x24f   :  { %1909 = vmatprep.subr.bf16.mxu1 %v7269_v39  ;;  %v7324_v39 = vld [vmem:[%s10786_s10 + $0x148] ss:$16 sps:$4 sm:$0xff]  }
 0x252   :  { %1910 = vmatpush1.bf16.msra.mxu1 %v7267_v40  ;;  %v7332_v40 = vld [vmem:[%s10786_s10 + $0x16c] ss:$16 sps:$4 sm:$0xff]  }
 0x253   :  { %1911 = vmatprep.subr.bf16.mxu1 %v7275_v41  ;;  %v7330_v41 = vld [vmem:[%s10786_s10 + $0x168] ss:$16 sps:$4 sm:$0xff]  }
 0x256   :  { %1912 = vmatpush1.bf16.msra.mxu1 %v7273_v42  ;;  %v7338_v42 = vld [vmem:[%s10786_s10 + $0x18c] ss:$16 sps:$4 sm:$0xff]  }
 0x257   :  { %1913 = vmatprep.subr.bf16.mxu1 %v7281_v43  ;;  %v7336_v43 = vld [vmem:[%s10786_s10 + $0x188] ss:$16 sps:$4 sm:$0xff]  }
 0x25a   :  { %1914 = vmatpush1.bf16.msra.mxu1 %v7279_v44  ;;  %v7344_v44 = vld [vmem:[%s10786_s10 + $0x1ac] ss:$16 sps:$4 sm:$0xff]  }
 0x25b   :  { %1915 = vmatprep.subr.bf16.mxu1 %v7287_v45  ;;  %v7342_v45 = vld [vmem:[%s10786_s10 + $0x1a8] ss:$16 sps:$4 sm:$0xff]  }
 0x25e   :  { %1916 = vmatpush1.bf16.msra.mxu1 %v7285_v46  ;;  %v7347_v46 = vld [vmem:[%s10786_s10 + $0x1c4] ss:$16 sps:$4 sm:$0xff]  }
 0x25f   :  { %1917 = vmatprep.subr.bf16.mxu1 %v7293_v47  ;;  %v7350_v47 = vld [vmem:[%s10786_s10 + $0x1cc] ss:$16 sps:$4 sm:$0xff]  }
 0x262   :  { %1918 = vmatpush1.bf16.msra.mxu1 %v7291_v48  ;;  %v7345_v48 = vld [vmem:[%s10786_s10 + $0x1c0] ss:$16 sps:$4 sm:$0xff]  }
 0x263   :  { %1919 = vmatprep.subr.bf16.mxu1 %v7299_v49  ;;  %v7348_v49 = vld [vmem:[%s10786_s10 + $0x1c8] ss:$16 sps:$4 sm:$0xff]  }
 0x266   :  { %1920 = vmatpush1.bf16.msra.mxu1 %v7297_v50  ;;  %v7353_v50 = vld [vmem:[%s10786_s10 + $0x1e4] ss:$16 sps:$4 sm:$0xff]  }
 0x267   :  { %1921 = vmatprep.subr.bf16.mxu1 %v7305_v51  ;;  %v7356_v51 = vld [vmem:[%s10786_s10 + $0x1ec] ss:$16 sps:$4 sm:$0xff]  }
 0x26a   :  { %1922 = vmatpush1.bf16.msra.mxu1 %v7303_v52  ;;  %v7351_v52 = vld [vmem:[%s10786_s10 + $0x1e0] ss:$16 sps:$4 sm:$0xff]  }
 0x26b   :  { %1923 = vmatprep.subr.bf16.mxu1 %v7311_v53  ;;  %v7354_v53 = vld [vmem:[%s10786_s10 + $0x1e8] ss:$16 sps:$4 sm:$0xff]  }
 0x26e   :  { %1924 = vmatpush1.bf16.msra.mxu1 %v7309_v55  ;;  %v7359_v55 = vld [vmem:[%s10742_s14 + $0x4] ss:$16 sps:$4 sm:$0xff]  }
 0x26f   :  { %1925 = vmatprep.subr.bf16.mxu1 %v7317_v56  ;;  %v7362_v56 = vld [vmem:[%s10742_s14 + $0xc] ss:$16 sps:$4 sm:$0xff]  }
 0x272   :  { %1926 = vmatpush1.bf16.msra.mxu1 %v7315_v57  ;;  %v1282_v57 = vld [vmem:[%s10788_s8] sm:$0x3] }
 0x273   :  { %1927 = vmatprep.subr.bf16.mxu1 %v7323_v58  ;;  %v1287_v58 = vrot.slane %v1282_v57, %v8639_v0 }
 0x276   :  { %1928 = vmatpush1.bf16.msra.mxu1 %v7321_v59  ;;  %v1291_v59 = vrot.slane %v1282_v57, %v8642_v1  ;;  %v7431_v57 = vld [vmem:[%s10742_s14 + $0x184] ss:$16 sps:$4 sm:$0xff]  }
 0x277   :  { %1929 = vmatprep.subr.bf16.mxu1 %v7329_v60 }
 0x27a   :  { %1930 = vmatpush1.bf16.msra.mxu1 %v7327_v61 }
 0x27b   :  { %1931 = vmatprep.subr.bf16.mxu1 %v7335_v54 }
 0x27e   :  { %1932 = vmatpush1.bf16.msra.mxu1 %v7333_v62 }
 0x27f   :  { %1933 = vmatprep.subr.bf16.mxu1 %v7341_v63 }
 0x282   :  { %1934 = vmatpush1.bf16.msra.mxu1 %v7339_v2 }
 0x283   :  { %1935 = vmatprep.subr.bf16.mxu1 %v7347_v46  ;;  %v7411_v46 = vld [vmem:[%s10742_s14 + $0x120] ss:$16 sps:$4 sm:$0xff]  }
 0x286   :  { %1936 = vmatpush1.bf16.msra.mxu1 %v7345_v48  ;;  %v7419_v48 = vld [vmem:[%s10742_s14 + $0x144] ss:$16 sps:$4 sm:$0xff]  }
 0x287   :  { %1937 = vmatprep.subr.bf16.mxu1 %v7353_v50  ;;  %v7417_v50 = vld [vmem:[%s10742_s14 + $0x140] ss:$16 sps:$4 sm:$0xff]  }
 0x28a   :  { %1938 = vmatpush1.bf16.msra.mxu1 %v7351_v52  ;;  %v7425_v52 = vld [vmem:[%s10742_s14 + $0x164] ss:$16 sps:$4 sm:$0xff]  }
 0x28b   :  { %2399 = vmatprep.subr.bf16.mxu1 %v7359_v55  ;;  %v7423_v55 = vld [vmem:[%s10742_s14 + $0x160] ss:$16 sps:$4 sm:$0xff]  }
 0x320   :  { %v1239_v6 = vpop.f32.mrb[4].mxu1 }
 0x321   :  { %v1240_v7 = vadd.f32 %v1239_v6, %v1038_v4  ;;  %v1241_v8 = vpop.f32.mrb[5].mxu1 }
 0x322   :  { %v1242_v9 = vadd.f32 %v1241_v8, %v1042_v5  ;;  %v1243_v10 = vpop.f32.mrb[6].mxu1  ;;  %v7357_v8 = vld [vmem:[%s10742_s14] ss:$16 sps:$4 sm:$0xff]  }
 0x323   :  { %v1246_v11 = vmax.f32 %v1240_v7, 0.0  ;;  %v1244_v12 = vpop.f32.mrb[7].mxu1 }
 0x324   :  { %v1247_v13 = vmax.f32 %v1242_v9, 0.0  ;;  %v7360_v9 = vld [vmem:[%s10742_s14 + $0x8] ss:$16 sps:$4 sm:$0xff]  }
 0x325   :  { %v1248_v17 = vpack.c.bf16 %v1246_v11, %v1246_v11  ;;  %v7363_v11 = vld [vmem:[%s10742_s14 + $0x20] ss:$16 sps:$4 sm:$0xff]   ;;  %v7366_v12 = vld [vmem:[%s10742_s14 + $0x28] ss:$16 sps:$4 sm:$0xff]  }
 0x326   :  { %v1249_v14 = vpack.c.bf16 %v1247_v13, %v1247_v13  ;;  %v7371_v13 = vld [vmem:[%s10742_s14 + $0x44] ss:$16 sps:$4 sm:$0xff]  }
 0x328   :  { %1486 = vmatprep.mubr.bf16.mxu0 %v1249_v14  ;;  %v7374_v14 = vld [vmem:[%s10742_s14 + $0x4c] ss:$16 sps:$4 sm:$0xff]  }
 0x329   :  { %1487 = vmatmul.mubr.bf16.vlgmr.msra.gmra.mrb[4].mxu0 %v1248_v17  ;;  %v7372_v17 = vld [vmem:[%s10742_s14 + $0x48] ss:$16 sps:$4 sm:$0xff]  }
 0x32a   :  { %1949 = vmatpush1.bf16.msra.mxu0 %v7264_v16  ;;  %v7369_v16 = vld [vmem:[%s10742_s14 + $0x40] ss:$16 sps:$4 sm:$0xff]  }
 0x32b   :  { %1950 = vmatprep.subr.bf16.mxu0 %v7272_v18  ;;  %v7377_v18 = vld [vmem:[%s10742_s14 + $0x64] ss:$16 sps:$4 sm:$0xff]  }
 0x32e   :  { %1951 = vmatpush1.bf16.msra.mxu0 %v7270_v19  ;;  %v7380_v19 = vld [vmem:[%s10742_s14 + $0x6c] ss:$16 sps:$4 sm:$0xff]  }
 0x32f   :  { %1952 = vmatprep.subr.bf16.mxu0 %v7278_v20  ;;  %v7375_v20 = vld [vmem:[%s10742_s14 + $0x60] ss:$16 sps:$4 sm:$0xff]  }
 0x332   :  { %1953 = vmatpush1.bf16.msra.mxu0 %v7276_v21  ;;  %v7378_v21 = vld [vmem:[%s10742_s14 + $0x68] ss:$16 sps:$4 sm:$0xff]  }
 0x333   :  { %1954 = vmatprep.subr.bf16.mxu0 %v7284_v22  ;;  %v7383_v22 = vld [vmem:[%s10742_s14 + $0x84] ss:$16 sps:$4 sm:$0xff]  }
 0x336   :  { %1955 = vmatpush1.bf16.msra.mxu0 %v7282_v23  ;;  %v7386_v23 = vld [vmem:[%s10742_s14 + $0x8c] ss:$16 sps:$4 sm:$0xff]  }
 0x337   :  { %1956 = vmatprep.subr.bf16.mxu0 %v7290_v24  ;;  %v7381_v24 = vld [vmem:[%s10742_s14 + $0x80] ss:$16 sps:$4 sm:$0xff]  }
 0x33a   :  { %1957 = vmatpush1.bf16.msra.mxu0 %v7288_v25  ;;  %v7384_v25 = vld [vmem:[%s10742_s14 + $0x88] ss:$16 sps:$4 sm:$0xff]  }
 0x33b   :  { %1958 = vmatprep.subr.bf16.mxu0 %v7296_v26  ;;  %v7389_v26 = vld [vmem:[%s10742_s14 + $0xa4] ss:$16 sps:$4 sm:$0xff]  }
 0x33e   :  { %1959 = vmatpush1.bf16.msra.mxu0 %v7294_v28  ;;  %v7392_v28 = vld [vmem:[%s10742_s14 + $0xac] ss:$16 sps:$4 sm:$0xff]  }
 0x33f   :  { %1960 = vmatprep.subr.bf16.mxu0 %v7302_v30  ;;  %v7387_v30 = vld [vmem:[%s10742_s14 + $0xa0] ss:$16 sps:$4 sm:$0xff]  }
 0x342   :  { %1961 = vmatpush1.bf16.msra.mxu0 %v7300_v31  ;;  %v7390_v31 = vld [vmem:[%s10742_s14 + $0xa8] ss:$16 sps:$4 sm:$0xff]  }
 0x343   :  { %1962 = vmatprep.subr.bf16.mxu0 %v7308_v32  ;;  %v7395_v32 = vld [vmem:[%s10742_s14 + $0xc4] ss:$16 sps:$4 sm:$0xff]  }
 0x346   :  { %1963 = vmatpush1.bf16.msra.mxu0 %v7306_v33  ;;  %v7398_v33 = vld [vmem:[%s10742_s14 + $0xcc] ss:$16 sps:$4 sm:$0xff]  }
 0x347   :  { %1964 = vmatprep.subr.bf16.mxu0 %v7314_v34  ;;  %v7393_v34 = vld [vmem:[%s10742_s14 + $0xc0] ss:$16 sps:$4 sm:$0xff]  }
 0x34a   :  { %1965 = vmatpush1.bf16.msra.mxu0 %v7312_v35  ;;  %v7396_v35 = vld [vmem:[%s10742_s14 + $0xc8] ss:$16 sps:$4 sm:$0xff]  }
 0x34b   :  { %1966 = vmatprep.subr.bf16.mxu0 %v7320_v36  ;;  %v7401_v36 = vld [vmem:[%s10742_s14 + $0xe4] ss:$16 sps:$4 sm:$0xff]  }
 0x34e   :  { %1967 = vmatpush1.bf16.msra.mxu0 %v7318_v37  ;;  %v7404_v37 = vld [vmem:[%s10742_s14 + $0xec] ss:$16 sps:$4 sm:$0xff]  }
 0x34f   :  { %1968 = vmatprep.subr.bf16.mxu0 %v7326_v38  ;;  %v7399_v38 = vld [vmem:[%s10742_s14 + $0xe0] ss:$16 sps:$4 sm:$0xff]  }
 0x352   :  { %1969 = vmatpush1.bf16.msra.mxu0 %v7324_v39  ;;  %v7402_v39 = vld [vmem:[%s10742_s14 + $0xe8] ss:$16 sps:$4 sm:$0xff]  }
 0x353   :  { %1970 = vmatprep.subr.bf16.mxu0 %v7332_v40  ;;  %v7407_v40 = vld [vmem:[%s10742_s14 + $0x104] ss:$16 sps:$4 sm:$0xff]  }
 0x356   :  { %1971 = vmatpush1.bf16.msra.mxu0 %v7330_v41  ;;  %v7410_v41 = vld [vmem:[%s10742_s14 + $0x10c] ss:$16 sps:$4 sm:$0xff]  }
 0x357   :  { %1972 = vmatprep.subr.bf16.mxu0 %v7338_v42  ;;  %v7405_v42 = vld [vmem:[%s10742_s14 + $0x100] ss:$16 sps:$4 sm:$0xff]  }
 0x35a   :  { %1973 = vmatpush1.bf16.msra.mxu0 %v7336_v43  ;;  %v7408_v43 = vld [vmem:[%s10742_s14 + $0x108] ss:$16 sps:$4 sm:$0xff]  }
 0x35b   :  { %1974 = vmatprep.subr.bf16.mxu0 %v7344_v44  ;;  %v7413_v44 = vld [vmem:[%s10742_s14 + $0x124] ss:$16 sps:$4 sm:$0xff]  }
 0x35e   :  { %1975 = vmatpush1.bf16.msra.mxu0 %v7342_v45  ;;  %v7416_v45 = vld [vmem:[%s10742_s14 + $0x12c] ss:$16 sps:$4 sm:$0xff]  }
 0x35f   :  { %1976 = vmatprep.subr.bf16.mxu0 %v7350_v47  ;;  %v7414_v47 = vld [vmem:[%s10742_s14 + $0x128] ss:$16 sps:$4 sm:$0xff]  }
 0x362   :  { %1977 = vmatpush1.bf16.msra.mxu0 %v7348_v49  ;;  %v7422_v49 = vld [vmem:[%s10742_s14 + $0x14c] ss:$16 sps:$4 sm:$0xff]  }
 0x363   :  { %1978 = vmatprep.subr.bf16.mxu0 %v7356_v51  ;;  %v7420_v51 = vld [vmem:[%s10742_s14 + $0x148] ss:$16 sps:$4 sm:$0xff]  }
 0x366   :  { %1979 = vmatpush1.bf16.msra.mxu0 %v7354_v53  ;;  %v7428_v53 = vld [vmem:[%s10742_s14 + $0x16c] ss:$16 sps:$4 sm:$0xff]  }
 0x367   :  { %2440 = vmatprep.subr.bf16.mxu0 %v7362_v56  ;;  %v7426_v56 = vld [vmem:[%s10742_s14 + $0x168] ss:$16 sps:$4 sm:$0xff]  }
 0x3fc   :  { %v1488_v60 = vpop.f32.mrb[4].mxu0 }
 0x3fd   :  { %v1489_v61 = vadd.f32 %v1488_v60, %v1287_v58  ;;  %v1490_v54 = vpop.f32.mrb[5].mxu0  ;;  %v7434_v58 = vld [vmem:[%s10742_s14 + $0x18c] ss:$16 sps:$4 sm:$0xff]   ;;  %v7432_v60 = vld [vmem:[%s10742_s14 + $0x188] ss:$16 sps:$4 sm:$0xff]  }
 0x3fe   :  { %v1491_v62 = vadd.f32 %v1490_v54, %v1291_v59  ;;  %v1492_v63 = vpop.f32.mrb[6].mxu0  ;;  %v7429_v59 = vld [vmem:[%s10742_s14 + $0x180] ss:$16 sps:$4 sm:$0xff]   ;;  %v7440_v54 = vld [vmem:[%s10742_s14 + $0x1ac] ss:$16 sps:$4 sm:$0xff]  }
 0x3ff   :  { %v1495_v2 = vadd.f32 %v1489_v61, %v8836_v27  ;;  %v1493_v3 = vpop.f32.mrb[7].mxu0  ;;  %v7365_v27 = vld [vmem:[%s10742_s14 + $0x24] ss:$16 sps:$4 sm:$0xff]   ;;  %v7438_v63 = vld [vmem:[%s10742_s14 + $0x1a8] ss:$16 sps:$4 sm:$0xff]  }
 0x400   :  { %v1496_v4 = vadd.f32 %v1491_v62, %v8838_v29  ;;  %v7368_v29 = vld [vmem:[%s10742_s14 + $0x2c] ss:$16 sps:$4 sm:$0xff]   ;;  %v7437_v61 = vld [vmem:[%s10742_s14 + $0x1a4] ss:$16 sps:$4 sm:$0xff]   ;;  %v7435_v62 = vld [vmem:[%s10742_s14 + $0x1a0] ss:$16 sps:$4 sm:$0xff]  }
 0x401   :  { %v1497_v5 = vmax.f32 %v1495_v2, 0.0  ;;  %v7443_v2 = vld [vmem:[%s10742_s14 + $0x1c4] ss:$16 sps:$4 sm:$0xff]   ;;  %v7446_v3 = vld [vmem:[%s10742_s14 + $0x1cc] ss:$16 sps:$4 sm:$0xff]  }
 0x402   :  { %v1498_v6 = vmax.f32 %v1496_v4, 0.0  ;;  %v7441_v4 = vld [vmem:[%s10742_s14 + $0x1c0] ss:$16 sps:$4 sm:$0xff]  }
 0x403   :  { %v9072_v10 = vpack.c.bf16 %v1497_v5, %v1497_v5  ;;  %v7444_v5 = vld [vmem:[%s10742_s14 + $0x1c8] ss:$16 sps:$4 sm:$0xff]  }
 0x404   :  { %v1500_v7 = vpack.c.bf16 %v1498_v6, %v1498_v6  ;;  %v7449_v6 = vld [vmem:[%s10742_s14 + $0x1e4] ss:$16 sps:$4 sm:$0xff]  }
 0x406   :  { %1939 = vmatprep.mubr.bf16.mxu1 %v1500_v7  ;;  %1980 = vmatprep.mubr.bf16.mxu0 %v1500_v7 }
 0x407   :  { %1940 = vmatmul.mubr.bf16.vlgmr.msra.gmra.mrb[8].mxu1 %v9072_v10  ;;  %1981 = vmatmul.mubr.bf16.vlgmr.msra.gmra.mrb[8].mxu0 %v9072_v10 }
 0x408   :  { %2400 = vmatpush1.bf16.msra.mxu1 %v7357_v8  ;;  %2441 = vmatpush1.bf16.msra.mxu0 %v7360_v9  ;;  %v7447_v8 = vld [vmem:[%s10742_s14 + $0x1e0] ss:$16 sps:$4 sm:$0xff]   ;;  %v7450_v9 = vld [vmem:[%s10742_s14 + $0x1e8] ss:$16 sps:$4 sm:$0xff]  }
 0x409   :  { %2431 = vmatprep.mubr.bf16.mxu1 %v1500_v7  ;;  %2472 = vmatprep.mubr.bf16.mxu0 %v1500_v7  ;;  %v7452_v7 = vld [vmem:[%s10742_s14 + $0x1ec] ss:$16 sps:$4 sm:$0xff]  }
 0x40a   :  { %2401 = vmatprep.subr.bf16.mxu1 %v7365_v27  ;;  %2442 = vmatprep.subr.bf16.mxu0 %v7368_v29  ;;  %v7455_v27 = vld [vmem:[%s10744_s16 + $0x4] ss:$16 sps:$4 sm:$0xff]   ;;  %v7458_v29 = vld [vmem:[%s10744_s16 + $0xc] ss:$16 sps:$4 sm:$0xff]  }
 0x40c   :  { %2402 = vmatpush1.bf16.msra.mxu1 %v7363_v11  ;;  %2443 = vmatpush1.bf16.msra.mxu0 %v7366_v12  ;;  %v7453_v11 = vld [vmem:[%s10744_s16] ss:$16 sps:$4 sm:$0xff]   ;;  %v7456_v12 = vld [vmem:[%s10744_s16 + $0x8] ss:$16 sps:$4 sm:$0xff]  }
 0x40d   :  { %2403 = vmatprep.subr.bf16.mxu1 %v7371_v13  ;;  %2444 = vmatprep.subr.bf16.mxu0 %v7374_v14  ;;  %v7461_v13 = vld [vmem:[%s10744_s16 + $0x24] ss:$16 sps:$4 sm:$0xff]   ;;  %v7464_v14 = vld [vmem:[%s10744_s16 + $0x2c] ss:$16 sps:$4 sm:$0xff]  }
 0x410   :  { %2404 = vmatpush1.bf16.msra.mxu1 %v7369_v16  ;;  %2445 = vmatpush1.bf16.msra.mxu0 %v7372_v17  ;;  %v7459_v16 = vld [vmem:[%s10744_s16 + $0x20] ss:$16 sps:$4 sm:$0xff]   ;;  %v7462_v17 = vld [vmem:[%s10744_s16 + $0x28] ss:$16 sps:$4 sm:$0xff]  }
 0x411   :  { %2405 = vmatprep.subr.bf16.mxu1 %v7377_v18  ;;  %2446 = vmatprep.subr.bf16.mxu0 %v7380_v19  ;;  %v7467_v18 = vld [vmem:[%s10744_s16 + $0x44] ss:$16 sps:$4 sm:$0xff]   ;;  %v7465_v19 = vld [vmem:[%s10744_s16 + $0x40] ss:$16 sps:$4 sm:$0xff]  }
 0x414   :  { %2406 = vmatpush1.bf16.msra.mxu1 %v7375_v20  ;;  %2447 = vmatpush1.bf16.msra.mxu0 %v7378_v21  ;;  %v7468_v20 = vld [vmem:[%s10744_s16 + $0x48] ss:$16 sps:$4 sm:$0xff]   ;;  %v7473_v21 = vld [vmem:[%s10744_s16 + $0x64] ss:$16 sps:$4 sm:$0xff]  }
 0x415   :  { %2407 = vmatprep.subr.bf16.mxu1 %v7383_v22  ;;  %2448 = vmatprep.subr.bf16.mxu0 %v7386_v23  ;;  %v7476_v22 = vld [vmem:[%s10744_s16 + $0x6c] ss:$16 sps:$4 sm:$0xff]   ;;  %v7471_v23 = vld [vmem:[%s10744_s16 + $0x60] ss:$16 sps:$4 sm:$0xff]  }
 0x418   :  { %2408 = vmatpush1.bf16.msra.mxu1 %v7381_v24  ;;  %2449 = vmatpush1.bf16.msra.mxu0 %v7384_v25  ;;  %v7474_v24 = vld [vmem:[%s10744_s16 + $0x68] ss:$16 sps:$4 sm:$0xff]   ;;  %v7479_v25 = vld [vmem:[%s10744_s16 + $0x84] ss:$16 sps:$4 sm:$0xff]  }
 0x419   :  { %2409 = vmatprep.subr.bf16.mxu1 %v7389_v26  ;;  %2450 = vmatprep.subr.bf16.mxu0 %v7392_v28  ;;  %v7482_v26 = vld [vmem:[%s10744_s16 + $0x8c] ss:$16 sps:$4 sm:$0xff]   ;;  %v7477_v28 = vld [vmem:[%s10744_s16 + $0x80] ss:$16 sps:$4 sm:$0xff]  }
 0x41c   :  { %2410 = vmatpush1.bf16.msra.mxu1 %v7387_v30  ;;  %2451 = vmatpush1.bf16.msra.mxu0 %v7390_v31  ;;  %v7480_v30 = vld [vmem:[%s10744_s16 + $0x88] ss:$16 sps:$4 sm:$0xff]   ;;  %v7485_v31 = vld [vmem:[%s10744_s16 + $0xa4] ss:$16 sps:$4 sm:$0xff]  }
 0x41d   :  { %2411 = vmatprep.subr.bf16.mxu1 %v7395_v32  ;;  %2452 = vmatprep.subr.bf16.mxu0 %v7398_v33  ;;  %v7488_v32 = vld [vmem:[%s10744_s16 + $0xac] ss:$16 sps:$4 sm:$0xff]   ;;  %v7483_v33 = vld [vmem:[%s10744_s16 + $0xa0] ss:$16 sps:$4 sm:$0xff]  }
 0x420   :  { %2412 = vmatpush1.bf16.msra.mxu1 %v7393_v34  ;;  %2453 = vmatpush1.bf16.msra.mxu0 %v7396_v35  ;;  %v7486_v34 = vld [vmem:[%s10744_s16 + $0xa8] ss:$16 sps:$4 sm:$0xff]   ;;  %v7491_v35 = vld [vmem:[%s10744_s16 + $0xc4] ss:$16 sps:$4 sm:$0xff]  }
 0x421   :  { %2413 = vmatprep.subr.bf16.mxu1 %v7401_v36  ;;  %2454 = vmatprep.subr.bf16.mxu0 %v7404_v37  ;;  %v7494_v36 = vld [vmem:[%s10744_s16 + $0xcc] ss:$16 sps:$4 sm:$0xff]   ;;  %v7489_v37 = vld [vmem:[%s10744_s16 + $0xc0] ss:$16 sps:$4 sm:$0xff]  }
 0x424   :  { %2414 = vmatpush1.bf16.msra.mxu1 %v7399_v38  ;;  %2455 = vmatpush1.bf16.msra.mxu0 %v7402_v39  ;;  %v7492_v38 = vld [vmem:[%s10744_s16 + $0xc8] ss:$16 sps:$4 sm:$0xff]   ;;  %v7497_v39 = vld [vmem:[%s10744_s16 + $0xe4] ss:$16 sps:$4 sm:$0xff]  }
 0x425   :  { %2415 = vmatprep.subr.bf16.mxu1 %v7407_v40  ;;  %2456 = vmatprep.subr.bf16.mxu0 %v7410_v41  ;;  %v7500_v40 = vld [vmem:[%s10744_s16 + $0xec] ss:$16 sps:$4 sm:$0xff]   ;;  %v7495_v41 = vld [vmem:[%s10744_s16 + $0xe0] ss:$16 sps:$4 sm:$0xff]  }
 0x428   :  { %2416 = vmatpush1.bf16.msra.mxu1 %v7405_v42  ;;  %2457 = vmatpush1.bf16.msra.mxu0 %v7408_v43  ;;  %v7498_v42 = vld [vmem:[%s10744_s16 + $0xe8] ss:$16 sps:$4 sm:$0xff]   ;;  %v7503_v43 = vld [vmem:[%s10744_s16 + $0x104] ss:$16 sps:$4 sm:$0xff]  }
 0x429   :  { %2417 = vmatprep.subr.bf16.mxu1 %v7413_v44  ;;  %2458 = vmatprep.subr.bf16.mxu0 %v7416_v45  ;;  %v7506_v44 = vld [vmem:[%s10744_s16 + $0x10c] ss:$16 sps:$4 sm:$0xff]   ;;  %v7501_v45 = vld [vmem:[%s10744_s16 + $0x100] ss:$16 sps:$4 sm:$0xff]  }
 0x42c   :  { %2418 = vmatpush1.bf16.msra.mxu1 %v7411_v46  ;;  %2459 = vmatpush1.bf16.msra.mxu0 %v7414_v47  ;;  %v7504_v46 = vld [vmem:[%s10744_s16 + $0x108] ss:$16 sps:$4 sm:$0xff]   ;;  %v7509_v47 = vld [vmem:[%s10744_s16 + $0x124] ss:$16 sps:$4 sm:$0xff]  }
 0x42d   :  { %2419 = vmatprep.subr.bf16.mxu1 %v7419_v48  ;;  %2460 = vmatprep.subr.bf16.mxu0 %v7422_v49  ;;  %v7512_v48 = vld [vmem:[%s10744_s16 + $0x12c] ss:$16 sps:$4 sm:$0xff]   ;;  %v7507_v49 = vld [vmem:[%s10744_s16 + $0x120] ss:$16 sps:$4 sm:$0xff]  }
 0x430   :  { %2420 = vmatpush1.bf16.msra.mxu1 %v7417_v50  ;;  %2461 = vmatpush1.bf16.msra.mxu0 %v7420_v51  ;;  %v7510_v50 = vld [vmem:[%s10744_s16 + $0x128] ss:$16 sps:$4 sm:$0xff]   ;;  %v7515_v51 = vld [vmem:[%s10744_s16 + $0x144] ss:$16 sps:$4 sm:$0xff]  }
 0x431   :  { %2421 = vmatprep.subr.bf16.mxu1 %v7425_v52  ;;  %2462 = vmatprep.subr.bf16.mxu0 %v7428_v53  ;;  %v7518_v52 = vld [vmem:[%s10744_s16 + $0x14c] ss:$16 sps:$4 sm:$0xff]   ;;  %v7513_v53 = vld [vmem:[%s10744_s16 + $0x140] ss:$16 sps:$4 sm:$0xff]  }
 0x434   :  { %2422 = vmatpush1.bf16.msra.mxu1 %v7423_v55  ;;  %2463 = vmatpush1.bf16.msra.mxu0 %v7426_v56  ;;  %v7516_v55 = vld [vmem:[%s10744_s16 + $0x148] ss:$16 sps:$4 sm:$0xff]   ;;  %v7521_v56 = vld [vmem:[%s10744_s16 + $0x164] ss:$16 sps:$4 sm:$0xff]  }
 0x435   :  { %2423 = vmatprep.subr.bf16.mxu1 %v7431_v57  ;;  %2464 = vmatprep.subr.bf16.mxu0 %v7434_v58  ;;  %v7524_v57 = vld [vmem:[%s10744_s16 + $0x16c] ss:$16 sps:$4 sm:$0xff]   ;;  %v7519_v58 = vld [vmem:[%s10744_s16 + $0x160] ss:$16 sps:$4 sm:$0xff]  }
 0x438   :  { %2424 = vmatpush1.bf16.msra.mxu1 %v7429_v59  ;;  %2465 = vmatpush1.bf16.msra.mxu0 %v7432_v60  ;;  %v7522_v59 = vld [vmem:[%s10744_s16 + $0x168] ss:$16 sps:$4 sm:$0xff]   ;;  %v7527_v60 = vld [vmem:[%s10744_s16 + $0x184] ss:$16 sps:$4 sm:$0xff]  }
 0x439   :  { %2425 = vmatprep.subr.bf16.mxu1 %v7437_v61  ;;  %2466 = vmatprep.subr.bf16.mxu0 %v7440_v54  ;;  %v7530_v61 = vld [vmem:[%s10744_s16 + $0x18c] ss:$16 sps:$4 sm:$0xff]   ;;  %v7525_v54 = vld [vmem:[%s10744_s16 + $0x180] ss:$16 sps:$4 sm:$0xff]  }
 0x43c   :  { %2426 = vmatpush1.bf16.msra.mxu1 %v7435_v62  ;;  %2467 = vmatpush1.bf16.msra.mxu0 %v7438_v63  ;;  %v7528_v62 = vld [vmem:[%s10744_s16 + $0x188] ss:$16 sps:$4 sm:$0xff]   ;;  %v7533_v63 = vld [vmem:[%s10744_s16 + $0x1a4] ss:$16 sps:$4 sm:$0xff]  }
 0x43d   :  { %2427 = vmatprep.subr.bf16.mxu1 %v7443_v2  ;;  %2468 = vmatprep.subr.bf16.mxu0 %v7446_v3  ;;  %v7536_v2 = vld [vmem:[%s10744_s16 + $0x1ac] ss:$16 sps:$4 sm:$0xff]   ;;  %v7531_v3 = vld [vmem:[%s10744_s16 + $0x1a0] ss:$16 sps:$4 sm:$0xff]  }
 0x440   :  { %2428 = vmatpush1.bf16.msra.mxu1 %v7441_v4  ;;  %2469 = vmatpush1.bf16.msra.mxu0 %v7444_v5  ;;  %v7534_v4 = vld [vmem:[%s10744_s16 + $0x1a8] ss:$16 sps:$4 sm:$0xff]   ;;  %v7539_v5 = vld [vmem:[%s10744_s16 + $0x1c4] ss:$16 sps:$4 sm:$0xff]  }
 0x441   :  { %2429 = vmatprep.subr.bf16.mxu1 %v7449_v6  ;;  %2470 = vmatprep.subr.bf16.mxu0 %v7452_v7  ;;  %v7542_v6 = vld [vmem:[%s10744_s16 + $0x1cc] ss:$16 sps:$4 sm:$0xff]   ;;  %v7537_v7 = vld [vmem:[%s10744_s16 + $0x1c0] ss:$16 sps:$4 sm:$0xff]  }
 0x444   :  { %2430 = vmatpush1.bf16.msra.mxu1 %v7447_v8  ;;  %2471 = vmatpush1.bf16.msra.mxu0 %v7450_v9  ;;  %v7540_v8 = vld [vmem:[%s10744_s16 + $0x1c8] ss:$16 sps:$4 sm:$0xff]   ;;  %v7545_v9 = vld [vmem:[%s10744_s16 + $0x1e4] ss:$16 sps:$4 sm:$0xff]  }
 0x445   :  { %3275 = vmatprep.subr.bf16.mxu1 %v7455_v27  ;;  %3357 = vmatprep.subr.bf16.mxu0 %v7458_v29  ;;  %v7548_v27 = vld [vmem:[%s10744_s16 + $0x1ec] ss:$16 sps:$4 sm:$0xff]   ;;  %v7543_v29 = vld [vmem:[%s10744_s16 + $0x1e0] ss:$16 sps:$4 sm:$0xff]  }
 0x447   :  { %2432 = vmatmul.mubr.bf16.vlgmr.msra.gmra.mrb[12].mxu1 %v9072_v10  ;;  %2473 = vmatmul.mubr.bf16.vlgmr.msra.gmra.mrb[12].mxu0 %v9072_v10  ;;  %v7470_v10 = vld [vmem:[%s10744_s16 + $0x4c] ss:$16 sps:$4 sm:$0xff]  }
 0x448   :  { %3276 = vmatpush1.bf16.msra.mxu1 %v7453_v11  ;;  %3358 = vmatpush1.bf16.msra.mxu0 %v7456_v12  ;;  %v7546_v11 = vld [vmem:[%s10744_s16 + $0x1e8] ss:$16 sps:$4 sm:$0xff]   ;;  %v7551_v12 = vld [vmem:[%s10744_s16 + $0x204] ss:$16 sps:$4 sm:$0xff]  }
 0x449   :  { %3277 = vmatprep.subr.bf16.mxu1 %v7461_v13  ;;  %3359 = vmatprep.subr.bf16.mxu0 %v7464_v14  ;;  %v7554_v13 = vld [vmem:[%s10744_s16 + $0x20c] ss:$16 sps:$4 sm:$0xff]   ;;  %v9459_v14 = vld [vmem:[%s10741_s13] sm:$0xf] }
 0x44c   :  { %3278 = vmatpush1.bf16.msra.mxu1 %v7459_v16  ;;  %3360 = vmatpush1.bf16.msra.mxu0 %v7462_v17  ;;  %v9462_v16 = vsub.s32 3, %v8304_v15  ;;  %v1570_v17 = vrot.slane %v9459_v14, %v8639_v0 }
 0x44d   :  { %3279 = vmatprep.subr.bf16.mxu1 %v7467_v18  ;;  %3361 = vmatprep.subr.bf16.mxu0 %v7470_v10  ;;  %v1574_v18 = vrot.slane %v9459_v14, %v8642_v1 }
 0x44e   :  { %v1582_v10 = vrot.slane %v9459_v14, %v9462_v16 }
 0x450   :  { %3280 = vmatpush1.bf16.msra.mxu1 %v7465_v19  ;;  %3362 = vmatpush1.bf16.msra.mxu0 %v7468_v20 }
 0x451   :  { %3281 = vmatprep.subr.bf16.mxu1 %v7473_v21  ;;  %3363 = vmatprep.subr.bf16.mxu0 %v7476_v22 }
 0x454   :  { %3282 = vmatpush1.bf16.msra.mxu1 %v7471_v23  ;;  %3364 = vmatpush1.bf16.msra.mxu0 %v7474_v24 }
 0x455   :  { %3283 = vmatprep.subr.bf16.mxu1 %v7479_v25  ;;  %3365 = vmatprep.subr.bf16.mxu0 %v7482_v26 }
 0x458   :  { %3284 = vmatpush1.bf16.msra.mxu1 %v7477_v28  ;;  %3366 = vmatpush1.bf16.msra.mxu0 %v7480_v30 }
 0x459   :  { %3285 = vmatprep.subr.bf16.mxu1 %v7485_v31  ;;  %3367 = vmatprep.subr.bf16.mxu0 %v7488_v32 }
 0x45c   :  { %3286 = vmatpush1.bf16.msra.mxu1 %v7483_v33  ;;  %3368 = vmatpush1.bf16.msra.mxu0 %v7486_v34 }
 0x45d   :  { %3287 = vmatprep.subr.bf16.mxu1 %v7491_v35  ;;  %3369 = vmatprep.subr.bf16.mxu0 %v7494_v36  ;;  %v7549_v36 = vld [vmem:[%s10744_s16 + $0x200] ss:$16 sps:$4 sm:$0xff]  }
 0x460   :  { %3288 = vmatpush1.bf16.msra.mxu1 %v7489_v37  ;;  %3370 = vmatpush1.bf16.msra.mxu0 %v7492_v38  ;;  %v7552_v37 = vld [vmem:[%s10744_s16 + $0x208] ss:$16 sps:$4 sm:$0xff]  }
 0x461   :  { %3289 = vmatprep.subr.bf16.mxu1 %v7497_v39  ;;  %3371 = vmatprep.subr.bf16.mxu0 %v7500_v40  ;;  %v7557_v39 = vld [vmem:[%s10744_s16 + $0x224] ss:$16 sps:$4 sm:$0xff]   ;;  %v7560_v40 = vld [vmem:[%s10744_s16 + $0x22c] ss:$16 sps:$4 sm:$0xff]  }
 0x464   :  { %3290 = vmatpush1.bf16.msra.mxu1 %v7495_v41  ;;  %3372 = vmatpush1.bf16.msra.mxu0 %v7498_v42  ;;  %v7555_v42 = vld [vmem:[%s10744_s16 + $0x220] ss:$16 sps:$4 sm:$0xff]  }
 0x465   :  { %3291 = vmatprep.subr.bf16.mxu1 %v7503_v43  ;;  %3373 = vmatprep.subr.bf16.mxu0 %v7506_v44  ;;  %v7558_v43 = vld [vmem:[%s10744_s16 + $0x228] ss:$16 sps:$4 sm:$0xff]   ;;  %v7563_v44 = vld [vmem:[%s10744_s16 + $0x244] ss:$16 sps:$4 sm:$0xff]  }
 0x468   :  { %3292 = vmatpush1.bf16.msra.mxu1 %v7501_v45  ;;  %3374 = vmatpush1.bf16.msra.mxu0 %v7504_v46  ;;  %v7566_v45 = vld [vmem:[%s10744_s16 + $0x24c] ss:$16 sps:$4 sm:$0xff]   ;;  %v7561_v46 = vld [vmem:[%s10744_s16 + $0x240] ss:$16 sps:$4 sm:$0xff]  }
 0x469   :  { %3293 = vmatprep.subr.bf16.mxu1 %v7509_v47  ;;  %3375 = vmatprep.subr.bf16.mxu0 %v7512_v48  ;;  %v7564_v47 = vld [vmem:[%s10744_s16 + $0x248] ss:$16 sps:$4 sm:$0xff]   ;;  %v7569_v48 = vld [vmem:[%s10744_s16 + $0x264] ss:$16 sps:$4 sm:$0xff]  }
 0x46c   :  { %3294 = vmatpush1.bf16.msra.mxu1 %v7507_v49  ;;  %3376 = vmatpush1.bf16.msra.mxu0 %v7510_v50  ;;  %v7572_v49 = vld [vmem:[%s10744_s16 + $0x26c] ss:$16 sps:$4 sm:$0xff]   ;;  %v7567_v50 = vld [vmem:[%s10744_s16 + $0x260] ss:$16 sps:$4 sm:$0xff]  }
 0x46d   :  { %3295 = vmatprep.subr.bf16.mxu1 %v7515_v51  ;;  %3377 = vmatprep.subr.bf16.mxu0 %v7518_v52  ;;  %v7570_v51 = vld [vmem:[%s10744_s16 + $0x268] ss:$16 sps:$4 sm:$0xff]   ;;  %v7575_v52 = vld [vmem:[%s10744_s16 + $0x284] ss:$16 sps:$4 sm:$0xff]  }
 0x470   :  { %3296 = vmatpush1.bf16.msra.mxu1 %v7513_v53  ;;  %3378 = vmatpush1.bf16.msra.mxu0 %v7516_v55  ;;  %v7578_v53 = vld [vmem:[%s10744_s16 + $0x28c] ss:$16 sps:$4 sm:$0xff]   ;;  %v7573_v55 = vld [vmem:[%s10744_s16 + $0x280] ss:$16 sps:$4 sm:$0xff]  }
 0x471   :  { %3297 = vmatprep.subr.bf16.mxu1 %v7521_v56  ;;  %3379 = vmatprep.subr.bf16.mxu0 %v7524_v57  ;;  %v7576_v56 = vld [vmem:[%s10744_s16 + $0x288] ss:$16 sps:$4 sm:$0xff]   ;;  %v7581_v57 = vld [vmem:[%s10744_s16 + $0x2a4] ss:$16 sps:$4 sm:$0xff]  }
 0x474   :  { %3298 = vmatpush1.bf16.msra.mxu1 %v7519_v58  ;;  %3380 = vmatpush1.bf16.msra.mxu0 %v7522_v59  ;;  %v7584_v58 = vld [vmem:[%s10744_s16 + $0x2ac] ss:$16 sps:$4 sm:$0xff]   ;;  %v7579_v59 = vld [vmem:[%s10744_s16 + $0x2a0] ss:$16 sps:$4 sm:$0xff]  }
 0x475   :  { %3299 = vmatprep.subr.bf16.mxu1 %v7527_v60  ;;  %3381 = vmatprep.subr.bf16.mxu0 %v7530_v61  ;;  %v7582_v60 = vld [vmem:[%s10744_s16 + $0x2a8] ss:$16 sps:$4 sm:$0xff]   ;;  %v7587_v61 = vld [vmem:[%s10744_s16 + $0x2c4] ss:$16 sps:$4 sm:$0xff]  }
 0x478   :  { %3300 = vmatpush1.bf16.msra.mxu1 %v7525_v54  ;;  %3382 = vmatpush1.bf16.msra.mxu0 %v7528_v62  ;;  %v7590_v54 = vld [vmem:[%s10744_s16 + $0x2cc] ss:$16 sps:$4 sm:$0xff]   ;;  %v7585_v62 = vld [vmem:[%s10744_s16 + $0x2c0] ss:$16 sps:$4 sm:$0xff]  }
 0x479   :  { %3301 = vmatprep.subr.bf16.mxu1 %v7533_v63  ;;  %3383 = vmatprep.subr.bf16.mxu0 %v7536_v2  ;;  %v7588_v63 = vld [vmem:[%s10744_s16 + $0x2c8] ss:$16 sps:$4 sm:$0xff]   ;;  %v7593_v2 = vld [vmem:[%s10744_s16 + $0x2e4] ss:$16 sps:$4 sm:$0xff]  }
 0x47c   :  { %3302 = vmatpush1.bf16.msra.mxu1 %v7531_v3  ;;  %3384 = vmatpush1.bf16.msra.mxu0 %v7534_v4  ;;  %v7596_v3 = vld [vmem:[%s10744_s16 + $0x2ec] ss:$16 sps:$4 sm:$0xff]   ;;  %v7591_v4 = vld [vmem:[%s10744_s16 + $0x2e0] ss:$16 sps:$4 sm:$0xff]  }
 0x47d   :  { %3303 = vmatprep.subr.bf16.mxu1 %v7539_v5  ;;  %3385 = vmatprep.subr.bf16.mxu0 %v7542_v6  ;;  %v7594_v5 = vld [vmem:[%s10744_s16 + $0x2e8] ss:$16 sps:$4 sm:$0xff]   ;;  %v7599_v6 = vld [vmem:[%s10744_s16 + $0x304] ss:$16 sps:$4 sm:$0xff]  }
 0x480   :  { %3304 = vmatpush1.bf16.msra.mxu1 %v7537_v7  ;;  %3386 = vmatpush1.bf16.msra.mxu0 %v7540_v8  ;;  %v7602_v7 = vld [vmem:[%s10744_s16 + $0x30c] ss:$16 sps:$4 sm:$0xff]   ;;  %v7597_v8 = vld [vmem:[%s10744_s16 + $0x300] ss:$16 sps:$4 sm:$0xff]  }
 0x481   :  { %3305 = vmatprep.subr.bf16.mxu1 %v7545_v9  ;;  %3387 = vmatprep.subr.bf16.mxu0 %v7548_v27  ;;  %v7600_v9 = vld [vmem:[%s10744_s16 + $0x308] ss:$16 sps:$4 sm:$0xff]   ;;  %v7605_v27 = vld [vmem:[%s10744_s16 + $0x324] ss:$16 sps:$4 sm:$0xff]  }
 0x484   :  { %3306 = vmatpush1.bf16.msra.mxu1 %v7543_v29  ;;  %3388 = vmatpush1.bf16.msra.mxu0 %v7546_v11  ;;  %v7608_v29 = vld [vmem:[%s10744_s16 + $0x32c] ss:$16 sps:$4 sm:$0xff]   ;;  %v7603_v11 = vld [vmem:[%s10744_s16 + $0x320] ss:$16 sps:$4 sm:$0xff]  }
 0x485   :  { %3316 = vmatprep.subr.bf16.mxu1 %v7551_v12  ;;  %3398 = vmatprep.subr.bf16.mxu0 %v7554_v13  ;;  %v7606_v12 = vld [vmem:[%s10744_s16 + $0x328] ss:$16 sps:$4 sm:$0xff]   ;;  %v7611_v13 = vld [vmem:[%s10744_s16 + $0x344] ss:$16 sps:$4 sm:$0xff]  }
 0x4da   :  { %v1941_v19 = vpop.f32.mrb[8].mxu1  ;;  %v9470_v20 = vpop.f32.mrb[8].mxu0 }
 0x4db   :  { %v1942_v21 = vadd.f32 %v1941_v19, %v1570_v17  ;;  %v1943_v22 = vpop.f32.mrb[9].mxu1  ;;  %v1984_v23 = vpop.f32.mrb[9].mxu0  ;;  %v7614_v17 = vld [vmem:[%s10744_s16 + $0x34c] ss:$16 sps:$4 sm:$0xff]   ;;  %v7617_v19 = vld [vmem:[%s10744_s16 + $0x364] ss:$16 sps:$4 sm:$0xff]  }
 0x4dc   :  { %v1944_v24 = vadd.f32 %v1943_v22, %v1574_v18  ;;  %v1985_v25 = vadd.f32 %v1984_v23, %v1582_v10  ;;  %v1945_v26 = vpop.f32.mrb[10].mxu1  ;;  %v1986_v28 = vpop.f32.mrb[10].mxu0  ;;  %v7609_v18 = vld [vmem:[%s10744_s16 + $0x340] ss:$16 sps:$4 sm:$0xff]   ;;  %v7612_v10 = vld [vmem:[%s10744_s16 + $0x348] ss:$16 sps:$4 sm:$0xff]  }
 0x4dd   :  { %v1989_v30 = vmax.f32 %v1942_v21, 0.0  ;;  %v1946_v31 = vpop.f32.mrb[11].mxu1  ;;  %v1987_v32 = vpop.f32.mrb[11].mxu0  ;;  %v7620_v21 = vld [vmem:[%s10744_s16 + $0x36c] ss:$16 sps:$4 sm:$0xff]  }
 0x4de   :  { %v1990_v33 = vmax.f32 %v1944_v24, 0.0  ;;  %v1992_v34 = vmax.f32 %v1985_v25, 0.0  ;;  %v7615_v22 = vld [vmem:[%s10744_s16 + $0x360] ss:$16 sps:$4 sm:$0xff]   ;;  %v7618_v23 = vld [vmem:[%s10744_s16 + $0x368] ss:$16 sps:$4 sm:$0xff]  }
 0x4df   :  { %v2481_v38 = vpack.c.bf16 %v1989_v30, %v1989_v30  ;;  %v7623_v24 = vld [vmem:[%s10744_s16 + $0x384] ss:$16 sps:$4 sm:$0xff]   ;;  %v7626_v25 = vld [vmem:[%s10744_s16 + $0x38c] ss:$16 sps:$4 sm:$0xff]   ;;  %v7621_v26 = vld [vmem:[%s10744_s16 + $0x380] ss:$16 sps:$4 sm:$0xff]  }
 0x4e0   :  { %v2482_v35 = vpack.c.bf16 %v1990_v33, %v1990_v33  ;;  %v2484_v41 = vpack.c.bf16 %v1992_v34, %v1992_v34  ;;  %v7624_v28 = vld [vmem:[%s10744_s16 + $0x388] ss:$16 sps:$4 sm:$0xff]   ;;  %v9623_v30 = vsub.s32 2, %v8304_v15  ;;  %v7629_v31 = vld [vmem:[%s10744_s16 + $0x3a4] ss:$16 sps:$4 sm:$0xff]  }
 0x4e1   :  { %v7632_v32 = vld [vmem:[%s10744_s16 + $0x3ac] ss:$16 sps:$4 sm:$0xff]   ;;  %v7627_v33 = vld [vmem:[%s10744_s16 + $0x3a0] ss:$16 sps:$4 sm:$0xff]   ;;  %v7630_v15 = vld [vmem:[%s10744_s16 + $0x3a8] ss:$16 sps:$4 sm:$0xff]  }
 0x4e2   :  { %3307 = vmatprep.mubr.bf16.mxu1 %v2482_v35  ;;  %3389 = vmatprep.mubr.bf16.mxu0 %v2482_v35  ;;  %v1578_v34 = vrot.slane %v9459_v14, %v9623_v30  ;;  %v7635_v35 = vld [vmem:[%s10744_s16 + $0x3c4] ss:$16 sps:$4 sm:$0xff]   ;;  %v7636_v14 = vld [vmem:[%s10744_s16 + $0x3c8] ss:$16 sps:$4 sm:$0xff]  }
 0x4e3   :  { %3308 = vmatmul.mubr.bf16.vlgmr.msra.gmra.mrb[12].mxu1 %v2481_v38  ;;  %3390 = vmatmul.mubr.bf16.vlgmr.msra.gmra.mrb[12].mxu0 %v2481_v38 }
 0x4e4   :  { %3317 = vmatpush1.bf16.msra.mxu1 %v7549_v36  ;;  %3399 = vmatpush1.bf16.msra.mxu0 %v7552_v37  ;;  %v7638_v36 = vld [vmem:[%s10744_s16 + $0x3cc] ss:$16 sps:$4 sm:$0xff]   ;;  %v7633_v37 = vld [vmem:[%s10744_s16 + $0x3c0] ss:$16 sps:$4 sm:$0xff]   ;;  %v1983_v38 = vadd.f32 %v9470_v20, %v1578_v34  ;;  %v7642_v20 = vld [vmem:[%s10744_s16 + $0x3e8] ss:$16 sps:$4 sm:$0xff]  }
 0x4e5   :  { %3348 = vmatprep.mubr.bf16.mxu1 %v2484_v41  ;;  %3430 = vmatprep.mubr.bf16.mxu0 %v2484_v41  ;;  %v7639_v41 = vld [vmem:[%s10744_s16 + $0x3e0] ss:$16 sps:$4 sm:$0xff]   ;;  %v7719_v34 = vld [vmem:[%s10746_s18 + $0x184] ss:$16 sps:$4 sm:$0xff]  }
 0x4e6   :  { %3318 = vmatprep.subr.bf16.mxu1 %v7557_v39  ;;  %3400 = vmatprep.subr.bf16.mxu0 %v7560_v40  ;;  %v7641_v39 = vld [vmem:[%s10744_s16 + $0x3e4] ss:$16 sps:$4 sm:$0xff]   ;;  %v7644_v40 = vld [vmem:[%s10744_s16 + $0x3ec] ss:$16 sps:$4 sm:$0xff]  }
 0x4e8   :  { %3319 = vmatpush1.bf16.msra.mxu1 %v7555_v42  ;;  %3401 = vmatpush1.bf16.msra.mxu0 %v7558_v43  ;;  %v1991_v42 = vmax.f32 %v1983_v38, 0.0  ;;  %v7647_v43 = vld [vmem:[%s10746_s18 + $0x4] ss:$16 sps:$4 sm:$0xff]   ;;  %v7728_v38 = vld [vmem:[%s10746_s18 + $0x1ac] ss:$16 sps:$4 sm:$0xff]  }
 0x4e9   :  { %3320 = vmatprep.subr.bf16.mxu1 %v7563_v44  ;;  %3402 = vmatprep.subr.bf16.mxu0 %v7566_v45  ;;  %v7650_v44 = vld [vmem:[%s10746_s18 + $0xc] ss:$16 sps:$4 sm:$0xff]   ;;  %v7645_v45 = vld [vmem:[%s10746_s18] ss:$16 sps:$4 sm:$0xff]  }
 0x4ec   :  { %3321 = vmatpush1.bf16.msra.mxu1 %v7561_v46  ;;  %3403 = vmatpush1.bf16.msra.mxu0 %v7564_v47  ;;  %v7648_v46 = vld [vmem:[%s10746_s18 + $0x8] ss:$16 sps:$4 sm:$0xff]   ;;  %v2483_v47 = vpack.c.bf16 %v1991_v42, %v1991_v42  ;;  %v7729_v42 = vld [vmem:[%s10746_s18 + $0x1c0] ss:$16 sps:$4 sm:$0xff]  }
 0x4ed   :  { %3322 = vmatprep.subr.bf16.mxu1 %v7569_v48  ;;  %3404 = vmatprep.subr.bf16.mxu0 %v7572_v49  ;;  %v7653_v48 = vld [vmem:[%s10746_s18 + $0x24] ss:$16 sps:$4 sm:$0xff]   ;;  %v7656_v49 = vld [vmem:[%s10746_s18 + $0x2c] ss:$16 sps:$4 sm:$0xff]  }
 0x4f0   :  { %3323 = vmatpush1.bf16.msra.mxu1 %v7567_v50  ;;  %3405 = vmatpush1.bf16.msra.mxu0 %v7570_v51  ;;  %v7651_v50 = vld [vmem:[%s10746_s18 + $0x20] ss:$16 sps:$4 sm:$0xff]   ;;  %v7654_v51 = vld [vmem:[%s10746_s18 + $0x28] ss:$16 sps:$4 sm:$0xff]  }
 0x4f1   :  { %3324 = vmatprep.subr.bf16.mxu1 %v7575_v52  ;;  %3406 = vmatprep.subr.bf16.mxu0 %v7578_v53  ;;  %v7659_v52 = vld [vmem:[%s10746_s18 + $0x44] ss:$16 sps:$4 sm:$0xff]   ;;  %v7662_v53 = vld [vmem:[%s10746_s18 + $0x4c] ss:$16 sps:$4 sm:$0xff]  }
 0x4f4   :  { %3325 = vmatpush1.bf16.msra.mxu1 %v7573_v55  ;;  %3407 = vmatpush1.bf16.msra.mxu0 %v7576_v56  ;;  %v7657_v55 = vld [vmem:[%s10746_s18 + $0x40] ss:$16 sps:$4 sm:$0xff]   ;;  %v7660_v56 = vld [vmem:[%s10746_s18 + $0x48] ss:$16 sps:$4 sm:$0xff]  }
 0x4f5   :  { %3326 = vmatprep.subr.bf16.mxu1 %v7581_v57  ;;  %3408 = vmatprep.subr.bf16.mxu0 %v7584_v58  ;;  %v7665_v57 = vld [vmem:[%s10746_s18 + $0x64] ss:$16 sps:$4 sm:$0xff]   ;;  %v7668_v58 = vld [vmem:[%s10746_s18 + $0x6c] ss:$16 sps:$4 sm:$0xff]  }
 0x4f8   :  { %3327 = vmatpush1.bf16.msra.mxu1 %v7579_v59  ;;  %3409 = vmatpush1.bf16.msra.mxu0 %v7582_v60  ;;  %v7663_v59 = vld [vmem:[%s10746_s18 + $0x60] ss:$16 sps:$4 sm:$0xff]   ;;  %v7666_v60 = vld [vmem:[%s10746_s18 + $0x68] ss:$16 sps:$4 sm:$0xff]  }
 0x4f9   :  { %3328 = vmatprep.subr.bf16.mxu1 %v7587_v61  ;;  %3410 = vmatprep.subr.bf16.mxu0 %v7590_v54  ;;  %v7671_v61 = vld [vmem:[%s10746_s18 + $0x84] ss:$16 sps:$4 sm:$0xff]   ;;  %v7674_v54 = vld [vmem:[%s10746_s18 + $0x8c] ss:$16 sps:$4 sm:$0xff]  }
 0x4fc   :  { %3329 = vmatpush1.bf16.msra.mxu1 %v7585_v62  ;;  %3411 = vmatpush1.bf16.msra.mxu0 %v7588_v63  ;;  %v7669_v62 = vld [vmem:[%s10746_s18 + $0x80] ss:$16 sps:$4 sm:$0xff]   ;;  %v7672_v63 = vld [vmem:[%s10746_s18 + $0x88] ss:$16 sps:$4 sm:$0xff]  }
 0x4fd   :  { %3330 = vmatprep.subr.bf16.mxu1 %v7593_v2  ;;  %3412 = vmatprep.subr.bf16.mxu0 %v7596_v3  ;;  %v7677_v2 = vld [vmem:[%s10746_s18 + $0xa4] ss:$16 sps:$4 sm:$0xff]   ;;  %v7680_v3 = vld [vmem:[%s10746_s18 + $0xac] ss:$16 sps:$4 sm:$0xff]  }
 0x500   :  { %3331 = vmatpush1.bf16.msra.mxu1 %v7591_v4  ;;  %3413 = vmatpush1.bf16.msra.mxu0 %v7594_v5  ;;  %v7675_v4 = vld [vmem:[%s10746_s18 + $0xa0] ss:$16 sps:$4 sm:$0xff]   ;;  %v7678_v5 = vld [vmem:[%s10746_s18 + $0xa8] ss:$16 sps:$4 sm:$0xff]  }
 0x501   :  { %3332 = vmatprep.subr.bf16.mxu1 %v7599_v6  ;;  %3414 = vmatprep.subr.bf16.mxu0 %v7602_v7  ;;  %v7683_v6 = vld [vmem:[%s10746_s18 + $0xc4] ss:$16 sps:$4 sm:$0xff]   ;;  %v7686_v7 = vld [vmem:[%s10746_s18 + $0xcc] ss:$16 sps:$4 sm:$0xff]  }
 0x504   :  { %3333 = vmatpush1.bf16.msra.mxu1 %v7597_v8  ;;  %3415 = vmatpush1.bf16.msra.mxu0 %v7600_v9  ;;  %v7681_v8 = vld [vmem:[%s10746_s18 + $0xc0] ss:$16 sps:$4 sm:$0xff]   ;;  %v7684_v9 = vld [vmem:[%s10746_s18 + $0xc8] ss:$16 sps:$4 sm:$0xff]  }
 0x505   :  { %3334 = vmatprep.subr.bf16.mxu1 %v7605_v27  ;;  %3416 = vmatprep.subr.bf16.mxu0 %v7608_v29  ;;  %v7689_v27 = vld [vmem:[%s10746_s18 + $0xe4] ss:$16 sps:$4 sm:$0xff]   ;;  %v7692_v29 = vld [vmem:[%s10746_s18 + $0xec] ss:$16 sps:$4 sm:$0xff]  }
 0x508   :  { %3335 = vmatpush1.bf16.msra.mxu1 %v7603_v11  ;;  %3417 = vmatpush1.bf16.msra.mxu0 %v7606_v12  ;;  %v7687_v11 = vld [vmem:[%s10746_s18 + $0xe0] ss:$16 sps:$4 sm:$0xff]   ;;  %v7690_v12 = vld [vmem:[%s10746_s18 + $0xe8] ss:$16 sps:$4 sm:$0xff]  }
 0x509   :  { %3336 = vmatprep.subr.bf16.mxu1 %v7611_v13  ;;  %3418 = vmatprep.subr.bf16.mxu0 %v7614_v17  ;;  %v7695_v13 = vld [vmem:[%s10746_s18 + $0x104] ss:$16 sps:$4 sm:$0xff]   ;;  %v7698_v17 = vld [vmem:[%s10746_s18 + $0x10c] ss:$16 sps:$4 sm:$0xff]  }
 0x50c   :  { %3337 = vmatpush1.bf16.msra.mxu1 %v7609_v18  ;;  %3419 = vmatpush1.bf16.msra.mxu0 %v7612_v10  ;;  %v7693_v18 = vld [vmem:[%s10746_s18 + $0x100] ss:$16 sps:$4 sm:$0xff]   ;;  %v7696_v10 = vld [vmem:[%s10746_s18 + $0x108] ss:$16 sps:$4 sm:$0xff]  }
 0x50d   :  { %3338 = vmatprep.subr.bf16.mxu1 %v7617_v19  ;;  %3420 = vmatprep.subr.bf16.mxu0 %v7620_v21  ;;  %v7701_v19 = vld [vmem:[%s10746_s18 + $0x124] ss:$16 sps:$4 sm:$0xff]   ;;  %v7704_v21 = vld [vmem:[%s10746_s18 + $0x12c] ss:$16 sps:$4 sm:$0xff]  }
 0x510   :  { %3339 = vmatpush1.bf16.msra.mxu1 %v7615_v22  ;;  %3421 = vmatpush1.bf16.msra.mxu0 %v7618_v23  ;;  %v7699_v22 = vld [vmem:[%s10746_s18 + $0x120] ss:$16 sps:$4 sm:$0xff]   ;;  %v7702_v23 = vld [vmem:[%s10746_s18 + $0x128] ss:$16 sps:$4 sm:$0xff]  }
 0x511   :  { %3340 = vmatprep.subr.bf16.mxu1 %v7623_v24  ;;  %3422 = vmatprep.subr.bf16.mxu0 %v7626_v25  ;;  %v7707_v24 = vld [vmem:[%s10746_s18 + $0x144] ss:$16 sps:$4 sm:$0xff]   ;;  %v7710_v25 = vld [vmem:[%s10746_s18 + $0x14c] ss:$16 sps:$4 sm:$0xff]  }
 0x514   :  { %3341 = vmatpush1.bf16.msra.mxu1 %v7621_v26  ;;  %3423 = vmatpush1.bf16.msra.mxu0 %v7624_v28  ;;  %v7705_v26 = vld [vmem:[%s10746_s18 + $0x140] ss:$16 sps:$4 sm:$0xff]   ;;  %v7708_v28 = vld [vmem:[%s10746_s18 + $0x148] ss:$16 sps:$4 sm:$0xff]  }
 0x515   :  { %3342 = vmatprep.subr.bf16.mxu1 %v7629_v31  ;;  %3424 = vmatprep.subr.bf16.mxu0 %v7632_v32  ;;  %v7713_v31 = vld [vmem:[%s10746_s18 + $0x164] ss:$16 sps:$4 sm:$0xff]   ;;  %v7716_v32 = vld [vmem:[%s10746_s18 + $0x16c] ss:$16 sps:$4 sm:$0xff]  }
 0x518   :  { %3343 = vmatpush1.bf16.msra.mxu1 %v7627_v33  ;;  %3425 = vmatpush1.bf16.msra.mxu0 %v7630_v15  ;;  %v7711_v33 = vld [vmem:[%s10746_s18 + $0x160] ss:$16 sps:$4 sm:$0xff]   ;;  %v7714_v15 = vld [vmem:[%s10746_s18 + $0x168] ss:$16 sps:$4 sm:$0xff]  }
 0x519   :  { %3344 = vmatprep.subr.bf16.mxu1 %v7635_v35  ;;  %3426 = vmatprep.subr.bf16.mxu0 %v7638_v36  ;;  %v7722_v35 = vld [vmem:[%s10746_s18 + $0x18c] ss:$16 sps:$4 sm:$0xff]   ;;  %v7717_v36 = vld [vmem:[%s10746_s18 + $0x180] ss:$16 sps:$4 sm:$0xff]  }
 0x51c   :  { %3345 = vmatpush1.bf16.msra.mxu1 %v7633_v37  ;;  %3427 = vmatpush1.bf16.msra.mxu0 %v7636_v14  ;;  %v7720_v37 = vld [vmem:[%s10746_s18 + $0x188] ss:$16 sps:$4 sm:$0xff]   ;;  %v7725_v14 = vld [vmem:[%s10746_s18 + $0x1a4] ss:$16 sps:$4 sm:$0xff]  }
 0x51d   :  { %3346 = vmatprep.subr.bf16.mxu1 %v7641_v39  ;;  %3428 = vmatprep.subr.bf16.mxu0 %v7644_v40  ;;  %v7723_v39 = vld [vmem:[%s10746_s18 + $0x1a0] ss:$16 sps:$4 sm:$0xff]   ;;  %v7726_v40 = vld [vmem:[%s10746_s18 + $0x1a8] ss:$16 sps:$4 sm:$0xff]  }
 0x520   :  { %3347 = vmatpush1.bf16.msra.mxu1 %v7639_v41  ;;  %3429 = vmatpush1.bf16.msra.mxu0 %v7642_v20  ;;  %v7731_v41 = vld [vmem:[%s10746_s18 + $0x1c4] ss:$16 sps:$4 sm:$0xff]   ;;  %v7734_v20 = vld [vmem:[%s10746_s18 + $0x1cc] ss:$16 sps:$4 sm:$0xff]  }
 0x521   :  { %4241 = vmatprep.subr.bf16.mxu1 %v7647_v43  ;;  %4323 = vmatprep.subr.bf16.mxu0 %v7650_v44  ;;  %v7732_v43 = vld [vmem:[%s10746_s18 + $0x1c8] ss:$16 sps:$4 sm:$0xff]   ;;  %v7737_v44 = vld [vmem:[%s10746_s18 + $0x1e4] ss:$16 sps:$4 sm:$0xff]  }
 0x523   :  { %3349 = vmatmul.mubr.bf16.vlgmr.msra.gmra.mrb[12].mxu1 %v2483_v47  ;;  %3431 = vmatmul.mubr.bf16.vlgmr.msra.gmra.mrb[12].mxu0 %v2483_v47  ;;  %v7738_v47 = vld [vmem:[%s10746_s18 + $0x1e8] ss:$16 sps:$4 sm:$0xff]  }
 0x524   :  { %4242 = vmatpush1.bf16.msra.mxu1 %v7645_v45  ;;  %4324 = vmatpush1.bf16.msra.mxu0 %v7648_v46  ;;  %v7740_v45 = vld [vmem:[%s10746_s18 + $0x1ec] ss:$16 sps:$4 sm:$0xff]   ;;  %v7735_v46 = vld [vmem:[%s10746_s18 + $0x1e0] ss:$16 sps:$4 sm:$0xff]  }
 0x525   :  { %4243 = vmatprep.subr.bf16.mxu1 %v7653_v48  ;;  %4325 = vmatprep.subr.bf16.mxu0 %v7656_v49  ;;  %v7743_v48 = vld [vmem:[%s10746_s18 + $0x204] ss:$16 sps:$4 sm:$0xff]   ;;  %v7746_v49 = vld [vmem:[%s10746_s18 + $0x20c] ss:$16 sps:$4 sm:$0xff]  }
 0x528   :  { %4244 = vmatpush1.bf16.msra.mxu1 %v7651_v50  ;;  %4326 = vmatpush1.bf16.msra.mxu0 %v7654_v51  ;;  %v9865_v50 = vld [vmem:[%s10743_s15] sm:$0xf] }
 0x529   :  { %4245 = vmatprep.subr.bf16.mxu1 %v7659_v52  ;;  %4327 = vmatprep.subr.bf16.mxu0 %v7662_v53  ;;  %v9870_v51 = vld [vmem:[%s10745_s17] sm:$0xf]  ;;  %v2062_v52 = vrot.slane %v9865_v50, %v8639_v0 }
 0x52a   :  { %v2618_v53 = vrot.slane %v9870_v51, %v8639_v0 }
 0x52c   :  { %4246 = vmatpush1.bf16.msra.mxu1 %v7657_v55  ;;  %4328 = vmatpush1.bf16.msra.mxu0 %v7660_v56  ;;  %v2066_v55 = vrot.slane %v9865_v50, %v8642_v1  ;;  %v2622_v56 = vrot.slane %v9870_v51, %v8642_v1 }
 0x52d   :  { %4247 = vmatprep.subr.bf16.mxu1 %v7665_v57  ;;  %4329 = vmatprep.subr.bf16.mxu0 %v7668_v58  ;;  %v2074_v57 = vrot.slane %v9865_v50, %v9462_v16  ;;  %v2630_v58 = vrot.slane %v9870_v51, %v9462_v16 }
 0x530   :  { %4248 = vmatpush1.bf16.msra.mxu1 %v7663_v59  ;;  %4330 = vmatpush1.bf16.msra.mxu0 %v7666_v60  ;;  %v6950_v59 = vadd.f32 %v2618_v53, %v2062_v52  ;;  %v6952_v60 = vadd.f32 %v2622_v56, %v2066_v55  ;;  %v7789_v52 = vld [vmem:[%s10746_s18 + $0x300] ss:$16 sps:$4 sm:$0xff]   ;;  %v7792_v53 = vld [vmem:[%s10746_s18 + $0x308] ss:$16 sps:$4 sm:$0xff]   ;;  %v7797_v55 = vld [vmem:[%s10746_s18 + $0x324] ss:$16 sps:$4 sm:$0xff]  }
 0x531   :  { %4249 = vmatprep.subr.bf16.mxu1 %v7671_v61  ;;  %4331 = vmatprep.subr.bf16.mxu0 %v7674_v54  ;;  %v6956_v61 = vadd.f32 %v2630_v58, %v2074_v57  ;;  %v7800_v56 = vld [vmem:[%s10746_s18 + $0x32c] ss:$16 sps:$4 sm:$0xff]   ;;  %v7795_v57 = vld [vmem:[%s10746_s18 + $0x320] ss:$16 sps:$4 sm:$0xff]   ;;  %v7798_v58 = vld [vmem:[%s10746_s18 + $0x328] ss:$16 sps:$4 sm:$0xff]  }
 0x534   :  { %4250 = vmatpush1.bf16.msra.mxu1 %v7669_v62  ;;  %4332 = vmatpush1.bf16.msra.mxu0 %v7672_v63 }
 0x535   :  { %4251 = vmatprep.subr.bf16.mxu1 %v7677_v2  ;;  %4333 = vmatprep.subr.bf16.mxu0 %v7680_v3 }
 0x538   :  { %4252 = vmatpush1.bf16.msra.mxu1 %v7675_v4  ;;  %4334 = vmatpush1.bf16.msra.mxu0 %v7678_v5 }
 0x539   :  { %4253 = vmatprep.subr.bf16.mxu1 %v7683_v6  ;;  %4335 = vmatprep.subr.bf16.mxu0 %v7686_v7 }
 0x53c   :  { %4254 = vmatpush1.bf16.msra.mxu1 %v7681_v8  ;;  %4336 = vmatpush1.bf16.msra.mxu0 %v7684_v9 }
 0x53d   :  { %4255 = vmatprep.subr.bf16.mxu1 %v7689_v27  ;;  %4337 = vmatprep.subr.bf16.mxu0 %v7692_v29 }
 0x540   :  { %4256 = vmatpush1.bf16.msra.mxu1 %v7687_v11  ;;  %4338 = vmatpush1.bf16.msra.mxu0 %v7690_v12 }
 0x541   :  { %4257 = vmatprep.subr.bf16.mxu1 %v7695_v13  ;;  %4339 = vmatprep.subr.bf16.mxu0 %v7698_v17  ;;  %v7741_v13 = vld [vmem:[%s10746_s18 + $0x200] ss:$16 sps:$4 sm:$0xff]   ;;  %v7744_v17 = vld [vmem:[%s10746_s18 + $0x208] ss:$16 sps:$4 sm:$0xff]  }
 0x544   :  { %4258 = vmatpush1.bf16.msra.mxu1 %v7693_v18  ;;  %4340 = vmatpush1.bf16.msra.mxu0 %v7696_v10  ;;  %v7749_v10 = vld [vmem:[%s10746_s18 + $0x224] ss:$16 sps:$4 sm:$0xff]  }
 0x545   :  { %4259 = vmatprep.subr.bf16.mxu1 %v7701_v19  ;;  %4341 = vmatprep.subr.bf16.mxu0 %v7704_v21  ;;  %v7752_v19 = vld [vmem:[%s10746_s18 + $0x22c] ss:$16 sps:$4 sm:$0xff]  }
 0x548   :  { %4260 = vmatpush1.bf16.msra.mxu1 %v7699_v22  ;;  %4342 = vmatpush1.bf16.msra.mxu0 %v7702_v23  ;;  %v7747_v22 = vld [vmem:[%s10746_s18 + $0x220] ss:$16 sps:$4 sm:$0xff]   ;;  %v7750_v23 = vld [vmem:[%s10746_s18 + $0x228] ss:$16 sps:$4 sm:$0xff]  }
 0x549   :  { %4261 = vmatprep.subr.bf16.mxu1 %v7707_v24  ;;  %4343 = vmatprep.subr.bf16.mxu0 %v7710_v25  ;;  %v7755_v24 = vld [vmem:[%s10746_s18 + $0x244] ss:$16 sps:$4 sm:$0xff]   ;;  %v7758_v25 = vld [vmem:[%s10746_s18 + $0x24c] ss:$16 sps:$4 sm:$0xff]  }
 0x54c   :  { %4262 = vmatpush1.bf16.msra.mxu1 %v7705_v26  ;;  %4344 = vmatpush1.bf16.msra.mxu0 %v7708_v28  ;;  %v7753_v26 = vld [vmem:[%s10746_s18 + $0x240] ss:$16 sps:$4 sm:$0xff]   ;;  %v7756_v28 = vld [vmem:[%s10746_s18 + $0x248] ss:$16 sps:$4 sm:$0xff]  }
 0x54d   :  { %4263 = vmatprep.subr.bf16.mxu1 %v7713_v31  ;;  %4345 = vmatprep.subr.bf16.mxu0 %v7716_v32  ;;  %v7761_v31 = vld [vmem:[%s10746_s18 + $0x264] ss:$16 sps:$4 sm:$0xff]   ;;  %v7764_v32 = vld [vmem:[%s10746_s18 + $0x26c] ss:$16 sps:$4 sm:$0xff]  }
 0x550   :  { %4264 = vmatpush1.bf16.msra.mxu1 %v7711_v33  ;;  %4346 = vmatpush1.bf16.msra.mxu0 %v7714_v15  ;;  %v7759_v33 = vld [vmem:[%s10746_s18 + $0x260] ss:$16 sps:$4 sm:$0xff]   ;;  %v7762_v15 = vld [vmem:[%s10746_s18 + $0x268] ss:$16 sps:$4 sm:$0xff]  }
 0x551   :  { %4265 = vmatprep.subr.bf16.mxu1 %v7719_v34  ;;  %4347 = vmatprep.subr.bf16.mxu0 %v7722_v35  ;;  %v7767_v34 = vld [vmem:[%s10746_s18 + $0x284] ss:$16 sps:$4 sm:$0xff]   ;;  %v7770_v35 = vld [vmem:[%s10746_s18 + $0x28c] ss:$16 sps:$4 sm:$0xff]  }
 0x554   :  { %4266 = vmatpush1.bf16.msra.mxu1 %v7717_v36  ;;  %4348 = vmatpush1.bf16.msra.mxu0 %v7720_v37  ;;  %v7765_v36 = vld [vmem:[%s10746_s18 + $0x280] ss:$16 sps:$4 sm:$0xff]   ;;  %v7768_v37 = vld [vmem:[%s10746_s18 + $0x288] ss:$16 sps:$4 sm:$0xff]  }
 0x555   :  { %4267 = vmatprep.subr.bf16.mxu1 %v7725_v14  ;;  %4349 = vmatprep.subr.bf16.mxu0 %v7728_v38  ;;  %v7773_v14 = vld [vmem:[%s10746_s18 + $0x2a4] ss:$16 sps:$4 sm:$0xff]   ;;  %v7776_v38 = vld [vmem:[%s10746_s18 + $0x2ac] ss:$16 sps:$4 sm:$0xff]  }
 0x558   :  { %4268 = vmatpush1.bf16.msra.mxu1 %v7723_v39  ;;  %4350 = vmatpush1.bf16.msra.mxu0 %v7726_v40  ;;  %v7771_v39 = vld [vmem:[%s10746_s18 + $0x2a0] ss:$16 sps:$4 sm:$0xff]   ;;  %v7774_v40 = vld [vmem:[%s10746_s18 + $0x2a8] ss:$16 sps:$4 sm:$0xff]  }
 0x559   :  { %4269 = vmatprep.subr.bf16.mxu1 %v7731_v41  ;;  %4351 = vmatprep.subr.bf16.mxu0 %v7734_v20  ;;  %v7779_v41 = vld [vmem:[%s10746_s18 + $0x2c4] ss:$16 sps:$4 sm:$0xff]   ;;  %v7782_v20 = vld [vmem:[%s10746_s18 + $0x2cc] ss:$16 sps:$4 sm:$0xff]  }
 0x55c   :  { %4270 = vmatpush1.bf16.msra.mxu1 %v7729_v42  ;;  %4352 = vmatpush1.bf16.msra.mxu0 %v7732_v43  ;;  %v7777_v42 = vld [vmem:[%s10746_s18 + $0x2c0] ss:$16 sps:$4 sm:$0xff]   ;;  %v7780_v43 = vld [vmem:[%s10746_s18 + $0x2c8] ss:$16 sps:$4 sm:$0xff]  }
 0x55d   :  { %4271 = vmatprep.subr.bf16.mxu1 %v7737_v44  ;;  %4353 = vmatprep.subr.bf16.mxu0 %v7740_v45  ;;  %v7785_v44 = vld [vmem:[%s10746_s18 + $0x2e4] ss:$16 sps:$4 sm:$0xff]   ;;  %v7788_v45 = vld [vmem:[%s10746_s18 + $0x2ec] ss:$16 sps:$4 sm:$0xff]  }
 0x560   :  { %4272 = vmatpush1.bf16.msra.mxu1 %v7735_v46  ;;  %4354 = vmatpush1.bf16.msra.mxu0 %v7738_v47  ;;  %v7783_v46 = vld [vmem:[%s10746_s18 + $0x2e0] ss:$16 sps:$4 sm:$0xff]   ;;  %v7786_v47 = vld [vmem:[%s10746_s18 + $0x2e8] ss:$16 sps:$4 sm:$0xff]  }
 0x561   :  { %4282 = vmatprep.subr.bf16.mxu1 %v7743_v48  ;;  %4364 = vmatprep.subr.bf16.mxu0 %v7746_v49  ;;  %v7791_v48 = vld [vmem:[%s10746_s18 + $0x304] ss:$16 sps:$4 sm:$0xff]   ;;  %v7794_v49 = vld [vmem:[%s10746_s18 + $0x30c] ss:$16 sps:$4 sm:$0xff]  }
 0x5f6   :  { %v3350_v54 = vpop.f32.mrb[12].mxu1  ;;  %v9884_v62 = vpop.f32.mrb[12].mxu0 }
 0x5f7   :  { %v6951_v63 = vadd.f32 %v6950_v59, %v3350_v54  ;;  %v3352_v2 = vpop.f32.mrb[13].mxu1  ;;  %v3434_v3 = vpop.f32.mrb[13].mxu0  ;;  %v7803_v59 = vld [vmem:[%s10746_s18 + $0x344] ss:$16 sps:$4 sm:$0xff]   ;;  %v7804_v54 = vld [vmem:[%s10746_s18 + $0x348] ss:$16 sps:$4 sm:$0xff]  }
 0x5f8   :  { %v6953_v4 = vadd.f32 %v6952_v60, %v3352_v2  ;;  %v6957_v5 = vadd.f32 %v6956_v61, %v3434_v3  ;;  %v3354_v6 = vpop.f32.mrb[14].mxu1  ;;  %v3436_v7 = vpop.f32.mrb[14].mxu0  ;;  %v7806_v60 = vld [vmem:[%s10746_s18 + $0x34c] ss:$16 sps:$4 sm:$0xff]   ;;  %v7801_v61 = vld [vmem:[%s10746_s18 + $0x340] ss:$16 sps:$4 sm:$0xff]  }
 0x5f9   :  { %v9886_v8 = vmax.f32 %v6951_v63, 0.0  ;;  %v3355_v9 = vpop.f32.mrb[15].mxu1  ;;  %v3437_v27 = vpop.f32.mrb[15].mxu0  ;;  %v7809_v63 = vld [vmem:[%s10746_s18 + $0x364] ss:$16 sps:$4 sm:$0xff]  }
 0x5fa   :  { %v9888_v29 = vmax.f32 %v6953_v4, 0.0  ;;  %v9890_v11 = vmax.f32 %v6957_v5, 0.0  ;;  %v7812_v2 = vld [vmem:[%s10746_s18 + $0x36c] ss:$16 sps:$4 sm:$0xff]   ;;  %v7807_v3 = vld [vmem:[%s10746_s18 + $0x360] ss:$16 sps:$4 sm:$0xff]   ;;  %v2070_v27 = vrot.slane %v9865_v50, %v9623_v30 }
 0x5fb   :  { %v3447_v18 = vpack.c.bf16 %v9886_v8, %v9886_v8  ;;  %v7810_v4 = vld [vmem:[%s10746_s18 + $0x368] ss:$16 sps:$4 sm:$0xff]   ;;  %v7815_v5 = vld [vmem:[%s10746_s18 + $0x384] ss:$16 sps:$4 sm:$0xff]   ;;  %v7818_v6 = vld [vmem:[%s10746_s18 + $0x38c] ss:$16 sps:$4 sm:$0xff]  }
 0x5fc   :  { %v3448_v12 = vpack.c.bf16 %v9888_v29, %v9888_v29  ;;  %v3450_v21 = vpack.c.bf16 %v9890_v11, %v9890_v11  ;;  %v7813_v7 = vld [vmem:[%s10746_s18 + $0x380] ss:$16 sps:$4 sm:$0xff]   ;;  %v7816_v9 = vld [vmem:[%s10746_s18 + $0x388] ss:$16 sps:$4 sm:$0xff]  }
 0x5fd   :  { %v7822_v50 = vld [vmem:[%s10746_s18 + $0x3a8] ss:$16 sps:$4 sm:$0xff]  }
 0x5fe   :  { %4273 = vmatprep.mubr.bf16.mxu1 %v3448_v12  ;;  %4355 = vmatprep.mubr.bf16.mxu0 %v3448_v12  ;;  %v2626_v12 = vrot.slane %v9870_v51, %v9623_v30 }
 0x5ff   :  { %4274 = vmatmul.mubr.bf16.vlgmr.msra.gmra.mrb[16].mxu1 %v3447_v18  ;;  %4356 = vmatmul.mubr.bf16.vlgmr.msra.gmra.mrb[16].mxu0 %v3447_v18  ;;  %v7819_v18 = vld [vmem:[%s10746_s18 + $0x3a0] ss:$16 sps:$4 sm:$0xff]  }
 0x600   :  { %4283 = vmatpush1.bf16.msra.mxu1 %v7741_v13  ;;  %4365 = vmatpush1.bf16.msra.mxu0 %v7744_v17  ;;  %v7821_v13 = vld [vmem:[%s10746_s18 + $0x3a4] ss:$16 sps:$4 sm:$0xff]   ;;  %v7824_v17 = vld [vmem:[%s10746_s18 + $0x3ac] ss:$16 sps:$4 sm:$0xff]   ;;  %v6954_v51 = vadd.f32 %v2626_v12, %v2070_v27  ;;  %v7894_v27 = vld [vmem:[%s10748_s20 + $0x320] ss:$16 sps:$4 sm:$0xff]  }
 0x601   :  { %4314 = vmatprep.mubr.bf16.mxu1 %v3450_v21  ;;  %4396 = vmatprep.mubr.bf16.mxu0 %v3450_v21  ;;  %v7825_v21 = vld [vmem:[%s10746_s18 + $0x3c0] ss:$16 sps:$4 sm:$0xff]   ;;  %v7899_v12 = vld [vmem:[%s10748_s20 + $0x144] ss:$16 sps:$4 sm:$0xff]  }
 0x602   :  { %4284 = vmatprep.subr.bf16.mxu1 %v7749_v10  ;;  %4366 = vmatprep.subr.bf16.mxu0 %v7752_v19  ;;  %v7827_v10 = vld [vmem:[%s10746_s18 + $0x3c4] ss:$16 sps:$4 sm:$0xff]   ;;  %v7830_v19 = vld [vmem:[%s10746_s18 + $0x3cc] ss:$16 sps:$4 sm:$0xff]  }
 0x604   :  { %4285 = vmatpush1.bf16.msra.mxu1 %v7747_v22  ;;  %4367 = vmatpush1.bf16.msra.mxu0 %v7750_v23  ;;  %v7828_v22 = vld [vmem:[%s10746_s18 + $0x3c8] ss:$16 sps:$4 sm:$0xff]   ;;  %v6955_v23 = vadd.f32 %v6954_v51, %v9884_v62  ;;  %v7908_v51 = vld [vmem:[%s10748_s20 + $0x364] ss:$16 sps:$4 sm:$0xff]  }
 0x605   :  { %4286 = vmatprep.subr.bf16.mxu1 %v7755_v24  ;;  %4368 = vmatprep.subr.bf16.mxu0 %v7758_v25  ;;  %v7833_v24 = vld [vmem:[%s10746_s18 + $0x3e4] ss:$16 sps:$4 sm:$0xff]   ;;  %v7836_v25 = vld [vmem:[%s10746_s18 + $0x3ec] ss:$16 sps:$4 sm:$0xff]   ;;  %v7834_v62 = vld [vmem:[%s10746_s18 + $0x3e8] ss:$16 sps:$4 sm:$0xff]  }
 0x608   :  { %4287 = vmatpush1.bf16.msra.mxu1 %v7753_v26  ;;  %4369 = vmatpush1.bf16.msra.mxu0 %v7756_v28  ;;  %v7831_v26 = vld [vmem:[%s10746_s18 + $0x3e0] ss:$16 sps:$4 sm:$0xff]   ;;  %v10089_v28 = vmax.f32 %v6955_v23, 0.0 }
 0x609   :  { %4288 = vmatprep.subr.bf16.mxu1 %v7761_v31  ;;  %4370 = vmatprep.subr.bf16.mxu0 %v7764_v32  ;;  %v7839_v31 = vld [vmem:[%s10748_s20 + $0x4] ss:$16 sps:$4 sm:$0xff]   ;;  %v7909_v23 = vld [vmem:[%s10748_s20 + $0x180] ss:$16 sps:$4 sm:$0xff]  }
 0x60a   :  { %v7842_v32 = vld [vmem:[%s10748_s20 + $0x204] ss:$16 sps:$4 sm:$0xff]  }
 0x60c   :  { %4289 = vmatpush1.bf16.msra.mxu1 %v7759_v33  ;;  %4371 = vmatpush1.bf16.msra.mxu0 %v7762_v15  ;;  %v7837_v33 = vld [vmem:[%s10748_s20] ss:$16 sps:$4 sm:$0xff]  }
 0x60d   :  { %4290 = vmatprep.subr.bf16.mxu1 %v7767_v34  ;;  %4372 = vmatprep.subr.bf16.mxu0 %v7770_v35  ;;  %v7840_v15 = vld [vmem:[%s10748_s20 + $0x200] ss:$16 sps:$4 sm:$0xff]   ;;  %v3449_v34 = vpack.c.bf16 %v10089_v28, %v10089_v28  ;;  %v7845_v35 = vld [vmem:[%s10748_s20 + $0x24] ss:$16 sps:$4 sm:$0xff]  }
 0x610   :  { %4291 = vmatpush1.bf16.msra.mxu1 %v7765_v36  ;;  %4373 = vmatpush1.bf16.msra.mxu0 %v7768_v37  ;;  %v7848_v36 = vld [vmem:[%s10748_s20 + $0x224] ss:$16 sps:$4 sm:$0xff]   ;;  %v7843_v37 = vld [vmem:[%s10748_s20 + $0x20] ss:$16 sps:$4 sm:$0xff]  }
 0x611   :  { %4292 = vmatprep.subr.bf16.mxu1 %v7773_v14  ;;  %4374 = vmatprep.subr.bf16.mxu0 %v7776_v38  ;;  %v7846_v14 = vld [vmem:[%s10748_s20 + $0x220] ss:$16 sps:$4 sm:$0xff]   ;;  %v7851_v38 = vld [vmem:[%s10748_s20 + $0x44] ss:$16 sps:$4 sm:$0xff]  }
 0x614   :  { %4293 = vmatpush1.bf16.msra.mxu1 %v7771_v39  ;;  %4375 = vmatpush1.bf16.msra.mxu0 %v7774_v40  ;;  %v7854_v39 = vld [vmem:[%s10748_s20 + $0x244] ss:$16 sps:$4 sm:$0xff]   ;;  %v7849_v40 = vld [vmem:[%s10748_s20 + $0x40] ss:$16 sps:$4 sm:$0xff]  }
 0x615   :  { %4294 = vmatprep.subr.bf16.mxu1 %v7779_v41  ;;  %4376 = vmatprep.subr.bf16.mxu0 %v7782_v20  ;;  %v7852_v41 = vld [vmem:[%s10748_s20 + $0x240] ss:$16 sps:$4 sm:$0xff]   ;;  %v7857_v20 = vld [vmem:[%s10748_s20 + $0x64] ss:$16 sps:$4 sm:$0xff]  }
 0x618   :  { %4295 = vmatpush1.bf16.msra.mxu1 %v7777_v42  ;;  %4377 = vmatpush1.bf16.msra.mxu0 %v7780_v43  ;;  %v7860_v42 = vld [vmem:[%s10748_s20 + $0x264] ss:$16 sps:$4 sm:$0xff]   ;;  %v7855_v43 = vld [vmem:[%s10748_s20 + $0x60] ss:$16 sps:$4 sm:$0xff]  }
 0x619   :  { %4296 = vmatprep.subr.bf16.mxu1 %v7785_v44  ;;  %4378 = vmatprep.subr.bf16.mxu0 %v7788_v45  ;;  %v7858_v44 = vld [vmem:[%s10748_s20 + $0x260] ss:$16 sps:$4 sm:$0xff]   ;;  %v7863_v45 = vld [vmem:[%s10748_s20 + $0x84] ss:$16 sps:$4 sm:$0xff]  }
 0x61c   :  { %4297 = vmatpush1.bf16.msra.mxu1 %v7783_v46  ;;  %4379 = vmatpush1.bf16.msra.mxu0 %v7786_v47  ;;  %v7866_v46 = vld [vmem:[%s10748_s20 + $0x284] ss:$16 sps:$4 sm:$0xff]   ;;  %v7861_v47 = vld [vmem:[%s10748_s20 + $0x80] ss:$16 sps:$4 sm:$0xff]  }
 0x61d   :  { %4298 = vmatprep.subr.bf16.mxu1 %v7791_v48  ;;  %4380 = vmatprep.subr.bf16.mxu0 %v7794_v49  ;;  %v7864_v48 = vld [vmem:[%s10748_s20 + $0x280] ss:$16 sps:$4 sm:$0xff]   ;;  %v7869_v49 = vld [vmem:[%s10748_s20 + $0xa4] ss:$16 sps:$4 sm:$0xff]  }
 0x620   :  { %4299 = vmatpush1.bf16.msra.mxu1 %v7789_v52  ;;  %4381 = vmatpush1.bf16.msra.mxu0 %v7792_v53  ;;  %v7872_v52 = vld [vmem:[%s10748_s20 + $0x2a4] ss:$16 sps:$4 sm:$0xff]   ;;  %v7867_v53 = vld [vmem:[%s10748_s20 + $0xa0] ss:$16 sps:$4 sm:$0xff]  }
 0x621   :  { %4300 = vmatprep.subr.bf16.mxu1 %v7797_v55  ;;  %4382 = vmatprep.subr.bf16.mxu0 %v7800_v56  ;;  %v7870_v55 = vld [vmem:[%s10748_s20 + $0x2a0] ss:$16 sps:$4 sm:$0xff]   ;;  %v7875_v56 = vld [vmem:[%s10748_s20 + $0xc4] ss:$16 sps:$4 sm:$0xff]  }
 0x624   :  { %4301 = vmatpush1.bf16.msra.mxu1 %v7795_v57  ;;  %4383 = vmatpush1.bf16.msra.mxu0 %v7798_v58  ;;  %v7878_v57 = vld [vmem:[%s10748_s20 + $0x2c4] ss:$16 sps:$4 sm:$0xff]   ;;  %v7873_v58 = vld [vmem:[%s10748_s20 + $0xc0] ss:$16 sps:$4 sm:$0xff]  }
 0x625   :  { %4302 = vmatprep.subr.bf16.mxu1 %v7803_v59  ;;  %4384 = vmatprep.subr.bf16.mxu0 %v7806_v60  ;;  %v7876_v59 = vld [vmem:[%s10748_s20 + $0x2c0] ss:$16 sps:$4 sm:$0xff]   ;;  %v7881_v60 = vld [vmem:[%s10748_s20 + $0xe4] ss:$16 sps:$4 sm:$0xff]  }
 0x628   :  { %4303 = vmatpush1.bf16.msra.mxu1 %v7801_v61  ;;  %4385 = vmatpush1.bf16.msra.mxu0 %v7804_v54  ;;  %v7884_v61 = vld [vmem:[%s10748_s20 + $0x2e4] ss:$16 sps:$4 sm:$0xff]   ;;  %v7879_v54 = vld [vmem:[%s10748_s20 + $0xe0] ss:$16 sps:$4 sm:$0xff]  }
 0x629   :  { %4304 = vmatprep.subr.bf16.mxu1 %v7809_v63  ;;  %4386 = vmatprep.subr.bf16.mxu0 %v7812_v2  ;;  %v7882_v63 = vld [vmem:[%s10748_s20 + $0x2e0] ss:$16 sps:$4 sm:$0xff]   ;;  %v7887_v2 = vld [vmem:[%s10748_s20 + $0x104] ss:$16 sps:$4 sm:$0xff]  }
 0x62c   :  { %4305 = vmatpush1.bf16.msra.mxu1 %v7807_v3  ;;  %4387 = vmatpush1.bf16.msra.mxu0 %v7810_v4  ;;  %v7890_v3 = vld [vmem:[%s10748_s20 + $0x304] ss:$16 sps:$4 sm:$0xff]   ;;  %v7885_v4 = vld [vmem:[%s10748_s20 + $0x100] ss:$16 sps:$4 sm:$0xff]  }
 0x62d   :  { %4306 = vmatprep.subr.bf16.mxu1 %v7815_v5  ;;  %4388 = vmatprep.subr.bf16.mxu0 %v7818_v6  ;;  %v7888_v5 = vld [vmem:[%s10748_s20 + $0x300] ss:$16 sps:$4 sm:$0xff]   ;;  %v7893_v6 = vld [vmem:[%s10748_s20 + $0x124] ss:$16 sps:$4 sm:$0xff]  }
 0x630   :  { %4307 = vmatpush1.bf16.msra.mxu1 %v7813_v7  ;;  %4389 = vmatpush1.bf16.msra.mxu0 %v7816_v9  ;;  %v7896_v7 = vld [vmem:[%s10748_s20 + $0x324] ss:$16 sps:$4 sm:$0xff]   ;;  %v7891_v9 = vld [vmem:[%s10748_s20 + $0x120] ss:$16 sps:$4 sm:$0xff]  }
 0x631   :  { %4308 = vmatprep.subr.bf16.mxu1 %v7821_v13  ;;  %4390 = vmatprep.subr.bf16.mxu0 %v7824_v17  ;;  %v7902_v13 = vld [vmem:[%s10748_s20 + $0x344] ss:$16 sps:$4 sm:$0xff]   ;;  %v7897_v17 = vld [vmem:[%s10748_s20 + $0x140] ss:$16 sps:$4 sm:$0xff]  }
 0x634   :  { %4309 = vmatpush1.bf16.msra.mxu1 %v7819_v18  ;;  %4391 = vmatpush1.bf16.msra.mxu0 %v7822_v50  ;;  %v7900_v18 = vld [vmem:[%s10748_s20 + $0x340] ss:$16 sps:$4 sm:$0xff]   ;;  %v7905_v50 = vld [vmem:[%s10748_s20 + $0x164] ss:$16 sps:$4 sm:$0xff]  }
 0x635   :  { %4310 = vmatprep.subr.bf16.mxu1 %v7827_v10  ;;  %4392 = vmatprep.subr.bf16.mxu0 %v7830_v19  ;;  %v7903_v10 = vld [vmem:[%s10748_s20 + $0x160] ss:$16 sps:$4 sm:$0xff]  }
 0x636   :  { %v7906_v19 = vld [vmem:[%s10748_s20 + $0x360] ss:$16 sps:$4 sm:$0xff]  }
 0x638   :  { %4311 = vmatpush1.bf16.msra.mxu1 %v7825_v21  ;;  %4393 = vmatpush1.bf16.msra.mxu0 %v7828_v22  ;;  %v7911_v21 = vld [vmem:[%s10748_s20 + $0x184] ss:$16 sps:$4 sm:$0xff]  }
 0x639   :  { %4312 = vmatprep.subr.bf16.mxu1 %v7833_v24  ;;  %4394 = vmatprep.subr.bf16.mxu0 %v7836_v25  ;;  %v7914_v22 = vld [vmem:[%s10748_s20 + $0x384] ss:$16 sps:$4 sm:$0xff]   ;;  %v7912_v24 = vld [vmem:[%s10748_s20 + $0x380] ss:$16 sps:$4 sm:$0xff]  }
 0x63a   :  { %v7917_v25 = vld [vmem:[%s10748_s20 + $0x1a4] ss:$16 sps:$4 sm:$0xff]  }
 0x63c   :  { %4313 = vmatpush1.bf16.msra.mxu1 %v7831_v26  ;;  %4395 = vmatpush1.bf16.msra.mxu0 %v7834_v62  ;;  %v7920_v26 = vld [vmem:[%s10748_s20 + $0x3a4] ss:$16 sps:$4 sm:$0xff]   ;;  %v7915_v62 = vld [vmem:[%s10748_s20 + $0x1a0] ss:$16 sps:$4 sm:$0xff]  }
 0x63d   :  { %5203 = vmatprep.subr.bf16.mxu1 %v7839_v31  ;;  %5244 = vmatprep.subr.bf16.mxu0 %v7842_v32  ;;  %v7918_v31 = vld [vmem:[%s10748_s20 + $0x3a0] ss:$16 sps:$4 sm:$0xff]   ;;  %v7923_v32 = vld [vmem:[%s10748_s20 + $0x1c4] ss:$16 sps:$4 sm:$0xff]  }
 0x63f   :  { %4315 = vmatmul.mubr.bf16.vlgmr.msra.gmra.mrb[16].mxu1 %v3449_v34  ;;  %4397 = vmatmul.mubr.bf16.vlgmr.msra.gmra.mrb[16].mxu0 %v3449_v34  ;;  %v7924_v34 = vld [vmem:[%s10748_s20 + $0x3c0] ss:$16 sps:$4 sm:$0xff]  }
 0x640   :  { %5204 = vmatpush1.bf16.msra.mxu1 %v7837_v33  ;;  %5245 = vmatpush1.bf16.msra.mxu0 %v7840_v15  ;;  %v7926_v33 = vld [vmem:[%s10748_s20 + $0x3c4] ss:$16 sps:$4 sm:$0xff]   ;;  %v7921_v15 = vld [vmem:[%s10748_s20 + $0x1c0] ss:$16 sps:$4 sm:$0xff]  }
 0x641   :  { %5205 = vmatprep.subr.bf16.mxu1 %v7845_v35  ;;  %5246 = vmatprep.subr.bf16.mxu0 %v7848_v36  ;;  %v7929_v35 = vld [vmem:[%s10748_s20 + $0x1e4] ss:$16 sps:$4 sm:$0xff]  }
 0x642   :  { %v7932_v36 = vld [vmem:[%s10748_s20 + $0x3e4] ss:$16 sps:$4 sm:$0xff]  }
 0x644   :  { %5206 = vmatpush1.bf16.msra.mxu1 %v7843_v37  ;;  %5247 = vmatpush1.bf16.msra.mxu0 %v7846_v14  ;;  %v7927_v37 = vld [vmem:[%s10748_s20 + $0x1e0] ss:$16 sps:$4 sm:$0xff]  }
 0x645   :  { %5207 = vmatprep.subr.bf16.mxu1 %v7851_v38  ;;  %5248 = vmatprep.subr.bf16.mxu0 %v7854_v39  ;;  %v7930_v14 = vld [vmem:[%s10748_s20 + $0x3e0] ss:$16 sps:$4 sm:$0xff]   ;;  %v7935_v38 = vld [vmem:[%s10748_s20 + $0xc] ss:$16 sps:$4 sm:$0xff]  }
 0x646   :  { %v7938_v39 = vld [vmem:[%s10748_s20 + $0x20c] ss:$16 sps:$4 sm:$0xff]  }
 0x648   :  { %5208 = vmatpush1.bf16.msra.mxu1 %v7849_v40  ;;  %5249 = vmatpush1.bf16.msra.mxu0 %v7852_v41  ;;  %v3579_v40 = vld [vmem:[%s10747_s19] sm:$0xf] }
 0x649   :  { %5209 = vmatprep.subr.bf16.mxu1 %v7857_v20  ;;  %5250 = vmatprep.subr.bf16.mxu0 %v7860_v42  ;;  %v3584_v41 = vrot.slane %v3579_v40, %v8639_v0  ;;  %v3592_v20 = vrot.slane %v3579_v40, %v9623_v30  ;;  %v3588_v42 = vrot.slane %v3579_v40, %v8642_v1 }
 0x64c   :  { %5210 = vmatpush1.bf16.msra.mxu1 %v7855_v43  ;;  %5251 = vmatpush1.bf16.msra.mxu0 %v7858_v44  ;;  %v3596_v43 = vrot.slane %v3579_v40, %v9462_v16  ;;  %v7986_v40 = vld [vmem:[%s10748_s20 + $0x30c] ss:$16 sps:$4 sm:$0xff]  }
 0x64d   :  { %5211 = vmatprep.subr.bf16.mxu1 %v7863_v45  ;;  %5252 = vmatprep.subr.bf16.mxu0 %v7866_v46 }
 0x650   :  { %5212 = vmatpush1.bf16.msra.mxu1 %v7861_v47  ;;  %5253 = vmatpush1.bf16.msra.mxu0 %v7864_v48 }
 0x651   :  { %5213 = vmatprep.subr.bf16.mxu1 %v7869_v49  ;;  %5254 = vmatprep.subr.bf16.mxu0 %v7872_v52 }
 0x654   :  { %5214 = vmatpush1.bf16.msra.mxu1 %v7867_v53  ;;  %5255 = vmatpush1.bf16.msra.mxu0 %v7870_v55 }
 0x655   :  { %5215 = vmatprep.subr.bf16.mxu1 %v7875_v56  ;;  %5256 = vmatprep.subr.bf16.mxu0 %v7878_v57 }
 0x658   :  { %5216 = vmatpush1.bf16.msra.mxu1 %v7873_v58  ;;  %5257 = vmatpush1.bf16.msra.mxu0 %v7876_v59 }
 0x659   :  { %5217 = vmatprep.subr.bf16.mxu1 %v7881_v60  ;;  %5258 = vmatprep.subr.bf16.mxu0 %v7884_v61 }
 0x65c   :  { %5218 = vmatpush1.bf16.msra.mxu1 %v7879_v54  ;;  %5259 = vmatpush1.bf16.msra.mxu0 %v7882_v63 }
 0x65d   :  { %5219 = vmatprep.subr.bf16.mxu1 %v7887_v2  ;;  %5260 = vmatprep.subr.bf16.mxu0 %v7890_v3  ;;  %v7933_v3 = vld [vmem:[%s10748_s20 + $0x8] ss:$16 sps:$4 sm:$0xff]  }
 0x660   :  { %5220 = vmatpush1.bf16.msra.mxu1 %v7885_v4  ;;  %5261 = vmatpush1.bf16.msra.mxu0 %v7888_v5  ;;  %v7936_v4 = vld [vmem:[%s10748_s20 + $0x208] ss:$16 sps:$4 sm:$0xff]  }
 0x661   :  { %5221 = vmatprep.subr.bf16.mxu1 %v7893_v6  ;;  %5262 = vmatprep.subr.bf16.mxu0 %v7896_v7  ;;  %v7941_v7 = vld [vmem:[%s10748_s20 + $0x2c] ss:$16 sps:$4 sm:$0xff]  }
 0x664   :  { %5222 = vmatpush1.bf16.msra.mxu1 %v7891_v9  ;;  %5263 = vmatpush1.bf16.msra.mxu0 %v7894_v27  ;;  %v7944_v9 = vld [vmem:[%s10748_s20 + $0x22c] ss:$16 sps:$4 sm:$0xff]   ;;  %v7939_v27 = vld [vmem:[%s10748_s20 + $0x28] ss:$16 sps:$4 sm:$0xff]  }
 0x665   :  { %5223 = vmatprep.subr.bf16.mxu1 %v7899_v12  ;;  %5264 = vmatprep.subr.bf16.mxu0 %v7902_v13  ;;  %v7942_v12 = vld [vmem:[%s10748_s20 + $0x228] ss:$16 sps:$4 sm:$0xff]   ;;  %v7947_v13 = vld [vmem:[%s10748_s20 + $0x4c] ss:$16 sps:$4 sm:$0xff]  }
 0x668   :  { %5224 = vmatpush1.bf16.msra.mxu1 %v7897_v17  ;;  %5265 = vmatpush1.bf16.msra.mxu0 %v7900_v18  ;;  %v7950_v17 = vld [vmem:[%s10748_s20 + $0x24c] ss:$16 sps:$4 sm:$0xff]   ;;  %v7945_v18 = vld [vmem:[%s10748_s20 + $0x48] ss:$16 sps:$4 sm:$0xff]  }
 0x669   :  { %5225 = vmatprep.subr.bf16.mxu1 %v7905_v50  ;;  %5266 = vmatprep.subr.bf16.mxu0 %v7908_v51  ;;  %v7948_v50 = vld [vmem:[%s10748_s20 + $0x248] ss:$16 sps:$4 sm:$0xff]   ;;  %v7953_v51 = vld [vmem:[%s10748_s20 + $0x6c] ss:$16 sps:$4 sm:$0xff]  }
 0x66c   :  { %5226 = vmatpush1.bf16.msra.mxu1 %v7903_v10  ;;  %5267 = vmatpush1.bf16.msra.mxu0 %v7906_v19  ;;  %v7956_v10 = vld [vmem:[%s10748_s20 + $0x26c] ss:$16 sps:$4 sm:$0xff]   ;;  %v7951_v19 = vld [vmem:[%s10748_s20 + $0x68] ss:$16 sps:$4 sm:$0xff]  }
 0x66d   :  { %5227 = vmatprep.subr.bf16.mxu1 %v7911_v21  ;;  %5268 = vmatprep.subr.bf16.mxu0 %v7914_v22  ;;  %v7954_v21 = vld [vmem:[%s10748_s20 + $0x268] ss:$16 sps:$4 sm:$0xff]   ;;  %v7959_v22 = vld [vmem:[%s10748_s20 + $0x8c] ss:$16 sps:$4 sm:$0xff]  }
 0x670   :  { %5228 = vmatpush1.bf16.msra.mxu1 %v7909_v23  ;;  %5269 = vmatpush1.bf16.msra.mxu0 %v7912_v24  ;;  %v7962_v23 = vld [vmem:[%s10748_s20 + $0x28c] ss:$16 sps:$4 sm:$0xff]   ;;  %v7957_v24 = vld [vmem:[%s10748_s20 + $0x88] ss:$16 sps:$4 sm:$0xff]  }
 0x671   :  { %5229 = vmatprep.subr.bf16.mxu1 %v7917_v25  ;;  %5270 = vmatprep.subr.bf16.mxu0 %v7920_v26  ;;  %v7960_v25 = vld [vmem:[%s10748_s20 + $0x288] ss:$16 sps:$4 sm:$0xff]   ;;  %v7965_v26 = vld [vmem:[%s10748_s20 + $0xac] ss:$16 sps:$4 sm:$0xff]  }
 0x674   :  { %5230 = vmatpush1.bf16.msra.mxu1 %v7915_v62  ;;  %5271 = vmatpush1.bf16.msra.mxu0 %v7918_v31  ;;  %v7968_v62 = vld [vmem:[%s10748_s20 + $0x2ac] ss:$16 sps:$4 sm:$0xff]   ;;  %v7963_v31 = vld [vmem:[%s10748_s20 + $0xa8] ss:$16 sps:$4 sm:$0xff]  }
 0x675   :  { %5231 = vmatprep.subr.bf16.mxu1 %v7923_v32  ;;  %5272 = vmatprep.subr.bf16.mxu0 %v7926_v33  ;;  %v7966_v32 = vld [vmem:[%s10748_s20 + $0x2a8] ss:$16 sps:$4 sm:$0xff]   ;;  %v7971_v33 = vld [vmem:[%s10748_s20 + $0xcc] ss:$16 sps:$4 sm:$0xff]  }
 0x678   :  { %5232 = vmatpush1.bf16.msra.mxu1 %v7921_v15  ;;  %5273 = vmatpush1.bf16.msra.mxu0 %v7924_v34  ;;  %v7974_v15 = vld [vmem:[%s10748_s20 + $0x2cc] ss:$16 sps:$4 sm:$0xff]   ;;  %v7969_v34 = vld [vmem:[%s10748_s20 + $0xc8] ss:$16 sps:$4 sm:$0xff]  }
 0x679   :  { %5233 = vmatprep.subr.bf16.mxu1 %v7929_v35  ;;  %5274 = vmatprep.subr.bf16.mxu0 %v7932_v36  ;;  %v7972_v35 = vld [vmem:[%s10748_s20 + $0x2c8] ss:$16 sps:$4 sm:$0xff]   ;;  %v7977_v36 = vld [vmem:[%s10748_s20 + $0xec] ss:$16 sps:$4 sm:$0xff]  }
 0x67c   :  { %5234 = vmatpush1.bf16.msra.mxu1 %v7927_v37  ;;  %5275 = vmatpush1.bf16.msra.mxu0 %v7930_v14  ;;  %v7980_v37 = vld [vmem:[%s10748_s20 + $0x2ec] ss:$16 sps:$4 sm:$0xff]   ;;  %v7975_v14 = vld [vmem:[%s10748_s20 + $0xe8] ss:$16 sps:$4 sm:$0xff]  }
 0x67d   :  { %5285 = vmatprep.subr.bf16.mxu1 %v7935_v38  ;;  %5326 = vmatprep.subr.bf16.mxu0 %v7938_v39  ;;  %v7978_v38 = vld [vmem:[%s10748_s20 + $0x2e8] ss:$16 sps:$4 sm:$0xff]   ;;  %v7983_v39 = vld [vmem:[%s10748_s20 + $0x10c] ss:$16 sps:$4 sm:$0xff]  }
 0x712   :  { %v4316_v44 = vpop.f32.mrb[16].mxu1  ;;  %v4398_v45 = vpop.f32.mrb[16].mxu0 }
 0x713   :  { %v6958_v46 = vadd.f32 %v4316_v44, %v3584_v41  ;;  %v6960_v47 = vadd.f32 %v4398_v45, %v3592_v20  ;;  %v4318_v48 = vpop.f32.mrb[17].mxu1  ;;  %v4400_v49 = vpop.f32.mrb[17].mxu0  ;;  %v7981_v41 = vld [vmem:[%s10748_s20 + $0x108] ss:$16 sps:$4 sm:$0xff]  }
 0x714   :  { %v6959_v52 = vadd.f32 %v4318_v48, %v3588_v42  ;;  %v6961_v53 = vadd.f32 %v4400_v49, %v3596_v43  ;;  %v4320_v55 = vpop.f32.mrb[18].mxu1  ;;  %v4402_v56 = vpop.f32.mrb[18].mxu0  ;;  %v7984_v20 = vld [vmem:[%s10748_s20 + $0x308] ss:$16 sps:$4 sm:$0xff]   ;;  %v7989_v42 = vld [vmem:[%s10748_s20 + $0x12c] ss:$16 sps:$4 sm:$0xff]  }
 0x715   :  { %v4405_v57 = vmax.f32 %v6958_v46, 0.0  ;;  %v4407_v58 = vmax.f32 %v6960_v47, 0.0  ;;  %v4321_v59 = vpop.f32.mrb[19].mxu1  ;;  %v4403_v60 = vpop.f32.mrb[19].mxu0  ;;  %v7992_v43 = vld [vmem:[%s10748_s20 + $0x32c] ss:$16 sps:$4 sm:$0xff]  }
 0x716   :  { %v4406_v61 = vmax.f32 %v6959_v52, 0.0  ;;  %v4408_v54 = vmax.f32 %v6961_v53, 0.0  ;;  %v7987_v44 = vld [vmem:[%s10748_s20 + $0x128] ss:$16 sps:$4 sm:$0xff]   ;;  %v7995_v46 = vld [vmem:[%s10748_s20 + $0x14c] ss:$16 sps:$4 sm:$0xff]  }
 0x717   :  { %v10304_v5 = vpack.c.bf16 %v4405_v57, %v4405_v57  ;;  %v10306_v6 = vpack.c.bf16 %v4407_v58, %v4407_v58  ;;  %v7990_v45 = vld [vmem:[%s10748_s20 + $0x328] ss:$16 sps:$4 sm:$0xff]   ;;  %v7998_v47 = vld [vmem:[%s10748_s20 + $0x34c] ss:$16 sps:$4 sm:$0xff]  }
 0x718   :  { %v4410_v63 = vpack.c.bf16 %v4406_v61, %v4406_v61  ;;  %v4412_v2 = vpack.c.bf16 %v4408_v54, %v4408_v54  ;;  %v7993_v48 = vld [vmem:[%s10748_s20 + $0x148] ss:$16 sps:$4 sm:$0xff]   ;;  %v8001_v52 = vld [vmem:[%s10748_s20 + $0x16c] ss:$16 sps:$4 sm:$0xff]  }
 0x719   :  { %v7996_v49 = vld [vmem:[%s10748_s20 + $0x348] ss:$16 sps:$4 sm:$0xff]   ;;  %v8004_v53 = vld [vmem:[%s10748_s20 + $0x36c] ss:$16 sps:$4 sm:$0xff]  }
 0x71a   :  { %5235 = vmatprep.mubr.bf16.mxu1 %v4410_v63  ;;  %5276 = vmatprep.mubr.bf16.mxu0 %v4412_v2  ;;  %v7999_v55 = vld [vmem:[%s10748_s20 + $0x168] ss:$16 sps:$4 sm:$0xff]   ;;  %v8007_v57 = vld [vmem:[%s10748_s20 + $0x18c] ss:$16 sps:$4 sm:$0xff]  }
 0x71b   :  { %5236 = vmatmul.mubr.bf16.vlgmr.msra.gmra.mrb[20].mxu1 %v10304_v5  ;;  %5277 = vmatmul.mubr.bf16.vlgmr.msra.gmra.mrb[20].mxu0 %v10306_v6  ;;  %v8002_v56 = vld [vmem:[%s10748_s20 + $0x368] ss:$16 sps:$4 sm:$0xff]   ;;  %v8010_v58 = vld [vmem:[%s10748_s20 + $0x38c] ss:$16 sps:$4 sm:$0xff]  }
 0x71c   :  { %5286 = vmatpush1.bf16.msra.mxu1 %v7933_v3  ;;  %5327 = vmatpush1.bf16.msra.mxu0 %v7936_v4  ;;  %v8005_v59 = vld [vmem:[%s10748_s20 + $0x188] ss:$16 sps:$4 sm:$0xff]   ;;  %v8013_v61 = vld [vmem:[%s10748_s20 + $0x1ac] ss:$16 sps:$4 sm:$0xff]  }
 0x71d   :  { %5317 = vmatprep.mubr.bf16.mxu1 %v4410_v63  ;;  %5358 = vmatprep.mubr.bf16.mxu0 %v4412_v2  ;;  %v8008_v60 = vld [vmem:[%s10748_s20 + $0x388] ss:$16 sps:$4 sm:$0xff]   ;;  %v8016_v54 = vld [vmem:[%s10748_s20 + $0x3ac] ss:$16 sps:$4 sm:$0xff]  }
 0x71e   :  { %5287 = vmatprep.subr.bf16.mxu1 %v7941_v7  ;;  %5328 = vmatprep.subr.bf16.mxu0 %v7944_v9  ;;  %v8011_v63 = vld [vmem:[%s10748_s20 + $0x1a8] ss:$16 sps:$4 sm:$0xff]   ;;  %v8019_v3 = vld [vmem:[%s10748_s20 + $0x1cc] ss:$16 sps:$4 sm:$0xff]  }
 0x71f   :  { %v8014_v2 = vld [vmem:[%s10748_s20 + $0x3a8] ss:$16 sps:$4 sm:$0xff]   ;;  %v8022_v4 = vld [vmem:[%s10748_s20 + $0x3cc] ss:$16 sps:$4 sm:$0xff]  }
 0x720   :  { %5288 = vmatpush1.bf16.msra.mxu1 %v7939_v27  ;;  %5329 = vmatpush1.bf16.msra.mxu0 %v7942_v12  ;;  %v8017_v7 = vld [vmem:[%s10748_s20 + $0x1c8] ss:$16 sps:$4 sm:$0xff]   ;;  %v8025_v27 = vld [vmem:[%s10748_s20 + $0x1ec] ss:$16 sps:$4 sm:$0xff]  }
 0x721   :  { %5289 = vmatprep.subr.bf16.mxu1 %v7947_v13  ;;  %5330 = vmatprep.subr.bf16.mxu0 %v7950_v17  ;;  %v8020_v9 = vld [vmem:[%s10748_s20 + $0x3c8] ss:$16 sps:$4 sm:$0xff]   ;;  %v8028_v12 = vld [vmem:[%s10748_s20 + $0x3ec] ss:$16 sps:$4 sm:$0xff]  }
 0x722   :  { %v8023_v13 = vld [vmem:[%s10748_s20 + $0x1e8] ss:$16 sps:$4 sm:$0xff]  }
 0x723   :  { %v8026_v17 = vld [vmem:[%s10748_s20 + $0x3e8] ss:$16 sps:$4 sm:$0xff]  }
 0x724   :  { %5290 = vmatpush1.bf16.msra.mxu1 %v7945_v18  ;;  %5331 = vmatpush1.bf16.msra.mxu0 %v7948_v50  ;;  %v8029_v18 = vld [vmem:[%s10750_s22 + $0x40] sm:$0xff]  }
 0x725   :  { %5291 = vmatprep.subr.bf16.mxu1 %v7953_v51  ;;  %5332 = vmatprep.subr.bf16.mxu0 %v7956_v10  ;;  %v8030_v50 = vld [vmem:[%s10750_s22] sm:$0xff]   ;;  %v8031_v51 = vld [vmem:[%s10750_s22 + $0x48] sm:$0xff]  }
 0x726   :  { %v8032_v10 = vld [vmem:[%s10750_s22 + $0x8] sm:$0xff]  }
 0x728   :  { %5292 = vmatpush1.bf16.msra.mxu1 %v7951_v19  ;;  %5333 = vmatpush1.bf16.msra.mxu0 %v7954_v21  ;;  %v8033_v19 = vld [vmem:[%s10750_s22 + $0x50] sm:$0xff]  }
 0x729   :  { %5293 = vmatprep.subr.bf16.mxu1 %v7959_v22  ;;  %5334 = vmatprep.subr.bf16.mxu0 %v7962_v23  ;;  %v8034_v21 = vld [vmem:[%s10750_s22 + $0x10] sm:$0xff]   ;;  %v8037_v22 = vld [vmem:[%s10750_s22 + $0x60] sm:$0xff]  }
 0x72a   :  { %v8038_v23 = vld [vmem:[%s10750_s22 + $0x20] sm:$0xff]  }
 0x72c   :  { %5294 = vmatpush1.bf16.msra.mxu1 %v7957_v24  ;;  %5335 = vmatpush1.bf16.msra.mxu0 %v7960_v25  ;;  %v8039_v24 = vld [vmem:[%s10750_s22 + $0x68] sm:$0xff]  }
 0x72d   :  { %5295 = vmatprep.subr.bf16.mxu1 %v7965_v26  ;;  %5336 = vmatprep.subr.bf16.mxu0 %v7968_v62  ;;  %v8040_v25 = vld [vmem:[%s10750_s22 + $0x28] sm:$0xff]   ;;  %v8041_v26 = vld [vmem:[%s10750_s22 + $0x70] sm:$0xff]  }
 0x72e   :  { %v8042_v62 = vld [vmem:[%s10750_s22 + $0x30] sm:$0xff]  }
 0x730   :  { %5296 = vmatpush1.bf16.msra.mxu1 %v7963_v31  ;;  %5337 = vmatpush1.bf16.msra.mxu0 %v7966_v32  ;;  %v8043_v31 = vld [vmem:[%s10750_s22 + $0x78] sm:$0xff]  }
 0x731   :  { %5297 = vmatprep.subr.bf16.mxu1 %v7971_v33  ;;  %5338 = vmatprep.subr.bf16.mxu0 %v7974_v15  ;;  %v8044_v32 = vld [vmem:[%s10750_s22 + $0x38] sm:$0xff]   ;;  %v8045_v33 = vld [vmem:[%s10751_s23 + $0x40] sm:$0xff]  }
 0x732   :  { %v8061_v15 = vld [vmem:[%s10750_s22 + $0xc0] sm:$0xff]  }
 0x734   :  { %5298 = vmatpush1.bf16.msra.mxu1 %v7969_v34  ;;  %5339 = vmatpush1.bf16.msra.mxu0 %v7972_v35  ;;  %v8062_v34 = vld [vmem:[%s10750_s22 + $0x80] sm:$0xff]   ;;  %v8063_v35 = vld [vmem:[%s10750_s22 + $0xc8] sm:$0xff]  }
 0x735   :  { %5299 = vmatprep.subr.bf16.mxu1 %v7977_v36  ;;  %5340 = vmatprep.subr.bf16.mxu0 %v7980_v37  ;;  %v8064_v36 = vld [vmem:[%s10750_s22 + $0x88] sm:$0xff]   ;;  %v8065_v37 = vld [vmem:[%s10750_s22 + $0xd0] sm:$0xff]  }
 0x738   :  { %5300 = vmatpush1.bf16.msra.mxu1 %v7975_v14  ;;  %5341 = vmatpush1.bf16.msra.mxu0 %v7978_v38  ;;  %v8066_v14 = vld [vmem:[%s10750_s22 + $0x90] sm:$0xff]   ;;  %v8067_v38 = vld [vmem:[%s10750_s22 + $0xd8] sm:$0xff]  }
 0x739   :  { %5301 = vmatprep.subr.bf16.mxu1 %v7983_v39  ;;  %5342 = vmatprep.subr.bf16.mxu0 %v7986_v40  ;;  %v8068_v39 = vld [vmem:[%s10750_s22 + $0x98] sm:$0xff]   ;;  %v8069_v40 = vld [vmem:[%s10750_s22 + $0xe0] sm:$0xff]  }
 0x73c   :  { %5302 = vmatpush1.bf16.msra.mxu1 %v7981_v41  ;;  %5343 = vmatpush1.bf16.msra.mxu0 %v7984_v20  ;;  %v8070_v41 = vld [vmem:[%s10750_s22 + $0xa0] sm:$0xff]   ;;  %v8071_v20 = vld [vmem:[%s10750_s22 + $0xe8] sm:$0xff]  }
 0x73d   :  { %5303 = vmatprep.subr.bf16.mxu1 %v7989_v42  ;;  %5344 = vmatprep.subr.bf16.mxu0 %v7992_v43  ;;  %v8072_v42 = vld [vmem:[%s10750_s22 + $0xa8] sm:$0xff]   ;;  %v8073_v43 = vld [vmem:[%s10750_s22 + $0xf0] sm:$0xff]  }
 0x740   :  { %5304 = vmatpush1.bf16.msra.mxu1 %v7987_v44  ;;  %5345 = vmatpush1.bf16.msra.mxu0 %v7990_v45  ;;  %v8074_v44 = vld [vmem:[%s10750_s22 + $0xb0] sm:$0xff]   ;;  %v8075_v45 = vld [vmem:[%s10750_s22 + $0xf8] sm:$0xff]  }
 0x741   :  { %5305 = vmatprep.subr.bf16.mxu1 %v7995_v46  ;;  %5346 = vmatprep.subr.bf16.mxu0 %v7998_v47  ;;  %v8076_v46 = vld [vmem:[%s10750_s22 + $0xb8] sm:$0xff]   ;;  %v8077_v47 = vld [vmem:[%s10751_s23 + $0xc0] sm:$0xff]  }
 0x744   :  { %5306 = vmatpush1.bf16.msra.mxu1 %v7993_v48  ;;  %5347 = vmatpush1.bf16.msra.mxu0 %v7996_v49  ;;  %v10597_v48 = vld [vmem:[%s10749_s21] sm:$0xf] }
 0x745   :  { %5307 = vmatprep.subr.bf16.mxu1 %v8001_v52  ;;  %5348 = vmatprep.subr.bf16.mxu0 %v8004_v53  ;;  %v4546_v49 = vrot.slane %v10597_v48, %v8639_v0  ;;  %v4550_v52 = vrot.slane %v10597_v48, %v8642_v1  ;;  %v8046_v1 = vld [vmem:[%s10751_s23] sm:$0xff]  }
 0x748   :  { %5308 = vmatpush1.bf16.msra.mxu1 %v7999_v55  ;;  %5349 = vmatpush1.bf16.msra.mxu0 %v8002_v56 }
 0x749   :  { %5309 = vmatprep.subr.bf16.mxu1 %v8007_v57  ;;  %5350 = vmatprep.subr.bf16.mxu0 %v8010_v58 }
 0x74c   :  { %5310 = vmatpush1.bf16.msra.mxu1 %v8005_v59  ;;  %5351 = vmatpush1.bf16.msra.mxu0 %v8008_v60 }
 0x74d   :  { %5311 = vmatprep.subr.bf16.mxu1 %v8013_v61  ;;  %5352 = vmatprep.subr.bf16.mxu0 %v8016_v54 }
 0x750   :  { %5312 = vmatpush1.bf16.msra.mxu1 %v8011_v63  ;;  %5353 = vmatpush1.bf16.msra.mxu0 %v8014_v2 }
 0x751   :  { %5313 = vmatprep.subr.bf16.mxu1 %v8019_v3  ;;  %5354 = vmatprep.subr.bf16.mxu0 %v8022_v4 }
 0x754   :  { %5314 = vmatpush1.bf16.msra.mxu1 %v8017_v7  ;;  %5355 = vmatpush1.bf16.msra.mxu0 %v8020_v9 }
 0x755   :  { %5315 = vmatprep.subr.bf16.mxu1 %v8025_v27  ;;  %5356 = vmatprep.subr.bf16.mxu0 %v8028_v12 }
 0x758   :  { %5316 = vmatpush1.bf16.msra.mxu1 %v8023_v13  ;;  %5357 = vmatpush1.bf16.msra.mxu0 %v8026_v17  ;;  %v8047_v13 = vld [vmem:[%s10751_s23 + $0x48] sm:$0xff]   ;;  %v8050_v17 = vld [vmem:[%s10751_s23 + $0x10] sm:$0xff]  }
 0x759   :  { %6856 = vmatprep.subr.bf16.mxu1 %v8029_v18  ;;  %6878 = vmatprep.subr.bf16.mxu0 %v8061_v15  ;;  %v8051_v18 = vld [vmem:[%s10751_s23 + $0x58] sm:$0xff]  }
 0x75b   :  { %5318 = vmatmul.mubr.bf16.vlgmr.msra.gmra.mrb[24].mxu1 %v10304_v5  ;;  %5359 = vmatmul.mubr.bf16.vlgmr.msra.gmra.mrb[24].mxu0 %v10306_v6  ;;  %v8035_v5 = vld [vmem:[%s10750_s22 + $0x58] sm:$0xff]  }
 0x75c   :  { %6857 = vmatpush3.bf16.msra.mxu1 %v8030_v50  ;;  %v8036_v6 = vld [vmem:[%s10750_s22 + $0x18] sm:$0xff]   ;;  %6879 = vmatpush3.bf16.msra.mxu0 %v8062_v34 }
 0x75d   :  { %6858 = vmatprep.subr.bf16.mxu1 %v8031_v51  ;;  %6880 = vmatprep.subr.bf16.mxu0 %v8063_v35  ;;  %v8052_v50 = vld [vmem:[%s10751_s23 + $0x18] sm:$0xff]   ;;  %v8053_v51 = vld [vmem:[%s10751_s23 + $0x60] sm:$0xff]  }
 0x760   :  { %6859 = vmatpush3.bf16.msra.mxu1 %v8032_v10  ;;  %6881 = vmatpush3.bf16.msra.mxu0 %v8064_v36  ;;  %v8054_v10 = vld [vmem:[%s10751_s23 + $0x20] sm:$0xff]  }
 0x761   :  { %6860 = vmatprep.subr.bf16.mxu1 %v8033_v19  ;;  %6882 = vmatprep.subr.bf16.mxu0 %v8065_v37  ;;  %v8055_v19 = vld [vmem:[%s10751_s23 + $0x68] sm:$0xff]  }
 0x764   :  { %6861 = vmatpush3.bf16.msra.mxu1 %v8034_v21  ;;  %6883 = vmatpush3.bf16.msra.mxu0 %v8066_v14  ;;  %v8056_v21 = vld [vmem:[%s10751_s23 + $0x28] sm:$0xff]  }
 0x765   :  { %6862 = vmatprep.subr.bf16.mxu1 %v8035_v5  ;;  %6884 = vmatprep.subr.bf16.mxu0 %v8067_v38  ;;  %v8057_v5 = vld [vmem:[%s10751_s23 + $0x70] sm:$0xff]  }
 0x768   :  { %6863 = vmatpush3.bf16.msra.mxu1 %v8036_v6  ;;  %6885 = vmatpush3.bf16.msra.mxu0 %v8068_v39  ;;  %v8058_v6 = vld [vmem:[%s10751_s23 + $0x30] sm:$0xff]  }
 0x769   :  { %6864 = vmatprep.subr.bf16.mxu1 %v8037_v22  ;;  %6886 = vmatprep.subr.bf16.mxu0 %v8069_v40  ;;  %v8059_v22 = vld [vmem:[%s10751_s23 + $0x78] sm:$0xff]  }
 0x76c   :  { %6865 = vmatpush3.bf16.msra.mxu1 %v8038_v23  ;;  %6887 = vmatpush3.bf16.msra.mxu0 %v8070_v41  ;;  %v8060_v23 = vld [vmem:[%s10751_s23 + $0x38] sm:$0xff]  }
 0x76d   :  { %6866 = vmatprep.subr.bf16.mxu1 %v8039_v24  ;;  %6888 = vmatprep.subr.bf16.mxu0 %v8071_v20  ;;  %v4554_v24 = vrot.slane %v10597_v48, %v9623_v30 }
 0x770   :  { %6867 = vmatpush3.bf16.msra.mxu1 %v8040_v25  ;;  %6889 = vmatpush3.bf16.msra.mxu0 %v8072_v42  ;;  %v4558_v25 = vrot.slane %v10597_v48, %v9462_v16  ;;  %v8078_v16 = vld [vmem:[%s10751_s23 + $0x80] sm:$0xff]  }
 0x771   :  { %6868 = vmatprep.subr.bf16.mxu1 %v8041_v26  ;;  %6890 = vmatprep.subr.bf16.mxu0 %v8073_v43  ;;  %v8079_v43 = vld [vmem:[%s10751_s23 + $0xc8] sm:$0xff]   ;;  %v8086_v48 = vld [vmem:[%s10751_s23 + $0xa0] sm:$0xff]  }
 0x774   :  { %6869 = vmatpush3.bf16.msra.mxu1 %v8042_v62  ;;  %6891 = vmatpush3.bf16.msra.mxu0 %v8074_v44  ;;  %v8082_v44 = vld [vmem:[%s10751_s23 + $0x90] sm:$0xff]  }
 0x775   :  { %6870 = vmatprep.subr.bf16.mxu1 %v8043_v31  ;;  %6892 = vmatprep.subr.bf16.mxu0 %v8075_v45  ;;  %v8083_v45 = vld [vmem:[%s10751_s23 + $0xd8] sm:$0xff]  }
 0x778   :  { %6871 = vmatpush3.bf16.msra.mxu1 %v8044_v32  ;;  %6893 = vmatpush3.bf16.msra.mxu0 %v8076_v46  ;;  %v8084_v46 = vld [vmem:[%s10751_s23 + $0x98] sm:$0xff]  }
 0x779   :  { %6900 = vmatprep.subr.bf16.mxu1 %v8045_v33  ;;  %6922 = vmatprep.subr.bf16.mxu0 %v8077_v47  ;;  %v8085_v47 = vld [vmem:[%s10751_s23 + $0xe0] sm:$0xff]  }
 0x7ee   :  { %v5237_v53 = vpop.f32.mrb[20].mxu1  ;;  %v5278_v55 = vpop.f32.mrb[20].mxu0 }
 0x7ef   :  { %v5238_v56 = vadd.f32 %v5237_v53, %v4546_v49  ;;  %v5239_v57 = vpop.f32.mrb[21].mxu1  ;;  %v5280_v58 = vpop.f32.mrb[21].mxu0  ;;  %v8087_v49 = vld [vmem:[%s10751_s23 + $0xe8] sm:$0xff]   ;;  %v8089_v53 = vld [vmem:[%s10751_s23 + $0xf0] sm:$0xff]  }
 0x7f0   :  { %v5240_v59 = vadd.f32 %v5239_v57, %v4550_v52  ;;  %v5241_v60 = vpop.f32.mrb[22].mxu1  ;;  %v5282_v61 = vpop.f32.mrb[22].mxu0  ;;  %v8088_v52 = vld [vmem:[%s10751_s23 + $0xa8] sm:$0xff]   ;;  %v8092_v57 = vld [vmem:[%s10751_s23 + $0xb8] sm:$0xff]  }
 0x7f1   :  { %v5279_v54 = vadd.f32 %v5278_v55, %v5238_v56  ;;  %v5242_v63 = vpop.f32.mrb[23].mxu1  ;;  %v5283_v2 = vpop.f32.mrb[23].mxu0  ;;  %v8090_v55 = vld [vmem:[%s10751_s23 + $0xb0] sm:$0xff]   ;;  %v8091_v56 = vld [vmem:[%s10751_s23 + $0xf8] sm:$0xff]  }
 0x7f2   :  { %v5281_v3 = vadd.f32 %v5280_v58, %v5240_v59 }
 0x7f3   :  { %v5367_v4 = vadd.f32 %v5279_v54, %v9886_v8  ;;  %v8048_v8 = vld [vmem:[%s10751_s23 + $0x8] sm:$0xff]  }
 0x7f4   :  { %v5368_v7 = vadd.f32 %v5281_v3, %v9888_v29  ;;  %v8049_v29 = vld [vmem:[%s10751_s23 + $0x50] sm:$0xff]  }
 0x7f5   :  { %v5371_v0 = vmax.f32 %v5367_v4, 0.0 }
 0x7f6   :  { %v5372_v9 = vmax.f32 %v5368_v7, 0.0 }
 0x7f7   :  { %v5375_v12 = vpack.c.bf16 %v5371_v0, %v5371_v0  ;;  %v6790_v0 = vld [vmem:[%s10752_s24] ss:$0 sm:$0xff] }
 0x7f8   :  { %v5376_v27 = vpack.c.bf16 %v5372_v9, %v5372_v9 }
 0x7fa   :  { %5674 = vmatprep.mubr.bf16.mxu1 %v5376_v27 }
 0x7fb   :  { %5675 = vmatmul.mubr.bf16.vlgmr.msra.gmra.mrb[28].mxu1 %v5375_v12 }
 0x7fc   :  { %6901 = vmatpush3.bf16.msra.mxu1 %v8046_v1  ;;  %6017 = vmatprep.mubr.bf16.mxu1 %v5376_v27 }
 0x7fd   :  { %6902 = vmatprep.subr.bf16.mxu1 %v8047_v13 }
 0x800   :  { %6903 = vmatpush3.bf16.msra.mxu1 %v8048_v8 }
 0x801   :  { %6904 = vmatprep.subr.bf16.mxu1 %v8049_v29 }
 0x804   :  { %6905 = vmatpush3.bf16.msra.mxu1 %v8050_v17  ;;  %v6823_v17 = vld [vmem:[%s10753_s25] ss:$0 sm:$0xff]  ;;  %s8125_s25 = smov [#allocation2]  }
 0x805   :  { %6906 = vmatprep.subr.bf16.mxu1 %v8051_v18 }
 0x808   :  { %6907 = vmatpush3.bf16.msra.mxu1 %v8052_v50 }
 0x809   :  { %6908 = vmatprep.subr.bf16.mxu1 %v8053_v51 }
 0x80c   :  { %6909 = vmatpush3.bf16.msra.mxu1 %v8054_v10 }
 0x80d   :  { %6910 = vmatprep.subr.bf16.mxu1 %v8055_v19 }
 0x810   :  { %6911 = vmatpush3.bf16.msra.mxu1 %v8056_v21 }
 0x811   :  { %6912 = vmatprep.subr.bf16.mxu1 %v8057_v5 }
 0x814   :  { %6913 = vmatpush3.bf16.msra.mxu1 %v8058_v6 }
 0x815   :  { %6914 = vmatprep.subr.bf16.mxu1 %v8059_v22 }
 0x818   :  { %6915 = vmatpush3.bf16.msra.mxu1 %v8060_v23 }
 0x81b   :  { %6018 = vmatmul.mubr.bf16.vlgmr.msra.gmra.mrb[32].mxu1 %v5375_v12 }
 0x82e   :  { %v5319_v26 = vpop.f32.mrb[24].mxu1  ;;  %v5360_v62 = vpop.f32.mrb[24].mxu0 }
 0x82f   :  { %v5320_v31 = vadd.f32 %v5319_v26, %v4554_v24  ;;  %v5321_v32 = vpop.f32.mrb[25].mxu1  ;;  %v5362_v33 = vpop.f32.mrb[25].mxu0 }
 0x830   :  { %v5322_v15 = vadd.f32 %v5321_v32, %v4558_v25  ;;  %v5323_v34 = vpop.f32.mrb[26].mxu1  ;;  %v5364_v35 = vpop.f32.mrb[26].mxu0 }
 0x831   :  { %v5361_v36 = vadd.f32 %v5360_v62, %v5320_v31  ;;  %v5324_v37 = vpop.f32.mrb[27].mxu1  ;;  %v5365_v14 = vpop.f32.mrb[27].mxu0 }
 0x832   :  { %v5363_v38 = vadd.f32 %v5362_v33, %v5322_v15 }
 0x833   :  { %v5369_v39 = vadd.f32 %v5361_v36, %v10089_v28  ;;  %v8081_v28 = vld [vmem:[%s10751_s23 + $0xd0] sm:$0xff]  }
 0x834   :  { %v5370_v40 = vadd.f32 %v5363_v38, %v9890_v11  ;;  %v8080_v11 = vld [vmem:[%s10751_s23 + $0x88] sm:$0xff]  }
 0x835   :  { %v5373_v30 = vmax.f32 %v5369_v39, 0.0 }
 0x836   :  { %v5374_v41 = vmax.f32 %v5370_v40, 0.0 }
 0x837   :  { %v5377_v42 = vpack.c.bf16 %v5373_v30, %v5373_v30 }
 0x838   :  { %v5378_v20 = vpack.c.bf16 %v5374_v41, %v5374_v41 }
 0x83a   :  { %5714 = vmatprep.mubr.bf16.mxu0 %v5378_v20 }
 0x83b   :  { %5715 = vmatmul.mubr.bf16.vlgmr.msra.gmra.mrb[28].mxu0 %v5377_v42 }
 0x83c   :  { %6923 = vmatpush3.bf16.msra.mxu0 %v8078_v16  ;;  %6057 = vmatprep.mubr.bf16.mxu0 %v5378_v20 }
 0x83d   :  { %6924 = vmatprep.subr.bf16.mxu0 %v8079_v43 }
 0x840   :  { %6925 = vmatpush3.bf16.msra.mxu0 %v8080_v11 }
 0x841   :  { %6926 = vmatprep.subr.bf16.mxu0 %v8081_v28 }
 0x844   :  { %6927 = vmatpush3.bf16.msra.mxu0 %v8082_v44 }
 0x845   :  { %6928 = vmatprep.subr.bf16.mxu0 %v8083_v45 }
 0x848   :  { %6929 = vmatpush3.bf16.msra.mxu0 %v8084_v46 }
 0x849   :  { %6930 = vmatprep.subr.bf16.mxu0 %v8085_v47 }
 0x84c   :  { %6931 = vmatpush3.bf16.msra.mxu0 %v8086_v48 }
 0x84d   :  { %6932 = vmatprep.subr.bf16.mxu0 %v8087_v49 }
 0x850   :  { %6933 = vmatpush3.bf16.msra.mxu0 %v8088_v52 }
 0x851   :  { %6934 = vmatprep.subr.bf16.mxu0 %v8089_v53 }
 0x854   :  { %6935 = vmatpush3.bf16.msra.mxu0 %v8090_v55 }
 0x855   :  { %6936 = vmatprep.subr.bf16.mxu0 %v8091_v56 }
 0x858   :  { %6937 = vmatpush3.bf16.msra.mxu0 %v8092_v57 }
 0x85b   :  { %6058 = vmatmul.mubr.bf16.vlgmr.msra.gmra.mrb[32].mxu0 %v5377_v42 }
 0x8ce   :  { %v6872_v58 = vpop.f32.mrb[28].mxu1 }
 0x8cf   :  { %v6873_v59 = vpop.f32.mrb[29].mxu1 }
 0x8d0   :  { %v6874_v60 = vadd.f32 %v6873_v59, %v6872_v58  ;;  %v6875_v61 = vpop.f32.mrb[30].mxu1 }
 0x8d1   :  { %v6876_v54 = vpop.f32.mrb[31].mxu1 }
 0x8d2   :  { %v5677_v1 = vadd.f32 %v6874_v60, %v6790_v0 }
 0x8ee   :  { %v6916_v63 = vpop.f32.mrb[32].mxu1 }
 0x8ef   :  { %v6917_v2 = vpop.f32.mrb[33].mxu1 }
 0x8f0   :  { %v6918_v3 = vadd.f32 %v6917_v2, %v6916_v63  ;;  %v6919_v4 = vpop.f32.mrb[34].mxu1 }
 0x8f1   :  { %v6920_v7 = vpop.f32.mrb[35].mxu1 }
 0x8f2   :  { %v6020_v51 = vadd.f32 %v6918_v3, %v6823_v17 }
 0x90e   :  { %v6894_v9 = vpop.f32.mrb[28].mxu0 }
 0x90f   :  { %v6895_v27 = vpop.f32.mrb[29].mxu0 }
 0x910   :  { %v6896_v12 = vadd.f32 %v6895_v27, %v6894_v9  ;;  %v6897_v13 = vpop.f32.mrb[30].mxu0 }
 0x911   :  { %v6898_v8 = vpop.f32.mrb[31].mxu0 }
 0x912   :  { %v5717_v29 = vadd.f32 %v6896_v12, %v5677_v1 }
 0x914   :  { %6073 = vst.msk [vmem:[%s10754_s26] sm:$0x3] %vm6072_vm0, %v5717_v29  ;;  %s6089_s26 = sshll.u32 %s8125_s25, 4  ;;  %s6090_s26 = int_to_ptr.vmem [resolvable:$true] %s6089_s26 }
 0x915   :  { %s8099_s4 = scalar_lea.vmem %s6090_s26, 32  ;;  %p8104_p1 = scmp.lt.s32.totalorder %s6090_s26, %s6090_s26 }
 0x916   :  { %p8100_p0 = scmp.ne.s32.totalorder %s6090_s26, %s8099_s4  ;;  %p8105_p2 = scmp.lt.s32.totalorder %s8099_s4, %s8099_s4 }
 0x918   :  { %p8106_p3 = por %p8105_p2, %p8104_p1 }
 0x91a   :  { %p8107_p4 = pnand %p8106_p3, %p8100_p0 }
 0x92e   :  { %v6938_v18 = vpop.f32.mrb[32].mxu0 }
 0x92f   :  { %v6939_v50 = vpop.f32.mrb[33].mxu0 }
 0x930   :  { %v6940_v10 = vadd.f32 %v6939_v50, %v6938_v18  ;;  %v6941_v19 = vpop.f32.mrb[34].mxu0 }
 0x931   :  { %v6942_v21 = vpop.f32.mrb[35].mxu0 }
 0x932   :  { %v6060_v5 = vadd.f32 %v6940_v10, %v6020_v51 }
 0x934   :  { %v6065_v6 = vmax.f32 %v5717_v29, %v6060_v5  ;;  %6074 = vst.msk [vmem:[%s10755_s27] sm:$0x3] %vm6072_vm0, %v6060_v5 }
 0x936   :  { %v6066_v22 = vsub.f32 %v5717_v29, %v6065_v6  ;;  %v6069_v23 = vsub.f32 %v6060_v5, %v6065_v6 }
 0x938   :  { %v6067_v24 = vmul.f32 1.442695, %v6066_v22  ;;  %v6070_v25 = vmul.f32 1.442695, %v6069_v23 }
 0x93a   :  { %8093 = vpow2.f32 %v6067_v24 }
 0x93b   :  { %8095 = vpow2.f32 %v6070_v25 }
 0x944   :  { %v8094_v26 = vpop.eup %8093 }
 0x945   :  { %v8096_v62 = vpop.eup %8095 }
 0x946   :  { %v6075_v31 = vadd.f32 %v8096_v62, %v8094_v26 }
 0x948   :  { %8097 = vrcp.f32 %v6075_v31 }
 0x952   :  { %v8098_v32 = vpop.eup %8097 }
 0x953   :  { %v6077_v33 = vmul.f32 %v8098_v32, %v8096_v62 }
 0x955   :  { %6078 = vst.msk [vmem:[#allocation2] sm:$0x3] %vm6072_vm0, %v6077_v33 }
 0x956   :  { %8110 = shalt.err (!%p8107_p4)
}
 0x957   :  { %s8111_s16 = scalar_lea.hbm %s10756_s28, 32 }
 0x958   :  { %p8112_p5 = scmp.ne.s32.totalorder %s10756_s28, %s8111_s16  ;;  %p8115_p6 = scmp.lt.u32.totalorder %s8111_s16, %s10756_s28 }
 0x95a   :  { %p8117_p7 = pnand %p8115_p6, %p8112_p5 }
 0x95c   :  { %8120 = shalt.err (!%p8117_p7)
}
 0x95d   :  { %6092 = dma.vmem_to_hbm [thread:$0]  %s6090_s26, 32, %s10756_s28, [#allocation3]  }
 0x95e   :  { %8121 = dma.done.wait [#allocation3], 32  }
 0x95f   :  { %8122 = vsyncadd [#allocation3], 4294967264 }
 0x960   :  { %6100 = vsyncpa [#allocation3], 1 }

</bundles_post_ra>
